<compile_context>
chip_gen: v6e
topology: v6e:2x2x1
jax: 0.10.0
libtpu: 0.0.40
codegen_flags: <defaults>
</compile_context>

<pallas_src>
import functools
import math

import jax
import jax.numpy as jnp
import numpy as np
from jax.experimental import pallas as pl
from jax.experimental.pallas import tpu as pltpu


LN_EPS = 1e-5


# ---------------------------------------------------------------------------
# Shared math: used both inside the fused Pallas kernel (on VMEM-resident
# values) and by the pure-JAX reference.  Everything operates on a single
# batch element with the feature axis on the lane (last) dim.
# ---------------------------------------------------------------------------

def _layernorm(x, g, b, eps=LN_EPS, relu=False):
    x = x.astype(jnp.float32)
    mean = jnp.mean(x, axis=-1, keepdims=True)
    var = jnp.mean(jnp.square(x - mean), axis=-1, keepdims=True)
    y = (x - mean) * jax.lax.rsqrt(var + eps) * g + b
    return jnp.maximum(y, 0.0) if relu else y


def _linear(x, w, b, relu=False):
    y = jnp.dot(x, w, preferred_element_type=jnp.float32) + b
    return jnp.maximum(y, 0.0) if relu else y


def _mha(tgt, mem, d, nhead):
    """nn.MultiheadAttention (cross-attention, eval mode) for one batch element.

    tgt: (L, E)  query stream;  mem: (S, E)  key/value stream.
    """
    _, E = tgt.shape
    dh = E // nhead
    scale = 1.0 / math.sqrt(dh)
    q = _linear(tgt, d['wq'], d['bq'])                       # (L, E)
    kv = _linear(mem, d['wkv'], d['bkv'])                    # (S, 2E)  fused K|V proj
    k, v = kv[:, :E], kv[:, E:]
    outs = []
    for h in range(nhead):                                   # static unroll over heads
        sl = slice(h * dh, (h + 1) * dh)
        qh, kh, vh = q[:, sl], k[:, sl], v[:, sl]
        s = jax.lax.dot_general(qh, kh, (((1,), (1,)), ((), ())),
                                preferred_element_type=jnp.float32) * scale
        m = jnp.max(s, axis=-1, keepdims=True)
        e = jnp.exp(s - m)
        p = e / jnp.sum(e, axis=-1, keepdims=True)
        outs.append(jnp.dot(p, vh, preferred_element_type=jnp.float32))
    o = jnp.concatenate(outs, axis=-1)                       # (L, E)
    return _linear(o, d['wo'], d['bo'])


def _decoder_layer(tgt, mem, d, nhead, eps=LN_EPS):
    """TransformerDecoderLayerOptimal.forward (eval: dropout == identity)."""
    t = _layernorm(tgt + tgt, d['n1g'], d['n1b'], eps)       # tgt + dropout1(tgt); norm1
    attn = _mha(t, mem, d, nhead)
    t = _layernorm(t + attn, d['n2g'], d['n2b'], eps)        # + dropout2(attn); norm2
    ff = _linear(t, d['l1w'], d['l1b'], relu=True)
    ff = _linear(ff, d['l2w'], d['l2b'])
    t = _layernorm(t + ff, d['n3g'], d['n3b'], eps)          # + dropout3(ff); norm3
    return t


def _decoder_forward_single(x_b, p, nheads, eps=LN_EPS):
    """Whole Decoder.forward for one batch element: x_b (S, D) -> (L, 1)."""
    mem = _layernorm(x_b, p['norm_g'], p['norm_b'], eps, relu=True)       # (S, D)

    t1 = _decoder_layer(p['qe1'], mem, p['dec1'], nheads[0], eps)         # (L, D)
    x1 = _layernorm(_linear(t1, p['fc1_w'], p['fc1_b']),
                    p['dn1_g'], p['dn1_b'], eps, relu=True)               # (L, D/2)

    t2 = _decoder_layer(p['qe2'], x1, p['dec2'], nheads[1], eps)
    x2 = _layernorm(_linear(x1 + t2, p['fc2_w'], p['fc2_b']),
                    p['dn2_g'], p['dn2_b'], eps, relu=True)               # (L, D/4)

    t3 = _decoder_layer(p['qe3'], x2, p['dec3'], nheads[2], eps)
    y3 = x2 + t3                                                          # (L, D/4)
    # fc3: (D/4 -> 1) as broadcast-mul + lane reduction (avoids N=1 matmul).
    logits = jnp.sum(y3 * p['fc3_w'], axis=-1, keepdims=True) + p['fc3_b']  # (L, 1)
    return logits


# ---------------------------------------------------------------------------
# Fused Pallas kernel: one grid step == one batch element.
# ---------------------------------------------------------------------------

def _fused_decoder_kernel(*refs, treedef, nheads, eps):
    x_ref = refs[0]
    out_ref = refs[-1]
    leaves = [r[...] for r in refs[1:-1]]                     # load params from VMEM
    p = jax.tree_util.tree_unflatten(treedef, leaves)
    x_b = x_ref[0].astype(jnp.float32)                        # (S, D)
    out = _decoder_forward_single(x_b, p, nheads, eps)        # (L, 1)
    out_ref[0] = out.astype(out_ref.dtype)


def decoder_forward_pallas(x, params, nheads, eps=LN_EPS):
    """x: (bs, src_len, d_model) -> logits (bs, num_classes)."""
    bs, S, D = x.shape
    L = params['qe1'].shape[0]
    leaves, treedef = jax.tree_util.tree_flatten(params)

    def _full(shape):
        nd = len(shape)
        return pl.BlockSpec(shape, lambda b, _n=nd: (0,) * _n)

    in_specs = [pl.BlockSpec((1, S, D), lambda b: (b, 0, 0))]
    in_specs += [_full(leaf.shape) for leaf in leaves]

    out = pl.pallas_call(
        functools.partial(_fused_decoder_kernel, treedef=treedef,
                          nheads=tuple(nheads), eps=eps),
        out_shape=jax.ShapeDtypeStruct((bs, L, 1), x.dtype),
        grid=(bs,),
        in_specs=in_specs,
        out_specs=pl.BlockSpec((1, L, 1), lambda b: (b, 0, 0)),
        compiler_params=pltpu.CompilerParams(
            dimension_semantics=("parallel",)),
    )(x, *leaves)
    return out.reshape(bs, L)


# ---------------------------------------------------------------------------
# Pure-JAX reference (same shared math, vmapped over batch).
# ---------------------------------------------------------------------------

def decoder_forward_reference(x, params, nheads, eps=LN_EPS):
    out = jax.vmap(lambda xb: _decoder_forward_single(xb, params, nheads, eps))(x)
    return out.reshape(x.shape[0], -1)


# ---------------------------------------------------------------------------
# Parameter init (fresh random weights; matches the module's parameterization)
# ---------------------------------------------------------------------------

def init_params(key, num_classes, d_model, dim_ff):
    keys = iter(jax.random.split(key, 64))

    def nrm(shape, scale=0.05):
        return (scale * jax.random.normal(next(keys), shape)).astype(jnp.float32)

    def ln_pair(dim):
        return jnp.ones((1, dim), jnp.float32), jnp.zeros((1, dim), jnp.float32)

    def layer(e, f):
        n1g, n1b = ln_pair(e)
        n2g, n2b = ln_pair(e)
        n3g, n3b = ln_pair(e)
        return dict(
            wq=nrm((e, e)), bq=nrm((1, e)),
            wkv=nrm((e, 2 * e)), bkv=nrm((1, 2 * e)),      # fused K|V projection
            wo=nrm((e, e)), bo=nrm((1, e)),
            n1g=n1g, n1b=n1b, n2g=n2g, n2b=n2b, n3g=n3g, n3b=n3b,
            l1w=nrm((e, f)), l1b=nrm((1, f)),
            l2w=nrm((f, e)), l2b=nrm((1, e)))

    d2, d4 = d_model // 2, d_model // 4
    ng, nb = ln_pair(d_model)
    dn1g, dn1b = ln_pair(d2)
    dn2g, dn2b = ln_pair(d4)
    # TODO(synk): q1_q2 / norm_q2 / q2_q3 / norm_q3 exist in __init__ but are
    # never used in Decoder.forward, so they are omitted here.
    return dict(
        norm_g=ng, norm_b=nb,
        qe1=jax.random.normal(next(keys), (num_classes, d_model), jnp.float32),
        qe2=jax.random.normal(next(keys), (num_classes, d2), jnp.float32),
        qe3=jax.random.normal(next(keys), (num_classes, d4), jnp.float32),
        dec1=layer(d_model, dim_ff),
        dec2=layer(d2, dim_ff // 2),
        dec3=layer(d4, dim_ff // 4),
        fc1_w=nrm((d_model, d2)), fc1_b=nrm((1, d2)),
        dn1_g=dn1g, dn1_b=dn1b,
        fc2_w=nrm((d2, d4)), fc2_b=nrm((1, d4)),
        dn2_g=dn2g, dn2_b=dn2b,
        fc3_w=nrm((1, d4)), fc3_b=nrm((1, 1)),             # fc3 as row vector + bias
    )


# ---------------------------------------------------------------------------
# main
# ---------------------------------------------------------------------------

if __name__ == "__main__":
    # Small, forward-consistent shapes:
    num_classes = 16         # number of query tokens (L)
    d_model = 128            # decoder_embedding (divisible by 8/4/2 heads)
    dim_ff = 256             # scaled-down stand-in for the hard-coded 4096
    bs, src_len = 2, 8       # batch, memory sequence length
    nheads = (8, 4, 2)

    key = jax.random.PRNGKey(0)
    kx, kp = jax.random.split(key)
    x = jax.random.normal(kx, (bs, src_len, d_model), dtype=jnp.float32)
    params = init_params(kp, num_classes, d_model, dim_ff)

    fwd = jax.jit(functools.partial(decoder_forward_pallas, nheads=nheads))
    out = jax.block_until_ready(fwd(x, params))
    assert out.shape == (bs, num_classes), out.shape

    with jax.default_matmul_precision("highest"):
        ref = decoder_forward_reference(x, params, nheads)
    np.testing.assert_allclose(np.asarray(out), np.asarray(ref), rtol=2e-3, atol=2e-3)
    print("KERNEL_OK")
</pallas_src>

<mosaic_0001>
module attributes {stable_mosaic.version = 11 : i64} {
  func.func @_fused_decoder_kernel(%arg0: i32, %arg1: memref<1x8x128xf32, #tpu.memory_space<vmem>>, %arg2: memref<1x256xf32, #tpu.memory_space<vmem>>, %arg3: memref<1x128xf32, #tpu.memory_space<vmem>>, %arg4: memref<1x128xf32, #tpu.memory_space<vmem>>, %arg5: memref<1x256xf32, #tpu.memory_space<vmem>>, %arg6: memref<128x256xf32, #tpu.memory_space<vmem>>, %arg7: memref<1x128xf32, #tpu.memory_space<vmem>>, %arg8: memref<256x128xf32, #tpu.memory_space<vmem>>, %arg9: memref<1x128xf32, #tpu.memory_space<vmem>>, %arg10: memref<1x128xf32, #tpu.memory_space<vmem>>, %arg11: memref<1x128xf32, #tpu.memory_space<vmem>>, %arg12: memref<1x128xf32, #tpu.memory_space<vmem>>, %arg13: memref<1x128xf32, #tpu.memory_space<vmem>>, %arg14: memref<1x128xf32, #tpu.memory_space<vmem>>, %arg15: memref<128x256xf32, #tpu.memory_space<vmem>>, %arg16: memref<128x128xf32, #tpu.memory_space<vmem>>, %arg17: memref<128x128xf32, #tpu.memory_space<vmem>>, %arg18: memref<1x128xf32, #tpu.memory_space<vmem>>, %arg19: memref<1x64xf32, #tpu.memory_space<vmem>>, %arg20: memref<1x64xf32, #tpu.memory_space<vmem>>, %arg21: memref<1x128xf32, #tpu.memory_space<vmem>>, %arg22: memref<64x128xf32, #tpu.memory_space<vmem>>, %arg23: memref<1x64xf32, #tpu.memory_space<vmem>>, %arg24: memref<128x64xf32, #tpu.memory_space<vmem>>, %arg25: memref<1x64xf32, #tpu.memory_space<vmem>>, %arg26: memref<1x64xf32, #tpu.memory_space<vmem>>, %arg27: memref<1x64xf32, #tpu.memory_space<vmem>>, %arg28: memref<1x64xf32, #tpu.memory_space<vmem>>, %arg29: memref<1x64xf32, #tpu.memory_space<vmem>>, %arg30: memref<1x64xf32, #tpu.memory_space<vmem>>, %arg31: memref<64x128xf32, #tpu.memory_space<vmem>>, %arg32: memref<64x64xf32, #tpu.memory_space<vmem>>, %arg33: memref<64x64xf32, #tpu.memory_space<vmem>>, %arg34: memref<1x64xf32, #tpu.memory_space<vmem>>, %arg35: memref<1x32xf32, #tpu.memory_space<vmem>>, %arg36: memref<1x32xf32, #tpu.memory_space<vmem>>, %arg37: memref<1x64xf32, #tpu.memory_space<vmem>>, %arg38: memref<32x64xf32, #tpu.memory_space<vmem>>, %arg39: memref<1x32xf32, #tpu.memory_space<vmem>>, %arg40: memref<64x32xf32, #tpu.memory_space<vmem>>, %arg41: memref<1x32xf32, #tpu.memory_space<vmem>>, %arg42: memref<1x32xf32, #tpu.memory_space<vmem>>, %arg43: memref<1x32xf32, #tpu.memory_space<vmem>>, %arg44: memref<1x32xf32, #tpu.memory_space<vmem>>, %arg45: memref<1x32xf32, #tpu.memory_space<vmem>>, %arg46: memref<1x32xf32, #tpu.memory_space<vmem>>, %arg47: memref<32x64xf32, #tpu.memory_space<vmem>>, %arg48: memref<32x32xf32, #tpu.memory_space<vmem>>, %arg49: memref<32x32xf32, #tpu.memory_space<vmem>>, %arg50: memref<1x64xf32, #tpu.memory_space<vmem>>, %arg51: memref<1x64xf32, #tpu.memory_space<vmem>>, %arg52: memref<1x32xf32, #tpu.memory_space<vmem>>, %arg53: memref<1x32xf32, #tpu.memory_space<vmem>>, %arg54: memref<1x64xf32, #tpu.memory_space<vmem>>, %arg55: memref<128x64xf32, #tpu.memory_space<vmem>>, %arg56: memref<1x32xf32, #tpu.memory_space<vmem>>, %arg57: memref<64x32xf32, #tpu.memory_space<vmem>>, %arg58: memref<1x1xf32, #tpu.memory_space<vmem>>, %arg59: memref<1x32xf32, #tpu.memory_space<vmem>>, %arg60: memref<1x128xf32, #tpu.memory_space<vmem>>, %arg61: memref<1x128xf32, #tpu.memory_space<vmem>>, %arg62: memref<16x128xf32, #tpu.memory_space<vmem>>, %arg63: memref<16x64xf32, #tpu.memory_space<vmem>>, %arg64: memref<16x32xf32, #tpu.memory_space<vmem>>, %arg65: memref<1x16x1xf32, #tpu.memory_space<vmem>>) attributes {dimension_semantics = [#tpu.dimension_semantics<parallel>], iteration_bounds = array<i64: 2>, scalar_prefetch = 0 : i64, scratch_operands = 0 : i64, tpu.core_type = #tpu.core_type<tc>, window_params = [{transform_indices = @transform_0, window_bounds = array<i64: 1, 8, 128>}, {pipeline_mode = #tpu.pipeline_mode<synchronous>, transform_indices = @transform_1, window_bounds = array<i64: 1, 256>}, {pipeline_mode = #tpu.pipeline_mode<synchronous>, transform_indices = @transform_2, window_bounds = array<i64: 1, 128>}, {pipeline_mode = #tpu.pipeline_mode<synchronous>, transform_indices = @transform_3, window_bounds = array<i64: 1, 128>}, {pipeline_mode = #tpu.pipeline_mode<synchronous>, transform_indices = @transform_4, window_bounds = array<i64: 1, 256>}, {pipeline_mode = #tpu.pipeline_mode<synchronous>, transform_indices = @transform_5, window_bounds = array<i64: 128, 256>}, {pipeline_mode = #tpu.pipeline_mode<synchronous>, transform_indices = @transform_6, window_bounds = array<i64: 1, 128>}, {pipeline_mode = #tpu.pipeline_mode<synchronous>, transform_indices = @transform_7, window_bounds = array<i64: 256, 128>}, {pipeline_mode = #tpu.pipeline_mode<synchronous>, transform_indices = @transform_8, window_bounds = array<i64: 1, 128>}, {pipeline_mode = #tpu.pipeline_mode<synchronous>, transform_indices = @transform_9, window_bounds = array<i64: 1, 128>}, {pipeline_mode = #tpu.pipeline_mode<synchronous>, transform_indices = @transform_10, window_bounds = array<i64: 1, 128>}, {pipeline_mode = #tpu.pipeline_mode<synchronous>, transform_indices = @transform_11, window_bounds = array<i64: 1, 128>}, {pipeline_mode = #tpu.pipeline_mode<synchronous>, transform_indices = @transform_12, window_bounds = array<i64: 1, 128>}, {pipeline_mode = #tpu.pipeline_mode<synchronous>, transform_indices = @transform_13, window_bounds = array<i64: 1, 128>}, {pipeline_mode = #tpu.pipeline_mode<synchronous>, transform_indices = @transform_14, window_bounds = array<i64: 128, 256>}, {pipeline_mode = #tpu.pipeline_mode<synchronous>, transform_indices = @transform_15, window_bounds = array<i64: 128, 128>}, {pipeline_mode = #tpu.pipeline_mode<synchronous>, transform_indices = @transform_16, window_bounds = array<i64: 128, 128>}, {pipeline_mode = #tpu.pipeline_mode<synchronous>, transform_indices = @transform_17, window_bounds = array<i64: 1, 128>}, {pipeline_mode = #tpu.pipeline_mode<synchronous>, transform_indices = @transform_18, window_bounds = array<i64: 1, 64>}, {pipeline_mode = #tpu.pipeline_mode<synchronous>, transform_indices = @transform_19, window_bounds = array<i64: 1, 64>}, {pipeline_mode = #tpu.pipeline_mode<synchronous>, transform_indices = @transform_20, window_bounds = array<i64: 1, 128>}, {pipeline_mode = #tpu.pipeline_mode<synchronous>, transform_indices = @transform_21, window_bounds = array<i64: 64, 128>}, {pipeline_mode = #tpu.pipeline_mode<synchronous>, transform_indices = @transform_22, window_bounds = array<i64: 1, 64>}, {pipeline_mode = #tpu.pipeline_mode<synchronous>, transform_indices = @transform_23, window_bounds = array<i64: 128, 64>}, {pipeline_mode = #tpu.pipeline_mode<synchronous>, transform_indices = @transform_24, window_bounds = array<i64: 1, 64>}, {pipeline_mode = #tpu.pipeline_mode<synchronous>, transform_indices = @transform_25, window_bounds = array<i64: 1, 64>}, {pipeline_mode = #tpu.pipeline_mode<synchronous>, transform_indices = @transform_26, window_bounds = array<i64: 1, 64>}, {pipeline_mode = #tpu.pipeline_mode<synchronous>, transform_indices = @transform_27, window_bounds = array<i64: 1, 64>}, {pipeline_mode = #tpu.pipeline_mode<synchronous>, transform_indices = @transform_28, window_bounds = array<i64: 1, 64>}, {pipeline_mode = #tpu.pipeline_mode<synchronous>, transform_indices = @transform_29, window_bounds = array<i64: 1, 64>}, {pipeline_mode = #tpu.pipeline_mode<synchronous>, transform_indices = @transform_30, window_bounds = array<i64: 64, 128>}, {pipeline_mode = #tpu.pipeline_mode<synchronous>, transform_indices = @transform_31, window_bounds = array<i64: 64, 64>}, {pipeline_mode = #tpu.pipeline_mode<synchronous>, transform_indices = @transform_32, window_bounds = array<i64: 64, 64>}, {pipeline_mode = #tpu.pipeline_mode<synchronous>, transform_indices = @transform_33, window_bounds = array<i64: 1, 64>}, {pipeline_mode = #tpu.pipeline_mode<synchronous>, transform_indices = @transform_34, window_bounds = array<i64: 1, 32>}, {pipeline_mode = #tpu.pipeline_mode<synchronous>, transform_indices = @transform_35, window_bounds = array<i64: 1, 32>}, {pipeline_mode = #tpu.pipeline_mode<synchronous>, transform_indices = @transform_36, window_bounds = array<i64: 1, 64>}, {pipeline_mode = #tpu.pipeline_mode<synchronous>, transform_indices = @transform_37, window_bounds = array<i64: 32, 64>}, {pipeline_mode = #tpu.pipeline_mode<synchronous>, transform_indices = @transform_38, window_bounds = array<i64: 1, 32>}, {pipeline_mode = #tpu.pipeline_mode<synchronous>, transform_indices = @transform_39, window_bounds = array<i64: 64, 32>}, {pipeline_mode = #tpu.pipeline_mode<synchronous>, transform_indices = @transform_40, window_bounds = array<i64: 1, 32>}, {pipeline_mode = #tpu.pipeline_mode<synchronous>, transform_indices = @transform_41, window_bounds = array<i64: 1, 32>}, {pipeline_mode = #tpu.pipeline_mode<synchronous>, transform_indices = @transform_42, window_bounds = array<i64: 1, 32>}, {pipeline_mode = #tpu.pipeline_mode<synchronous>, transform_indices = @transform_43, window_bounds = array<i64: 1, 32>}, {pipeline_mode = #tpu.pipeline_mode<synchronous>, transform_indices = @transform_44, window_bounds = array<i64: 1, 32>}, {pipeline_mode = #tpu.pipeline_mode<synchronous>, transform_indices = @transform_45, window_bounds = array<i64: 1, 32>}, {pipeline_mode = #tpu.pipeline_mode<synchronous>, transform_indices = @transform_46, window_bounds = array<i64: 32, 64>}, {pipeline_mode = #tpu.pipeline_mode<synchronous>, transform_indices = @transform_47, window_bounds = array<i64: 32, 32>}, {pipeline_mode = #tpu.pipeline_mode<synchronous>, transform_indices = @transform_48, window_bounds = array<i64: 32, 32>}, {pipeline_mode = #tpu.pipeline_mode<synchronous>, transform_indices = @transform_49, window_bounds = array<i64: 1, 64>}, {pipeline_mode = #tpu.pipeline_mode<synchronous>, transform_indices = @transform_50, window_bounds = array<i64: 1, 64>}, {pipeline_mode = #tpu.pipeline_mode<synchronous>, transform_indices = @transform_51, window_bounds = array<i64: 1, 32>}, {pipeline_mode = #tpu.pipeline_mode<synchronous>, transform_indices = @transform_52, window_bounds = array<i64: 1, 32>}, {pipeline_mode = #tpu.pipeline_mode<synchronous>, transform_indices = @transform_53, window_bounds = array<i64: 1, 64>}, {pipeline_mode = #tpu.pipeline_mode<synchronous>, transform_indices = @transform_54, window_bounds = array<i64: 128, 64>}, {pipeline_mode = #tpu.pipeline_mode<synchronous>, transform_indices = @transform_55, window_bounds = array<i64: 1, 32>}, {pipeline_mode = #tpu.pipeline_mode<synchronous>, transform_indices = @transform_56, window_bounds = array<i64: 64, 32>}, {pipeline_mode = #tpu.pipeline_mode<synchronous>, transform_indices = @transform_57, window_bounds = array<i64: 1, 1>}, {pipeline_mode = #tpu.pipeline_mode<synchronous>, transform_indices = @transform_58, window_bounds = array<i64: 1, 32>}, {pipeline_mode = #tpu.pipeline_mode<synchronous>, transform_indices = @transform_59, window_bounds = array<i64: 1, 128>}, {pipeline_mode = #tpu.pipeline_mode<synchronous>, transform_indices = @transform_60, window_bounds = array<i64: 1, 128>}, {pipeline_mode = #tpu.pipeline_mode<synchronous>, transform_indices = @transform_61, window_bounds = array<i64: 16, 128>}, {pipeline_mode = #tpu.pipeline_mode<synchronous>, transform_indices = @transform_62, window_bounds = array<i64: 16, 64>}, {pipeline_mode = #tpu.pipeline_mode<synchronous>, transform_indices = @transform_63, window_bounds = array<i64: 16, 32>}, {transform_indices = @transform_64, window_bounds = array<i64: 1, 16, 1>}]} {
    %c0 = arith.constant 0 : index
    %c0_0 = arith.constant 0 : index
    %0 = vector.load %arg2[%c0, %c0_0] : memref<1x256xf32, #tpu.memory_space<vmem>>, vector<1x256xf32>
    %c0_1 = arith.constant 0 : index
    %c0_2 = arith.constant 0 : index
    %1 = vector.load %arg3[%c0_1, %c0_2] : memref<1x128xf32, #tpu.memory_space<vmem>>, vector<1x128xf32>
    %c0_3 = arith.constant 0 : index
    %c0_4 = arith.constant 0 : index
    %2 = vector.load %arg4[%c0_3, %c0_4] : memref<1x128xf32, #tpu.memory_space<vmem>>, vector<1x128xf32>
    %c0_5 = arith.constant 0 : index
    %c0_6 = arith.constant 0 : index
    %3 = vector.load %arg5[%c0_5, %c0_6] : memref<1x256xf32, #tpu.memory_space<vmem>>, vector<1x256xf32>
    %c0_7 = arith.constant 0 : index
    %c0_8 = arith.constant 0 : index
    %4 = vector.load %arg6[%c0_7, %c0_8] : memref<128x256xf32, #tpu.memory_space<vmem>>, vector<128x256xf32>
    %c0_9 = arith.constant 0 : index
    %c0_10 = arith.constant 0 : index
    %5 = vector.load %arg7[%c0_9, %c0_10] : memref<1x128xf32, #tpu.memory_space<vmem>>, vector<1x128xf32>
    %c0_11 = arith.constant 0 : index
    %c0_12 = arith.constant 0 : index
    %6 = vector.load %arg8[%c0_11, %c0_12] : memref<256x128xf32, #tpu.memory_space<vmem>>, vector<256x128xf32>
    %c0_13 = arith.constant 0 : index
    %c0_14 = arith.constant 0 : index
    %7 = vector.load %arg9[%c0_13, %c0_14] : memref<1x128xf32, #tpu.memory_space<vmem>>, vector<1x128xf32>
    %c0_15 = arith.constant 0 : index
    %c0_16 = arith.constant 0 : index
    %8 = vector.load %arg10[%c0_15, %c0_16] : memref<1x128xf32, #tpu.memory_space<vmem>>, vector<1x128xf32>
    %c0_17 = arith.constant 0 : index
    %c0_18 = arith.constant 0 : index
    %9 = vector.load %arg11[%c0_17, %c0_18] : memref<1x128xf32, #tpu.memory_space<vmem>>, vector<1x128xf32>
    %c0_19 = arith.constant 0 : index
    %c0_20 = arith.constant 0 : index
    %10 = vector.load %arg12[%c0_19, %c0_20] : memref<1x128xf32, #tpu.memory_space<vmem>>, vector<1x128xf32>
    %c0_21 = arith.constant 0 : index
    %c0_22 = arith.constant 0 : index
    %11 = vector.load %arg13[%c0_21, %c0_22] : memref<1x128xf32, #tpu.memory_space<vmem>>, vector<1x128xf32>
    %c0_23 = arith.constant 0 : index
    %c0_24 = arith.constant 0 : index
    %12 = vector.load %arg14[%c0_23, %c0_24] : memref<1x128xf32, #tpu.memory_space<vmem>>, vector<1x128xf32>
    %c0_25 = arith.constant 0 : index
    %c0_26 = arith.constant 0 : index
    %13 = vector.load %arg15[%c0_25, %c0_26] : memref<128x256xf32, #tpu.memory_space<vmem>>, vector<128x256xf32>
    %c0_27 = arith.constant 0 : index
    %c0_28 = arith.constant 0 : index
    %14 = vector.load %arg16[%c0_27, %c0_28] : memref<128x128xf32, #tpu.memory_space<vmem>>, vector<128x128xf32>
    %c0_29 = arith.constant 0 : index
    %c0_30 = arith.constant 0 : index
    %15 = vector.load %arg17[%c0_29, %c0_30] : memref<128x128xf32, #tpu.memory_space<vmem>>, vector<128x128xf32>
    %c0_31 = arith.constant 0 : index
    %c0_32 = arith.constant 0 : index
    %16 = vector.load %arg18[%c0_31, %c0_32] : memref<1x128xf32, #tpu.memory_space<vmem>>, vector<1x128xf32>
    %c0_33 = arith.constant 0 : index
    %c0_34 = arith.constant 0 : index
    %17 = vector.load %arg19[%c0_33, %c0_34] : memref<1x64xf32, #tpu.memory_space<vmem>>, vector<1x64xf32>
    %c0_35 = arith.constant 0 : index
    %c0_36 = arith.constant 0 : index
    %18 = vector.load %arg20[%c0_35, %c0_36] : memref<1x64xf32, #tpu.memory_space<vmem>>, vector<1x64xf32>
    %c0_37 = arith.constant 0 : index
    %c0_38 = arith.constant 0 : index
    %19 = vector.load %arg21[%c0_37, %c0_38] : memref<1x128xf32, #tpu.memory_space<vmem>>, vector<1x128xf32>
    %c0_39 = arith.constant 0 : index
    %c0_40 = arith.constant 0 : index
    %20 = vector.load %arg22[%c0_39, %c0_40] : memref<64x128xf32, #tpu.memory_space<vmem>>, vector<64x128xf32>
    %c0_41 = arith.constant 0 : index
    %c0_42 = arith.constant 0 : index
    %21 = vector.load %arg23[%c0_41, %c0_42] : memref<1x64xf32, #tpu.memory_space<vmem>>, vector<1x64xf32>
    %c0_43 = arith.constant 0 : index
    %c0_44 = arith.constant 0 : index
    %22 = vector.load %arg24[%c0_43, %c0_44] : memref<128x64xf32, #tpu.memory_space<vmem>>, vector<128x64xf32>
    %c0_45 = arith.constant 0 : index
    %c0_46 = arith.constant 0 : index
    %23 = vector.load %arg25[%c0_45, %c0_46] : memref<1x64xf32, #tpu.memory_space<vmem>>, vector<1x64xf32>
    %c0_47 = arith.constant 0 : index
    %c0_48 = arith.constant 0 : index
    %24 = vector.load %arg26[%c0_47, %c0_48] : memref<1x64xf32, #tpu.memory_space<vmem>>, vector<1x64xf32>
    %c0_49 = arith.constant 0 : index
    %c0_50 = arith.constant 0 : index
    %25 = vector.load %arg27[%c0_49, %c0_50] : memref<1x64xf32, #tpu.memory_space<vmem>>, vector<1x64xf32>
    %c0_51 = arith.constant 0 : index
    %c0_52 = arith.constant 0 : index
    %26 = vector.load %arg28[%c0_51, %c0_52] : memref<1x64xf32, #tpu.memory_space<vmem>>, vector<1x64xf32>
    %c0_53 = arith.constant 0 : index
    %c0_54 = arith.constant 0 : index
    %27 = vector.load %arg29[%c0_53, %c0_54] : memref<1x64xf32, #tpu.memory_space<vmem>>, vector<1x64xf32>
    %c0_55 = arith.constant 0 : index
    %c0_56 = arith.constant 0 : index
    %28 = vector.load %arg30[%c0_55, %c0_56] : memref<1x64xf32, #tpu.memory_space<vmem>>, vector<1x64xf32>
    %c0_57 = arith.constant 0 : index
    %c0_58 = arith.constant 0 : index
    %29 = vector.load %arg31[%c0_57, %c0_58] : memref<64x128xf32, #tpu.memory_space<vmem>>, vector<64x128xf32>
    %c0_59 = arith.constant 0 : index
    %c0_60 = arith.constant 0 : index
    %30 = vector.load %arg32[%c0_59, %c0_60] : memref<64x64xf32, #tpu.memory_space<vmem>>, vector<64x64xf32>
    %c0_61 = arith.constant 0 : index
    %c0_62 = arith.constant 0 : index
    %31 = vector.load %arg33[%c0_61, %c0_62] : memref<64x64xf32, #tpu.memory_space<vmem>>, vector<64x64xf32>
    %c0_63 = arith.constant 0 : index
    %c0_64 = arith.constant 0 : index
    %32 = vector.load %arg34[%c0_63, %c0_64] : memref<1x64xf32, #tpu.memory_space<vmem>>, vector<1x64xf32>
    %c0_65 = arith.constant 0 : index
    %c0_66 = arith.constant 0 : index
    %33 = vector.load %arg35[%c0_65, %c0_66] : memref<1x32xf32, #tpu.memory_space<vmem>>, vector<1x32xf32>
    %c0_67 = arith.constant 0 : index
    %c0_68 = arith.constant 0 : index
    %34 = vector.load %arg36[%c0_67, %c0_68] : memref<1x32xf32, #tpu.memory_space<vmem>>, vector<1x32xf32>
    %c0_69 = arith.constant 0 : index
    %c0_70 = arith.constant 0 : index
    %35 = vector.load %arg37[%c0_69, %c0_70] : memref<1x64xf32, #tpu.memory_space<vmem>>, vector<1x64xf32>
    %c0_71 = arith.constant 0 : index
    %c0_72 = arith.constant 0 : index
    %36 = vector.load %arg38[%c0_71, %c0_72] : memref<32x64xf32, #tpu.memory_space<vmem>>, vector<32x64xf32>
    %c0_73 = arith.constant 0 : index
    %c0_74 = arith.constant 0 : index
    %37 = vector.load %arg39[%c0_73, %c0_74] : memref<1x32xf32, #tpu.memory_space<vmem>>, vector<1x32xf32>
    %c0_75 = arith.constant 0 : index
    %c0_76 = arith.constant 0 : index
    %38 = vector.load %arg40[%c0_75, %c0_76] : memref<64x32xf32, #tpu.memory_space<vmem>>, vector<64x32xf32>
    %c0_77 = arith.constant 0 : index
    %c0_78 = arith.constant 0 : index
    %39 = vector.load %arg41[%c0_77, %c0_78] : memref<1x32xf32, #tpu.memory_space<vmem>>, vector<1x32xf32>
    %c0_79 = arith.constant 0 : index
    %c0_80 = arith.constant 0 : index
    %40 = vector.load %arg42[%c0_79, %c0_80] : memref<1x32xf32, #tpu.memory_space<vmem>>, vector<1x32xf32>
    %c0_81 = arith.constant 0 : index
    %c0_82 = arith.constant 0 : index
    %41 = vector.load %arg43[%c0_81, %c0_82] : memref<1x32xf32, #tpu.memory_space<vmem>>, vector<1x32xf32>
    %c0_83 = arith.constant 0 : index
    %c0_84 = arith.constant 0 : index
    %42 = vector.load %arg44[%c0_83, %c0_84] : memref<1x32xf32, #tpu.memory_space<vmem>>, vector<1x32xf32>
    %c0_85 = arith.constant 0 : index
    %c0_86 = arith.constant 0 : index
    %43 = vector.load %arg45[%c0_85, %c0_86] : memref<1x32xf32, #tpu.memory_space<vmem>>, vector<1x32xf32>
    %c0_87 = arith.constant 0 : index
    %c0_88 = arith.constant 0 : index
    %44 = vector.load %arg46[%c0_87, %c0_88] : memref<1x32xf32, #tpu.memory_space<vmem>>, vector<1x32xf32>
    %c0_89 = arith.constant 0 : index
    %c0_90 = arith.constant 0 : index
    %45 = vector.load %arg47[%c0_89, %c0_90] : memref<32x64xf32, #tpu.memory_space<vmem>>, vector<32x64xf32>
    %c0_91 = arith.constant 0 : index
    %c0_92 = arith.constant 0 : index
    %46 = vector.load %arg48[%c0_91, %c0_92] : memref<32x32xf32, #tpu.memory_space<vmem>>, vector<32x32xf32>
    %c0_93 = arith.constant 0 : index
    %c0_94 = arith.constant 0 : index
    %47 = vector.load %arg49[%c0_93, %c0_94] : memref<32x32xf32, #tpu.memory_space<vmem>>, vector<32x32xf32>
    %c0_95 = arith.constant 0 : index
    %c0_96 = arith.constant 0 : index
    %48 = vector.load %arg50[%c0_95, %c0_96] : memref<1x64xf32, #tpu.memory_space<vmem>>, vector<1x64xf32>
    %c0_97 = arith.constant 0 : index
    %c0_98 = arith.constant 0 : index
    %49 = vector.load %arg51[%c0_97, %c0_98] : memref<1x64xf32, #tpu.memory_space<vmem>>, vector<1x64xf32>
    %c0_99 = arith.constant 0 : index
    %c0_100 = arith.constant 0 : index
    %50 = vector.load %arg52[%c0_99, %c0_100] : memref<1x32xf32, #tpu.memory_space<vmem>>, vector<1x32xf32>
    %c0_101 = arith.constant 0 : index
    %c0_102 = arith.constant 0 : index
    %51 = vector.load %arg53[%c0_101, %c0_102] : memref<1x32xf32, #tpu.memory_space<vmem>>, vector<1x32xf32>
    %c0_103 = arith.constant 0 : index
    %c0_104 = arith.constant 0 : index
    %52 = vector.load %arg54[%c0_103, %c0_104] : memref<1x64xf32, #tpu.memory_space<vmem>>, vector<1x64xf32>
    %c0_105 = arith.constant 0 : index
    %c0_106 = arith.constant 0 : index
    %53 = vector.load %arg55[%c0_105, %c0_106] : memref<128x64xf32, #tpu.memory_space<vmem>>, vector<128x64xf32>
    %c0_107 = arith.constant 0 : index
    %c0_108 = arith.constant 0 : index
    %54 = vector.load %arg56[%c0_107, %c0_108] : memref<1x32xf32, #tpu.memory_space<vmem>>, vector<1x32xf32>
    %c0_109 = arith.constant 0 : index
    %c0_110 = arith.constant 0 : index
    %55 = vector.load %arg57[%c0_109, %c0_110] : memref<64x32xf32, #tpu.memory_space<vmem>>, vector<64x32xf32>
    %c0_111 = arith.constant 0 : index
    %c0_112 = arith.constant 0 : index
    %56 = vector.load %arg58[%c0_111, %c0_112] : memref<1x1xf32, #tpu.memory_space<vmem>>, vector<1x1xf32>
    %c0_113 = arith.constant 0 : index
    %c0_114 = arith.constant 0 : index
    %57 = vector.load %arg59[%c0_113, %c0_114] : memref<1x32xf32, #tpu.memory_space<vmem>>, vector<1x32xf32>
    %c0_115 = arith.constant 0 : index
    %c0_116 = arith.constant 0 : index
    %58 = vector.load %arg60[%c0_115, %c0_116] : memref<1x128xf32, #tpu.memory_space<vmem>>, vector<1x128xf32>
    %c0_117 = arith.constant 0 : index
    %c0_118 = arith.constant 0 : index
    %59 = vector.load %arg61[%c0_117, %c0_118] : memref<1x128xf32, #tpu.memory_space<vmem>>, vector<1x128xf32>
    %c0_119 = arith.constant 0 : index
    %c0_120 = arith.constant 0 : index
    %60 = vector.load %arg62[%c0_119, %c0_120] : memref<16x128xf32, #tpu.memory_space<vmem>>, vector<16x128xf32>
    %c0_121 = arith.constant 0 : index
    %c0_122 = arith.constant 0 : index
    %61 = vector.load %arg63[%c0_121, %c0_122] : memref<16x64xf32, #tpu.memory_space<vmem>>, vector<16x64xf32>
    %c0_123 = arith.constant 0 : index
    %c0_124 = arith.constant 0 : index
    %62 = vector.load %arg64[%c0_123, %c0_124] : memref<16x32xf32, #tpu.memory_space<vmem>>, vector<16x32xf32>
    %c0_125 = arith.constant 0 : index
    %c0_126 = arith.constant 0 : index
    %c0_127 = arith.constant 0 : index
    %63 = vector.load %arg1[%c0_125, %c0_126, %c0_127] : memref<1x8x128xf32, #tpu.memory_space<vmem>>, vector<1x8x128xf32>
    %64 = vector.shape_cast %63 : vector<1x8x128xf32> to vector<8x128xf32>
    %cst = arith.constant dense<0.000000e+00> : vector<8xf32>
    %65 = vector.multi_reduction <add>, %64, %cst [1] : vector<8x128xf32> to vector<8xf32>
    %66 = vector.shape_cast %65 : vector<8xf32> to vector<8x1xf32>
    %cst_128 = arith.constant 1.280000e+02 : f32
    %67 = vector.broadcast %cst_128 : f32 to vector<8x1xf32>
    %68 = arith.divf %66, %67 : vector<8x1xf32>
    %69 = vector.broadcast %68 : vector<8x1xf32> to vector<8x128xf32>
    %70 = arith.subf %64, %69 : vector<8x128xf32>
    %71 = arith.mulf %70, %70 : vector<8x128xf32>
    %cst_129 = arith.constant dense<0.000000e+00> : vector<8xf32>
    %72 = vector.multi_reduction <add>, %71, %cst_129 [1] : vector<8x128xf32> to vector<8xf32>
    %73 = vector.shape_cast %72 : vector<8xf32> to vector<8x1xf32>
    %cst_130 = arith.constant 1.280000e+02 : f32
    %74 = vector.broadcast %cst_130 : f32 to vector<8x1xf32>
    %75 = arith.divf %73, %74 : vector<8x1xf32>
    %76 = vector.broadcast %68 : vector<8x1xf32> to vector<8x128xf32>
    %77 = arith.subf %64, %76 : vector<8x128xf32>
    %cst_131 = arith.constant 9.99999974E-6 : f32
    %78 = vector.broadcast %cst_131 : f32 to vector<8x1xf32>
    %79 = arith.addf %75, %78 : vector<8x1xf32>
    %80 = math.rsqrt %79 : vector<8x1xf32>
    %81 = vector.broadcast %80 : vector<8x1xf32> to vector<8x128xf32>
    %82 = arith.mulf %77, %81 : vector<8x128xf32>
    %83 = vector.broadcast %59 : vector<1x128xf32> to vector<8x128xf32>
    %84 = arith.mulf %82, %83 : vector<8x128xf32>
    %85 = vector.broadcast %58 : vector<1x128xf32> to vector<8x128xf32>
    %86 = arith.addf %84, %85 : vector<8x128xf32>
    %cst_132 = arith.constant 0.000000e+00 : f32
    %87 = vector.broadcast %cst_132 : f32 to vector<8x128xf32>
    %88 = arith.maximumf %86, %87 : vector<8x128xf32>
    %89 = arith.addf %60, %60 : vector<16x128xf32>
    %cst_133 = arith.constant dense<0.000000e+00> : vector<16xf32>
    %90 = vector.multi_reduction <add>, %89, %cst_133 [1] : vector<16x128xf32> to vector<16xf32>
    %91 = vector.shape_cast %90 : vector<16xf32> to vector<16x1xf32>
    %cst_134 = arith.constant 1.280000e+02 : f32
    %92 = vector.broadcast %cst_134 : f32 to vector<16x1xf32>
    %93 = arith.divf %91, %92 : vector<16x1xf32>
    %94 = vector.broadcast %93 : vector<16x1xf32> to vector<16x128xf32>
    %95 = arith.subf %89, %94 : vector<16x128xf32>
    %96 = arith.mulf %95, %95 : vector<16x128xf32>
    %cst_135 = arith.constant dense<0.000000e+00> : vector<16xf32>
    %97 = vector.multi_reduction <add>, %96, %cst_135 [1] : vector<16x128xf32> to vector<16xf32>
    %98 = vector.shape_cast %97 : vector<16xf32> to vector<16x1xf32>
    %cst_136 = arith.constant 1.280000e+02 : f32
    %99 = vector.broadcast %cst_136 : f32 to vector<16x1xf32>
    %100 = arith.divf %98, %99 : vector<16x1xf32>
    %101 = vector.broadcast %93 : vector<16x1xf32> to vector<16x128xf32>
    %102 = arith.subf %89, %101 : vector<16x128xf32>
    %cst_137 = arith.constant 9.99999974E-6 : f32
    %103 = vector.broadcast %cst_137 : f32 to vector<16x1xf32>
    %104 = arith.addf %100, %103 : vector<16x1xf32>
    %105 = math.rsqrt %104 : vector<16x1xf32>
    %106 = vector.broadcast %105 : vector<16x1xf32> to vector<16x128xf32>
    %107 = arith.mulf %102, %106 : vector<16x128xf32>
    %108 = vector.broadcast %8 : vector<1x128xf32> to vector<16x128xf32>
    %109 = arith.mulf %107, %108 : vector<16x128xf32>
    %110 = vector.broadcast %7 : vector<1x128xf32> to vector<16x128xf32>
    %111 = arith.addf %109, %110 : vector<16x128xf32>
    %cst_138 = arith.constant dense<0.000000e+00> : vector<16x128xf32>
    %112 = tpu.matmul %111, %15, %cst_138 {dimension_numbers = #tpu.dot_dimension_numbers<[1], [0], [0], [1], [0, 0, 1, 1], [], []>} : vector<16x128xf32>, vector<128x128xf32>, vector<16x128xf32> -> vector<16x128xf32>
    %113 = vector.broadcast %2 : vector<1x128xf32> to vector<16x128xf32>
    %114 = arith.addf %112, %113 : vector<16x128xf32>
    %cst_139 = arith.constant dense<0.000000e+00> : vector<8x256xf32>
    %115 = tpu.matmul %88, %13, %cst_139 {dimension_numbers = #tpu.dot_dimension_numbers<[1], [0], [0], [1], [0, 0, 1, 1], [], []>} : vector<8x128xf32>, vector<128x256xf32>, vector<8x256xf32> -> vector<8x256xf32>
    %116 = vector.broadcast %0 : vector<1x256xf32> to vector<8x256xf32>
    %117 = arith.addf %115, %116 : vector<8x256xf32>
    %118 = vector.extract_strided_slice %117 {offsets = [0, 0], sizes = [8, 128], strides = [1, 1]} : vector<8x256xf32> to vector<8x128xf32>
    %119 = vector.extract_strided_slice %117 {offsets = [0, 128], sizes = [8, 128], strides = [1, 1]} : vector<8x256xf32> to vector<8x128xf32>
    %120 = vector.extract_strided_slice %114 {offsets = [0, 0], sizes = [16, 16], strides = [1, 1]} : vector<16x128xf32> to vector<16x16xf32>
    %121 = vector.extract_strided_slice %118 {offsets = [0, 0], sizes = [8, 16], strides = [1, 1]} : vector<8x128xf32> to vector<8x16xf32>
    %122 = vector.extract_strided_slice %119 {offsets = [0, 0], sizes = [8, 16], strides = [1, 1]} : vector<8x128xf32> to vector<8x16xf32>
    %cst_140 = arith.constant dense<0.000000e+00> : vector<16x8xf32>
    %123 = tpu.matmul %120, %121, %cst_140 {dimension_numbers = #tpu.dot_dimension_numbers<[1], [1], [0], [0], [0, 0, 1, 0], [], []>} : vector<16x16xf32>, vector<8x16xf32>, vector<16x8xf32> -> vector<16x8xf32>
    %cst_141 = arith.constant 2.500000e-01 : f32
    %124 = vector.broadcast %cst_141 : f32 to vector<16x8xf32>
    %125 = arith.mulf %123, %124 : vector<16x8xf32>
    %cst_142 = arith.constant dense<0xFF800000> : vector<16xf32>
    %126 = vector.multi_reduction <maximumf>, %125, %cst_142 [1] : vector<16x8xf32> to vector<16xf32>
    %127 = vector.shape_cast %126 : vector<16xf32> to vector<16x1xf32>
    %128 = vector.broadcast %127 : vector<16x1xf32> to vector<16x8xf32>
    %129 = arith.subf %125, %128 : vector<16x8xf32>
    %130 = math.exp %129 : vector<16x8xf32>
    %cst_143 = arith.constant dense<0.000000e+00> : vector<16xf32>
    %131 = vector.multi_reduction <add>, %130, %cst_143 [1] : vector<16x8xf32> to vector<16xf32>
    %132 = vector.shape_cast %131 : vector<16xf32> to vector<16x1xf32>
    %133 = vector.broadcast %132 : vector<16x1xf32> to vector<16x8xf32>
    %134 = arith.divf %130, %133 : vector<16x8xf32>
    %cst_144 = arith.constant dense<0.000000e+00> : vector<16x16xf32>
    %135 = tpu.matmul %134, %122, %cst_144 {dimension_numbers = #tpu.dot_dimension_numbers<[1], [0], [0], [1], [0, 0, 1, 1], [], []>} : vector<16x8xf32>, vector<8x16xf32>, vector<16x16xf32> -> vector<16x16xf32>
    %136 = vector.extract_strided_slice %114 {offsets = [0, 16], sizes = [16, 16], strides = [1, 1]} : vector<16x128xf32> to vector<16x16xf32>
    %137 = vector.extract_strided_slice %118 {offsets = [0, 16], sizes = [8, 16], strides = [1, 1]} : vector<8x128xf32> to vector<8x16xf32>
    %138 = vector.extract_strided_slice %119 {offsets = [0, 16], sizes = [8, 16], strides = [1, 1]} : vector<8x128xf32> to vector<8x16xf32>
    %cst_145 = arith.constant dense<0.000000e+00> : vector<16x8xf32>
    %139 = tpu.matmul %136, %137, %cst_145 {dimension_numbers = #tpu.dot_dimension_numbers<[1], [1], [0], [0], [0, 0, 1, 0], [], []>} : vector<16x16xf32>, vector<8x16xf32>, vector<16x8xf32> -> vector<16x8xf32>
    %cst_146 = arith.constant 2.500000e-01 : f32
    %140 = vector.broadcast %cst_146 : f32 to vector<16x8xf32>
    %141 = arith.mulf %139, %140 : vector<16x8xf32>
    %cst_147 = arith.constant dense<0xFF800000> : vector<16xf32>
    %142 = vector.multi_reduction <maximumf>, %141, %cst_147 [1] : vector<16x8xf32> to vector<16xf32>
    %143 = vector.shape_cast %142 : vector<16xf32> to vector<16x1xf32>
    %144 = vector.broadcast %143 : vector<16x1xf32> to vector<16x8xf32>
    %145 = arith.subf %141, %144 : vector<16x8xf32>
    %146 = math.exp %145 : vector<16x8xf32>
    %cst_148 = arith.constant dense<0.000000e+00> : vector<16xf32>
    %147 = vector.multi_reduction <add>, %146, %cst_148 [1] : vector<16x8xf32> to vector<16xf32>
    %148 = vector.shape_cast %147 : vector<16xf32> to vector<16x1xf32>
    %149 = vector.broadcast %148 : vector<16x1xf32> to vector<16x8xf32>
    %150 = arith.divf %146, %149 : vector<16x8xf32>
    %cst_149 = arith.constant dense<0.000000e+00> : vector<16x16xf32>
    %151 = tpu.matmul %150, %138, %cst_149 {dimension_numbers = #tpu.dot_dimension_numbers<[1], [0], [0], [1], [0, 0, 1, 1], [], []>} : vector<16x8xf32>, vector<8x16xf32>, vector<16x16xf32> -> vector<16x16xf32>
    %152 = vector.extract_strided_slice %114 {offsets = [0, 32], sizes = [16, 16], strides = [1, 1]} : vector<16x128xf32> to vector<16x16xf32>
    %153 = vector.extract_strided_slice %118 {offsets = [0, 32], sizes = [8, 16], strides = [1, 1]} : vector<8x128xf32> to vector<8x16xf32>
    %154 = vector.extract_strided_slice %119 {offsets = [0, 32], sizes = [8, 16], strides = [1, 1]} : vector<8x128xf32> to vector<8x16xf32>
    %cst_150 = arith.constant dense<0.000000e+00> : vector<16x8xf32>
    %155 = tpu.matmul %152, %153, %cst_150 {dimension_numbers = #tpu.dot_dimension_numbers<[1], [1], [0], [0], [0, 0, 1, 0], [], []>} : vector<16x16xf32>, vector<8x16xf32>, vector<16x8xf32> -> vector<16x8xf32>
    %cst_151 = arith.constant 2.500000e-01 : f32
    %156 = vector.broadcast %cst_151 : f32 to vector<16x8xf32>
    %157 = arith.mulf %155, %156 : vector<16x8xf32>
    %cst_152 = arith.constant dense<0xFF800000> : vector<16xf32>
    %158 = vector.multi_reduction <maximumf>, %157, %cst_152 [1] : vector<16x8xf32> to vector<16xf32>
    %159 = vector.shape_cast %158 : vector<16xf32> to vector<16x1xf32>
    %160 = vector.broadcast %159 : vector<16x1xf32> to vector<16x8xf32>
    %161 = arith.subf %157, %160 : vector<16x8xf32>
    %162 = math.exp %161 : vector<16x8xf32>
    %cst_153 = arith.constant dense<0.000000e+00> : vector<16xf32>
    %163 = vector.multi_reduction <add>, %162, %cst_153 [1] : vector<16x8xf32> to vector<16xf32>
    %164 = vector.shape_cast %163 : vector<16xf32> to vector<16x1xf32>
    %165 = vector.broadcast %164 : vector<16x1xf32> to vector<16x8xf32>
    %166 = arith.divf %162, %165 : vector<16x8xf32>
    %cst_154 = arith.constant dense<0.000000e+00> : vector<16x16xf32>
    %167 = tpu.matmul %166, %154, %cst_154 {dimension_numbers = #tpu.dot_dimension_numbers<[1], [0], [0], [1], [0, 0, 1, 1], [], []>} : vector<16x8xf32>, vector<8x16xf32>, vector<16x16xf32> -> vector<16x16xf32>
    %168 = vector.extract_strided_slice %114 {offsets = [0, 48], sizes = [16, 16], strides = [1, 1]} : vector<16x128xf32> to vector<16x16xf32>
    %169 = vector.extract_strided_slice %118 {offsets = [0, 48], sizes = [8, 16], strides = [1, 1]} : vector<8x128xf32> to vector<8x16xf32>
    %170 = vector.extract_strided_slice %119 {offsets = [0, 48], sizes = [8, 16], strides = [1, 1]} : vector<8x128xf32> to vector<8x16xf32>
    %cst_155 = arith.constant dense<0.000000e+00> : vector<16x8xf32>
    %171 = tpu.matmul %168, %169, %cst_155 {dimension_numbers = #tpu.dot_dimension_numbers<[1], [1], [0], [0], [0, 0, 1, 0], [], []>} : vector<16x16xf32>, vector<8x16xf32>, vector<16x8xf32> -> vector<16x8xf32>
    %cst_156 = arith.constant 2.500000e-01 : f32
    %172 = vector.broadcast %cst_156 : f32 to vector<16x8xf32>
    %173 = arith.mulf %171, %172 : vector<16x8xf32>
    %cst_157 = arith.constant dense<0xFF800000> : vector<16xf32>
    %174 = vector.multi_reduction <maximumf>, %173, %cst_157 [1] : vector<16x8xf32> to vector<16xf32>
    %175 = vector.shape_cast %174 : vector<16xf32> to vector<16x1xf32>
    %176 = vector.broadcast %175 : vector<16x1xf32> to vector<16x8xf32>
    %177 = arith.subf %173, %176 : vector<16x8xf32>
    %178 = math.exp %177 : vector<16x8xf32>
    %cst_158 = arith.constant dense<0.000000e+00> : vector<16xf32>
    %179 = vector.multi_reduction <add>, %178, %cst_158 [1] : vector<16x8xf32> to vector<16xf32>
    %180 = vector.shape_cast %179 : vector<16xf32> to vector<16x1xf32>
    %181 = vector.broadcast %180 : vector<16x1xf32> to vector<16x8xf32>
    %182 = arith.divf %178, %181 : vector<16x8xf32>
    %cst_159 = arith.constant dense<0.000000e+00> : vector<16x16xf32>
    %183 = tpu.matmul %182, %170, %cst_159 {dimension_numbers = #tpu.dot_dimension_numbers<[1], [0], [0], [1], [0, 0, 1, 1], [], []>} : vector<16x8xf32>, vector<8x16xf32>, vector<16x16xf32> -> vector<16x16xf32>
    %184 = vector.extract_strided_slice %114 {offsets = [0, 64], sizes = [16, 16], strides = [1, 1]} : vector<16x128xf32> to vector<16x16xf32>
    %185 = vector.extract_strided_slice %118 {offsets = [0, 64], sizes = [8, 16], strides = [1, 1]} : vector<8x128xf32> to vector<8x16xf32>
    %186 = vector.extract_strided_slice %119 {offsets = [0, 64], sizes = [8, 16], strides = [1, 1]} : vector<8x128xf32> to vector<8x16xf32>
    %cst_160 = arith.constant dense<0.000000e+00> : vector<16x8xf32>
    %187 = tpu.matmul %184, %185, %cst_160 {dimension_numbers = #tpu.dot_dimension_numbers<[1], [1], [0], [0], [0, 0, 1, 0], [], []>} : vector<16x16xf32>, vector<8x16xf32>, vector<16x8xf32> -> vector<16x8xf32>
    %cst_161 = arith.constant 2.500000e-01 : f32
    %188 = vector.broadcast %cst_161 : f32 to vector<16x8xf32>
    %189 = arith.mulf %187, %188 : vector<16x8xf32>
    %cst_162 = arith.constant dense<0xFF800000> : vector<16xf32>
    %190 = vector.multi_reduction <maximumf>, %189, %cst_162 [1] : vector<16x8xf32> to vector<16xf32>
    %191 = vector.shape_cast %190 : vector<16xf32> to vector<16x1xf32>
    %192 = vector.broadcast %191 : vector<16x1xf32> to vector<16x8xf32>
    %193 = arith.subf %189, %192 : vector<16x8xf32>
    %194 = math.exp %193 : vector<16x8xf32>
    %cst_163 = arith.constant dense<0.000000e+00> : vector<16xf32>
    %195 = vector.multi_reduction <add>, %194, %cst_163 [1] : vector<16x8xf32> to vector<16xf32>
    %196 = vector.shape_cast %195 : vector<16xf32> to vector<16x1xf32>
    %197 = vector.broadcast %196 : vector<16x1xf32> to vector<16x8xf32>
    %198 = arith.divf %194, %197 : vector<16x8xf32>
    %cst_164 = arith.constant dense<0.000000e+00> : vector<16x16xf32>
    %199 = tpu.matmul %198, %186, %cst_164 {dimension_numbers = #tpu.dot_dimension_numbers<[1], [0], [0], [1], [0, 0, 1, 1], [], []>} : vector<16x8xf32>, vector<8x16xf32>, vector<16x16xf32> -> vector<16x16xf32>
    %200 = vector.extract_strided_slice %114 {offsets = [0, 80], sizes = [16, 16], strides = [1, 1]} : vector<16x128xf32> to vector<16x16xf32>
    %201 = vector.extract_strided_slice %118 {offsets = [0, 80], sizes = [8, 16], strides = [1, 1]} : vector<8x128xf32> to vector<8x16xf32>
    %202 = vector.extract_strided_slice %119 {offsets = [0, 80], sizes = [8, 16], strides = [1, 1]} : vector<8x128xf32> to vector<8x16xf32>
    %cst_165 = arith.constant dense<0.000000e+00> : vector<16x8xf32>
    %203 = tpu.matmul %200, %201, %cst_165 {dimension_numbers = #tpu.dot_dimension_numbers<[1], [1], [0], [0], [0, 0, 1, 0], [], []>} : vector<16x16xf32>, vector<8x16xf32>, vector<16x8xf32> -> vector<16x8xf32>
    %cst_166 = arith.constant 2.500000e-01 : f32
    %204 = vector.broadcast %cst_166 : f32 to vector<16x8xf32>
    %205 = arith.mulf %203, %204 : vector<16x8xf32>
    %cst_167 = arith.constant dense<0xFF800000> : vector<16xf32>
    %206 = vector.multi_reduction <maximumf>, %205, %cst_167 [1] : vector<16x8xf32> to vector<16xf32>
    %207 = vector.shape_cast %206 : vector<16xf32> to vector<16x1xf32>
    %208 = vector.broadcast %207 : vector<16x1xf32> to vector<16x8xf32>
    %209 = arith.subf %205, %208 : vector<16x8xf32>
    %210 = math.exp %209 : vector<16x8xf32>
    %cst_168 = arith.constant dense<0.000000e+00> : vector<16xf32>
    %211 = vector.multi_reduction <add>, %210, %cst_168 [1] : vector<16x8xf32> to vector<16xf32>
    %212 = vector.shape_cast %211 : vector<16xf32> to vector<16x1xf32>
    %213 = vector.broadcast %212 : vector<16x1xf32> to vector<16x8xf32>
    %214 = arith.divf %210, %213 : vector<16x8xf32>
    %cst_169 = arith.constant dense<0.000000e+00> : vector<16x16xf32>
    %215 = tpu.matmul %214, %202, %cst_169 {dimension_numbers = #tpu.dot_dimension_numbers<[1], [0], [0], [1], [0, 0, 1, 1], [], []>} : vector<16x8xf32>, vector<8x16xf32>, vector<16x16xf32> -> vector<16x16xf32>
    %216 = vector.extract_strided_slice %114 {offsets = [0, 96], sizes = [16, 16], strides = [1, 1]} : vector<16x128xf32> to vector<16x16xf32>
    %217 = vector.extract_strided_slice %118 {offsets = [0, 96], sizes = [8, 16], strides = [1, 1]} : vector<8x128xf32> to vector<8x16xf32>
    %218 = vector.extract_strided_slice %119 {offsets = [0, 96], sizes = [8, 16], strides = [1, 1]} : vector<8x128xf32> to vector<8x16xf32>
    %cst_170 = arith.constant dense<0.000000e+00> : vector<16x8xf32>
    %219 = tpu.matmul %216, %217, %cst_170 {dimension_numbers = #tpu.dot_dimension_numbers<[1], [1], [0], [0], [0, 0, 1, 0], [], []>} : vector<16x16xf32>, vector<8x16xf32>, vector<16x8xf32> -> vector<16x8xf32>
    %cst_171 = arith.constant 2.500000e-01 : f32
    %220 = vector.broadcast %cst_171 : f32 to vector<16x8xf32>
    %221 = arith.mulf %219, %220 : vector<16x8xf32>
    %cst_172 = arith.constant dense<0xFF800000> : vector<16xf32>
    %222 = vector.multi_reduction <maximumf>, %221, %cst_172 [1] : vector<16x8xf32> to vector<16xf32>
    %223 = vector.shape_cast %222 : vector<16xf32> to vector<16x1xf32>
    %224 = vector.broadcast %223 : vector<16x1xf32> to vector<16x8xf32>
    %225 = arith.subf %221, %224 : vector<16x8xf32>
    %226 = math.exp %225 : vector<16x8xf32>
    %cst_173 = arith.constant dense<0.000000e+00> : vector<16xf32>
    %227 = vector.multi_reduction <add>, %226, %cst_173 [1] : vector<16x8xf32> to vector<16xf32>
    %228 = vector.shape_cast %227 : vector<16xf32> to vector<16x1xf32>
    %229 = vector.broadcast %228 : vector<16x1xf32> to vector<16x8xf32>
    %230 = arith.divf %226, %229 : vector<16x8xf32>
    %cst_174 = arith.constant dense<0.000000e+00> : vector<16x16xf32>
    %231 = tpu.matmul %230, %218, %cst_174 {dimension_numbers = #tpu.dot_dimension_numbers<[1], [0], [0], [1], [0, 0, 1, 1], [], []>} : vector<16x8xf32>, vector<8x16xf32>, vector<16x16xf32> -> vector<16x16xf32>
    %232 = vector.extract_strided_slice %114 {offsets = [0, 112], sizes = [16, 16], strides = [1, 1]} : vector<16x128xf32> to vector<16x16xf32>
    %233 = vector.extract_strided_slice %118 {offsets = [0, 112], sizes = [8, 16], strides = [1, 1]} : vector<8x128xf32> to vector<8x16xf32>
    %234 = vector.extract_strided_slice %119 {offsets = [0, 112], sizes = [8, 16], strides = [1, 1]} : vector<8x128xf32> to vector<8x16xf32>
    %cst_175 = arith.constant dense<0.000000e+00> : vector<16x8xf32>
    %235 = tpu.matmul %232, %233, %cst_175 {dimension_numbers = #tpu.dot_dimension_numbers<[1], [1], [0], [0], [0, 0, 1, 0], [], []>} : vector<16x16xf32>, vector<8x16xf32>, vector<16x8xf32> -> vector<16x8xf32>
    %cst_176 = arith.constant 2.500000e-01 : f32
    %236 = vector.broadcast %cst_176 : f32 to vector<16x8xf32>
    %237 = arith.mulf %235, %236 : vector<16x8xf32>
    %cst_177 = arith.constant dense<0xFF800000> : vector<16xf32>
    %238 = vector.multi_reduction <maximumf>, %237, %cst_177 [1] : vector<16x8xf32> to vector<16xf32>
    %239 = vector.shape_cast %238 : vector<16xf32> to vector<16x1xf32>
    %240 = vector.broadcast %239 : vector<16x1xf32> to vector<16x8xf32>
    %241 = arith.subf %237, %240 : vector<16x8xf32>
    %242 = math.exp %241 : vector<16x8xf32>
    %cst_178 = arith.constant dense<0.000000e+00> : vector<16xf32>
    %243 = vector.multi_reduction <add>, %242, %cst_178 [1] : vector<16x8xf32> to vector<16xf32>
    %244 = vector.shape_cast %243 : vector<16xf32> to vector<16x1xf32>
    %245 = vector.broadcast %244 : vector<16x1xf32> to vector<16x8xf32>
    %246 = arith.divf %242, %245 : vector<16x8xf32>
    %cst_179 = arith.constant dense<0.000000e+00> : vector<16x16xf32>
    %247 = tpu.matmul %246, %234, %cst_179 {dimension_numbers = #tpu.dot_dimension_numbers<[1], [0], [0], [1], [0, 0, 1, 1], [], []>} : vector<16x8xf32>, vector<8x16xf32>, vector<16x16xf32> -> vector<16x16xf32>
    %248 = tpu.concatenate %135, %151, %167, %183, %199, %215, %231, %247 in 1 : vector<16x16xf32>, vector<16x16xf32>, vector<16x16xf32>, vector<16x16xf32>, vector<16x16xf32>, vector<16x16xf32>, vector<16x16xf32>, vector<16x16xf32> -> vector<16x128xf32>
    %cst_180 = arith.constant dense<0.000000e+00> : vector<16x128xf32>
    %249 = tpu.matmul %248, %14, %cst_180 {dimension_numbers = #tpu.dot_dimension_numbers<[1], [0], [0], [1], [0, 0, 1, 1], [], []>} : vector<16x128xf32>, vector<128x128xf32>, vector<16x128xf32> -> vector<16x128xf32>
    %250 = vector.broadcast %1 : vector<1x128xf32> to vector<16x128xf32>
    %251 = arith.addf %249, %250 : vector<16x128xf32>
    %252 = arith.addf %111, %251 : vector<16x128xf32>
    %cst_181 = arith.constant dense<0.000000e+00> : vector<16xf32>
    %253 = vector.multi_reduction <add>, %252, %cst_181 [1] : vector<16x128xf32> to vector<16xf32>
    %254 = vector.shape_cast %253 : vector<16xf32> to vector<16x1xf32>
    %cst_182 = arith.constant 1.280000e+02 : f32
    %255 = vector.broadcast %cst_182 : f32 to vector<16x1xf32>
    %256 = arith.divf %254, %255 : vector<16x1xf32>
    %257 = vector.broadcast %256 : vector<16x1xf32> to vector<16x128xf32>
    %258 = arith.subf %252, %257 : vector<16x128xf32>
    %259 = arith.mulf %258, %258 : vector<16x128xf32>
    %cst_183 = arith.constant dense<0.000000e+00> : vector<16xf32>
    %260 = vector.multi_reduction <add>, %259, %cst_183 [1] : vector<16x128xf32> to vector<16xf32>
    %261 = vector.shape_cast %260 : vector<16xf32> to vector<16x1xf32>
    %cst_184 = arith.constant 1.280000e+02 : f32
    %262 = vector.broadcast %cst_184 : f32 to vector<16x1xf32>
    %263 = arith.divf %261, %262 : vector<16x1xf32>
    %264 = vector.broadcast %256 : vector<16x1xf32> to vector<16x128xf32>
    %265 = arith.subf %252, %264 : vector<16x128xf32>
    %cst_185 = arith.constant 9.99999974E-6 : f32
    %266 = vector.broadcast %cst_185 : f32 to vector<16x1xf32>
    %267 = arith.addf %263, %266 : vector<16x1xf32>
    %268 = math.rsqrt %267 : vector<16x1xf32>
    %269 = vector.broadcast %268 : vector<16x1xf32> to vector<16x128xf32>
    %270 = arith.mulf %265, %269 : vector<16x128xf32>
    %271 = vector.broadcast %10 : vector<1x128xf32> to vector<16x128xf32>
    %272 = arith.mulf %270, %271 : vector<16x128xf32>
    %273 = vector.broadcast %9 : vector<1x128xf32> to vector<16x128xf32>
    %274 = arith.addf %272, %273 : vector<16x128xf32>
    %cst_186 = arith.constant dense<0.000000e+00> : vector<16x256xf32>
    %275 = tpu.matmul %274, %4, %cst_186 {dimension_numbers = #tpu.dot_dimension_numbers<[1], [0], [0], [1], [0, 0, 1, 1], [], []>} : vector<16x128xf32>, vector<128x256xf32>, vector<16x256xf32> -> vector<16x256xf32>
    %276 = vector.broadcast %3 : vector<1x256xf32> to vector<16x256xf32>
    %277 = arith.addf %275, %276 : vector<16x256xf32>
    %cst_187 = arith.constant 0.000000e+00 : f32
    %278 = vector.broadcast %cst_187 : f32 to vector<16x256xf32>
    %279 = arith.maximumf %277, %278 : vector<16x256xf32>
    %cst_188 = arith.constant dense<0.000000e+00> : vector<16x128xf32>
    %280 = tpu.matmul %279, %6, %cst_188 {dimension_numbers = #tpu.dot_dimension_numbers<[1], [0], [0], [1], [0, 0, 1, 1], [], []>} : vector<16x256xf32>, vector<256x128xf32>, vector<16x128xf32> -> vector<16x128xf32>
    %281 = vector.broadcast %5 : vector<1x128xf32> to vector<16x128xf32>
    %282 = arith.addf %280, %281 : vector<16x128xf32>
    %283 = arith.addf %274, %282 : vector<16x128xf32>
    %cst_189 = arith.constant dense<0.000000e+00> : vector<16xf32>
    %284 = vector.multi_reduction <add>, %283, %cst_189 [1] : vector<16x128xf32> to vector<16xf32>
    %285 = vector.shape_cast %284 : vector<16xf32> to vector<16x1xf32>
    %cst_190 = arith.constant 1.280000e+02 : f32
    %286 = vector.broadcast %cst_190 : f32 to vector<16x1xf32>
    %287 = arith.divf %285, %286 : vector<16x1xf32>
    %288 = vector.broadcast %287 : vector<16x1xf32> to vector<16x128xf32>
    %289 = arith.subf %283, %288 : vector<16x128xf32>
    %290 = arith.mulf %289, %289 : vector<16x128xf32>
    %cst_191 = arith.constant dense<0.000000e+00> : vector<16xf32>
    %291 = vector.multi_reduction <add>, %290, %cst_191 [1] : vector<16x128xf32> to vector<16xf32>
    %292 = vector.shape_cast %291 : vector<16xf32> to vector<16x1xf32>
    %cst_192 = arith.constant 1.280000e+02 : f32
    %293 = vector.broadcast %cst_192 : f32 to vector<16x1xf32>
    %294 = arith.divf %292, %293 : vector<16x1xf32>
    %295 = vector.broadcast %287 : vector<16x1xf32> to vector<16x128xf32>
    %296 = arith.subf %283, %295 : vector<16x128xf32>
    %cst_193 = arith.constant 9.99999974E-6 : f32
    %297 = vector.broadcast %cst_193 : f32 to vector<16x1xf32>
    %298 = arith.addf %294, %297 : vector<16x1xf32>
    %299 = math.rsqrt %298 : vector<16x1xf32>
    %300 = vector.broadcast %299 : vector<16x1xf32> to vector<16x128xf32>
    %301 = arith.mulf %296, %300 : vector<16x128xf32>
    %302 = vector.broadcast %12 : vector<1x128xf32> to vector<16x128xf32>
    %303 = arith.mulf %301, %302 : vector<16x128xf32>
    %304 = vector.broadcast %11 : vector<1x128xf32> to vector<16x128xf32>
    %305 = arith.addf %303, %304 : vector<16x128xf32>
    %cst_194 = arith.constant dense<0.000000e+00> : vector<16x64xf32>
    %306 = tpu.matmul %305, %53, %cst_194 {dimension_numbers = #tpu.dot_dimension_numbers<[1], [0], [0], [1], [0, 0, 1, 1], [], []>} : vector<16x128xf32>, vector<128x64xf32>, vector<16x64xf32> -> vector<16x64xf32>
    %307 = vector.broadcast %52 : vector<1x64xf32> to vector<16x64xf32>
    %308 = arith.addf %306, %307 : vector<16x64xf32>
    %cst_195 = arith.constant dense<0.000000e+00> : vector<16xf32>
    %309 = vector.multi_reduction <add>, %308, %cst_195 [1] : vector<16x64xf32> to vector<16xf32>
    %310 = vector.shape_cast %309 : vector<16xf32> to vector<16x1xf32>
    %cst_196 = arith.constant 6.400000e+01 : f32
    %311 = vector.broadcast %cst_196 : f32 to vector<16x1xf32>
    %312 = arith.divf %310, %311 : vector<16x1xf32>
    %313 = vector.broadcast %312 : vector<16x1xf32> to vector<16x64xf32>
    %314 = arith.subf %308, %313 : vector<16x64xf32>
    %315 = arith.mulf %314, %314 : vector<16x64xf32>
    %cst_197 = arith.constant dense<0.000000e+00> : vector<16xf32>
    %316 = vector.multi_reduction <add>, %315, %cst_197 [1] : vector<16x64xf32> to vector<16xf32>
    %317 = vector.shape_cast %316 : vector<16xf32> to vector<16x1xf32>
    %cst_198 = arith.constant 6.400000e+01 : f32
    %318 = vector.broadcast %cst_198 : f32 to vector<16x1xf32>
    %319 = arith.divf %317, %318 : vector<16x1xf32>
    %320 = vector.broadcast %312 : vector<16x1xf32> to vector<16x64xf32>
    %321 = arith.subf %308, %320 : vector<16x64xf32>
    %cst_199 = arith.constant 9.99999974E-6 : f32
    %322 = vector.broadcast %cst_199 : f32 to vector<16x1xf32>
    %323 = arith.addf %319, %322 : vector<16x1xf32>
    %324 = math.rsqrt %323 : vector<16x1xf32>
    %325 = vector.broadcast %324 : vector<16x1xf32> to vector<16x64xf32>
    %326 = arith.mulf %321, %325 : vector<16x64xf32>
    %327 = vector.broadcast %49 : vector<1x64xf32> to vector<16x64xf32>
    %328 = arith.mulf %326, %327 : vector<16x64xf32>
    %329 = vector.broadcast %48 : vector<1x64xf32> to vector<16x64xf32>
    %330 = arith.addf %328, %329 : vector<16x64xf32>
    %cst_200 = arith.constant 0.000000e+00 : f32
    %331 = vector.broadcast %cst_200 : f32 to vector<16x64xf32>
    %332 = arith.maximumf %330, %331 : vector<16x64xf32>
    %333 = arith.addf %61, %61 : vector<16x64xf32>
    %cst_201 = arith.constant dense<0.000000e+00> : vector<16xf32>
    %334 = vector.multi_reduction <add>, %333, %cst_201 [1] : vector<16x64xf32> to vector<16xf32>
    %335 = vector.shape_cast %334 : vector<16xf32> to vector<16x1xf32>
    %cst_202 = arith.constant 6.400000e+01 : f32
    %336 = vector.broadcast %cst_202 : f32 to vector<16x1xf32>
    %337 = arith.divf %335, %336 : vector<16x1xf32>
    %338 = vector.broadcast %337 : vector<16x1xf32> to vector<16x64xf32>
    %339 = arith.subf %333, %338 : vector<16x64xf32>
    %340 = arith.mulf %339, %339 : vector<16x64xf32>
    %cst_203 = arith.constant dense<0.000000e+00> : vector<16xf32>
    %341 = vector.multi_reduction <add>, %340, %cst_203 [1] : vector<16x64xf32> to vector<16xf32>
    %342 = vector.shape_cast %341 : vector<16xf32> to vector<16x1xf32>
    %cst_204 = arith.constant 6.400000e+01 : f32
    %343 = vector.broadcast %cst_204 : f32 to vector<16x1xf32>
    %344 = arith.divf %342, %343 : vector<16x1xf32>
    %345 = vector.broadcast %337 : vector<16x1xf32> to vector<16x64xf32>
    %346 = arith.subf %333, %345 : vector<16x64xf32>
    %cst_205 = arith.constant 9.99999974E-6 : f32
    %347 = vector.broadcast %cst_205 : f32 to vector<16x1xf32>
    %348 = arith.addf %344, %347 : vector<16x1xf32>
    %349 = math.rsqrt %348 : vector<16x1xf32>
    %350 = vector.broadcast %349 : vector<16x1xf32> to vector<16x64xf32>
    %351 = arith.mulf %346, %350 : vector<16x64xf32>
    %352 = vector.broadcast %24 : vector<1x64xf32> to vector<16x64xf32>
    %353 = arith.mulf %351, %352 : vector<16x64xf32>
    %354 = vector.broadcast %23 : vector<1x64xf32> to vector<16x64xf32>
    %355 = arith.addf %353, %354 : vector<16x64xf32>
    %cst_206 = arith.constant dense<0.000000e+00> : vector<16x64xf32>
    %356 = tpu.matmul %355, %31, %cst_206 {dimension_numbers = #tpu.dot_dimension_numbers<[1], [0], [0], [1], [0, 0, 1, 1], [], []>} : vector<16x64xf32>, vector<64x64xf32>, vector<16x64xf32> -> vector<16x64xf32>
    %357 = vector.broadcast %18 : vector<1x64xf32> to vector<16x64xf32>
    %358 = arith.addf %356, %357 : vector<16x64xf32>
    %cst_207 = arith.constant dense<0.000000e+00> : vector<16x128xf32>
    %359 = tpu.matmul %332, %29, %cst_207 {dimension_numbers = #tpu.dot_dimension_numbers<[1], [0], [0], [1], [0, 0, 1, 1], [], []>} : vector<16x64xf32>, vector<64x128xf32>, vector<16x128xf32> -> vector<16x128xf32>
    %360 = vector.broadcast %16 : vector<1x128xf32> to vector<16x128xf32>
    %361 = arith.addf %359, %360 : vector<16x128xf32>
    %362 = vector.extract_strided_slice %361 {offsets = [0, 0], sizes = [16, 64], strides = [1, 1]} : vector<16x128xf32> to vector<16x64xf32>
    %363 = vector.extract_strided_slice %361 {offsets = [0, 64], sizes = [16, 64], strides = [1, 1]} : vector<16x128xf32> to vector<16x64xf32>
    %364 = vector.extract_strided_slice %358 {offsets = [0, 0], sizes = [16, 16], strides = [1, 1]} : vector<16x64xf32> to vector<16x16xf32>
    %365 = vector.extract_strided_slice %362 {offsets = [0, 0], sizes = [16, 16], strides = [1, 1]} : vector<16x64xf32> to vector<16x16xf32>
    %366 = vector.extract_strided_slice %363 {offsets = [0, 0], sizes = [16, 16], strides = [1, 1]} : vector<16x64xf32> to vector<16x16xf32>
    %cst_208 = arith.constant dense<0.000000e+00> : vector<16x16xf32>
    %367 = tpu.matmul %364, %365, %cst_208 {dimension_numbers = #tpu.dot_dimension_numbers<[1], [1], [0], [0], [0, 0, 1, 0], [], []>} : vector<16x16xf32>, vector<16x16xf32>, vector<16x16xf32> -> vector<16x16xf32>
    %cst_209 = arith.constant 2.500000e-01 : f32
    %368 = vector.broadcast %cst_209 : f32 to vector<16x16xf32>
    %369 = arith.mulf %367, %368 : vector<16x16xf32>
    %cst_210 = arith.constant dense<0xFF800000> : vector<16xf32>
    %370 = vector.multi_reduction <maximumf>, %369, %cst_210 [1] : vector<16x16xf32> to vector<16xf32>
    %371 = vector.shape_cast %370 : vector<16xf32> to vector<16x1xf32>
    %372 = vector.broadcast %371 : vector<16x1xf32> to vector<16x16xf32>
    %373 = arith.subf %369, %372 : vector<16x16xf32>
    %374 = math.exp %373 : vector<16x16xf32>
    %cst_211 = arith.constant dense<0.000000e+00> : vector<16xf32>
    %375 = vector.multi_reduction <add>, %374, %cst_211 [1] : vector<16x16xf32> to vector<16xf32>
    %376 = vector.shape_cast %375 : vector<16xf32> to vector<16x1xf32>
    %377 = vector.broadcast %376 : vector<16x1xf32> to vector<16x16xf32>
    %378 = arith.divf %374, %377 : vector<16x16xf32>
    %cst_212 = arith.constant dense<0.000000e+00> : vector<16x16xf32>
    %379 = tpu.matmul %378, %366, %cst_212 {dimension_numbers = #tpu.dot_dimension_numbers<[1], [0], [0], [1], [0, 0, 1, 1], [], []>} : vector<16x16xf32>, vector<16x16xf32>, vector<16x16xf32> -> vector<16x16xf32>
    %380 = vector.extract_strided_slice %358 {offsets = [0, 16], sizes = [16, 16], strides = [1, 1]} : vector<16x64xf32> to vector<16x16xf32>
    %381 = vector.extract_strided_slice %362 {offsets = [0, 16], sizes = [16, 16], strides = [1, 1]} : vector<16x64xf32> to vector<16x16xf32>
    %382 = vector.extract_strided_slice %363 {offsets = [0, 16], sizes = [16, 16], strides = [1, 1]} : vector<16x64xf32> to vector<16x16xf32>
    %cst_213 = arith.constant dense<0.000000e+00> : vector<16x16xf32>
    %383 = tpu.matmul %380, %381, %cst_213 {dimension_numbers = #tpu.dot_dimension_numbers<[1], [1], [0], [0], [0, 0, 1, 0], [], []>} : vector<16x16xf32>, vector<16x16xf32>, vector<16x16xf32> -> vector<16x16xf32>
    %cst_214 = arith.constant 2.500000e-01 : f32
    %384 = vector.broadcast %cst_214 : f32 to vector<16x16xf32>
    %385 = arith.mulf %383, %384 : vector<16x16xf32>
    %cst_215 = arith.constant dense<0xFF800000> : vector<16xf32>
    %386 = vector.multi_reduction <maximumf>, %385, %cst_215 [1] : vector<16x16xf32> to vector<16xf32>
    %387 = vector.shape_cast %386 : vector<16xf32> to vector<16x1xf32>
    %388 = vector.broadcast %387 : vector<16x1xf32> to vector<16x16xf32>
    %389 = arith.subf %385, %388 : vector<16x16xf32>
    %390 = math.exp %389 : vector<16x16xf32>
    %cst_216 = arith.constant dense<0.000000e+00> : vector<16xf32>
    %391 = vector.multi_reduction <add>, %390, %cst_216 [1] : vector<16x16xf32> to vector<16xf32>
    %392 = vector.shape_cast %391 : vector<16xf32> to vector<16x1xf32>
    %393 = vector.broadcast %392 : vector<16x1xf32> to vector<16x16xf32>
    %394 = arith.divf %390, %393 : vector<16x16xf32>
    %cst_217 = arith.constant dense<0.000000e+00> : vector<16x16xf32>
    %395 = tpu.matmul %394, %382, %cst_217 {dimension_numbers = #tpu.dot_dimension_numbers<[1], [0], [0], [1], [0, 0, 1, 1], [], []>} : vector<16x16xf32>, vector<16x16xf32>, vector<16x16xf32> -> vector<16x16xf32>
    %396 = vector.extract_strided_slice %358 {offsets = [0, 32], sizes = [16, 16], strides = [1, 1]} : vector<16x64xf32> to vector<16x16xf32>
    %397 = vector.extract_strided_slice %362 {offsets = [0, 32], sizes = [16, 16], strides = [1, 1]} : vector<16x64xf32> to vector<16x16xf32>
    %398 = vector.extract_strided_slice %363 {offsets = [0, 32], sizes = [16, 16], strides = [1, 1]} : vector<16x64xf32> to vector<16x16xf32>
    %cst_218 = arith.constant dense<0.000000e+00> : vector<16x16xf32>
    %399 = tpu.matmul %396, %397, %cst_218 {dimension_numbers = #tpu.dot_dimension_numbers<[1], [1], [0], [0], [0, 0, 1, 0], [], []>} : vector<16x16xf32>, vector<16x16xf32>, vector<16x16xf32> -> vector<16x16xf32>
    %cst_219 = arith.constant 2.500000e-01 : f32
    %400 = vector.broadcast %cst_219 : f32 to vector<16x16xf32>
    %401 = arith.mulf %399, %400 : vector<16x16xf32>
    %cst_220 = arith.constant dense<0xFF800000> : vector<16xf32>
    %402 = vector.multi_reduction <maximumf>, %401, %cst_220 [1] : vector<16x16xf32> to vector<16xf32>
    %403 = vector.shape_cast %402 : vector<16xf32> to vector<16x1xf32>
    %404 = vector.broadcast %403 : vector<16x1xf32> to vector<16x16xf32>
    %405 = arith.subf %401, %404 : vector<16x16xf32>
    %406 = math.exp %405 : vector<16x16xf32>
    %cst_221 = arith.constant dense<0.000000e+00> : vector<16xf32>
    %407 = vector.multi_reduction <add>, %406, %cst_221 [1] : vector<16x16xf32> to vector<16xf32>
    %408 = vector.shape_cast %407 : vector<16xf32> to vector<16x1xf32>
    %409 = vector.broadcast %408 : vector<16x1xf32> to vector<16x16xf32>
    %410 = arith.divf %406, %409 : vector<16x16xf32>
    %cst_222 = arith.constant dense<0.000000e+00> : vector<16x16xf32>
    %411 = tpu.matmul %410, %398, %cst_222 {dimension_numbers = #tpu.dot_dimension_numbers<[1], [0], [0], [1], [0, 0, 1, 1], [], []>} : vector<16x16xf32>, vector<16x16xf32>, vector<16x16xf32> -> vector<16x16xf32>
    %412 = vector.extract_strided_slice %358 {offsets = [0, 48], sizes = [16, 16], strides = [1, 1]} : vector<16x64xf32> to vector<16x16xf32>
    %413 = vector.extract_strided_slice %362 {offsets = [0, 48], sizes = [16, 16], strides = [1, 1]} : vector<16x64xf32> to vector<16x16xf32>
    %414 = vector.extract_strided_slice %363 {offsets = [0, 48], sizes = [16, 16], strides = [1, 1]} : vector<16x64xf32> to vector<16x16xf32>
    %cst_223 = arith.constant dense<0.000000e+00> : vector<16x16xf32>
    %415 = tpu.matmul %412, %413, %cst_223 {dimension_numbers = #tpu.dot_dimension_numbers<[1], [1], [0], [0], [0, 0, 1, 0], [], []>} : vector<16x16xf32>, vector<16x16xf32>, vector<16x16xf32> -> vector<16x16xf32>
    %cst_224 = arith.constant 2.500000e-01 : f32
    %416 = vector.broadcast %cst_224 : f32 to vector<16x16xf32>
    %417 = arith.mulf %415, %416 : vector<16x16xf32>
    %cst_225 = arith.constant dense<0xFF800000> : vector<16xf32>
    %418 = vector.multi_reduction <maximumf>, %417, %cst_225 [1] : vector<16x16xf32> to vector<16xf32>
    %419 = vector.shape_cast %418 : vector<16xf32> to vector<16x1xf32>
    %420 = vector.broadcast %419 : vector<16x1xf32> to vector<16x16xf32>
    %421 = arith.subf %417, %420 : vector<16x16xf32>
    %422 = math.exp %421 : vector<16x16xf32>
    %cst_226 = arith.constant dense<0.000000e+00> : vector<16xf32>
    %423 = vector.multi_reduction <add>, %422, %cst_226 [1] : vector<16x16xf32> to vector<16xf32>
    %424 = vector.shape_cast %423 : vector<16xf32> to vector<16x1xf32>
    %425 = vector.broadcast %424 : vector<16x1xf32> to vector<16x16xf32>
    %426 = arith.divf %422, %425 : vector<16x16xf32>
    %cst_227 = arith.constant dense<0.000000e+00> : vector<16x16xf32>
    %427 = tpu.matmul %426, %414, %cst_227 {dimension_numbers = #tpu.dot_dimension_numbers<[1], [0], [0], [1], [0, 0, 1, 1], [], []>} : vector<16x16xf32>, vector<16x16xf32>, vector<16x16xf32> -> vector<16x16xf32>
    %428 = tpu.concatenate %379, %395, %411, %427 in 1 : vector<16x16xf32>, vector<16x16xf32>, vector<16x16xf32>, vector<16x16xf32> -> vector<16x64xf32>
    %cst_228 = arith.constant dense<0.000000e+00> : vector<16x64xf32>
    %429 = tpu.matmul %428, %30, %cst_228 {dimension_numbers = #tpu.dot_dimension_numbers<[1], [0], [0], [1], [0, 0, 1, 1], [], []>} : vector<16x64xf32>, vector<64x64xf32>, vector<16x64xf32> -> vector<16x64xf32>
    %430 = vector.broadcast %17 : vector<1x64xf32> to vector<16x64xf32>
    %431 = arith.addf %429, %430 : vector<16x64xf32>
    %432 = arith.addf %355, %431 : vector<16x64xf32>
    %cst_229 = arith.constant dense<0.000000e+00> : vector<16xf32>
    %433 = vector.multi_reduction <add>, %432, %cst_229 [1] : vector<16x64xf32> to vector<16xf32>
    %434 = vector.shape_cast %433 : vector<16xf32> to vector<16x1xf32>
    %cst_230 = arith.constant 6.400000e+01 : f32
    %435 = vector.broadcast %cst_230 : f32 to vector<16x1xf32>
    %436 = arith.divf %434, %435 : vector<16x1xf32>
    %437 = vector.broadcast %436 : vector<16x1xf32> to vector<16x64xf32>
    %438 = arith.subf %432, %437 : vector<16x64xf32>
    %439 = arith.mulf %438, %438 : vector<16x64xf32>
    %cst_231 = arith.constant dense<0.000000e+00> : vector<16xf32>
    %440 = vector.multi_reduction <add>, %439, %cst_231 [1] : vector<16x64xf32> to vector<16xf32>
    %441 = vector.shape_cast %440 : vector<16xf32> to vector<16x1xf32>
    %cst_232 = arith.constant 6.400000e+01 : f32
    %442 = vector.broadcast %cst_232 : f32 to vector<16x1xf32>
    %443 = arith.divf %441, %442 : vector<16x1xf32>
    %444 = vector.broadcast %436 : vector<16x1xf32> to vector<16x64xf32>
    %445 = arith.subf %432, %444 : vector<16x64xf32>
    %cst_233 = arith.constant 9.99999974E-6 : f32
    %446 = vector.broadcast %cst_233 : f32 to vector<16x1xf32>
    %447 = arith.addf %443, %446 : vector<16x1xf32>
    %448 = math.rsqrt %447 : vector<16x1xf32>
    %449 = vector.broadcast %448 : vector<16x1xf32> to vector<16x64xf32>
    %450 = arith.mulf %445, %449 : vector<16x64xf32>
    %451 = vector.broadcast %26 : vector<1x64xf32> to vector<16x64xf32>
    %452 = arith.mulf %450, %451 : vector<16x64xf32>
    %453 = vector.broadcast %25 : vector<1x64xf32> to vector<16x64xf32>
    %454 = arith.addf %452, %453 : vector<16x64xf32>
    %cst_234 = arith.constant dense<0.000000e+00> : vector<16x128xf32>
    %455 = tpu.matmul %454, %20, %cst_234 {dimension_numbers = #tpu.dot_dimension_numbers<[1], [0], [0], [1], [0, 0, 1, 1], [], []>} : vector<16x64xf32>, vector<64x128xf32>, vector<16x128xf32> -> vector<16x128xf32>
    %456 = vector.broadcast %19 : vector<1x128xf32> to vector<16x128xf32>
    %457 = arith.addf %455, %456 : vector<16x128xf32>
    %cst_235 = arith.constant 0.000000e+00 : f32
    %458 = vector.broadcast %cst_235 : f32 to vector<16x128xf32>
    %459 = arith.maximumf %457, %458 : vector<16x128xf32>
    %cst_236 = arith.constant dense<0.000000e+00> : vector<16x64xf32>
    %460 = tpu.matmul %459, %22, %cst_236 {dimension_numbers = #tpu.dot_dimension_numbers<[1], [0], [0], [1], [0, 0, 1, 1], [], []>} : vector<16x128xf32>, vector<128x64xf32>, vector<16x64xf32> -> vector<16x64xf32>
    %461 = vector.broadcast %21 : vector<1x64xf32> to vector<16x64xf32>
    %462 = arith.addf %460, %461 : vector<16x64xf32>
    %463 = arith.addf %454, %462 : vector<16x64xf32>
    %cst_237 = arith.constant dense<0.000000e+00> : vector<16xf32>
    %464 = vector.multi_reduction <add>, %463, %cst_237 [1] : vector<16x64xf32> to vector<16xf32>
    %465 = vector.shape_cast %464 : vector<16xf32> to vector<16x1xf32>
    %cst_238 = arith.constant 6.400000e+01 : f32
    %466 = vector.broadcast %cst_238 : f32 to vector<16x1xf32>
    %467 = arith.divf %465, %466 : vector<16x1xf32>
    %468 = vector.broadcast %467 : vector<16x1xf32> to vector<16x64xf32>
    %469 = arith.subf %463, %468 : vector<16x64xf32>
    %470 = arith.mulf %469, %469 : vector<16x64xf32>
    %cst_239 = arith.constant dense<0.000000e+00> : vector<16xf32>
    %471 = vector.multi_reduction <add>, %470, %cst_239 [1] : vector<16x64xf32> to vector<16xf32>
    %472 = vector.shape_cast %471 : vector<16xf32> to vector<16x1xf32>
    %cst_240 = arith.constant 6.400000e+01 : f32
    %473 = vector.broadcast %cst_240 : f32 to vector<16x1xf32>
    %474 = arith.divf %472, %473 : vector<16x1xf32>
    %475 = vector.broadcast %467 : vector<16x1xf32> to vector<16x64xf32>
    %476 = arith.subf %463, %475 : vector<16x64xf32>
    %cst_241 = arith.constant 9.99999974E-6 : f32
    %477 = vector.broadcast %cst_241 : f32 to vector<16x1xf32>
    %478 = arith.addf %474, %477 : vector<16x1xf32>
    %479 = math.rsqrt %478 : vector<16x1xf32>
    %480 = vector.broadcast %479 : vector<16x1xf32> to vector<16x64xf32>
    %481 = arith.mulf %476, %480 : vector<16x64xf32>
    %482 = vector.broadcast %28 : vector<1x64xf32> to vector<16x64xf32>
    %483 = arith.mulf %481, %482 : vector<16x64xf32>
    %484 = vector.broadcast %27 : vector<1x64xf32> to vector<16x64xf32>
    %485 = arith.addf %483, %484 : vector<16x64xf32>
    %486 = arith.addf %332, %485 : vector<16x64xf32>
    %cst_242 = arith.constant dense<0.000000e+00> : vector<16x32xf32>
    %487 = tpu.matmul %486, %55, %cst_242 {dimension_numbers = #tpu.dot_dimension_numbers<[1], [0], [0], [1], [0, 0, 1, 1], [], []>} : vector<16x64xf32>, vector<64x32xf32>, vector<16x32xf32> -> vector<16x32xf32>
    %488 = vector.broadcast %54 : vector<1x32xf32> to vector<16x32xf32>
    %489 = arith.addf %487, %488 : vector<16x32xf32>
    %cst_243 = arith.constant dense<0.000000e+00> : vector<16xf32>
    %490 = vector.multi_reduction <add>, %489, %cst_243 [1] : vector<16x32xf32> to vector<16xf32>
    %491 = vector.shape_cast %490 : vector<16xf32> to vector<16x1xf32>
    %cst_244 = arith.constant 3.200000e+01 : f32
    %492 = vector.broadcast %cst_244 : f32 to vector<16x1xf32>
    %493 = arith.divf %491, %492 : vector<16x1xf32>
    %494 = vector.broadcast %493 : vector<16x1xf32> to vector<16x32xf32>
    %495 = arith.subf %489, %494 : vector<16x32xf32>
    %496 = arith.mulf %495, %495 : vector<16x32xf32>
    %cst_245 = arith.constant dense<0.000000e+00> : vector<16xf32>
    %497 = vector.multi_reduction <add>, %496, %cst_245 [1] : vector<16x32xf32> to vector<16xf32>
    %498 = vector.shape_cast %497 : vector<16xf32> to vector<16x1xf32>
    %cst_246 = arith.constant 3.200000e+01 : f32
    %499 = vector.broadcast %cst_246 : f32 to vector<16x1xf32>
    %500 = arith.divf %498, %499 : vector<16x1xf32>
    %501 = vector.broadcast %493 : vector<16x1xf32> to vector<16x32xf32>
    %502 = arith.subf %489, %501 : vector<16x32xf32>
    %cst_247 = arith.constant 9.99999974E-6 : f32
    %503 = vector.broadcast %cst_247 : f32 to vector<16x1xf32>
    %504 = arith.addf %500, %503 : vector<16x1xf32>
    %505 = math.rsqrt %504 : vector<16x1xf32>
    %506 = vector.broadcast %505 : vector<16x1xf32> to vector<16x32xf32>
    %507 = arith.mulf %502, %506 : vector<16x32xf32>
    %508 = vector.broadcast %51 : vector<1x32xf32> to vector<16x32xf32>
    %509 = arith.mulf %507, %508 : vector<16x32xf32>
    %510 = vector.broadcast %50 : vector<1x32xf32> to vector<16x32xf32>
    %511 = arith.addf %509, %510 : vector<16x32xf32>
    %cst_248 = arith.constant 0.000000e+00 : f32
    %512 = vector.broadcast %cst_248 : f32 to vector<16x32xf32>
    %513 = arith.maximumf %511, %512 : vector<16x32xf32>
    %514 = arith.addf %62, %62 : vector<16x32xf32>
    %cst_249 = arith.constant dense<0.000000e+00> : vector<16xf32>
    %515 = vector.multi_reduction <add>, %514, %cst_249 [1] : vector<16x32xf32> to vector<16xf32>
    %516 = vector.shape_cast %515 : vector<16xf32> to vector<16x1xf32>
    %cst_250 = arith.constant 3.200000e+01 : f32
    %517 = vector.broadcast %cst_250 : f32 to vector<16x1xf32>
    %518 = arith.divf %516, %517 : vector<16x1xf32>
    %519 = vector.broadcast %518 : vector<16x1xf32> to vector<16x32xf32>
    %520 = arith.subf %514, %519 : vector<16x32xf32>
    %521 = arith.mulf %520, %520 : vector<16x32xf32>
    %cst_251 = arith.constant dense<0.000000e+00> : vector<16xf32>
    %522 = vector.multi_reduction <add>, %521, %cst_251 [1] : vector<16x32xf32> to vector<16xf32>
    %523 = vector.shape_cast %522 : vector<16xf32> to vector<16x1xf32>
    %cst_252 = arith.constant 3.200000e+01 : f32
    %524 = vector.broadcast %cst_252 : f32 to vector<16x1xf32>
    %525 = arith.divf %523, %524 : vector<16x1xf32>
    %526 = vector.broadcast %518 : vector<16x1xf32> to vector<16x32xf32>
    %527 = arith.subf %514, %526 : vector<16x32xf32>
    %cst_253 = arith.constant 9.99999974E-6 : f32
    %528 = vector.broadcast %cst_253 : f32 to vector<16x1xf32>
    %529 = arith.addf %525, %528 : vector<16x1xf32>
    %530 = math.rsqrt %529 : vector<16x1xf32>
    %531 = vector.broadcast %530 : vector<16x1xf32> to vector<16x32xf32>
    %532 = arith.mulf %527, %531 : vector<16x32xf32>
    %533 = vector.broadcast %40 : vector<1x32xf32> to vector<16x32xf32>
    %534 = arith.mulf %532, %533 : vector<16x32xf32>
    %535 = vector.broadcast %39 : vector<1x32xf32> to vector<16x32xf32>
    %536 = arith.addf %534, %535 : vector<16x32xf32>
    %cst_254 = arith.constant dense<0.000000e+00> : vector<16x32xf32>
    %537 = tpu.matmul %536, %47, %cst_254 {dimension_numbers = #tpu.dot_dimension_numbers<[1], [0], [0], [1], [0, 0, 1, 1], [], []>} : vector<16x32xf32>, vector<32x32xf32>, vector<16x32xf32> -> vector<16x32xf32>
    %538 = vector.broadcast %34 : vector<1x32xf32> to vector<16x32xf32>
    %539 = arith.addf %537, %538 : vector<16x32xf32>
    %cst_255 = arith.constant dense<0.000000e+00> : vector<16x64xf32>
    %540 = tpu.matmul %513, %45, %cst_255 {dimension_numbers = #tpu.dot_dimension_numbers<[1], [0], [0], [1], [0, 0, 1, 1], [], []>} : vector<16x32xf32>, vector<32x64xf32>, vector<16x64xf32> -> vector<16x64xf32>
    %541 = vector.broadcast %32 : vector<1x64xf32> to vector<16x64xf32>
    %542 = arith.addf %540, %541 : vector<16x64xf32>
    %543 = vector.extract_strided_slice %542 {offsets = [0, 0], sizes = [16, 32], strides = [1, 1]} : vector<16x64xf32> to vector<16x32xf32>
    %544 = vector.extract_strided_slice %542 {offsets = [0, 32], sizes = [16, 32], strides = [1, 1]} : vector<16x64xf32> to vector<16x32xf32>
    %545 = vector.extract_strided_slice %539 {offsets = [0, 0], sizes = [16, 16], strides = [1, 1]} : vector<16x32xf32> to vector<16x16xf32>
    %546 = vector.extract_strided_slice %543 {offsets = [0, 0], sizes = [16, 16], strides = [1, 1]} : vector<16x32xf32> to vector<16x16xf32>
    %547 = vector.extract_strided_slice %544 {offsets = [0, 0], sizes = [16, 16], strides = [1, 1]} : vector<16x32xf32> to vector<16x16xf32>
    %cst_256 = arith.constant dense<0.000000e+00> : vector<16x16xf32>
    %548 = tpu.matmul %545, %546, %cst_256 {dimension_numbers = #tpu.dot_dimension_numbers<[1], [1], [0], [0], [0, 0, 1, 0], [], []>} : vector<16x16xf32>, vector<16x16xf32>, vector<16x16xf32> -> vector<16x16xf32>
    %cst_257 = arith.constant 2.500000e-01 : f32
    %549 = vector.broadcast %cst_257 : f32 to vector<16x16xf32>
    %550 = arith.mulf %548, %549 : vector<16x16xf32>
    %cst_258 = arith.constant dense<0xFF800000> : vector<16xf32>
    %551 = vector.multi_reduction <maximumf>, %550, %cst_258 [1] : vector<16x16xf32> to vector<16xf32>
    %552 = vector.shape_cast %551 : vector<16xf32> to vector<16x1xf32>
    %553 = vector.broadcast %552 : vector<16x1xf32> to vector<16x16xf32>
    %554 = arith.subf %550, %553 : vector<16x16xf32>
    %555 = math.exp %554 : vector<16x16xf32>
    %cst_259 = arith.constant dense<0.000000e+00> : vector<16xf32>
    %556 = vector.multi_reduction <add>, %555, %cst_259 [1] : vector<16x16xf32> to vector<16xf32>
    %557 = vector.shape_cast %556 : vector<16xf32> to vector<16x1xf32>
    %558 = vector.broadcast %557 : vector<16x1xf32> to vector<16x16xf32>
    %559 = arith.divf %555, %558 : vector<16x16xf32>
    %cst_260 = arith.constant dense<0.000000e+00> : vector<16x16xf32>
    %560 = tpu.matmul %559, %547, %cst_260 {dimension_numbers = #tpu.dot_dimension_numbers<[1], [0], [0], [1], [0, 0, 1, 1], [], []>} : vector<16x16xf32>, vector<16x16xf32>, vector<16x16xf32> -> vector<16x16xf32>
    %561 = vector.extract_strided_slice %539 {offsets = [0, 16], sizes = [16, 16], strides = [1, 1]} : vector<16x32xf32> to vector<16x16xf32>
    %562 = vector.extract_strided_slice %543 {offsets = [0, 16], sizes = [16, 16], strides = [1, 1]} : vector<16x32xf32> to vector<16x16xf32>
    %563 = vector.extract_strided_slice %544 {offsets = [0, 16], sizes = [16, 16], strides = [1, 1]} : vector<16x32xf32> to vector<16x16xf32>
    %cst_261 = arith.constant dense<0.000000e+00> : vector<16x16xf32>
    %564 = tpu.matmul %561, %562, %cst_261 {dimension_numbers = #tpu.dot_dimension_numbers<[1], [1], [0], [0], [0, 0, 1, 0], [], []>} : vector<16x16xf32>, vector<16x16xf32>, vector<16x16xf32> -> vector<16x16xf32>
    %cst_262 = arith.constant 2.500000e-01 : f32
    %565 = vector.broadcast %cst_262 : f32 to vector<16x16xf32>
    %566 = arith.mulf %564, %565 : vector<16x16xf32>
    %cst_263 = arith.constant dense<0xFF800000> : vector<16xf32>
    %567 = vector.multi_reduction <maximumf>, %566, %cst_263 [1] : vector<16x16xf32> to vector<16xf32>
    %568 = vector.shape_cast %567 : vector<16xf32> to vector<16x1xf32>
    %569 = vector.broadcast %568 : vector<16x1xf32> to vector<16x16xf32>
    %570 = arith.subf %566, %569 : vector<16x16xf32>
    %571 = math.exp %570 : vector<16x16xf32>
    %cst_264 = arith.constant dense<0.000000e+00> : vector<16xf32>
    %572 = vector.multi_reduction <add>, %571, %cst_264 [1] : vector<16x16xf32> to vector<16xf32>
    %573 = vector.shape_cast %572 : vector<16xf32> to vector<16x1xf32>
    %574 = vector.broadcast %573 : vector<16x1xf32> to vector<16x16xf32>
    %575 = arith.divf %571, %574 : vector<16x16xf32>
    %cst_265 = arith.constant dense<0.000000e+00> : vector<16x16xf32>
    %576 = tpu.matmul %575, %563, %cst_265 {dimension_numbers = #tpu.dot_dimension_numbers<[1], [0], [0], [1], [0, 0, 1, 1], [], []>} : vector<16x16xf32>, vector<16x16xf32>, vector<16x16xf32> -> vector<16x16xf32>
    %577 = tpu.concatenate %560, %576 in 1 : vector<16x16xf32>, vector<16x16xf32> -> vector<16x32xf32>
    %cst_266 = arith.constant dense<0.000000e+00> : vector<16x32xf32>
    %578 = tpu.matmul %577, %46, %cst_266 {dimension_numbers = #tpu.dot_dimension_numbers<[1], [0], [0], [1], [0, 0, 1, 1], [], []>} : vector<16x32xf32>, vector<32x32xf32>, vector<16x32xf32> -> vector<16x32xf32>
    %579 = vector.broadcast %33 : vector<1x32xf32> to vector<16x32xf32>
    %580 = arith.addf %578, %579 : vector<16x32xf32>
    %581 = arith.addf %536, %580 : vector<16x32xf32>
    %cst_267 = arith.constant dense<0.000000e+00> : vector<16xf32>
    %582 = vector.multi_reduction <add>, %581, %cst_267 [1] : vector<16x32xf32> to vector<16xf32>
    %583 = vector.shape_cast %582 : vector<16xf32> to vector<16x1xf32>
    %cst_268 = arith.constant 3.200000e+01 : f32
    %584 = vector.broadcast %cst_268 : f32 to vector<16x1xf32>
    %585 = arith.divf %583, %584 : vector<16x1xf32>
    %586 = vector.broadcast %585 : vector<16x1xf32> to vector<16x32xf32>
    %587 = arith.subf %581, %586 : vector<16x32xf32>
    %588 = arith.mulf %587, %587 : vector<16x32xf32>
    %cst_269 = arith.constant dense<0.000000e+00> : vector<16xf32>
    %589 = vector.multi_reduction <add>, %588, %cst_269 [1] : vector<16x32xf32> to vector<16xf32>
    %590 = vector.shape_cast %589 : vector<16xf32> to vector<16x1xf32>
    %cst_270 = arith.constant 3.200000e+01 : f32
    %591 = vector.broadcast %cst_270 : f32 to vector<16x1xf32>
    %592 = arith.divf %590, %591 : vector<16x1xf32>
    %593 = vector.broadcast %585 : vector<16x1xf32> to vector<16x32xf32>
    %594 = arith.subf %581, %593 : vector<16x32xf32>
    %cst_271 = arith.constant 9.99999974E-6 : f32
    %595 = vector.broadcast %cst_271 : f32 to vector<16x1xf32>
    %596 = arith.addf %592, %595 : vector<16x1xf32>
    %597 = math.rsqrt %596 : vector<16x1xf32>
    %598 = vector.broadcast %597 : vector<16x1xf32> to vector<16x32xf32>
    %599 = arith.mulf %594, %598 : vector<16x32xf32>
    %600 = vector.broadcast %42 : vector<1x32xf32> to vector<16x32xf32>
    %601 = arith.mulf %599, %600 : vector<16x32xf32>
    %602 = vector.broadcast %41 : vector<1x32xf32> to vector<16x32xf32>
    %603 = arith.addf %601, %602 : vector<16x32xf32>
    %cst_272 = arith.constant dense<0.000000e+00> : vector<16x64xf32>
    %604 = tpu.matmul %603, %36, %cst_272 {dimension_numbers = #tpu.dot_dimension_numbers<[1], [0], [0], [1], [0, 0, 1, 1], [], []>} : vector<16x32xf32>, vector<32x64xf32>, vector<16x64xf32> -> vector<16x64xf32>
    %605 = vector.broadcast %35 : vector<1x64xf32> to vector<16x64xf32>
    %606 = arith.addf %604, %605 : vector<16x64xf32>
    %cst_273 = arith.constant 0.000000e+00 : f32
    %607 = vector.broadcast %cst_273 : f32 to vector<16x64xf32>
    %608 = arith.maximumf %606, %607 : vector<16x64xf32>
    %cst_274 = arith.constant dense<0.000000e+00> : vector<16x32xf32>
    %609 = tpu.matmul %608, %38, %cst_274 {dimension_numbers = #tpu.dot_dimension_numbers<[1], [0], [0], [1], [0, 0, 1, 1], [], []>} : vector<16x64xf32>, vector<64x32xf32>, vector<16x32xf32> -> vector<16x32xf32>
    %610 = vector.broadcast %37 : vector<1x32xf32> to vector<16x32xf32>
    %611 = arith.addf %609, %610 : vector<16x32xf32>
    %612 = arith.addf %603, %611 : vector<16x32xf32>
    %cst_275 = arith.constant dense<0.000000e+00> : vector<16xf32>
    %613 = vector.multi_reduction <add>, %612, %cst_275 [1] : vector<16x32xf32> to vector<16xf32>
    %614 = vector.shape_cast %613 : vector<16xf32> to vector<16x1xf32>
    %cst_276 = arith.constant 3.200000e+01 : f32
    %615 = vector.broadcast %cst_276 : f32 to vector<16x1xf32>
    %616 = arith.divf %614, %615 : vector<16x1xf32>
    %617 = vector.broadcast %616 : vector<16x1xf32> to vector<16x32xf32>
    %618 = arith.subf %612, %617 : vector<16x32xf32>
    %619 = arith.mulf %618, %618 : vector<16x32xf32>
    %cst_277 = arith.constant dense<0.000000e+00> : vector<16xf32>
    %620 = vector.multi_reduction <add>, %619, %cst_277 [1] : vector<16x32xf32> to vector<16xf32>
    %621 = vector.shape_cast %620 : vector<16xf32> to vector<16x1xf32>
    %cst_278 = arith.constant 3.200000e+01 : f32
    %622 = vector.broadcast %cst_278 : f32 to vector<16x1xf32>
    %623 = arith.divf %621, %622 : vector<16x1xf32>
    %624 = vector.broadcast %616 : vector<16x1xf32> to vector<16x32xf32>
    %625 = arith.subf %612, %624 : vector<16x32xf32>
    %cst_279 = arith.constant 9.99999974E-6 : f32
    %626 = vector.broadcast %cst_279 : f32 to vector<16x1xf32>
    %627 = arith.addf %623, %626 : vector<16x1xf32>
    %628 = math.rsqrt %627 : vector<16x1xf32>
    %629 = vector.broadcast %628 : vector<16x1xf32> to vector<16x32xf32>
    %630 = arith.mulf %625, %629 : vector<16x32xf32>
    %631 = vector.broadcast %44 : vector<1x32xf32> to vector<16x32xf32>
    %632 = arith.mulf %630, %631 : vector<16x32xf32>
    %633 = vector.broadcast %43 : vector<1x32xf32> to vector<16x32xf32>
    %634 = arith.addf %632, %633 : vector<16x32xf32>
    %635 = arith.addf %513, %634 : vector<16x32xf32>
    %636 = vector.broadcast %57 : vector<1x32xf32> to vector<16x32xf32>
    %637 = arith.mulf %635, %636 : vector<16x32xf32>
    %cst_280 = arith.constant dense<0.000000e+00> : vector<16xf32>
    %638 = vector.multi_reduction <add>, %637, %cst_280 [1] : vector<16x32xf32> to vector<16xf32>
    %639 = vector.shape_cast %638 : vector<16xf32> to vector<16x1xf32>
    %640 = vector.broadcast %56 : vector<1x1xf32> to vector<16x1xf32>
    %641 = arith.addf %639, %640 : vector<16x1xf32>
    %c0_281 = arith.constant 0 : index
    %c0_282 = arith.constant 0 : index
    %c0_283 = arith.constant 0 : index
    %642 = vector.load %arg65[%c0_281, %c0_282, %c0_283] : memref<1x16x1xf32, #tpu.memory_space<vmem>>, vector<1x16x1xf32>
    %643 = vector.shape_cast %642 : vector<1x16x1xf32> to vector<16x1xf32>
    %644 = vector.shape_cast %641 : vector<16x1xf32> to vector<1x16x1xf32>
    tpu.vector_store %arg65[%c0_281, %c0_282, %c0_283], %644 {strides = array<i32>} : memref<1x16x1xf32, #tpu.memory_space<vmem>>, vector<1x16x1xf32>,
    return
  }
  func.func @transform_0(%arg0: i32) -> (i32, i32, i32) {
    %c0_i32 = arith.constant 0 : i32
    %c0_i32_0 = arith.constant 0 : i32
    %c0_i32_1 = arith.constant 0 : i32
    return %arg0, %c0_i32, %c0_i32_0 : i32, i32, i32
  }
  func.func @transform_1(%arg0: i32) -> (i32, i32) {
    %c0_i32 = arith.constant 0 : i32
    %c0_i32_0 = arith.constant 0 : i32
    %c0_i32_1 = arith.constant 0 : i32
    return %c0_i32, %c0_i32_0 : i32, i32
  }
  func.func @transform_2(%arg0: i32) -> (i32, i32) {
    %c0_i32 = arith.constant 0 : i32
    %c0_i32_0 = arith.constant 0 : i32
    %c0_i32_1 = arith.constant 0 : i32
    return %c0_i32, %c0_i32_0 : i32, i32
  }
  func.func @transform_3(%arg0: i32) -> (i32, i32) {
    %c0_i32 = arith.constant 0 : i32
    %c0_i32_0 = arith.constant 0 : i32
    %c0_i32_1 = arith.constant 0 : i32
    return %c0_i32, %c0_i32_0 : i32, i32
  }
  func.func @transform_4(%arg0: i32) -> (i32, i32) {
    %c0_i32 = arith.constant 0 : i32
    %c0_i32_0 = arith.constant 0 : i32
    %c0_i32_1 = arith.constant 0 : i32
    return %c0_i32, %c0_i32_0 : i32, i32
  }
  func.func @transform_5(%arg0: i32) -> (i32, i32) {
    %c0_i32 = arith.constant 0 : i32
    %c0_i32_0 = arith.constant 0 : i32
    %c0_i32_1 = arith.constant 0 : i32
    return %c0_i32, %c0_i32_0 : i32, i32
  }
  func.func @transform_6(%arg0: i32) -> (i32, i32) {
    %c0_i32 = arith.constant 0 : i32
    %c0_i32_0 = arith.constant 0 : i32
    %c0_i32_1 = arith.constant 0 : i32
    return %c0_i32, %c0_i32_0 : i32, i32
  }
  func.func @transform_7(%arg0: i32) -> (i32, i32) {
    %c0_i32 = arith.constant 0 : i32
    %c0_i32_0 = arith.constant 0 : i32
    %c0_i32_1 = arith.constant 0 : i32
    return %c0_i32, %c0_i32_0 : i32, i32
  }
  func.func @transform_8(%arg0: i32) -> (i32, i32) {
    %c0_i32 = arith.constant 0 : i32
    %c0_i32_0 = arith.constant 0 : i32
    %c0_i32_1 = arith.constant 0 : i32
    return %c0_i32, %c0_i32_0 : i32, i32
  }
  func.func @transform_9(%arg0: i32) -> (i32, i32) {
    %c0_i32 = arith.constant 0 : i32
    %c0_i32_0 = arith.constant 0 : i32
    %c0_i32_1 = arith.constant 0 : i32
    return %c0_i32, %c0_i32_0 : i32, i32
  }
  func.func @transform_10(%arg0: i32) -> (i32, i32) {
    %c0_i32 = arith.constant 0 : i32
    %c0_i32_0 = arith.constant 0 : i32
    %c0_i32_1 = arith.constant 0 : i32
    return %c0_i32, %c0_i32_0 : i32, i32
  }
  func.func @transform_11(%arg0: i32) -> (i32, i32) {
    %c0_i32 = arith.constant 0 : i32
    %c0_i32_0 = arith.constant 0 : i32
    %c0_i32_1 = arith.constant 0 : i32
    return %c0_i32, %c0_i32_0 : i32, i32
  }
  func.func @transform_12(%arg0: i32) -> (i32, i32) {
    %c0_i32 = arith.constant 0 : i32
    %c0_i32_0 = arith.constant 0 : i32
    %c0_i32_1 = arith.constant 0 : i32
    return %c0_i32, %c0_i32_0 : i32, i32
  }
  func.func @transform_13(%arg0: i32) -> (i32, i32) {
    %c0_i32 = arith.constant 0 : i32
    %c0_i32_0 = arith.constant 0 : i32
    %c0_i32_1 = arith.constant 0 : i32
    return %c0_i32, %c0_i32_0 : i32, i32
  }
  func.func @transform_14(%arg0: i32) -> (i32, i32) {
    %c0_i32 = arith.constant 0 : i32
    %c0_i32_0 = arith.constant 0 : i32
    %c0_i32_1 = arith.constant 0 : i32
    return %c0_i32, %c0_i32_0 : i32, i32
  }
  func.func @transform_15(%arg0: i32) -> (i32, i32) {
    %c0_i32 = arith.constant 0 : i32
    %c0_i32_0 = arith.constant 0 : i32
    %c0_i32_1 = arith.constant 0 : i32
    return %c0_i32, %c0_i32_0 : i32, i32
  }
  func.func @transform_16(%arg0: i32) -> (i32, i32) {
    %c0_i32 = arith.constant 0 : i32
    %c0_i32_0 = arith.constant 0 : i32
    %c0_i32_1 = arith.constant 0 : i32
    return %c0_i32, %c0_i32_0 : i32, i32
  }
  func.func @transform_17(%arg0: i32) -> (i32, i32) {
    %c0_i32 = arith.constant 0 : i32
    %c0_i32_0 = arith.constant 0 : i32
    %c0_i32_1 = arith.constant 0 : i32
    return %c0_i32, %c0_i32_0 : i32, i32
  }
  func.func @transform_18(%arg0: i32) -> (i32, i32) {
    %c0_i32 = arith.constant 0 : i32
    %c0_i32_0 = arith.constant 0 : i32
    %c0_i32_1 = arith.constant 0 : i32
    return %c0_i32, %c0_i32_0 : i32, i32
  }
  func.func @transform_19(%arg0: i32) -> (i32, i32) {
    %c0_i32 = arith.constant 0 : i32
    %c0_i32_0 = arith.constant 0 : i32
    %c0_i32_1 = arith.constant 0 : i32
    return %c0_i32, %c0_i32_0 : i32, i32
  }
  func.func @transform_20(%arg0: i32) -> (i32, i32) {
    %c0_i32 = arith.constant 0 : i32
    %c0_i32_0 = arith.constant 0 : i32
    %c0_i32_1 = arith.constant 0 : i32
    return %c0_i32, %c0_i32_0 : i32, i32
  }
  func.func @transform_21(%arg0: i32) -> (i32, i32) {
    %c0_i32 = arith.constant 0 : i32
    %c0_i32_0 = arith.constant 0 : i32
    %c0_i32_1 = arith.constant 0 : i32
    return %c0_i32, %c0_i32_0 : i32, i32
  }
  func.func @transform_22(%arg0: i32) -> (i32, i32) {
    %c0_i32 = arith.constant 0 : i32
    %c0_i32_0 = arith.constant 0 : i32
    %c0_i32_1 = arith.constant 0 : i32
    return %c0_i32, %c0_i32_0 : i32, i32
  }
  func.func @transform_23(%arg0: i32) -> (i32, i32) {
    %c0_i32 = arith.constant 0 : i32
    %c0_i32_0 = arith.constant 0 : i32
    %c0_i32_1 = arith.constant 0 : i32
    return %c0_i32, %c0_i32_0 : i32, i32
  }
  func.func @transform_24(%arg0: i32) -> (i32, i32) {
    %c0_i32 = arith.constant 0 : i32
    %c0_i32_0 = arith.constant 0 : i32
    %c0_i32_1 = arith.constant 0 : i32
    return %c0_i32, %c0_i32_0 : i32, i32
  }
  func.func @transform_25(%arg0: i32) -> (i32, i32) {
    %c0_i32 = arith.constant 0 : i32
    %c0_i32_0 = arith.constant 0 : i32
    %c0_i32_1 = arith.constant 0 : i32
    return %c0_i32, %c0_i32_0 : i32, i32
  }
  func.func @transform_26(%arg0: i32) -> (i32, i32) {
    %c0_i32 = arith.constant 0 : i32
    %c0_i32_0 = arith.constant 0 : i32
    %c0_i32_1 = arith.constant 0 : i32
    return %c0_i32, %c0_i32_0 : i32, i32
  }
  func.func @transform_27(%arg0: i32) -> (i32, i32) {
    %c0_i32 = arith.constant 0 : i32
    %c0_i32_0 = arith.constant 0 : i32
    %c0_i32_1 = arith.constant 0 : i32
    return %c0_i32, %c0_i32_0 : i32, i32
  }
  func.func @transform_28(%arg0: i32) -> (i32, i32) {
    %c0_i32 = arith.constant 0 : i32
    %c0_i32_0 = arith.constant 0 : i32
    %c0_i32_1 = arith.constant 0 : i32
    return %c0_i32, %c0_i32_0 : i32, i32
  }
  func.func @transform_29(%arg0: i32) -> (i32, i32) {
    %c0_i32 = arith.constant 0 : i32
    %c0_i32_0 = arith.constant 0 : i32
    %c0_i32_1 = arith.constant 0 : i32
    return %c0_i32, %c0_i32_0 : i32, i32
  }
  func.func @transform_30(%arg0: i32) -> (i32, i32) {
    %c0_i32 = arith.constant 0 : i32
    %c0_i32_0 = arith.constant 0 : i32
    %c0_i32_1 = arith.constant 0 : i32
    return %c0_i32, %c0_i32_0 : i32, i32
  }
  func.func @transform_31(%arg0: i32) -> (i32, i32) {
    %c0_i32 = arith.constant 0 : i32
    %c0_i32_0 = arith.constant 0 : i32
    %c0_i32_1 = arith.constant 0 : i32
    return %c0_i32, %c0_i32_0 : i32, i32
  }
  func.func @transform_32(%arg0: i32) -> (i32, i32) {
    %c0_i32 = arith.constant 0 : i32
    %c0_i32_0 = arith.constant 0 : i32
    %c0_i32_1 = arith.constant 0 : i32
    return %c0_i32, %c0_i32_0 : i32, i32
  }
  func.func @transform_33(%arg0: i32) -> (i32, i32) {
    %c0_i32 = arith.constant 0 : i32
    %c0_i32_0 = arith.constant 0 : i32
    %c0_i32_1 = arith.constant 0 : i32
    return %c0_i32, %c0_i32_0 : i32, i32
  }
  func.func @transform_34(%arg0: i32) -> (i32, i32) {
    %c0_i32 = arith.constant 0 : i32
    %c0_i32_0 = arith.constant 0 : i32
    %c0_i32_1 = arith.constant 0 : i32
    return %c0_i32, %c0_i32_0 : i32, i32
  }
  func.func @transform_35(%arg0: i32) -> (i32, i32) {
    %c0_i32 = arith.constant 0 : i32
    %c0_i32_0 = arith.constant 0 : i32
    %c0_i32_1 = arith.constant 0 : i32
    return %c0_i32, %c0_i32_0 : i32, i32
  }
  func.func @transform_36(%arg0: i32) -> (i32, i32) {
    %c0_i32 = arith.constant 0 : i32
    %c0_i32_0 = arith.constant 0 : i32
    %c0_i32_1 = arith.constant 0 : i32
    return %c0_i32, %c0_i32_0 : i32, i32
  }
  func.func @transform_37(%arg0: i32) -> (i32, i32) {
    %c0_i32 = arith.constant 0 : i32
    %c0_i32_0 = arith.constant 0 : i32
    %c0_i32_1 = arith.constant 0 : i32
    return %c0_i32, %c0_i32_0 : i32, i32
  }
  func.func @transform_38(%arg0: i32) -> (i32, i32) {
    %c0_i32 = arith.constant 0 : i32
    %c0_i32_0 = arith.constant 0 : i32
    %c0_i32_1 = arith.constant 0 : i32
    return %c0_i32, %c0_i32_0 : i32, i32
  }
  func.func @transform_39(%arg0: i32) -> (i32, i32) {
    %c0_i32 = arith.constant 0 : i32
    %c0_i32_0 = arith.constant 0 : i32
    %c0_i32_1 = arith.constant 0 : i32
    return %c0_i32, %c0_i32_0 : i32, i32
  }
  func.func @transform_40(%arg0: i32) -> (i32, i32) {
    %c0_i32 = arith.constant 0 : i32
    %c0_i32_0 = arith.constant 0 : i32
    %c0_i32_1 = arith.constant 0 : i32
    return %c0_i32, %c0_i32_0 : i32, i32
  }
  func.func @transform_41(%arg0: i32) -> (i32, i32) {
    %c0_i32 = arith.constant 0 : i32
    %c0_i32_0 = arith.constant 0 : i32
    %c0_i32_1 = arith.constant 0 : i32
    return %c0_i32, %c0_i32_0 : i32, i32
  }
  func.func @transform_42(%arg0: i32) -> (i32, i32) {
    %c0_i32 = arith.constant 0 : i32
    %c0_i32_0 = arith.constant 0 : i32
    %c0_i32_1 = arith.constant 0 : i32
    return %c0_i32, %c0_i32_0 : i32, i32
  }
  func.func @transform_43(%arg0: i32) -> (i32, i32) {
    %c0_i32 = arith.constant 0 : i32
    %c0_i32_0 = arith.constant 0 : i32
    %c0_i32_1 = arith.constant 0 : i32
    return %c0_i32, %c0_i32_0 : i32, i32
  }
  func.func @transform_44(%arg0: i32) -> (i32, i32) {
    %c0_i32 = arith.constant 0 : i32
    %c0_i32_0 = arith.constant 0 : i32
    %c0_i32_1 = arith.constant 0 : i32
    return %c0_i32, %c0_i32_0 : i32, i32
  }
  func.func @transform_45(%arg0: i32) -> (i32, i32) {
    %c0_i32 = arith.constant 0 : i32
    %c0_i32_0 = arith.constant 0 : i32
    %c0_i32_1 = arith.constant 0 : i32
    return %c0_i32, %c0_i32_0 : i32, i32
  }
  func.func @transform_46(%arg0: i32) -> (i32, i32) {
    %c0_i32 = arith.constant 0 : i32
    %c0_i32_0 = arith.constant 0 : i32
    %c0_i32_1 = arith.constant 0 : i32
    return %c0_i32, %c0_i32_0 : i32, i32
  }
  func.func @transform_47(%arg0: i32) -> (i32, i32) {
    %c0_i32 = arith.constant 0 : i32
    %c0_i32_0 = arith.constant 0 : i32
    %c0_i32_1 = arith.constant 0 : i32
    return %c0_i32, %c0_i32_0 : i32, i32
  }
  func.func @transform_48(%arg0: i32) -> (i32, i32) {
    %c0_i32 = arith.constant 0 : i32
    %c0_i32_0 = arith.constant 0 : i32
    %c0_i32_1 = arith.constant 0 : i32
    return %c0_i32, %c0_i32_0 : i32, i32
  }
  func.func @transform_49(%arg0: i32) -> (i32, i32) {
    %c0_i32 = arith.constant 0 : i32
    %c0_i32_0 = arith.constant 0 : i32
    %c0_i32_1 = arith.constant 0 : i32
    return %c0_i32, %c0_i32_0 : i32, i32
  }
  func.func @transform_50(%arg0: i32) -> (i32, i32) {
    %c0_i32 = arith.constant 0 : i32
    %c0_i32_0 = arith.constant 0 : i32
    %c0_i32_1 = arith.constant 0 : i32
    return %c0_i32, %c0_i32_0 : i32, i32
  }
  func.func @transform_51(%arg0: i32) -> (i32, i32) {
    %c0_i32 = arith.constant 0 : i32
    %c0_i32_0 = arith.constant 0 : i32
    %c0_i32_1 = arith.constant 0 : i32
    return %c0_i32, %c0_i32_0 : i32, i32
  }
  func.func @transform_52(%arg0: i32) -> (i32, i32) {
    %c0_i32 = arith.constant 0 : i32
    %c0_i32_0 = arith.constant 0 : i32
    %c0_i32_1 = arith.constant 0 : i32
    return %c0_i32, %c0_i32_0 : i32, i32
  }
  func.func @transform_53(%arg0: i32) -> (i32, i32) {
    %c0_i32 = arith.constant 0 : i32
    %c0_i32_0 = arith.constant 0 : i32
    %c0_i32_1 = arith.constant 0 : i32
    return %c0_i32, %c0_i32_0 : i32, i32
  }
  func.func @transform_54(%arg0: i32) -> (i32, i32) {
    %c0_i32 = arith.constant 0 : i32
    %c0_i32_0 = arith.constant 0 : i32
    %c0_i32_1 = arith.constant 0 : i32
    return %c0_i32, %c0_i32_0 : i32, i32
  }
  func.func @transform_55(%arg0: i32) -> (i32, i32) {
    %c0_i32 = arith.constant 0 : i32
    %c0_i32_0 = arith.constant 0 : i32
    %c0_i32_1 = arith.constant 0 : i32
    return %c0_i32, %c0_i32_0 : i32, i32
  }
  func.func @transform_56(%arg0: i32) -> (i32, i32) {
    %c0_i32 = arith.constant 0 : i32
    %c0_i32_0 = arith.constant 0 : i32
    %c0_i32_1 = arith.constant 0 : i32
    return %c0_i32, %c0_i32_0 : i32, i32
  }
  func.func @transform_57(%arg0: i32) -> (i32, i32) {
    %c0_i32 = arith.constant 0 : i32
    %c0_i32_0 = arith.constant 0 : i32
    %c0_i32_1 = arith.constant 0 : i32
    return %c0_i32, %c0_i32_0 : i32, i32
  }
  func.func @transform_58(%arg0: i32) -> (i32, i32) {
    %c0_i32 = arith.constant 0 : i32
    %c0_i32_0 = arith.constant 0 : i32
    %c0_i32_1 = arith.constant 0 : i32
    return %c0_i32, %c0_i32_0 : i32, i32
  }
  func.func @transform_59(%arg0: i32) -> (i32, i32) {
    %c0_i32 = arith.constant 0 : i32
    %c0_i32_0 = arith.constant 0 : i32
    %c0_i32_1 = arith.constant 0 : i32
    return %c0_i32, %c0_i32_0 : i32, i32
  }
  func.func @transform_60(%arg0: i32) -> (i32, i32) {
    %c0_i32 = arith.constant 0 : i32
    %c0_i32_0 = arith.constant 0 : i32
    %c0_i32_1 = arith.constant 0 : i32
    return %c0_i32, %c0_i32_0 : i32, i32
  }
  func.func @transform_61(%arg0: i32) -> (i32, i32) {
    %c0_i32 = arith.constant 0 : i32
    %c0_i32_0 = arith.constant 0 : i32
    %c0_i32_1 = arith.constant 0 : i32
    return %c0_i32, %c0_i32_0 : i32, i32
  }
  func.func @transform_62(%arg0: i32) -> (i32, i32) {
    %c0_i32 = arith.constant 0 : i32
    %c0_i32_0 = arith.constant 0 : i32
    %c0_i32_1 = arith.constant 0 : i32
    return %c0_i32, %c0_i32_0 : i32, i32
  }
  func.func @transform_63(%arg0: i32) -> (i32, i32) {
    %c0_i32 = arith.constant 0 : i32
    %c0_i32_0 = arith.constant 0 : i32
    %c0_i32_1 = arith.constant 0 : i32
    return %c0_i32, %c0_i32_0 : i32, i32
  }
  func.func @transform_64(%arg0: i32) -> (i32, i32, i32) {
    %c0_i32 = arith.constant 0 : i32
    %c0_i32_0 = arith.constant 0 : i32
    %c0_i32_1 = arith.constant 0 : i32
    return %arg0, %c0_i32, %c0_i32_0 : i32, i32, i32
  }
}

</mosaic_0001>

<bundles_post_ra>
// kernel: decoder_forward_pallas.1
= control target key start
LH: loop header
LB: loop body
LE: loop exit
PB: predicated region body
PF: predicated region fallthrough
CT: control target
= control target key end

     0   :  { %s11318_s6 = smov 1   ;;  %s11319_s10 = smov 2   ;;  %s13024_s0 = inlined_call_operand.smem [shape: u32[65], index: -1, kind: input, shape index: {}] }
   0x1   :  { %s11453_s5 = sld [smem:[%s13024_s0]]   ;;  %s11320_s14 = smov 3  }
   0x2   :  { %s11458_s9 = sld [smem:[%s13024_s0 + %s11318_s6]]   ;;  %s11321_s18 = smov 4  }
   0x3   :  { %s11463_s13 = sld [smem:[%s13024_s0 + %s11319_s10]]   ;;  %s11322_s22 = smov 5  }
   0x4   :  { %s11468_s17 = sld [smem:[%s13024_s0 + %s11320_s14]]   ;;  %s11323_s26 = smov 6  }
   0x5   :  { %s11473_s21 = sld [smem:[%s13024_s0 + %s11321_s18]]   ;;  %s11324_s30 = smov 7  }
   0x6   :  { %s11478_s25 = sld [smem:[%s13024_s0 + %s11322_s22]]   ;;  %s11325_s4 = smov 8  }
   0x7   :  { %13042 = sst [smem:[#allocation106_spill]] %s11453_s5  ;;  %s11326_s10 = smov 9  }
   0x8   :  { %13043 = sst [smem:[#allocation107_spill]] %s11458_s9  ;;  %s11327_s15 = smov 10  }
   0x9   :  { %13044 = sst [smem:[#allocation108_spill]] %s11463_s13  ;;  %s11328_s20 = smov 11  }
   0xa   :  { %13045 = sst [smem:[#allocation109_spill]] %s11468_s17  ;;  %s11330_s1 = smov 13  }
   0xb   :  { %s11483_s29 = sld [smem:[%s13024_s0 + %s11323_s26]]   ;;  %s11329_s26 = smov 12  }
   0xc   :  { %13046 = sst [smem:[#allocation110_spill]] %s11478_s25  ;;  %s11331_s7 = smov 14  }
   0xd   :  { %s11488_s3 = sld [smem:[%s13024_s0 + %s11324_s30]]   ;;  %s11333_s22 = smov 16  }
   0xe   :  { %s11493_s8 = sld [smem:[%s13024_s0 + %s11325_s4]]   ;;  %s11334_s28 = smov 17  }
   0xf   :  { %s11498_s14 = sld [smem:[%s13024_s0 + %s11326_s10]]   ;;  %s11375_s10 = smov 58  }
  0x10   :  { %s11503_s19 = sld [smem:[%s13024_s0 + %s11327_s15]]   ;;  %s11332_s15 = smov 15  }
  0x11   :  { %13047 = sst [smem:[#allocation111_spill]] %s11483_s29  ;;  %s11376_s16 = smov 59  }
  0x12   :  { %s11508_s24 = sld [smem:[%s13024_s0 + %s11328_s20]]   ;;  %s11377_s23 = smov 60  }
  0x13   :  { %13048 = sst [smem:[#allocation112_spill]] %s11488_s3 }
  0x14   :  { %13049 = sst [smem:[#allocation113_spill]] %s11493_s8 }
  0x15   :  { %13050 = sst [smem:[#allocation114_spill]] %s11498_s14 }
  0x16   :  { %s11513_s30 = sld [smem:[%s13024_s0 + %s11329_s26]]  }
  0x17   :  { %s11518_s6 = sld [smem:[%s13024_s0 + %s11330_s1]]   ;;  %s11378_s1 = smov 61  }
  0x18   :  { %13051 = sst [smem:[#allocation115_spill]] %s11508_s24 }
  0x19   :  { %s11523_s12 = sld [smem:[%s13024_s0 + %s11331_s7]]   ;;  %s11335_s7 = smov 18  }
  0x1a   :  { %s11528_s20 = sld [smem:[%s13024_s0 + %s11332_s15]]   ;;  %s11336_s15 = smov 19  }
  0x1b   :  { %s11533_s27 = sld [smem:[%s13024_s0 + %s11333_s22]]   ;;  %s11337_s22 = smov 20  }
  0x1c   :  { %s11538_s4 = sld [smem:[%s13024_s0 + %s11334_s28]]   ;;  %s11338_s28 = smov 21  }
  0x1d   :  { %13052 = sst [smem:[#allocation116_spill]] %s11518_s6 }
  0x1e   :  { %s11543_s3 = sld [smem:[%s13024_s0 + %s11335_s7]]   ;;  %s11339_s7 = smov 22  }
  0x1f   :  { %s11548_s25 = sld [smem:[%s13024_s0 + %s11336_s15]]   ;;  %s11340_s15 = smov 23  }
  0x20   :  { %13053 = sst [smem:[#allocation117_spill]] %s11528_s20 }
  0x21   :  { %s11553_s13 = sld [smem:[%s13024_s0 + %s11337_s22]]   ;;  %s11341_s22 = smov 24  }
  0x22   :  { %13054 = sst [smem:[#allocation118_spill]] %s11538_s4 }
  0x23   :  { %s11558_s5 = sld [smem:[%s13024_s0 + %s11338_s28]]   ;;  %s11342_s28 = smov 25  }
  0x24   :  { %13055 = sst [smem:[#allocation119_spill]] %s11543_s3 }
  0x25   :  { %13056 = sst [smem:[#allocation120_spill]] %s11548_s25 }
  0x26   :  { %s11563_s4 = sld [smem:[%s13024_s0 + %s11339_s7]]   ;;  %s11343_s7 = smov 26  }
  0x27   :  { %s11568_s25 = sld [smem:[%s13024_s0 + %s11340_s15]]   ;;  %s11344_s15 = smov 27  }
  0x28   :  { %s11573_s20 = sld [smem:[%s13024_s0 + %s11341_s22]]   ;;  %s11345_s22 = smov 28  }
  0x29   :  { %13057 = sst [smem:[#allocation121_spill]] %s11558_s5 }
  0x2a   :  { %s11578_s5 = sld [smem:[%s13024_s0 + %s11342_s28]]   ;;  %s11346_s28 = smov 29  }
  0x2b   :  { %s11583_s6 = sld [smem:[%s13024_s0 + %s11343_s7]]   ;;  %s11347_s7 = smov 30  }
  0x2c   :  { %13058 = sst [smem:[#allocation122_spill]] %s11563_s4 }
  0x2d   :  { %13059 = sst [smem:[#allocation123_spill]] %s11568_s25 }
  0x2e   :  { %13060 = sst [smem:[#allocation124_spill]] %s11573_s20 }
  0x2f   :  { %s11588_s25 = sld [smem:[%s13024_s0 + %s11344_s15]]   ;;  %s11348_s15 = smov 31  }
  0x30   :  { %13061 = sst [smem:[#allocation125_spill]] %s11578_s5 }
  0x31   :  { %13062 = sst [smem:[#allocation126_spill]] %s11583_s6 }
  0x32   :  { %s11593_s20 = sld [smem:[%s13024_s0 + %s11345_s22]]   ;;  %s11349_s22 = smov 32  }
  0x33   :  { %s11598_s24 = sld [smem:[%s13024_s0 + %s11346_s28]]   ;;  %s11350_s28 = smov 33  }
  0x34   :  { %s11603_s6 = sld [smem:[%s13024_s0 + %s11347_s7]]   ;;  %s11351_s7 = smov 34  }
  0x35   :  { %s11608_s14 = sld [smem:[%s13024_s0 + %s11348_s15]]   ;;  %s11352_s15 = smov 35  }
  0x36   :  { %s11618_s29 = sld [smem:[%s13024_s0 + %s11350_s28]]   ;;  %s11354_s28 = smov 37  }
  0x37   :  { %s11628_s17 = sld [smem:[%s13024_s0 + %s11352_s15]]   ;;  %s11356_s15 = smov 39  }
  0x38   :  { %13063 = sst [smem:[#allocation127_spill]] %s11593_s20 }
  0x39   :  { %s11613_s20 = sld [smem:[%s13024_s0 + %s11349_s22]]   ;;  %s11353_s22 = smov 36  }
  0x3a   :  { %13064 = sst [smem:[#allocation128_spill]] %s11603_s6 }
  0x3b   :  { %13065 = sst [smem:[#allocation129_spill]] %s11608_s14 }
  0x3c   :  { %13067 = sst [smem:[#allocation131_spill]] %s11618_s29 }
  0x3d   :  { %s11623_s6 = sld [smem:[%s13024_s0 + %s11351_s7]]   ;;  %s11355_s7 = smov 38  }
  0x3e   :  { %13069 = sst [smem:[#allocation133_spill]] %s11628_s17 }
  0x3f   :  { %13066 = sst [smem:[#allocation130_spill]] %s11613_s20 }
  0x40   :  { %s11633_s20 = sld [smem:[%s13024_s0 + %s11353_s22]]   ;;  %s11357_s22 = smov 40  }
  0x41   :  { %s11638_s29 = sld [smem:[%s13024_s0 + %s11354_s28]]   ;;  %s11358_s28 = smov 41  }
  0x42   :  { %s11648_s17 = sld [smem:[%s13024_s0 + %s11356_s15]]   ;;  %s11360_s15 = smov 43  }
  0x43   :  { %13068 = sst [smem:[#allocation132_spill]] %s11623_s6 }
  0x44   :  { %s11643_s6 = sld [smem:[%s13024_s0 + %s11355_s7]]   ;;  %s11359_s7 = smov 42  }
  0x45   :  { %s11756_s14 = sld [smem:[%s13024_s0 + %s11378_s1]]  }
  0x46   :  { %13070 = sst [smem:[#allocation134_spill]] %s11633_s20 }
  0x47   :  { %13071 = sst [smem:[#allocation135_spill]] %s11638_s29 }
  0x48   :  { %13073 = sst [smem:[#allocation137_spill]] %s11648_s17 }
  0x49   :  { %s11653_s20 = sld [smem:[%s13024_s0 + %s11357_s22]]   ;;  %s11361_s22 = smov 44  }
  0x4a   :  { %13072 = sst [smem:[#allocation136_spill]] %s11643_s6 }
  0x4b   :  { %s11658_s29 = sld [smem:[%s13024_s0 + %s11358_s28]]   ;;  %s11362_s28 = smov 45  }
  0x4c   :  { %s11663_s6 = sld [smem:[%s13024_s0 + %s11359_s7]]   ;;  %s11363_s7 = smov 46  }
  0x4d   :  { %s11668_s17 = sld [smem:[%s13024_s0 + %s11360_s15]]   ;;  %s11364_s15 = smov 47  }
  0x4f   :  { %13074 = sst [smem:[#allocation138_spill]] %s11653_s20 }
  0x50   :  { %s11673_s20 = sld [smem:[%s13024_s0 + %s11361_s22]]   ;;  %s11365_s22 = smov 48  }
  0x51   :  { %13075 = sst [smem:[#allocation139_spill]] %s11658_s29 }
  0x52   :  { %13076 = sst [smem:[#allocation140_spill]] %s11663_s6 }
  0x53   :  { %13077 = sst [smem:[#allocation141_spill]] %s11668_s17 }
  0x54   :  { %s11678_s29 = sld [smem:[%s13024_s0 + %s11362_s28]]   ;;  %s11366_s28 = smov 49  }
  0x55   :  { %s11683_s6 = sld [smem:[%s13024_s0 + %s11363_s7]]   ;;  %s11367_s7 = smov 50  }
  0x56   :  { %13078 = sst [smem:[#allocation142_spill]] %s11673_s20 }
  0x57   :  { %s11688_s17 = sld [smem:[%s13024_s0 + %s11364_s15]]   ;;  %s11368_s15 = smov 51  }
  0x58   :  { %s11693_s20 = sld [smem:[%s13024_s0 + %s11365_s22]]   ;;  %s11369_s22 = smov 52  }
  0x5a   :  { %13079 = sst [smem:[#allocation143_spill]] %s11678_s29 }
  0x5b   :  { %13080 = sst [smem:[#allocation144_spill]] %s11683_s6 }
  0x5c   :  { %s11698_s29 = sld [smem:[%s13024_s0 + %s11366_s28]]   ;;  %s11370_s28 = smov 53  }
  0x5d   :  { %13081 = sst [smem:[#allocation145_spill]] %s11688_s17 }
  0x5e   :  { %13082 = sst [smem:[#allocation146_spill]] %s11693_s20 }
  0x5f   :  { %s11703_s6 = sld [smem:[%s13024_s0 + %s11367_s7]]   ;;  %s11371_s7 = smov 54  }
  0x60   :  { %s11708_s17 = sld [smem:[%s13024_s0 + %s11368_s15]]   ;;  %s11372_s15 = smov 55  }
  0x61   :  { %s11713_s20 = sld [smem:[%s13024_s0 + %s11369_s22]]   ;;  %s11373_s22 = smov 56  }
  0x62   :  { %13083 = sst [smem:[#allocation147_spill]] %s11698_s29 }
  0x63   :  { %s11718_s29 = sld [smem:[%s13024_s0 + %s11370_s28]]   ;;  %s11374_s28 = smov 57  }
  0x65   :  { %13084 = sst [smem:[#allocation148_spill]] %s11703_s6 }
  0x66   :  { %13085 = sst [smem:[#allocation149_spill]] %s11708_s17 }
  0x67   :  { %13086 = sst [smem:[#allocation150_spill]] %s11713_s20 }
  0x68   :  { %s11723_s6 = sld [smem:[%s13024_s0 + %s11371_s7]]  }
  0x69   :  { %13087 = sst [smem:[#allocation151_spill]] %s11718_s29 }
  0x6a   :  { %s11728_s17 = sld [smem:[%s13024_s0 + %s11372_s15]]  }
  0x6b   :  { %s11733_s20 = sld [smem:[%s13024_s0 + %s11373_s22]]  }
  0x6c   :  { %s8286_s29 = sld [smem:[%s13024_s0 + %s11374_s28]]  }
  0x6e   :  { %13088 = sst [smem:[#allocation152_spill]] %s11723_s6 }
  0x6f   :  { %s11741_s6 = sld [smem:[%s13024_s0 + %s11375_s10]]   ;;  %s11379_s10 = smov 62  }
  0x70   :  { %13089 = sst [smem:[#allocation153_spill]] %s11728_s17 }
  0x71   :  { %13090 = sst [smem:[#allocation154_spill]] %s11733_s20 }
  0x72   :  { %s11746_s17 = sld [smem:[%s13024_s0 + %s11376_s16]]   ;;  %s11380_s16 = smov 63   ;;  %v134_v0 = vstv %s8286_s29 }
  0x73   :  { %s11751_s20 = sld [smem:[%s13024_s0 + %s11377_s23]]   ;;  %s11381_s23 = smov 64   ;;  %135 = vst [vmem:[#allocation2] sm:$0x1] %v134_v0 }
  0x74   :  { %s11771_s28 = sld [smem:[%s13024_s0 + %s11381_s23]]  }
  0x75   :  { %13091 = sst [smem:[#allocation155_spill]] %s11741_s6 }
  0x76   :  { %s11761_s6 = sld [smem:[%s13024_s0 + %s11379_s10]]  }
  0x78   :  { %13092 = sst [smem:[#allocation156_spill]] %s11746_s17 }
  0x79   :  { %s11766_s17 = sld [smem:[%s13024_s0 + %s11380_s16]]  }
  0x7a   :  { %13093 = sst [smem:[#allocation157_spill]] %s11771_s28 }
  0x7b   :  { %136 = vsyncpa [#allocation4], 0 }
  0x7c   :  { %138 = vsyncpa [#allocation4 + $0x1], 0 }
  0x7d   :  { %139 = vsyncpa [#allocation6], 0 }
  0x7e   :  { %140 = vsyncpa [#allocation9], 0 }
  0x7f   :  { %141 = vsyncpa [#allocation12], 0 }
  0x80   :  { %142 = vsyncpa [#allocation15], 0 }
  0x81   :  { %143 = vsyncpa [#allocation18], 0 }
  0x82   :  { %144 = vsyncpa [#allocation21], 0 }
  0x83   :  { %145 = vsyncpa [#allocation24], 0 }
  0x84   :  { %146 = vsyncpa [#allocation27], 0 }
  0x85   :  { %147 = vsyncpa [#allocation30], 0 }
  0x86   :  { %148 = vsyncpa [#allocation33], 0 }
  0x87   :  { %149 = vsyncpa [#allocation36], 0 }
  0x88   :  { %150 = vsyncpa [#allocation39], 0 }
  0x89   :  { %151 = vsyncpa [#allocation42], 0 }
  0x8a   :  { %152 = vsyncpa [#allocation45], 0 }
  0x8b   :  { %153 = vsyncpa [#allocation48], 0 }
  0x8c   :  { %154 = vsyncpa [#allocation51], 0 }
  0x8d   :  { %155 = vsyncpa [#allocation54], 0 }
  0x8e   :  { %156 = vsyncpa [#allocation57], 0 }
  0x8f   :  { %157 = vsyncpa [#allocation60], 0 }
  0x90   :  { %158 = vsyncpa [#allocation63], 0 }
  0x91   :  { %159 = vsyncpa [#allocation66], 0 }
  0x92   :  { %160 = vsyncpa [#allocation69], 0 }
  0x93   :  { %161 = vsyncpa [#allocation72], 0 }
  0x94   :  { %162 = vsyncpa [#allocation75], 0 }
  0x95   :  { %163 = vsyncpa [#allocation78], 0  ;;  %s11773_s0 = smov 0   ;;  %s11775_s29 = smov 0  }
  0x96   :  { %s11777_s1 = smov 0   ;;  %s11779_s2 = smov 0  }
  0x97 LB: > { %s11792_s10 = sadd.s32 4294967295, %s11316_s2   ;;  %s11795_s7 = sadd.s32 1, %s11316_s2   ;;  %s11316_s2 = sphi %s11779_s2, %s13205_s2   ;;  %s11312_s1 = sphi %s11777_s1, %s13209_s1   ;;  %s11308_s29 = sphi %s11775_s29, %s13208_s29   ;;  %s11304_s0 = sphi %s11773_s0, %s13207_s0  }
  0x98   : > { %13094 = sst [smem:[#allocation158_spill]] %s11795_s7  ;;  %s173_s11 = ssub.s32 %s11316_s2, %s11795_s7 }
  0x99   : > { %s176_s16 = sadd.s32 1, %s11312_s1  ;;  %p174_p0 = scmp.eq.s32.totalorder %s173_s11, 0 }
  0x9a   : > { %p183_p1 = scmp.ne.s32.totalorder %s11312_s1, %s11308_s29  ;;  %p184_p2 = scmp.eq.s32.totalorder %s11316_s2, 0 }
  0x9b   : > { %p189_p3 = scmp.ne.s32.totalorder %s11308_s29, %s11304_s0  ;;  %p13040_p5 = scmp.eq.s32.totalorder %s11792_s10, 0 }
  0x9c   : > { %s11805_s15 = scalar_select %p174_p0, %s11312_s1, %s176_s16  }
  0x9d   : > { %p11807_p4 = por %p184_p2, %p183_p1  ;;  %p8296_p6 = scmp.ge.s32.totalorder %s11316_s2, 1 }
  0x9e   : > { %13095 = sst [smem:[#allocation159_spill]] %s11805_s15  ;;  %p1549_p7 = scmp.lt.s32.totalorder %s11316_s2, 3 }
  0x9f   : > { %p11816_p8 = por %p13040_p5, %p189_p3 }
  0xa0   : > { %p11820_p9 = pnand %p8296_p6, %p1549_p7 }
  0xa1   : > { %s13097_s23 = scalar_select %p11816_p8, 1, 0 }
  0xa2   : > { %s13098_s22 = scalar_select %p11820_p9, 1, 0 }
  0xa3   : > { %1553 = sbr.rel (%p11820_p9) target bundleno = 727 (0x2d7), region = 12  ;;  %s11382_s26 = smov (!%p11820_p9), [#allocation5]  }
  0xa4   : > { %s1562_s0 = sshll.u32 (!%p11820_p9), %s11382_s26, 4  ;;  %s11383_s11 = smov (!%p11820_p9), [#allocation8]   ;;  %s1563_s0 = int_to_ptr.vmem [resolvable:$true] %s1562_s0 }
  0xa5   : > { %s1587_s16 = sshll.u32 (!%p11820_p9), %s11383_s11, 4  ;;  %s9964_s15 = scalar_lea.vmem (!%p11820_p9), %s1563_s0, 32  ;;  %s1588_s16 = int_to_ptr.vmem [resolvable:$true] %s1587_s16 }
  0xa6   : > { %p9965_p10 = scmp.ne.s32.totalorder (!%p11820_p9), %s1563_s0, %s9964_s15  ;;  %p9971_p13 = scmp.lt.s32.totalorder (!%p11820_p9), %s1563_s0, %s1563_s0 }
  0xa7   : > { %p9972_p0 = scmp.lt.s32.totalorder (!%p11820_p9), %s9964_s15, %s9964_s15 }
  0xa8   : > { %p9966_p11 = pnand %p9965_p10, %p13040_p5 }
  0xa9   : > { %p9973_p1 = por %p9972_p0, %p9971_p13 }
  0xaa   : > { %p9967_p12 = pneg %p9966_p11 }
  0xac   : > { %p9974_p2 = pnand %p9973_p1, %p9967_p12 }
  0xae   : > { %9977 = shalt.err (!%p9974_p2)
}
  0xaf   : > { %s13099_s9 = sld [smem:[#allocation107_spill]]  ;;  %s9988_s26 = scalar_lea.vmem %s1588_s16, 32 }
  0xb0   : > { %p9989_p3 = scmp.ne.s32.totalorder %s1588_s16, %s9988_s26  ;;  %p9995_p8 = scmp.lt.s32.totalorder %s1588_s16, %s1588_s16 }
  0xb1   : > { %p9996_p9 = scmp.lt.s32.totalorder %s9988_s26, %s9988_s26 }
  0xb2   : > { %p9990_p6 = pnand %p9989_p3, %p13040_p5 }
  0xb3   : > { %p9997_p10 = por %p9996_p9, %p9995_p8 }
  0xb4   : > { %p9991_p7 = pneg %p9990_p6 }
  0xb5   : > { %9297 = dma.hbm_to_vmem [thread:$0]  (%p13040_p5), %s13099_s9, 32, %s1563_s0, [#allocation6]  }
  0xb6   : > { %p9998_p11 = pnand %p9997_p10, %p9991_p7 }
  0xb8   : > { %10001 = shalt.err (!%p9998_p11)
}
  0xb9   : > { %9301 = dma.hbm_to_vmem [thread:$0]  (%p13040_p5), %s11473_s21, 32, %s1588_s16, [#allocation9]  }
  0xba   : > { %s11384_s15 = smov [#allocation11]   ;;  %s11385_s0 = smov [#allocation14]  }
  0xbb   : > { %s1615_s11 = sshll.u32 %s11384_s15, 4  ;;  %s1637_s9 = sshll.u32 %s11385_s0, 4  ;;  %s1616_s11 = int_to_ptr.vmem [resolvable:$true] %s1615_s11  ;;  %s1638_s9 = int_to_ptr.vmem [resolvable:$true] %s1637_s9 }
  0xbc   : > { %s10012_s7 = scalar_lea.vmem %s1616_s11, 16  ;;  %s10018_s28 = scalar_lea.vmem %s1616_s11, 32 }
  0xbd   : > { %p10013_p12 = scmp.ne.s32.totalorder %s1616_s11, %s10012_s7  ;;  %p10019_p1 = scmp.lt.s32.totalorder %s1616_s11, %s1616_s11 }
  0xbe   : > { %p10020_p8 = scmp.lt.s32.totalorder %s10018_s28, %s10012_s7 }
  0xbf   : > { %p10014_p13 = pnand %p10013_p12, %p13040_p5 }
  0xc0   : > { %p10021_p9 = por %p10020_p8, %p10019_p1 }
  0xc1   : > { %p10015_p0 = pneg %p10014_p13 }
  0xc3   : > { %p10022_p2 = pnand %p10021_p9, %p10015_p0 }
  0xc5   : > { %10025 = shalt.err (!%p10022_p2)
}
  0xc6   : > { %s13100_s8 = sld [smem:[#allocation113_spill]]  ;;  %s10036_s16 = scalar_lea.vmem %s1638_s9, 16 }
  0xc7   : > { %p10037_p3 = scmp.ne.s32.totalorder %s1638_s9, %s10036_s16  ;;  %s10042_s26 = scalar_lea.vmem %s1638_s9, 32 }
  0xc8   : > { %p10043_p10 = scmp.lt.s32.totalorder %s1638_s9, %s1638_s9  ;;  %p10044_p11 = scmp.lt.s32.totalorder %s10042_s26, %s10036_s16 }
  0xc9   : > { %p10038_p6 = pnand %p10037_p3, %p13040_p5 }
  0xca   : > { %p10045_p12 = por %p10044_p11, %p10043_p10 }
  0xcb   : > { %p10039_p7 = pneg %p10038_p6 }
  0xcc   : > { %9305 = dma.hbm_to_vmem [thread:$0]  (%p13040_p5), %s13100_s8, 16, %s1616_s11, [#allocation12]  }
  0xcd   : > { %p10046_p13 = pnand %p10045_p12, %p10039_p7 }
  0xcf   : > { %10049 = shalt.err (!%p10046_p13)
}
  0xd0   : > { %9309 = dma.hbm_to_vmem [thread:$0]  (%p13040_p5), %s11503_s19, 16, %s1638_s9, [#allocation15]  }
  0xd1   : > { %s11386_s28 = smov [#allocation17]   ;;  %s11387_s15 = smov [#allocation20]  }
  0xd2   : > { %s1659_s7 = sshll.u32 %s11386_s28, 4  ;;  %s1680_s11 = sshll.u32 %s11387_s15, 4  ;;  %s1660_s7 = int_to_ptr.vmem [resolvable:$true] %s1659_s7  ;;  %s1681_s11 = int_to_ptr.vmem [resolvable:$true] %s1680_s11 }
  0xd3   : > { %s10060_s0 = scalar_lea.vmem %s1660_s7, 16  ;;  %s10066_s8 = scalar_lea.vmem %s1660_s7, 32 }
  0xd4   : > { %p10061_p0 = scmp.ne.s32.totalorder %s1660_s7, %s10060_s0  ;;  %p10067_p9 = scmp.lt.s32.totalorder %s1660_s7, %s1660_s7 }
  0xd5   : > { %p10068_p2 = scmp.lt.s32.totalorder %s10066_s8, %s10060_s0 }
  0xd6   : > { %p10062_p1 = pnand %p10061_p0, %p13040_p5 }
  0xd7   : > { %p10069_p3 = por %p10068_p2, %p10067_p9 }
  0xd8   : > { %p10063_p8 = pneg %p10062_p1 }
  0xda   : > { %p10070_p6 = pnand %p10069_p3, %p10063_p8 }
  0xdc   : > { %10073 = shalt.err (!%p10070_p6)
}
  0xdd   : > { %9313 = dma.hbm_to_vmem [thread:$0]  (%p13040_p5), %s11513_s30, 16, %s1660_s7, [#allocation18]  }
  0xde   : > { %s10084_s9 = scalar_lea.vmem %s1681_s11, 4096  ;;  %p10091_p12 = scmp.lt.s32.totalorder %s1681_s11, %s1681_s11 }
  0xdf   : > { %p10085_p7 = scmp.ne.s32.totalorder %s1681_s11, %s10084_s9  ;;  %p10092_p13 = scmp.lt.s32.totalorder %s10084_s9, %s10084_s9 }
  0xe1   : > { %p10086_p10 = pnand %p10085_p7, %p13040_p5  ;;  %p10093_p0 = por %p10092_p13, %p10091_p12 }
  0xe3   : > { %p10087_p11 = pneg %p10086_p10 }
  0xe5   : > { %p10094_p1 = pnand %p10093_p0, %p10087_p11 }
  0xe7   : > { %10097 = shalt.err (!%p10094_p1)
}
  0xe8   : > { %s11388_s8 = smov 256   ;;  %s11389_s16 = smov 16  }
  0xe9   : > { %9317 = dma.hbm_to_vmem [thread:$0]  (%p13040_p5), %s11523_s12, 4096, %s1681_s11, [#allocation21], %s11388_s8, %s11388_s8, %s11389_s16  }
  0xea   : > { %s11390_s26 = smov [#allocation23]   ;;  %s11391_s7 = smov [#allocation26]  }
  0xeb   : > { %s1706_s28 = sshll.u32 %s11390_s26, 4  ;;  %s1731_s15 = sshll.u32 %s11391_s7, 4  ;;  %s1707_s28 = int_to_ptr.vmem [resolvable:$true] %s1706_s28  ;;  %s1732_s15 = int_to_ptr.vmem [resolvable:$true] %s1731_s15 }
  0xec   : > { %s10108_s0 = scalar_lea.vmem %s1707_s28, 2048  ;;  %p10115_p3 = scmp.lt.s32.totalorder %s1707_s28, %s1707_s28 }
  0xed   : > { %p10109_p8 = scmp.ne.s32.totalorder %s1707_s28, %s10108_s0  ;;  %p10116_p6 = scmp.lt.s32.totalorder %s10108_s0, %s10108_s0 }
  0xef   : > { %p10110_p9 = pnand %p10109_p8, %p13040_p5  ;;  %p10117_p7 = por %p10116_p6, %p10115_p3 }
  0xf1   : > { %p10111_p2 = pneg %p10110_p9 }
  0xf3   : > { %p10118_p10 = pnand %p10117_p7, %p10111_p2 }
  0xf5   : > { %10121 = shalt.err (!%p10118_p10)
}
  0xf6   : > { %s13036_s9 = smov 128   ;;  %s13038_s11 = smov 8  }
  0xf7   : > { %9321 = dma.hbm_to_vmem [thread:$0]  (%p13040_p5), %s11533_s27, 2048, %s1707_s28, [#allocation24], %s13036_s9, %s13036_s9, %s13038_s11  }
  0xf8   : > { %s10132_s8 = scalar_lea.vmem %s1732_s15, 16  ;;  %s10138_s16 = scalar_lea.vmem %s1732_s15, 32 }
  0xf9   : > { %p10133_p11 = scmp.ne.s32.totalorder %s1732_s15, %s10132_s8  ;;  %p10139_p0 = scmp.lt.s32.totalorder %s1732_s15, %s1732_s15 }
  0xfa   : > { %p10140_p1 = scmp.lt.s32.totalorder %s10138_s16, %s10132_s8 }
  0xfb   : > { %p10134_p12 = pnand %p10133_p11, %p13040_p5 }
  0xfc   : > { %p10141_p8 = por %p10140_p1, %p10139_p0 }
  0xfd   : > { %p10135_p13 = pneg %p10134_p12 }
  0xff   : > { %p10142_p9 = pnand %p10141_p8, %p10135_p13 }
 0x101   : > { %10145 = shalt.err (!%p10142_p9)
}
 0x102   : > { %s13101_s3 = sld [smem:[#allocation119_spill]]  ;;  %s11394_s26 = smov [#allocation29]  }
 0x103   : > { %s1753_s7 = sshll.u32 %s11394_s26, 4  ;;  %s11395_s28 = smov [#allocation32]   ;;  %s1754_s7 = int_to_ptr.vmem [resolvable:$true] %s1753_s7 }
 0x104   : > { %s1777_s0 = sshll.u32 %s11395_s28, 4  ;;  %s10156_s9 = scalar_lea.vmem %s1754_s7, 16  ;;  %s1778_s0 = int_to_ptr.vmem [resolvable:$true] %s1777_s0 }
 0x105   : > { %p10157_p2 = scmp.ne.s32.totalorder %s1754_s7, %s10156_s9  ;;  %s10162_s11 = scalar_lea.vmem %s1754_s7, 32 }
 0x106   : > { %p10163_p7 = scmp.lt.s32.totalorder %s1754_s7, %s1754_s7  ;;  %p10164_p10 = scmp.lt.s32.totalorder %s10162_s11, %s10156_s9 }
 0x107   : > { %p10158_p3 = pnand %p10157_p2, %p13040_p5 }
 0x108   : > { %9325 = dma.hbm_to_vmem [thread:$0]  (%p13040_p5), %s13101_s3, 16, %s1732_s15, [#allocation27]  }
 0x109   : > { %p10159_p6 = pneg %p10158_p3  ;;  %p10165_p11 = por %p10164_p10, %p10163_p7 }
 0x10b   : > { %p10166_p12 = pnand %p10165_p11, %p10159_p6 }
 0x10d   : > { %10169 = shalt.err (!%p10166_p12)
}
 0x10e   : > { %9329 = dma.hbm_to_vmem [thread:$0]  (%p13040_p5), %s11553_s13, 16, %s1754_s7, [#allocation30]  }
 0x10f   : > { %s10180_s15 = scalar_lea.vmem %s1778_s0, 16  ;;  %s10186_s8 = scalar_lea.vmem %s1778_s0, 32 }
 0x110   : > { %p10181_p13 = scmp.ne.s32.totalorder %s1778_s0, %s10180_s15  ;;  %p10187_p8 = scmp.lt.s32.totalorder %s1778_s0, %s1778_s0 }
 0x111   : > { %p10188_p9 = scmp.lt.s32.totalorder %s10186_s8, %s10180_s15 }
 0x112   : > { %p10182_p0 = pnand %p10181_p13, %p13040_p5 }
 0x113   : > { %p10189_p2 = por %p10188_p9, %p10187_p8 }
 0x114   : > { %p10183_p1 = pneg %p10182_p0 }
 0x116   : > { %p10190_p3 = pnand %p10189_p2, %p10183_p1 }
 0x118   : > { %10193 = shalt.err (!%p10190_p3)
}
 0x119   : > { %s13102_s4 = sld [smem:[#allocation122_spill]]  ;;  %s11396_s9 = smov [#allocation35]  }
 0x11a   : > { %s1802_s11 = sshll.u32 %s11396_s9, 4  ;;  %s11397_s16 = smov [#allocation38]   ;;  %s1803_s11 = int_to_ptr.vmem [resolvable:$true] %s1802_s11 }
 0x11b   : > { %s1824_s26 = sshll.u32 %s11397_s16, 4  ;;  %s10204_s7 = scalar_lea.vmem %s1803_s11, 16  ;;  %s1825_s26 = int_to_ptr.vmem [resolvable:$true] %s1824_s26 }
 0x11c   : > { %p10205_p6 = scmp.ne.s32.totalorder %s1803_s11, %s10204_s7  ;;  %s10210_s28 = scalar_lea.vmem %s1803_s11, 32 }
 0x11d   : > { %p10211_p11 = scmp.lt.s32.totalorder %s1803_s11, %s1803_s11  ;;  %p10212_p12 = scmp.lt.s32.totalorder %s10210_s28, %s10204_s7 }
 0x11e   : > { %p10206_p7 = pnand %p10205_p6, %p13040_p5 }
 0x11f   : > { %9333 = dma.hbm_to_vmem [thread:$0]  (%p13040_p5), %s13102_s4, 16, %s1778_s0, [#allocation33]  }
 0x120   : > { %p10207_p10 = pneg %p10206_p7  ;;  %p10213_p13 = por %p10212_p12, %p10211_p11 }
 0x122   : > { %p10214_p0 = pnand %p10213_p13, %p10207_p10 }
 0x124   : > { %10217 = shalt.err (!%p10214_p0)
}
 0x125   : > { %s13103_s5 = sld [smem:[#allocation125_spill]]  ;;  %s10228_s0 = scalar_lea.vmem %s1825_s26, 16 }
 0x126   : > { %p10229_p1 = scmp.ne.s32.totalorder %s1825_s26, %s10228_s0  ;;  %s10234_s15 = scalar_lea.vmem %s1825_s26, 32 }
 0x127   : > { %p10235_p2 = scmp.lt.s32.totalorder %s1825_s26, %s1825_s26  ;;  %p10236_p3 = scmp.lt.s32.totalorder %s10234_s15, %s10228_s0 }
 0x128   : > { %p10230_p8 = pnand %p10229_p1, %p13040_p5 }
 0x129   : > { %p10237_p6 = por %p10236_p3, %p10235_p2 }
 0x12a   : > { %p10231_p9 = pneg %p10230_p8 }
 0x12b   : > { %9337 = dma.hbm_to_vmem [thread:$0]  (%p13040_p5), %s13103_s5, 16, %s1803_s11, [#allocation36]  }
 0x12c   : > { %p10238_p7 = pnand %p10237_p6, %p10231_p9 }
 0x12e   : > { %10241 = shalt.err (!%p10238_p7)
}
 0x12f   : > { %9341 = dma.hbm_to_vmem [thread:$0]  (%p13040_p5), %s11588_s25, 16, %s1825_s26, [#allocation39]  }
 0x130   : > { %s11398_s8 = smov [#allocation41]   ;;  %s11399_s11 = smov [#allocation44]  }
 0x131   : > { %s1846_s9 = sshll.u32 %s11398_s8, 4  ;;  %s1869_s16 = sshll.u32 %s11399_s11, 4  ;;  %s1847_s9 = int_to_ptr.vmem [resolvable:$true] %s1846_s9  ;;  %s1870_s16 = int_to_ptr.vmem [resolvable:$true] %s1869_s16 }
 0x132   : > { %s10252_s7 = scalar_lea.vmem %s1847_s9, 16  ;;  %s10258_s28 = scalar_lea.vmem %s1847_s9, 32 }
 0x133   : > { %p10253_p10 = scmp.ne.s32.totalorder %s1847_s9, %s10252_s7  ;;  %p10259_p13 = scmp.lt.s32.totalorder %s1847_s9, %s1847_s9 }
 0x134   : > { %p10260_p0 = scmp.lt.s32.totalorder %s10258_s28, %s10252_s7 }
 0x135   : > { %p10254_p11 = pnand %p10253_p10, %p13040_p5 }
 0x136   : > { %p10261_p1 = por %p10260_p0, %p10259_p13 }
 0x137   : > { %p10255_p12 = pneg %p10254_p11 }
 0x139   : > { %p10262_p8 = pnand %p10261_p1, %p10255_p12 }
 0x13b   : > { %10265 = shalt.err (!%p10262_p8)
}
 0x13c   : > { %9345 = dma.hbm_to_vmem [thread:$0]  (%p13040_p5), %s11598_s24, 16, %s1847_s9, [#allocation42]  }
 0x13d   : > { %s10276_s26 = scalar_lea.vmem %s1870_s16, 1024  ;;  %p10283_p6 = scmp.lt.s32.totalorder %s1870_s16, %s1870_s16 }
 0x13e   : > { %p10277_p9 = scmp.ne.s32.totalorder %s1870_s16, %s10276_s26  ;;  %p10284_p7 = scmp.lt.s32.totalorder %s10276_s26, %s10276_s26 }
 0x140   : > { %p10278_p2 = pnand %p10277_p9, %p13040_p5  ;;  %p10285_p10 = por %p10284_p7, %p10283_p6 }
 0x142   : > { %p10279_p3 = pneg %p10278_p2 }
 0x144   : > { %p10286_p11 = pnand %p10285_p10, %p10279_p3 }
 0x146   : > { %10289 = shalt.err (!%p10286_p11)
}
 0x147   : > { %s13104_s0 = smov 8   ;;  %s13105_s15 = smov 128  }
 0x148   : > { %s13106_s8 = sld [smem:[#allocation129_spill]]  ;;  %s11400_s9 = smov [#allocation47]  }
 0x149   : > { %s1896_s11 = sshll.u32 %s11400_s9, 4  ;;  %s11401_s7 = smov [#allocation50]   ;;  %s1897_s11 = int_to_ptr.vmem [resolvable:$true] %s1896_s11 }
 0x14a   : > { %s1918_s28 = sshll.u32 %s11401_s7, 4  ;;  %s10300_s3 = scalar_lea.vmem %s1897_s11, 16  ;;  %s1919_s28 = int_to_ptr.vmem [resolvable:$true] %s1918_s28 }
 0x14b   : > { %p10301_p12 = scmp.ne.s32.totalorder %s1897_s11, %s10300_s3  ;;  %s10306_s26 = scalar_lea.vmem %s1897_s11, 32 }
 0x14c   : > { %p10307_p1 = scmp.lt.s32.totalorder %s1897_s11, %s1897_s11  ;;  %p10308_p8 = scmp.lt.s32.totalorder %s10306_s26, %s10300_s3 }
 0x14d   : > { %p10302_p13 = pnand %p10301_p12, %p13040_p5 }
 0x14e   : > { %9349 = dma.hbm_to_vmem [thread:$0]  (%p13040_p5), %s13106_s8, 1024, %s1870_s16, [#allocation45], %s13105_s15, %s13105_s15, %s13104_s0  }
 0x14f   : > { %p10303_p0 = pneg %p10302_p13  ;;  %p10309_p9 = por %p10308_p8, %p10307_p1 }
 0x151   : > { %p10310_p2 = pnand %p10309_p9, %p10303_p0 }
 0x153   : > { %10313 = shalt.err (!%p10310_p2)
}
 0x154   : > { %s13107_s4 = sld [smem:[#allocation131_spill]]  ;;  %s10324_s16 = scalar_lea.vmem %s1919_s28, 16 }
 0x155   : > { %p10325_p3 = scmp.ne.s32.totalorder %s1919_s28, %s10324_s16  ;;  %s10330_s8 = scalar_lea.vmem %s1919_s28, 32 }
 0x156   : > { %p10331_p10 = scmp.lt.s32.totalorder %s1919_s28, %s1919_s28  ;;  %p10332_p11 = scmp.lt.s32.totalorder %s10330_s8, %s10324_s16 }
 0x157   : > { %p10326_p6 = pnand %p10325_p3, %p13040_p5 }
 0x158   : > { %p10333_p12 = por %p10332_p11, %p10331_p10 }
 0x159   : > { %p10327_p7 = pneg %p10326_p6 }
 0x15a   : > { %9353 = dma.hbm_to_vmem [thread:$0]  (%p13040_p5), %s13107_s4, 16, %s1897_s11, [#allocation48]  }
 0x15b   : > { %p10334_p13 = pnand %p10333_p12, %p10327_p7 }
 0x15d   : > { %10337 = shalt.err (!%p10334_p13)
}
 0x15e   : > { %s13108_s3 = sld [smem:[#allocation133_spill]]  ;;  %s11402_s9 = smov [#allocation53]  }
 0x15f   : > { %s1939_s7 = sshll.u32 %s11402_s9, 4  ;;  %s11403_s4 = smov [#allocation56]   ;;  %s1940_s7 = int_to_ptr.vmem [resolvable:$true] %s1939_s7 }
 0x160   : > { %s1970_s11 = sshll.u32 %s11403_s4, 4  ;;  %s10348_s26 = scalar_lea.vmem %s1940_s7, 512  ;;  %s1971_s11 = int_to_ptr.vmem [resolvable:$true] %s1970_s11 }
 0x161   : > { %p10349_p0 = scmp.ne.s32.totalorder %s1940_s7, %s10348_s26  ;;  %p10355_p9 = scmp.lt.s32.totalorder %s1940_s7, %s1940_s7 }
 0x162   : > { %p10356_p2 = scmp.lt.s32.totalorder %s10348_s26, %s10348_s26 }
 0x163   : > { %p10350_p1 = pnand %p10349_p0, %p13040_p5 }
 0x164   : > { %9357 = dma.hbm_to_vmem [thread:$0]  (%p13040_p5), %s13108_s3, 16, %s1919_s28, [#allocation51]  }
 0x165   : > { %p10351_p8 = pneg %p10350_p1  ;;  %p10357_p3 = por %p10356_p2, %p10355_p9 }
 0x167   : > { %p10358_p6 = pnand %p10357_p3, %p10351_p8 }
 0x169   : > { %10361 = shalt.err (!%p10358_p6)
}
 0x16a   : > { %s13109_s28 = sld [smem:[#allocation135_spill]]  ;;  %s10372_s16 = scalar_lea.vmem %s1971_s11, 16 }
 0x16b   : > { %p10373_p7 = scmp.ne.s32.totalorder %s1971_s11, %s10372_s16  ;;  %s10378_s8 = scalar_lea.vmem %s1971_s11, 32 }
 0x16c   : > { %p10379_p12 = scmp.lt.s32.totalorder %s1971_s11, %s1971_s11  ;;  %p10380_p13 = scmp.lt.s32.totalorder %s10378_s8, %s10372_s16 }
 0x16d   : > { %p10374_p10 = pnand %p10373_p7, %p13040_p5 }
 0x16e   : > { %p10381_p0 = por %p10380_p13, %p10379_p12 }
 0x16f   : > { %p10375_p11 = pneg %p10374_p10 }
 0x170   : > { %9361 = dma.hbm_to_vmem [thread:$0]  (%p13040_p5), %s13109_s28, 512, %s1940_s7, [#allocation54], %s13105_s15, %s13105_s15, %s13104_s0  }
 0x171   : > { %p10382_p1 = pnand %p10381_p0, %p10375_p11 }
 0x173   : > { %10385 = shalt.err (!%p10382_p1)
}
 0x174   : > { %s13110_s3 = sld [smem:[#allocation139_spill]]  ;;  %s11404_s9 = smov [#allocation59]  }
 0x175   : > { %s1992_s4 = sshll.u32 %s11404_s9, 4  ;;  %s11405_s7 = smov [#allocation62]   ;;  %s1993_s4 = int_to_ptr.vmem [resolvable:$true] %s1992_s4 }
 0x176   : > { %s2014_s26 = sshll.u32 %s11405_s7, 4  ;;  %s10396_s28 = scalar_lea.vmem %s1993_s4, 16  ;;  %s2015_s26 = int_to_ptr.vmem [resolvable:$true] %s2014_s26 }
 0x177   : > { %p10397_p8 = scmp.ne.s32.totalorder %s1993_s4, %s10396_s28  ;;  %s10402_s5 = scalar_lea.vmem %s1993_s4, 32 }
 0x178   : > { %p10403_p3 = scmp.lt.s32.totalorder %s1993_s4, %s1993_s4  ;;  %p10404_p6 = scmp.lt.s32.totalorder %s10402_s5, %s10396_s28 }
 0x179   : > { %p10398_p9 = pnand %p10397_p8, %p13040_p5 }
 0x17a   : > { %9365 = dma.hbm_to_vmem [thread:$0]  (%p13040_p5), %s13110_s3, 16, %s1971_s11, [#allocation57]  }
 0x17b   : > { %p10399_p2 = pneg %p10398_p9  ;;  %p10405_p7 = por %p10404_p6, %p10403_p3 }
 0x17d   : > { %p10406_p10 = pnand %p10405_p7, %p10399_p2 }
 0x17f   : > { %10409 = shalt.err (!%p10406_p10)
}
 0x180   : > { %s13111_s16 = sld [smem:[#allocation141_spill]]  ;;  %s10420_s11 = scalar_lea.vmem %s2015_s26, 16 }
 0x181   : > { %p10421_p11 = scmp.ne.s32.totalorder %s2015_s26, %s10420_s11  ;;  %s10426_s8 = scalar_lea.vmem %s2015_s26, 32 }
 0x182   : > { %p10427_p0 = scmp.lt.s32.totalorder %s2015_s26, %s2015_s26  ;;  %p10428_p1 = scmp.lt.s32.totalorder %s10426_s8, %s10420_s11 }
 0x183   : > { %p10422_p12 = pnand %p10421_p11, %p13040_p5 }
 0x184   : > { %p10429_p8 = por %p10428_p1, %p10427_p0 }
 0x185   : > { %p10423_p13 = pneg %p10422_p12 }
 0x186   : > { %9369 = dma.hbm_to_vmem [thread:$0]  (%p13040_p5), %s13111_s16, 16, %s1993_s4, [#allocation60]  }
 0x187   : > { %p10430_p9 = pnand %p10429_p8, %p10423_p13 }
 0x189   : > { %10433 = shalt.err (!%p10430_p9)
}
 0x18a   : > { %s13112_s5 = sld [smem:[#allocation143_spill]]  ;;  %s11406_s3 = smov [#allocation65]  }
 0x18b   : > { %s2037_s9 = sshll.u32 %s11406_s3, 4  ;;  %s11407_s4 = smov [#allocation68]   ;;  %s2038_s9 = int_to_ptr.vmem [resolvable:$true] %s2037_s9 }
 0x18c   : > { %s2064_s7 = sshll.u32 %s11407_s4, 4  ;;  %s10444_s28 = scalar_lea.vmem %s2038_s9, 512  ;;  %s2065_s7 = int_to_ptr.vmem [resolvable:$true] %s2064_s7 }
 0x18d   : > { %p10445_p2 = scmp.ne.s32.totalorder %s2038_s9, %s10444_s28  ;;  %p10451_p7 = scmp.lt.s32.totalorder %s2038_s9, %s2038_s9 }
 0x18e   : > { %p10452_p10 = scmp.lt.s32.totalorder %s10444_s28, %s10444_s28 }
 0x18f   : > { %p10446_p3 = pnand %p10445_p2, %p13040_p5 }
 0x190   : > { %9373 = dma.hbm_to_vmem [thread:$0]  (%p13040_p5), %s13112_s5, 16, %s2015_s26, [#allocation63]  }
 0x191   : > { %p10447_p6 = pneg %p10446_p3  ;;  %p10453_p11 = por %p10452_p10, %p10451_p7 }
 0x193   : > { %p10454_p12 = pnand %p10453_p11, %p10447_p6 }
 0x195   : > { %10457 = shalt.err (!%p10454_p12)
}
 0x196   : > { %s13113_s26 = sld [smem:[#allocation145_spill]]  ;;  %s10468_s16 = scalar_lea.vmem %s2065_s7, 16 }
 0x197   : > { %p10469_p13 = scmp.ne.s32.totalorder %s2065_s7, %s10468_s16  ;;  %s10474_s11 = scalar_lea.vmem %s2065_s7, 32 }
 0x198   : > { %p10475_p8 = scmp.lt.s32.totalorder %s2065_s7, %s2065_s7  ;;  %p10476_p9 = scmp.lt.s32.totalorder %s10474_s11, %s10468_s16 }
 0x199   : > { %p10470_p0 = pnand %p10469_p13, %p13040_p5 }
 0x19a   : > { %p10477_p2 = por %p10476_p9, %p10475_p8 }
 0x19b   : > { %p10471_p1 = pneg %p10470_p0 }
 0x19c   : > { %9377 = dma.hbm_to_vmem [thread:$0]  (%p13040_p5), %s13113_s26, 512, %s2038_s9, [#allocation66], %s13105_s15, %s13105_s15, %s13104_s0  }
 0x19d   : > { %p10478_p3 = pnand %p10477_p2, %p10471_p1 }
 0x19f   : > { %10481 = shalt.err (!%p10478_p3)
}
 0x1a0   : > { %s13114_s8 = sld [smem:[#allocation147_spill]]  ;;  %s11408_s5 = smov [#allocation71]  }
 0x1a1   : > { %s2086_s3 = sshll.u32 %s11408_s5, 4  ;;  %s11409_s9 = smov [#allocation74]   ;;  %s2087_s3 = int_to_ptr.vmem [resolvable:$true] %s2086_s3 }
 0x1a2   : > { %s2108_s4 = sshll.u32 %s11409_s9, 4  ;;  %s10492_s28 = scalar_lea.vmem %s2087_s3, 16  ;;  %s2109_s4 = int_to_ptr.vmem [resolvable:$true] %s2108_s4 }
 0x1a3   : > { %p10493_p6 = scmp.ne.s32.totalorder %s2087_s3, %s10492_s28  ;;  %s10498_s26 = scalar_lea.vmem %s2087_s3, 32 }
 0x1a4   : > { %p10499_p11 = scmp.lt.s32.totalorder %s2087_s3, %s2087_s3  ;;  %p10500_p12 = scmp.lt.s32.totalorder %s10498_s26, %s10492_s28 }
 0x1a5   : > { %p10494_p7 = pnand %p10493_p6, %p13040_p5 }
 0x1a6   : > { %9381 = dma.hbm_to_vmem [thread:$0]  (%p13040_p5), %s13114_s8, 16, %s2065_s7, [#allocation69]  }
 0x1a7   : > { %p10495_p10 = pneg %p10494_p7  ;;  %p10501_p13 = por %p10500_p12, %p10499_p11 }
 0x1a9   : > { %p10502_p0 = pnand %p10501_p13, %p10495_p10 }
 0x1ab   : > { %10505 = shalt.err (!%p10502_p0)
}
 0x1ac   : > { %s13115_s16 = sld [smem:[#allocation149_spill]]  ;;  %s10516_s7 = scalar_lea.vmem %s2109_s4, 16 }
 0x1ad   : > { %p10517_p1 = scmp.ne.s32.totalorder %s2109_s4, %s10516_s7  ;;  %s10522_s11 = scalar_lea.vmem %s2109_s4, 32 }
 0x1ae   : > { %p10523_p2 = scmp.lt.s32.totalorder %s2109_s4, %s2109_s4  ;;  %p10524_p3 = scmp.lt.s32.totalorder %s10522_s11, %s10516_s7 }
 0x1af   : > { %p10518_p8 = pnand %p10517_p1, %p13040_p5 }
 0x1b0   : > { %p10525_p6 = por %p10524_p3, %p10523_p2 }
 0x1b1   : > { %p10519_p9 = pneg %p10518_p8 }
 0x1b2   : > { %9385 = dma.hbm_to_vmem [thread:$0]  (%p13040_p5), %s13115_s16, 16, %s2087_s3, [#allocation72]  }
 0x1b3   : > { %p10526_p7 = pnand %p10525_p6, %p10519_p9 }
 0x1b5   : > { %10529 = shalt.err (!%p10526_p7)
}
 0x1b6   : > { %s13116_s8 = sld [smem:[#allocation151_spill]]  ;;  %s11410_s5 = smov [#allocation77]  }
 0x1b7   : > { %s2152_s9 = sshll.u32 %s11410_s5, 4  ;;  %s11411_s3 = smov [#allocation7]   ;;  %s2153_s9 = int_to_ptr.vmem [resolvable:$true] %s2152_s9 }
 0x1b8   : > { %s1576_s28 = sshll.u32 %s11411_s3, 4  ;;  %s10540_s26 = scalar_lea.vmem %s2153_s9, 256  ;;  %s1577_s28 = int_to_ptr.vmem [resolvable:$true] %s1576_s28 }
 0x1b9   : > { %p10541_p10 = scmp.ne.s32.totalorder %s2153_s9, %s10540_s26  ;;  %p10547_p13 = scmp.lt.s32.totalorder %s2153_s9, %s2153_s9 }
 0x1ba   : > { %p10548_p0 = scmp.lt.s32.totalorder %s10540_s26, %s10540_s26 }
 0x1bb   : > { %p10542_p11 = pnand %p10541_p10, %p13040_p5 }
 0x1bc   : > { %9389 = dma.hbm_to_vmem [thread:$0]  (%p13040_p5), %s13116_s8, 16, %s2109_s4, [#allocation75]  }
 0x1bd   : > { %p10543_p12 = pneg %p10542_p11  ;;  %p10549_p1 = por %p10548_p0, %p10547_p13 }
 0x1bf   : > { %p10550_p8 = pnand %p10549_p1, %p10543_p12 }
 0x1c1   : > { %10553 = shalt.err (!%p10550_p8)
}
 0x1c2   : > { %9393 = dma.hbm_to_vmem [thread:$0]  (%p13040_p5), %s11761_s6, 256, %s2153_s9, [#allocation78], %s13105_s15, %s13105_s15, %s13104_s0  }
 0x1c3   : > { %s10564_s4 = scalar_lea.vmem %s1577_s28, 16  ;;  %s10570_s16 = scalar_lea.vmem %s1577_s28, 32 }
 0x1c4   : > { %p10565_p9 = scmp.ne.s32.totalorder %s1577_s28, %s10564_s4  ;;  %p10571_p6 = scmp.lt.s32.totalorder %s1577_s28, %s1577_s28 }
 0x1c5   : > { %p10572_p7 = scmp.lt.s32.totalorder %s10570_s16, %s10564_s4 }
 0x1c6   : > { %p10566_p2 = pnand %p10565_p9, %p13040_p5 }
 0x1c7   : > { %p10573_p10 = por %p10572_p7, %p10571_p6 }
 0x1c8   : > { %p10567_p3 = pneg %p10566_p2 }
 0x1ca   : > { %p10574_p11 = pnand %p10573_p10, %p10567_p3 }
 0x1cc   : > { %10577 = shalt.err (!%p10574_p11)
}
 0x1cd   : > { %s13117_s7 = sld [smem:[#allocation109_spill]]  ;;  %s11412_s11 = smov [#allocation10]  }
 0x1ce   : > { %s1601_s8 = sshll.u32 %s11412_s11, 4  ;;  %s11413_s5 = smov [#allocation13]   ;;  %s1602_s8 = int_to_ptr.vmem [resolvable:$true] %s1601_s8 }
 0x1cf   : > { %s1626_s9 = sshll.u32 %s11413_s5, 4  ;;  %s10588_s3 = scalar_lea.vmem %s1602_s8, 16  ;;  %s1627_s9 = int_to_ptr.vmem [resolvable:$true] %s1626_s9 }
 0x1d0   : > { %p10589_p12 = scmp.ne.s32.totalorder %s1602_s8, %s10588_s3  ;;  %s10594_s26 = scalar_lea.vmem %s1602_s8, 32 }
 0x1d1   : > { %p10595_p1 = scmp.lt.s32.totalorder %s1602_s8, %s1602_s8  ;;  %p10596_p8 = scmp.lt.s32.totalorder %s10594_s26, %s10588_s3 }
 0x1d2   : > { %p10590_p13 = pnand %p10589_p12, %p13040_p5 }
 0x1d3   : > { %9299 = dma.hbm_to_vmem [thread:$0]  (%p13040_p5), %s13117_s7, 16, %s1577_s28, [#allocation6]  }
 0x1d4   : > { %p10591_p0 = pneg %p10590_p13  ;;  %p10597_p9 = por %p10596_p8, %p10595_p1 }
 0x1d6   : > { %p10598_p2 = pnand %p10597_p9, %p10591_p0 }
 0x1d8   : > { %10601 = shalt.err (!%p10598_p2)
}
 0x1d9   : > { %s13118_s4 = sld [smem:[#allocation111_spill]]  ;;  %s10612_s28 = scalar_lea.vmem %s1627_s9, 16 }
 0x1da   : > { %p10613_p3 = scmp.ne.s32.totalorder %s1627_s9, %s10612_s28  ;;  %s10618_s16 = scalar_lea.vmem %s1627_s9, 32 }
 0x1db   : > { %p10619_p10 = scmp.lt.s32.totalorder %s1627_s9, %s1627_s9  ;;  %p10620_p11 = scmp.lt.s32.totalorder %s10618_s16, %s10612_s28 }
 0x1dc   : > { %p10614_p6 = pnand %p10613_p3, %p13040_p5 }
 0x1dd   : > { %p10621_p12 = por %p10620_p11, %p10619_p10 }
 0x1de   : > { %p10615_p7 = pneg %p10614_p6 }
 0x1df   : > { %9303 = dma.hbm_to_vmem [thread:$0]  (%p13040_p5), %s13118_s4, 16, %s1602_s8, [#allocation9]  }
 0x1e0   : > { %p10622_p13 = pnand %p10621_p12, %p10615_p7 }
 0x1e2   : > { %10625 = shalt.err (!%p10622_p13)
}
 0x1e3   : > { %s13119_s7 = sld [smem:[#allocation114_spill]]  ;;  %s11414_s11 = smov [#allocation16]  }
 0x1e4   : > { %s1648_s5 = sshll.u32 %s11414_s11, 4  ;;  %s11415_s8 = smov [#allocation19]   ;;  %s1649_s5 = int_to_ptr.vmem [resolvable:$true] %s1648_s5 }
 0x1e5   : > { %s1670_s3 = sshll.u32 %s11415_s8, 4  ;;  %s10636_s26 = scalar_lea.vmem %s1649_s5, 16  ;;  %s1671_s3 = int_to_ptr.vmem [resolvable:$true] %s1670_s3 }
 0x1e6   : > { %p10637_p0 = scmp.ne.s32.totalorder %s1649_s5, %s10636_s26  ;;  %s10642_s4 = scalar_lea.vmem %s1649_s5, 32 }
 0x1e7   : > { %p10643_p9 = scmp.lt.s32.totalorder %s1649_s5, %s1649_s5  ;;  %p10644_p2 = scmp.lt.s32.totalorder %s10642_s4, %s10636_s26 }
 0x1e8   : > { %p10638_p1 = pnand %p10637_p0, %p13040_p5 }
 0x1e9   : > { %9307 = dma.hbm_to_vmem [thread:$0]  (%p13040_p5), %s13119_s7, 16, %s1627_s9, [#allocation12]  }
 0x1ea   : > { %p10639_p8 = pneg %p10638_p1  ;;  %p10645_p3 = por %p10644_p2, %p10643_p9 }
 0x1ec   : > { %p10646_p6 = pnand %p10645_p3, %p10639_p8 }
 0x1ee   : > { %10649 = shalt.err (!%p10646_p6)
}
 0x1ef   : > { %s13120_s28 = sld [smem:[#allocation115_spill]]  ;;  %s10660_s9 = scalar_lea.vmem %s1671_s3, 16 }
 0x1f0   : > { %p10661_p7 = scmp.ne.s32.totalorder %s1671_s3, %s10660_s9  ;;  %s10666_s16 = scalar_lea.vmem %s1671_s3, 32 }
 0x1f1   : > { %p10667_p12 = scmp.lt.s32.totalorder %s1671_s3, %s1671_s3  ;;  %p10668_p13 = scmp.lt.s32.totalorder %s10666_s16, %s10660_s9 }
 0x1f2   : > { %p10662_p10 = pnand %p10661_p7, %p13040_p5 }
 0x1f3   : > { %p10669_p0 = por %p10668_p13, %p10667_p12 }
 0x1f4   : > { %p10663_p11 = pneg %p10662_p10 }
 0x1f5   : > { %9311 = dma.hbm_to_vmem [thread:$0]  (%p13040_p5), %s13120_s28, 16, %s1649_s5, [#allocation15]  }
 0x1f6   : > { %p10670_p1 = pnand %p10669_p0, %p10663_p11 }
 0x1f8   : > { %10673 = shalt.err (!%p10670_p1)
}
 0x1f9   : > { %s13121_s7 = sld [smem:[#allocation116_spill]]  ;;  %s11416_s11 = smov [#allocation22]  }
 0x1fa   : > { %s1693_s8 = sshll.u32 %s11416_s11, 4  ;;  %s11417_s5 = smov [#allocation25]   ;;  %s1694_s8 = int_to_ptr.vmem [resolvable:$true] %s1693_s8 }
 0x1fb   : > { %s1720_s26 = sshll.u32 %s11417_s5, 4  ;;  %s10684_s4 = scalar_lea.vmem %s1694_s8, 2048  ;;  %s1721_s26 = int_to_ptr.vmem [resolvable:$true] %s1720_s26 }
 0x1fc   : > { %p10685_p8 = scmp.ne.s32.totalorder %s1694_s8, %s10684_s4  ;;  %p10691_p3 = scmp.lt.s32.totalorder %s1694_s8, %s1694_s8 }
 0x1fd   : > { %p10692_p6 = scmp.lt.s32.totalorder %s10684_s4, %s10684_s4 }
 0x1fe   : > { %p10686_p9 = pnand %p10685_p8, %p13040_p5 }
 0x1ff   : > { %9315 = dma.hbm_to_vmem [thread:$0]  (%p13040_p5), %s13121_s7, 16, %s1671_s3, [#allocation18]  }
 0x200   : > { %p10687_p2 = pneg %p10686_p9  ;;  %p10693_p7 = por %p10692_p6, %p10691_p3 }
 0x202   : > { %p10694_p10 = pnand %p10693_p7, %p10687_p2 }
 0x204   : > { %10697 = shalt.err (!%p10694_p10)
}
 0x205   : > { %s13122_s3 = sld [smem:[#allocation117_spill]]  ;;  %s10708_s28 = scalar_lea.vmem %s1721_s26, 16 }
 0x206   : > { %p10709_p11 = scmp.ne.s32.totalorder %s1721_s26, %s10708_s28  ;;  %s10714_s9 = scalar_lea.vmem %s1721_s26, 32 }
 0x207   : > { %p10715_p0 = scmp.lt.s32.totalorder %s1721_s26, %s1721_s26  ;;  %p10716_p1 = scmp.lt.s32.totalorder %s10714_s9, %s10708_s28 }
 0x208   : > { %p10710_p12 = pnand %p10709_p11, %p13040_p5 }
 0x209   : > { %p10717_p8 = por %p10716_p1, %p10715_p0 }
 0x20a   : > { %p10711_p13 = pneg %p10710_p12 }
 0x20b   : > { %9319 = dma.hbm_to_vmem [thread:$0]  (%p13040_p5), %s13122_s3, 2048, %s1694_s8, [#allocation21], %s13105_s15, %s13105_s15, %s13104_s0  }
 0x20c   : > { %p10718_p9 = pnand %p10717_p8, %p10711_p13 }
 0x20e   : > { %10721 = shalt.err (!%p10718_p9)
}
 0x20f   : > { %s13123_s16 = sld [smem:[#allocation118_spill]]  ;;  %s11418_s7 = smov [#allocation28]  }
 0x210   : > { %s1742_s11 = sshll.u32 %s11418_s7, 4  ;;  %s11419_s8 = smov [#allocation31]   ;;  %s1743_s11 = int_to_ptr.vmem [resolvable:$true] %s1742_s11 }
 0x211   : > { %s1763_s5 = sshll.u32 %s11419_s8, 4  ;;  %s10732_s4 = scalar_lea.vmem %s1743_s11, 16  ;;  %s1764_s5 = int_to_ptr.vmem [resolvable:$true] %s1763_s5 }
 0x212   : > { %p10733_p2 = scmp.ne.s32.totalorder %s1743_s11, %s10732_s4  ;;  %s10738_s3 = scalar_lea.vmem %s1743_s11, 32 }
 0x213   : > { %p10739_p7 = scmp.lt.s32.totalorder %s1743_s11, %s1743_s11  ;;  %p10740_p10 = scmp.lt.s32.totalorder %s10738_s3, %s10732_s4 }
 0x214   : > { %p10734_p3 = pnand %p10733_p2, %p13040_p5 }
 0x215   : > { %9323 = dma.hbm_to_vmem [thread:$0]  (%p13040_p5), %s13123_s16, 16, %s1721_s26, [#allocation24]  }
 0x216   : > { %p10735_p6 = pneg %p10734_p3  ;;  %p10741_p11 = por %p10740_p10, %p10739_p7 }
 0x218   : > { %p10742_p12 = pnand %p10741_p11, %p10735_p6 }
 0x21a   : > { %10745 = shalt.err (!%p10742_p12)
}
 0x21b   : > { %s13124_s28 = sld [smem:[#allocation120_spill]]  ;;  %s10756_s26 = scalar_lea.vmem %s1764_s5, 1024 }
 0x21c   : > { %p10757_p13 = scmp.ne.s32.totalorder %s1764_s5, %s10756_s26  ;;  %p10763_p8 = scmp.lt.s32.totalorder %s1764_s5, %s1764_s5 }
 0x21d   : > { %p10764_p9 = scmp.lt.s32.totalorder %s10756_s26, %s10756_s26 }
 0x21e   : > { %p10758_p0 = pnand %p10757_p13, %p13040_p5 }
 0x21f   : > { %p10765_p2 = por %p10764_p9, %p10763_p8 }
 0x220   : > { %p10759_p1 = pneg %p10758_p0 }
 0x221   : > { %9327 = dma.hbm_to_vmem [thread:$0]  (%p13040_p5), %s13124_s28, 16, %s1743_s11, [#allocation27]  }
 0x222   : > { %p10766_p3 = pnand %p10765_p2, %p10759_p1 }
 0x224   : > { %10769 = shalt.err (!%p10766_p3)
}
 0x225   : > { %s13125_s9 = sld [smem:[#allocation121_spill]]  ;;  %s11420_s16 = smov [#allocation34]  }
 0x226   : > { %s1791_s7 = sshll.u32 %s11420_s16, 4  ;;  %s11421_s11 = smov [#allocation37]   ;;  %s1792_s7 = int_to_ptr.vmem [resolvable:$true] %s1791_s7 }
 0x227   : > { %s1813_s8 = sshll.u32 %s11421_s11, 4  ;;  %s10780_s4 = scalar_lea.vmem %s1792_s7, 16  ;;  %s1814_s8 = int_to_ptr.vmem [resolvable:$true] %s1813_s8 }
 0x228   : > { %p10781_p6 = scmp.ne.s32.totalorder %s1792_s7, %s10780_s4  ;;  %s10786_s3 = scalar_lea.vmem %s1792_s7, 32 }
 0x229   : > { %p10787_p11 = scmp.lt.s32.totalorder %s1792_s7, %s1792_s7  ;;  %p10788_p12 = scmp.lt.s32.totalorder %s10786_s3, %s10780_s4 }
 0x22a   : > { %p10782_p7 = pnand %p10781_p6, %p13040_p5 }
 0x22b   : > { %9331 = dma.hbm_to_vmem [thread:$0]  (%p13040_p5), %s13125_s9, 1024, %s1764_s5, [#allocation30], %s13105_s15, %s13105_s15, %s13104_s0  }
 0x22c   : > { %p10783_p10 = pneg %p10782_p7  ;;  %p10789_p13 = por %p10788_p12, %p10787_p11 }
 0x22e   : > { %p10790_p0 = pnand %p10789_p13, %p10783_p10 }
 0x230   : > { %10793 = shalt.err (!%p10790_p0)
}
 0x231   : > { %s13126_s28 = sld [smem:[#allocation124_spill]]  ;;  %s10804_s5 = scalar_lea.vmem %s1814_s8, 16 }
 0x232   : > { %p10805_p1 = scmp.ne.s32.totalorder %s1814_s8, %s10804_s5  ;;  %s10810_s26 = scalar_lea.vmem %s1814_s8, 32 }
 0x233   : > { %p10811_p2 = scmp.lt.s32.totalorder %s1814_s8, %s1814_s8  ;;  %p10812_p3 = scmp.lt.s32.totalorder %s10810_s26, %s10804_s5 }
 0x234   : > { %p10806_p8 = pnand %p10805_p1, %p13040_p5 }
 0x235   : > { %p10813_p6 = por %p10812_p3, %p10811_p2 }
 0x236   : > { %p10807_p9 = pneg %p10806_p8 }
 0x237   : > { %9335 = dma.hbm_to_vmem [thread:$0]  (%p13040_p5), %s13126_s28, 16, %s1792_s7, [#allocation33]  }
 0x238   : > { %p10814_p7 = pnand %p10813_p6, %p10807_p9 }
 0x23a   : > { %10817 = shalt.err (!%p10814_p7)
}
 0x23b   : > { %s13127_s9 = sld [smem:[#allocation126_spill]]  ;;  %s11422_s16 = smov [#allocation40]  }
 0x23c   : > { %s1835_s11 = sshll.u32 %s11422_s16, 4  ;;  %s11423_s7 = smov [#allocation43]   ;;  %s1836_s11 = int_to_ptr.vmem [resolvable:$true] %s1835_s11 }
 0x23d   : > { %s1856_s4 = sshll.u32 %s11423_s7, 4  ;;  %s10828_s3 = scalar_lea.vmem %s1836_s11, 16  ;;  %s1857_s4 = int_to_ptr.vmem [resolvable:$true] %s1856_s4 }
 0x23e   : > { %p10829_p10 = scmp.ne.s32.totalorder %s1836_s11, %s10828_s3  ;;  %s10834_s28 = scalar_lea.vmem %s1836_s11, 32 }
 0x23f   : > { %p10835_p13 = scmp.lt.s32.totalorder %s1836_s11, %s1836_s11  ;;  %p10836_p0 = scmp.lt.s32.totalorder %s10834_s28, %s10828_s3 }
 0x240   : > { %p10830_p11 = pnand %p10829_p10, %p13040_p5 }
 0x241   : > { %9339 = dma.hbm_to_vmem [thread:$0]  (%p13040_p5), %s13127_s9, 16, %s1814_s8, [#allocation36]  }
 0x242   : > { %p10831_p12 = pneg %p10830_p11  ;;  %p10837_p1 = por %p10836_p0, %p10835_p13 }
 0x244   : > { %p10838_p8 = pnand %p10837_p1, %p10831_p12 }
 0x246   : > { %10841 = shalt.err (!%p10838_p8)
}
 0x247   : > { %s13128_s5 = sld [smem:[#allocation127_spill]]  ;;  %s10852_s8 = scalar_lea.vmem %s1857_s4, 1024 }
 0x248   : > { %p10853_p9 = scmp.ne.s32.totalorder %s1857_s4, %s10852_s8  ;;  %p10859_p6 = scmp.lt.s32.totalorder %s1857_s4, %s1857_s4 }
 0x249   : > { %p10860_p7 = scmp.lt.s32.totalorder %s10852_s8, %s10852_s8 }
 0x24a   : > { %p10854_p2 = pnand %p10853_p9, %p13040_p5 }
 0x24b   : > { %p10861_p10 = por %p10860_p7, %p10859_p6 }
 0x24c   : > { %p10855_p3 = pneg %p10854_p2 }
 0x24d   : > { %9343 = dma.hbm_to_vmem [thread:$0]  (%p13040_p5), %s13128_s5, 16, %s1836_s11, [#allocation39]  }
 0x24e   : > { %p10862_p11 = pnand %p10861_p10, %p10855_p3 }
 0x250   : > { %10865 = shalt.err (!%p10862_p11)
}
 0x251   : > { %s13129_s26 = sld [smem:[#allocation128_spill]]  ;;  %s11424_s9 = smov [#allocation46]  }
 0x252   : > { %s1882_s16 = sshll.u32 %s11424_s9, 4  ;;  %s11425_s11 = smov [#allocation49]   ;;  %s1883_s16 = int_to_ptr.vmem [resolvable:$true] %s1882_s16 }
 0x253   : > { %s1907_s7 = sshll.u32 %s11425_s11, 4  ;;  %s10876_s3 = scalar_lea.vmem %s1883_s16, 1024  ;;  %s1908_s7 = int_to_ptr.vmem [resolvable:$true] %s1907_s7 }
 0x254   : > { %p10877_p12 = scmp.ne.s32.totalorder %s1883_s16, %s10876_s3  ;;  %p10883_p1 = scmp.lt.s32.totalorder %s1883_s16, %s1883_s16 }
 0x255   : > { %p10884_p8 = scmp.lt.s32.totalorder %s10876_s3, %s10876_s3 }
 0x256   : > { %p10878_p13 = pnand %p10877_p12, %p13040_p5 }
 0x257   : > { %9347 = dma.hbm_to_vmem [thread:$0]  (%p13040_p5), %s13129_s26, 1024, %s1857_s4, [#allocation42], %s13105_s15, %s13105_s15, %s13104_s0  }
 0x258   : > { %p10879_p0 = pneg %p10878_p13  ;;  %p10885_p9 = por %p10884_p8, %p10883_p1 }
 0x25a   : > { %p10886_p2 = pnand %p10885_p9, %p10879_p0 }
 0x25c   : > { %10889 = shalt.err (!%p10886_p2)
}
 0x25d   : > { %s13130_s4 = sld [smem:[#allocation130_spill]]  ;;  %s10900_s28 = scalar_lea.vmem %s1908_s7, 16 }
 0x25e   : > { %p10901_p3 = scmp.ne.s32.totalorder %s1908_s7, %s10900_s28  ;;  %s10906_s5 = scalar_lea.vmem %s1908_s7, 32 }
 0x25f   : > { %p10907_p10 = scmp.lt.s32.totalorder %s1908_s7, %s1908_s7  ;;  %p10908_p11 = scmp.lt.s32.totalorder %s10906_s5, %s10900_s28 }
 0x260   : > { %p10902_p6 = pnand %p10901_p3, %p13040_p5 }
 0x261   : > { %p10909_p12 = por %p10908_p11, %p10907_p10 }
 0x262   : > { %p10903_p7 = pneg %p10902_p6 }
 0x263   : > { %9351 = dma.hbm_to_vmem [thread:$0]  (%p13040_p5), %s13130_s4, 1024, %s1883_s16, [#allocation45], %s13105_s15, %s13105_s15, %s13104_s0  }
 0x264   : > { %p10910_p13 = pnand %p10909_p12, %p10903_p7 }
 0x266   : > { %10913 = shalt.err (!%p10910_p13)
}
 0x267   : > { %s13131_s8 = sld [smem:[#allocation132_spill]]  ;;  %s11426_s26 = smov [#allocation52]  }
 0x268   : > { %s1929_s9 = sshll.u32 %s11426_s26, 4  ;;  %s11427_s16 = smov [#allocation55]   ;;  %s1930_s9 = int_to_ptr.vmem [resolvable:$true] %s1929_s9 }
 0x269   : > { %s1953_s11 = sshll.u32 %s11427_s16, 4  ;;  %s10924_s3 = scalar_lea.vmem %s1930_s9, 16  ;;  %s1954_s11 = int_to_ptr.vmem [resolvable:$true] %s1953_s11 }
 0x26a   : > { %p10925_p0 = scmp.ne.s32.totalorder %s1930_s9, %s10924_s3  ;;  %s10930_s4 = scalar_lea.vmem %s1930_s9, 32 }
 0x26b   : > { %p10931_p9 = scmp.lt.s32.totalorder %s1930_s9, %s1930_s9  ;;  %p10932_p2 = scmp.lt.s32.totalorder %s10930_s4, %s10924_s3 }
 0x26c   : > { %p10926_p1 = pnand %p10925_p0, %p13040_p5 }
 0x26d   : > { %9355 = dma.hbm_to_vmem [thread:$0]  (%p13040_p5), %s13131_s8, 16, %s1908_s7, [#allocation48]  }
 0x26e   : > { %p10927_p8 = pneg %p10926_p1  ;;  %p10933_p3 = por %p10932_p2, %p10931_p9 }
 0x270   : > { %p10934_p6 = pnand %p10933_p3, %p10927_p8 }
 0x272   : > { %10937 = shalt.err (!%p10934_p6)
}
 0x273   : > { %s13132_s28 = sld [smem:[#allocation134_spill]]  ;;  %s10948_s7 = scalar_lea.vmem %s1954_s11, 16 }
 0x274   : > { %p10949_p7 = scmp.ne.s32.totalorder %s1954_s11, %s10948_s7  ;;  %s10954_s5 = scalar_lea.vmem %s1954_s11, 32 }
 0x275   : > { %p10955_p12 = scmp.lt.s32.totalorder %s1954_s11, %s1954_s11  ;;  %p10956_p13 = scmp.lt.s32.totalorder %s10954_s5, %s10948_s7 }
 0x276   : > { %p10950_p10 = pnand %p10949_p7, %p13040_p5 }
 0x277   : > { %p10957_p0 = por %p10956_p13, %p10955_p12 }
 0x278   : > { %p10951_p11 = pneg %p10950_p10 }
 0x279   : > { %9359 = dma.hbm_to_vmem [thread:$0]  (%p13040_p5), %s13132_s28, 16, %s1930_s9, [#allocation51]  }
 0x27a   : > { %p10958_p1 = pnand %p10957_p0, %p10951_p11 }
 0x27c   : > { %10961 = shalt.err (!%p10958_p1)
}
 0x27d   : > { %s13133_s8 = sld [smem:[#allocation136_spill]]  ;;  %s11428_s26 = smov [#allocation58]  }
 0x27e   : > { %s1981_s16 = sshll.u32 %s11428_s26, 4  ;;  %s11429_s9 = smov [#allocation61]   ;;  %s1982_s16 = int_to_ptr.vmem [resolvable:$true] %s1981_s16 }
 0x27f   : > { %s2003_s3 = sshll.u32 %s11429_s9, 4  ;;  %s10972_s4 = scalar_lea.vmem %s1982_s16, 16  ;;  %s2004_s3 = int_to_ptr.vmem [resolvable:$true] %s2003_s3 }
 0x280   : > { %p10973_p8 = scmp.ne.s32.totalorder %s1982_s16, %s10972_s4  ;;  %s10978_s28 = scalar_lea.vmem %s1982_s16, 32 }
 0x281   : > { %p10979_p3 = scmp.lt.s32.totalorder %s1982_s16, %s1982_s16  ;;  %p10980_p6 = scmp.lt.s32.totalorder %s10978_s28, %s10972_s4 }
 0x282   : > { %p10974_p9 = pnand %p10973_p8, %p13040_p5 }
 0x283   : > { %9363 = dma.hbm_to_vmem [thread:$0]  (%p13040_p5), %s13133_s8, 16, %s1954_s11, [#allocation54]  }
 0x284   : > { %p10975_p2 = pneg %p10974_p9  ;;  %p10981_p7 = por %p10980_p6, %p10979_p3 }
 0x286   : > { %p10982_p10 = pnand %p10981_p7, %p10975_p2 }
 0x288   : > { %10985 = shalt.err (!%p10982_p10)
}
 0x289   : > { %s13134_s7 = sld [smem:[#allocation140_spill]]  ;;  %s10996_s11 = scalar_lea.vmem %s2004_s3, 16 }
 0x28a   : > { %p10997_p11 = scmp.ne.s32.totalorder %s2004_s3, %s10996_s11  ;;  %s11002_s5 = scalar_lea.vmem %s2004_s3, 32 }
 0x28b   : > { %p11003_p0 = scmp.lt.s32.totalorder %s2004_s3, %s2004_s3  ;;  %p11004_p1 = scmp.lt.s32.totalorder %s11002_s5, %s10996_s11 }
 0x28c   : > { %p10998_p12 = pnand %p10997_p11, %p13040_p5 }
 0x28d   : > { %p11005_p8 = por %p11004_p1, %p11003_p0 }
 0x28e   : > { %p10999_p13 = pneg %p10998_p12 }
 0x28f   : > { %9367 = dma.hbm_to_vmem [thread:$0]  (%p13040_p5), %s13134_s7, 16, %s1982_s16, [#allocation57]  }
 0x290   : > { %p11006_p9 = pnand %p11005_p8, %p10999_p13 }
 0x292   : > { %11009 = shalt.err (!%p11006_p9)
}
 0x293   : > { %s13135_s8 = sld [smem:[#allocation142_spill]]  ;;  %s11430_s26 = smov [#allocation64]  }
 0x294   : > { %s2024_s9 = sshll.u32 %s11430_s26, 4  ;;  %s11431_s16 = smov [#allocation67]   ;;  %s2025_s9 = int_to_ptr.vmem [resolvable:$true] %s2024_s9 }
 0x295   : > { %s2050_s4 = sshll.u32 %s11431_s16, 4  ;;  %s11020_s28 = scalar_lea.vmem %s2025_s9, 512  ;;  %s2051_s4 = int_to_ptr.vmem [resolvable:$true] %s2050_s4 }
 0x296   : > { %p11021_p2 = scmp.ne.s32.totalorder %s2025_s9, %s11020_s28  ;;  %p11027_p7 = scmp.lt.s32.totalorder %s2025_s9, %s2025_s9 }
 0x297   : > { %p11028_p10 = scmp.lt.s32.totalorder %s11020_s28, %s11020_s28 }
 0x298   : > { %p11022_p3 = pnand %p11021_p2, %p13040_p5 }
 0x299   : > { %9371 = dma.hbm_to_vmem [thread:$0]  (%p13040_p5), %s13135_s8, 16, %s2004_s3, [#allocation60]  }
 0x29a   : > { %p11023_p6 = pneg %p11022_p3  ;;  %p11029_p11 = por %p11028_p10, %p11027_p7 }
 0x29c   : > { %p11030_p12 = pnand %p11029_p11, %p11023_p6 }
 0x29e   : > { %11033 = shalt.err (!%p11030_p12)
}
 0x29f   : > { %s13136_s3 = sld [smem:[#allocation144_spill]]  ;;  %s11044_s7 = scalar_lea.vmem %s2051_s4, 512 }
 0x2a0   : > { %p11045_p13 = scmp.ne.s32.totalorder %s2051_s4, %s11044_s7  ;;  %p11051_p8 = scmp.lt.s32.totalorder %s2051_s4, %s2051_s4 }
 0x2a1   : > { %p11052_p9 = scmp.lt.s32.totalorder %s11044_s7, %s11044_s7 }
 0x2a2   : > { %p11046_p0 = pnand %p11045_p13, %p13040_p5 }
 0x2a3   : > { %p11053_p2 = por %p11052_p9, %p11051_p8 }
 0x2a4   : > { %p11047_p1 = pneg %p11046_p0 }
 0x2a5   : > { %9375 = dma.hbm_to_vmem [thread:$0]  (%p13040_p5), %s13136_s3, 512, %s2025_s9, [#allocation63], %s13105_s15, %s13105_s15, %s13104_s0  }
 0x2a6   : > { %p11054_p3 = pnand %p11053_p2, %p11047_p1 }
 0x2a8   : > { %11057 = shalt.err (!%p11054_p3)
}
 0x2a9   : > { %s13137_s11 = sld [smem:[#allocation146_spill]]  ;;  %s11432_s5 = smov [#allocation70]  }
 0x2aa   : > { %s2075_s8 = sshll.u32 %s11432_s5, 4  ;;  %s11433_s26 = smov [#allocation73]   ;;  %s2076_s8 = int_to_ptr.vmem [resolvable:$true] %s2075_s8 }
 0x2ab   : > { %s2097_s9 = sshll.u32 %s11433_s26, 4  ;;  %s11068_s16 = scalar_lea.vmem %s2076_s8, 16  ;;  %s2098_s9 = int_to_ptr.vmem [resolvable:$true] %s2097_s9 }
 0x2ac   : > { %p11069_p6 = scmp.ne.s32.totalorder %s2076_s8, %s11068_s16  ;;  %s11074_s28 = scalar_lea.vmem %s2076_s8, 32 }
 0x2ad   : > { %p11075_p11 = scmp.lt.s32.totalorder %s2076_s8, %s2076_s8  ;;  %p11076_p12 = scmp.lt.s32.totalorder %s11074_s28, %s11068_s16 }
 0x2ae   : > { %p11070_p7 = pnand %p11069_p6, %p13040_p5 }
 0x2af   : > { %9379 = dma.hbm_to_vmem [thread:$0]  (%p13040_p5), %s13137_s11, 512, %s2051_s4, [#allocation66], %s13105_s15, %s13105_s15, %s13104_s0  }
 0x2b0   : > { %p11071_p10 = pneg %p11070_p7  ;;  %p11077_p13 = por %p11076_p12, %p11075_p11 }
 0x2b2   : > { %p11078_p0 = pnand %p11077_p13, %p11071_p10 }
 0x2b4   : > { %11081 = shalt.err (!%p11078_p0)
}
 0x2b5   : > { %s13138_s3 = sld [smem:[#allocation148_spill]]  ;;  %s11092_s4 = scalar_lea.vmem %s2098_s9, 16 }
 0x2b6   : > { %p11093_p1 = scmp.ne.s32.totalorder %s2098_s9, %s11092_s4  ;;  %s11098_s7 = scalar_lea.vmem %s2098_s9, 32 }
 0x2b7   : > { %p11099_p2 = scmp.lt.s32.totalorder %s2098_s9, %s2098_s9  ;;  %p11100_p3 = scmp.lt.s32.totalorder %s11098_s7, %s11092_s4 }
 0x2b8   : > { %p11094_p8 = pnand %p11093_p1, %p13040_p5 }
 0x2b9   : > { %p11101_p6 = por %p11100_p3, %p11099_p2 }
 0x2ba   : > { %p11095_p9 = pneg %p11094_p8 }
 0x2bb   : > { %9383 = dma.hbm_to_vmem [thread:$0]  (%p13040_p5), %s13138_s3, 16, %s2076_s8, [#allocation69]  }
 0x2bc   : > { %p11102_p7 = pnand %p11101_p6, %p11095_p9 }
 0x2be   : > { %11105 = shalt.err (!%p11102_p7)
}
 0x2bf   : > { %s13139_s11 = sld [smem:[#allocation150_spill]]  ;;  %s11434_s5 = smov [#allocation76]  }
 0x2c0   : > { %s2139_s26 = sshll.u32 %s11434_s5, 4  ;;  %s11435_s8 = smov [#allocation79]   ;;  %s2140_s26 = int_to_ptr.vmem [resolvable:$true] %s2139_s26 }
 0x2c1   : > { %s2165_s16 = sshll.u32 %s11435_s8, 4  ;;  %s11116_s28 = scalar_lea.vmem %s2140_s26, 256  ;;  %s2166_s16 = int_to_ptr.vmem [resolvable:$true] %s2165_s16 }
 0x2c2   : > { %p11117_p10 = scmp.ne.s32.totalorder %s2140_s26, %s11116_s28  ;;  %p11123_p13 = scmp.lt.s32.totalorder %s2140_s26, %s2140_s26 }
 0x2c3   : > { %p11124_p0 = scmp.lt.s32.totalorder %s11116_s28, %s11116_s28 }
 0x2c4   : > { %p11118_p11 = pnand %p11117_p10, %p13040_p5 }
 0x2c5   : > { %9387 = dma.hbm_to_vmem [thread:$0]  (%p13040_p5), %s13139_s11, 16, %s2098_s9, [#allocation72]  }
 0x2c6   : > { %p11119_p12 = pneg %p11118_p11  ;;  %p11125_p1 = por %p11124_p0, %p11123_p13 }
 0x2c8   : > { %p11126_p8 = pnand %p11125_p1, %p11119_p12 }
 0x2ca   : > { %11129 = shalt.err (!%p11126_p8)
}
 0x2cb   : > { %9391 = dma.hbm_to_vmem [thread:$0]  (%p13040_p5), %s11756_s14, 256, %s2140_s26, [#allocation75], %s13105_s15, %s13105_s15, %s13104_s0  }
 0x2cc   : > { %s11140_s9 = scalar_lea.vmem %s2166_s16, 256  ;;  %p11147_p6 = scmp.lt.s32.totalorder %s2166_s16, %s2166_s16 }
 0x2cd   : > { %p11141_p9 = scmp.ne.s32.totalorder %s2166_s16, %s11140_s9  ;;  %p11148_p7 = scmp.lt.s32.totalorder %s11140_s9, %s11140_s9 }
 0x2cf   : > { %p11142_p2 = pnand %p11141_p9, %p13040_p5  ;;  %p11149_p10 = por %p11148_p7, %p11147_p6 }
 0x2d1   : > { %p11143_p3 = pneg %p11142_p2 }
 0x2d3   : > { %p11150_p11 = pnand %p11149_p10, %p11143_p3 }
 0x2d5   : > { %11153 = shalt.err (!%p11150_p11)
}
 0x2d6   : > { %9395 = dma.hbm_to_vmem [thread:$0]  (%p13040_p5), %s11766_s17, 256, %s2166_s16, [#allocation78], %s13105_s15, %s13105_s15, %s13104_s0  }
 0x2d7 PF: > { %s13140_s3 = sld [smem:[#allocation106_spill]]  ;;  %p9552_p12 = scmp.lt.s32.totalorder %s11316_s2, 2 }
 0x2d8   : > { %s2179_s4 = sand.u32 1, %s11312_s1   ;;  %s8349_s7 = sshll.u32 %s11316_s2, 7 }
 0x2d9   : > { %s8348_s11 = sshll.u32 %s2179_s4, 3  ;;  %p12123_p13 = pnand %p9552_p12, %p11807_p4 }
 0x2da   : > { %s2183_s26 = scalar_lea.vmem [#allocation3], %s8348_s11  ;;  %s2180_s15 = scalar_lea.sflag [#allocation4], %s2179_s4 }
 0x2db   : > { %s2190_s8 = sshll.u32 %s2183_s26, 4  ;;  %p11156_p1 = pneg %p12123_p13  ;;  %s2191_s8 = int_to_ptr.vmem [resolvable:$true] %s2190_s8 }
 0x2dc   : > { %s13141_s0 = scalar_select %p12123_p13, 1, 0 }
 0x2dd   : > { %s12119_s5 = scalar_lea.hbm %s13140_s3, %s8349_s7  ;;  %s11159_s2 = scalar_lea.hbm %s13140_s3, 256 }
 0x2de   : > { %s11154_s16 = scalar_lea.hbm %s12119_s5, 128  ;;  %p11160_p2 = scmp.lt.s32.totalorder %s12119_s5, %s13140_s3 }
 0x2df   : > { %p11155_p0 = scmp.ne.s32.totalorder %s12119_s5, %s11154_s16  ;;  %p11161_p3 = scmp.lt.s32.totalorder %s11159_s2, %s11154_s16 }
 0x2e1   : > { %p11157_p8 = pnand %p11156_p1, %p11155_p0  ;;  %p11162_p6 = por %p11161_p3, %p11160_p2 }
 0x2e3   : > { %p11158_p9 = pneg %p11157_p8 }
 0x2e5   : > { %p11163_p7 = pnand %p11162_p6, %p11158_p9 }
 0x2e7   : > { %11166 = shalt.err (!%p11163_p7)
}
 0x2e8   : > { %s11167_s18 = scalar_lea.vmem %s2191_s8, 128  ;;  %s11436_s28 = smov [#allocation3]  }
 0x2e9   : > { %p11168_p4 = scmp.ne.s32.totalorder %s2191_s8, %s11167_s18  ;;  %s11172_s9 = sshll.u32 %s11436_s28, 4  ;;  %s11173_s9 = int_to_ptr.vmem [resolvable:$false] %s11172_s9 }
 0x2ea   : > { %s11174_s4 = scalar_lea.vmem %s11173_s9, 256  ;;  %p11175_p12 = scmp.lt.s32.totalorder %s2191_s8, %s11173_s9 }
 0x2eb   : > { %p11170_p10 = pnand %p11168_p4, %p11156_p1  ;;  %p11176_p5 = scmp.lt.s32.totalorder %s11174_s4, %s11167_s18 }
 0x2ed   : > { %p11171_p11 = pneg %p11170_p10  ;;  %p11177_p13 = por %p11176_p5, %p11175_p12 }
 0x2ef   : > { %p11178_p0 = pnand %p11177_p13, %p11171_p11 }
 0x2f1   : > { %11181 = shalt.err (!%p11178_p0)
}
 0x2f2   : > { %p13142_p8 = scmp.ne.s32.totalorder %s13141_s0, 0  ;;  %p13143_p9 = scmp.ne.s32.totalorder %s13098_s22, 0 }
 0x2f3   : > { %s2201_s7 = sand.u32 (!%p13143_p9), 1, %s11308_s29   ;;  %p13144_p1 = scmp.ne.s32.totalorder (!%p13143_p9), %s13097_s23, 0 }
 0x2f4   : > { %9501 = dma.hbm_to_vmem [thread:$0]  (!%p13142_p8), %s12119_s5, 128, %s2191_s8, %s2180_s15  }
 0x2f5   : > { %2199 = sbr.rel (%p13143_p9) target bundleno = 11327 (0x2c3f), region = 276  ;;  %s12140_s11 = sshll.u32 (!%p13143_p9), %s2201_s7, 3 }
 0x2f6   : > { %s2202_s26 = scalar_lea.sflag (!%p13143_p9), [#allocation4], %s2201_s7  ;;  %s2205_s16 = scalar_lea.vmem (!%p13143_p9), [#allocation3], %s12140_s11 }
 0x2fa   : > { %11199 = dma.done.wait (%p13144_p1), %s2202_s26, 128  }
 0x2fb   : > { %11201 = vsyncadd (%p13144_p1), %s2202_s26, 4294967168  ;;  %p13145_p5 = scmp.eq.s32.totalorder %s11792_s10, 0 }
 0x2fd   : > { %11203 = dma.done.wait (%p13145_p5), [#allocation6], 48   ;;  %p13146_p13 = pmov %p13145_p5 }
 0x2fe   : > { %p13147_p2 = pmov %p13145_p5 }
 0x2ff   : > { %11205 = vsyncadd (%p13146_p13), [#allocation6], 4294967248 }
 0x300   : > { %11207 = dma.done.wait (%p13147_p2), [#allocation9], 48   ;;  %p13148_p3 = pmov %p13147_p2 }
 0x301   : > { %p13149_p6 = pmov %p13147_p2 }
 0x302   : > { %11209 = vsyncadd (%p13148_p3), [#allocation9], 4294967248 }
 0x303   : > { %11211 = dma.done.wait (%p13149_p6), [#allocation12], 32   ;;  %p13150_p7 = pmov %p13147_p2 }
 0x304   : > { %p13151_p4 = pmov %p13147_p2 }
 0x305   : > { %11213 = vsyncadd (%p13150_p7), [#allocation12], 4294967264 }
 0x306   : > { %11215 = dma.done.wait (%p13151_p4), [#allocation15], 32   ;;  %p13152_p10 = pmov %p13147_p2 }
 0x307   : > { %p13153_p11 = pmov %p13147_p2 }
 0x308   : > { %11217 = vsyncadd (%p13152_p10), [#allocation15], 4294967264 }
 0x309   : > { %11219 = dma.done.wait (%p13153_p11), [#allocation18], 32   ;;  %p13154_p12 = pmov %p13147_p2 }
 0x30a   : > { %p13155_p0 = pmov %p13147_p2 }
 0x30b   : > { %11221 = vsyncadd (%p13154_p12), [#allocation18], 4294967264 }
 0x30c   : > { %11223 = dma.done.wait (%p13155_p0), [#allocation21], 6144   ;;  %p13156_p8 = pmov %p13155_p0 }
 0x30d   : > { %p13157_p9 = pmov %p13155_p0 }
 0x30e   : > { %11225 = vsyncadd (%p13156_p8), [#allocation21], 4294961152 }
 0x30f   : > { %11227 = dma.done.wait (%p13157_p9), [#allocation24], 2064   ;;  %p13158_p1 = pmov %p13155_p0 }
 0x310   : > { %p13159_p5 = pmov %p13155_p0 }
 0x311   : > { %11229 = vsyncadd (%p13158_p1), [#allocation24], 4294965232 }
 0x312   : > { %11231 = dma.done.wait (%p13159_p5), [#allocation27], 32   ;;  %p13160_p13 = pmov %p13155_p0 }
 0x313   : > { %p13161_p2 = pmov %p13155_p0 }
 0x314   : > { %11233 = vsyncadd (%p13160_p13), [#allocation27], 4294967264 }
 0x315   : > { %11235 = dma.done.wait (%p13161_p2), [#allocation30], 1040   ;;  %p13162_p3 = pmov %p13155_p0 }
 0x316   : > { %p13163_p6 = pmov %p13155_p0 }
 0x317   : > { %11237 = vsyncadd (%p13162_p3), [#allocation30], 4294966256 }
 0x318   : > { %11239 = dma.done.wait (%p13163_p6), [#allocation33], 32   ;;  %p13164_p7 = pmov %p13155_p0 }
 0x319   : > { %p13165_p4 = pmov %p13155_p0 }
 0x31a   : > { %11241 = vsyncadd (%p13164_p7), [#allocation33], 4294967264 }
 0x31b   : > { %11243 = dma.done.wait (%p13165_p4), [#allocation36], 32   ;;  %p13166_p10 = pmov %p13155_p0 }
 0x31c   : > { %p13167_p11 = pmov %p13155_p0 }
 0x31d   : > { %11245 = vsyncadd (%p13166_p10), [#allocation36], 4294967264 }
 0x31e   : > { %11247 = dma.done.wait (%p13167_p11), [#allocation39], 32   ;;  %p13168_p12 = pmov %p13155_p0 }
 0x320   : > { %11249 = vsyncadd (%p13168_p12), [#allocation39], 4294967264 }
 0x321   : > { %11251 = dma.done.wait (%p13155_p0), [#allocation42], 1040   ;;  %p13169_p8 = pmov %p13155_p0 }
 0x322   : > { %p13170_p9 = pmov %p13155_p0 }
 0x323   : > { %11253 = vsyncadd (%p13169_p8), [#allocation42], 4294966256 }
 0x324   : > { %11255 = dma.done.wait (%p13170_p9), [#allocation45], 2048   ;;  %p13171_p1 = pmov %p13155_p0 }
 0x325   : > { %p13172_p5 = pmov %p13155_p0 }
 0x326   : > { %11257 = vsyncadd (%p13171_p1), [#allocation45], 4294965248 }
 0x327   : > { %11259 = dma.done.wait (%p13172_p5), [#allocation48], 32   ;;  %p13173_p13 = pmov %p13155_p0 }
 0x328   : > { %p13174_p2 = pmov %p13155_p0 }
 0x329   : > { %11261 = vsyncadd (%p13173_p13), [#allocation48], 4294967264 }
 0x32a   : > { %11263 = dma.done.wait (%p13174_p2), [#allocation51], 32   ;;  %p13175_p3 = pmov %p13155_p0 }
 0x32b   : > { %p13176_p6 = pmov %p13155_p0 }
 0x32c   : > { %11265 = vsyncadd (%p13175_p3), [#allocation51], 4294967264 }
 0x32d   : > { %11267 = dma.done.wait (%p13176_p6), [#allocation54], 528   ;;  %p13177_p7 = pmov %p13155_p0 }
 0x32e   : > { %p13178_p4 = pmov %p13155_p0 }
 0x32f   : > { %11269 = vsyncadd (%p13177_p7), [#allocation54], 4294966768 }
 0x330   : > { %11271 = dma.done.wait (%p13178_p4), [#allocation57], 32   ;;  %p13179_p10 = pmov %p13155_p0 }
 0x331   : > { %p13180_p11 = pmov %p13155_p0 }
 0x332   : > { %11273 = vsyncadd (%p13179_p10), [#allocation57], 4294967264 }
 0x333   : > { %11275 = dma.done.wait (%p13180_p11), [#allocation60], 32   ;;  %p13181_p12 = pmov %p13155_p0 }
 0x335   : > { %11277 = vsyncadd (%p13181_p12), [#allocation60], 4294967264 }
 0x336   : > { %11279 = dma.done.wait (%p13155_p0), [#allocation63], 528   ;;  %p13182_p8 = pmov %p13155_p0 }
 0x337   : > { %p13183_p9 = pmov %p13155_p0 }
 0x338   : > { %11281 = vsyncadd (%p13182_p8), [#allocation63], 4294966768 }
 0x339   : > { %11283 = dma.done.wait (%p13183_p9), [#allocation66], 1024   ;;  %p13184_p1 = pmov %p13155_p0 }
 0x33a   : > { %p13185_p5 = pmov %p13155_p0 }
 0x33b   : > { %11285 = vsyncadd (%p13184_p1), [#allocation66], 4294966272 }
 0x33c   : > { %11287 = dma.done.wait (%p13185_p5), [#allocation69], 32   ;;  %p13186_p13 = pmov %p13155_p0 }
 0x33d   : > { %p13187_p2 = pmov %p13155_p0 }
 0x33e   : > { %11289 = vsyncadd (%p13186_p13), [#allocation69], 4294967264 }
 0x33f   : > { %11291 = dma.done.wait (%p13187_p2), [#allocation72], 32   ;;  %p13188_p3 = pmov %p13155_p0 }
 0x340   : > { %p13189_p6 = pmov %p13155_p0 }
 0x341   : > { %11293 = vsyncadd (%p13188_p3), [#allocation72], 4294967264 }
 0x342   : > { %11295 = dma.done.wait (%p13189_p6), [#allocation75], 272   ;;  %p13190_p7 = pmov %p13155_p0 }
 0x343   : > { %p13191_p4 = pmov %p13155_p0 }
 0x344   : > { %11297 = vsyncadd (%p13190_p7), [#allocation75], 4294967024 }
 0x345   : > { %11299 = dma.done.wait (%p13191_p4), [#allocation78], 512   ;;  %p13192_p10 = pmov %p13155_p0 }
 0x346   : > { %v2828_v1 = vld [vmem:[%s2205_s16] sm:$0xff]  ;;  %v2822_v3 = vld [vmem:[#allocation76] sm:$0xff]  ;;  %s13193_s23 = sld [smem:[#allocation156_spill]]  ;;  %vm3059_vm0 = vcmask 130048   ;;  %s11438_s22 = smov 96   ;;  %vm3146_vm1 = vcmask 64512  }
 0x347   : > { %11301 = vsyncadd (%p13192_p10), [#allocation78], 4294966784  ;;  %v2823_v2 = vld [vmem:[#allocation76 + $0x8] sm:$0xff]  ;;  %2829 = vadd.xlane.f32.xlu0 %v2828_v1  ;;  %v2856_v5 = vadd.f32 %v2822_v3, %v2822_v3  ;;  %v2660_v7 = vld [vmem:[#allocation20 + $0xf0] sm:$0xff]  ;;  %s11439_s5 = smov 112   ;;  %s11440_s8 = smov 64  }
 0x348   : > { %v2857_v4 = vadd.f32 %v2823_v2, %v2823_v2  ;;  %v2661_v6 = vld [vmem:[#allocation20 + $0xf8] sm:$0xff]  ;;  %v2659_v8 = vld [vmem:[#allocation20 + $0xe8] sm:$0xff]  ;;  %v2658_v10 = vld [vmem:[#allocation20 + $0xe0] sm:$0xff]  ;;  %v11437_v2 = vmov 0.0   ;;  %s11441_s0 = smov 80   ;;  %s11442_s15 = smov 48  }
 0x349   : > { %2988 = vmatprep.subr.mxu1 %v2661_v6  ;;  %v2693_v9 = vld [vmem:[#allocation23 + $0x78] sm:$0xff]  ;;  %v2692_v24 = vld [vmem:[#allocation23 + $0x70] sm:$0xff]  ;;  %v2655_v26 = vld [vmem:[#allocation20 + $0xc8] sm:$0xff]  ;;  %3052 = vmatprep.mubr.f32.mxu1 %v11437_v2  ;;  %s11443_s2 = smov 32   ;;  %s11444_s18 = smov 16   ;;  %vm4674_vm2 = vcmask 261120  }
 0x34a   : > { %2860 = vadd.xlane.f32.xlu1 %v2857_v4  ;;  %2989 = vmatpush1.msra.mxu1 %v2660_v7  ;;  %v2657_v11 = vld [vmem:[#allocation20 + $0xd8] sm:$0xff]  ;;  %v2656_v25 = vld [vmem:[#allocation20 + $0xd0] sm:$0xff]  ;;  %v2691_v27 = vld [vmem:[#allocation23 + $0x68] sm:$0xff]  ;;  %vm4677_vm3 = vcmask 392192   ;;  %vm4680_vm4 = vcmask 523264   ;;  %vm4683_vm5 = vcmask 654336  }
 0x34b   : > { %2858 = vadd.xlane.f32.xlu0 %v2856_v5  ;;  %8834 = vmatprep.subr.mxu0 %v2693_v9  ;;  %v2654_v28 = vld [vmem:[#allocation20 + $0xc0] sm:$0xff]  ;;  %v2653_v29 = vld [vmem:[#allocation20 + $0xb8] sm:$0xff]  ;;  %v2652_v31 = vld [vmem:[#allocation20 + $0xb0] sm:$0xff]  ;;  %s13194_s28 = sld [smem:[#allocation108_spill]]  ;;  %vm4686_vm6 = vcmask 785408   ;;  %vm4689_vm7 = vcmask 916480  }
 0x34c   : > { %2990 = vmatprep.subr.mxu1 %v2659_v8  ;;  %8835 = vmatpush3.msra.mxu0 %v2693_v9  ;;  %v2690_v30 = vld [vmem:[#allocation23 + $0x60] sm:$0xff]  ;;  %v2651_v32 = vld [vmem:[#allocation20 + $0xa8] sm:$0xff]  ;;  %v2689_v33 = vld [vmem:[#allocation23 + $0x58] sm:$0xff]  ;;  %s13195_s9 = sld [smem:[#allocation110_spill]]  ;;  %p2550_p11 = scmp.lt.s32.totalorder %s11792_s10, 1  ;;  %vm7686_vm8 = vcmask 7168  }
 0x34d   : > { %2991 = vmatpush1.msra.mxu1 %v2658_v10  ;;  %8836 = vmatprep.subr.mxu0 %v2692_v24  ;;  %v2650_v34 = vld [vmem:[#allocation20 + $0xa0] sm:$0xff]  ;;  %v2649_v35 = vld [vmem:[#allocation20 + $0x98] sm:$0xff]  ;;  %v2688_v36 = vld [vmem:[#allocation23 + $0x50] sm:$0xff]  ;;  %s13196_s4 = sld [smem:[#allocation112_spill]] }
 0x34e   : > { %2992 = vmatprep.subr.mxu1 %v2657_v11  ;;  %8837 = vmatpush3.msra.mxu0 %v2692_v24  ;;  %v2648_v37 = vld [vmem:[#allocation20 + $0x90] sm:$0xff]  ;;  %v2647_v38 = vld [vmem:[#allocation20 + $0x88] sm:$0xff]  ;;  %v2646_v40 = vld [vmem:[#allocation20 + $0x80] sm:$0xff]  ;;  %s13197_s7 = sld [smem:[#allocation152_spill]]  ;;  %s13211_s10 = smov (!%p2550_p11, %s11792_s10), 1 }
 0x34f   : > { %2993 = vmatpush1.msra.mxu1 %v2656_v25  ;;  %8838 = vmatprep.subr.mxu0 %v2691_v27  ;;  %v2687_v39 = vld [vmem:[#allocation23 + $0x48] sm:$0xff]  ;;  %v2645_v41 = vld [vmem:[#allocation20 + $0x78] sm:$0xff]  ;;  %v2686_v42 = vld [vmem:[#allocation23 + $0x40] sm:$0xff]  ;;  %s13198_s11 = sld [smem:[#allocation123_spill]] }
 0x350   : > { %2994 = vmatprep.subr.mxu1 %v2655_v26  ;;  %8839 = vmatpush3.msra.mxu0 %v2691_v27  ;;  %v2644_v43 = vld [vmem:[#allocation20 + $0x70] sm:$0xff]  ;;  %v2643_v44 = vld [vmem:[#allocation20 + $0x68] sm:$0xff]  ;;  %v2685_v45 = vld [vmem:[#allocation23 + $0x38] sm:$0xff]  ;;  %s13199_s26 = sld [smem:[#allocation154_spill]] }
 0x351   : > { %2995 = vmatpush1.msra.mxu1 %v2654_v28  ;;  %8840 = vmatprep.subr.mxu0 %v2690_v30  ;;  %v2642_v46 = vld [vmem:[#allocation20 + $0x60] sm:$0xff]  ;;  %v2641_v47 = vld [vmem:[#allocation20 + $0x58] sm:$0xff]  ;;  %v2684_v48 = vld [vmem:[#allocation23 + $0x30] sm:$0xff]  ;;  %s13200_s16 = sld [smem:[#allocation153_spill]] }
 0x352   : > { %2996 = vmatprep.subr.mxu1 %v2653_v29  ;;  %8841 = vmatpush3.msra.mxu0 %v2690_v30  ;;  %v2640_v49 = vld [vmem:[#allocation20 + $0x50] sm:$0xff]  ;;  %v2639_v50 = vld [vmem:[#allocation20 + $0x48] sm:$0xff]  ;;  %v2638_v52 = vld [vmem:[#allocation20 + $0x40] sm:$0xff] }
 0x353   : > { %2997 = vmatpush1.msra.mxu1 %v2652_v31  ;;  %8842 = vmatprep.subr.mxu0 %v2689_v33  ;;  %v2683_v51 = vld [vmem:[#allocation23 + $0x28] sm:$0xff]  ;;  %v2637_v53 = vld [vmem:[#allocation20 + $0x38] sm:$0xff]  ;;  %v2682_v54 = vld [vmem:[#allocation23 + $0x20] sm:$0xff] }
 0x354   : > { %2998 = vmatprep.subr.mxu1 %v2651_v32  ;;  %8843 = vmatpush3.msra.mxu0 %v2689_v33  ;;  %v2636_v55 = vld [vmem:[#allocation20 + $0x30] sm:$0xff]  ;;  %v2635_v56 = vld [vmem:[#allocation20 + $0x28] sm:$0xff]  ;;  %v2681_v57 = vld [vmem:[#allocation23 + $0x18] sm:$0xff] }
 0x355   : > { %2999 = vmatpush1.msra.mxu1 %v2650_v34  ;;  %8844 = vmatprep.subr.mxu0 %v2688_v36  ;;  %v2634_v58 = vld [vmem:[#allocation20 + $0x20] sm:$0xff]  ;;  %v2633_v59 = vld [vmem:[#allocation20 + $0x18] sm:$0xff]  ;;  %v2680_v60 = vld [vmem:[#allocation23 + $0x10] sm:$0xff] }
 0x356   : > { %3000 = vmatprep.subr.mxu1 %v2649_v35  ;;  %8845 = vmatpush3.msra.mxu0 %v2688_v36  ;;  %v2632_v61 = vld [vmem:[#allocation20 + $0x10] sm:$0xff]  ;;  %v2631_v62 = vld [vmem:[#allocation20 + $0x8] sm:$0xff]  ;;  %v2630_v0 = vld [vmem:[#allocation20] sm:$0xff] }
 0x357   : > { %3001 = vmatpush1.msra.mxu1 %v2648_v37  ;;  %8846 = vmatprep.subr.mxu0 %v2687_v39  ;;  %v2679_v63 = vld [vmem:[#allocation23 + $0x8] sm:$0xff]  ;;  %v8407_v25 = vld [vmem:[#allocation11] ss:$0 sm:$0xff] }
 0x358   : > { %3002 = vmatprep.subr.mxu1 %v2647_v38  ;;  %8847 = vmatpush3.msra.mxu0 %v2687_v39  ;;  %v2555_v33 = vld [vmem:[#allocation5] sm:$0x3] }
 0x359   : > { %3003 = vmatpush1.msra.mxu1 %v2646_v40  ;;  %8848 = vmatprep.subr.mxu0 %v2686_v42 }
 0x35a   : > { %3004 = vmatprep.subr.mxu1 %v2645_v41  ;;  %8849 = vmatpush3.msra.mxu0 %v2686_v42  ;;  %v8408_v41 = vld [vmem:[#allocation7] ss:$0 sm:$0xff] }
 0x35b   : > { %3005 = vmatpush1.msra.mxu1 %v2644_v43  ;;  %8850 = vmatprep.subr.mxu0 %v2685_v45 }
 0x35c   : > { %3006 = vmatprep.subr.mxu1 %v2643_v44  ;;  %8851 = vmatpush3.msra.mxu0 %v2685_v45 }
 0x35d   : > { %3007 = vmatpush1.msra.mxu1 %v2642_v46  ;;  %8852 = vmatprep.subr.mxu0 %v2684_v48 }
 0x35e   : > { %3008 = vmatprep.subr.mxu1 %v2641_v47  ;;  %8853 = vmatpush3.msra.mxu0 %v2684_v48 }
 0x35f   : > { %3009 = vmatpush1.msra.mxu1 %v2640_v49  ;;  %8854 = vmatprep.subr.mxu0 %v2683_v51 }
 0x360   : > { %3010 = vmatprep.subr.mxu1 %v2639_v50  ;;  %8855 = vmatpush3.msra.mxu0 %v2683_v51 }
 0x361   : > { %3011 = vmatpush1.msra.mxu1 %v2638_v52  ;;  %8856 = vmatprep.subr.mxu0 %v2682_v54 }
 0x362   : > { %3012 = vmatprep.subr.mxu1 %v2637_v53  ;;  %8857 = vmatpush3.msra.mxu0 %v2682_v54 }
 0x363   : > { %3013 = vmatpush1.msra.mxu1 %v2636_v55  ;;  %8858 = vmatprep.subr.mxu0 %v2681_v57 }
 0x364   : > { %3014 = vmatprep.subr.mxu1 %v2635_v56  ;;  %8859 = vmatpush3.msra.mxu0 %v2681_v57 }
 0x365   : > { %3015 = vmatpush1.msra.mxu1 %v2634_v58  ;;  %8860 = vmatprep.subr.mxu0 %v2680_v60 }
 0x366   : > { %3016 = vmatprep.subr.mxu1 %v2633_v59  ;;  %8861 = vmatpush3.msra.mxu0 %v2680_v60 }
 0x367   : > { %3017 = vmatpush1.msra.mxu1 %v2632_v61  ;;  %8862 = vmatprep.subr.mxu0 %v2679_v63 }
 0x368   : > { %3018 = vmatprep.subr.mxu1 %v2631_v62  ;;  %8863 = vmatpush3.msra.mxu0 %v2679_v63 }
 0x369   : > { %3019 = vmatpush1.msra.mxu1 %v2630_v0 }
 0x3d0   : > { %v2830_v12 = vpop.xlane.xlu0 %2829 }
 0x3d1   : > { %v2832_v13 = vmul.f32 0.0078125, %v2830_v12 }
 0x3d3   : > { %v2861_v14 = vpop.xlane.xlu1 %2860  ;;  %v12249_v16 = vsub.f32 %v2828_v1, %v2832_v13  ;;  %v2678_v1 = vld [vmem:[#allocation23] sm:$0xff]  ;;  %v8404_v13 = vld [vmem:[%s11751_s20] ss:$0 sm:$0xff] }
 0x3d4   : > { %v2863_v15 = vmul.f32 0.0078125, %v2861_v14  ;;  %v2859_v17 = vpop.xlane.xlu0 %2858  ;;  %8864 = vmatprep.subr.mxu0 %v2678_v1 }
 0x3d5   : > { %v2862_v18 = vmul.f32 0.0078125, %v2859_v17  ;;  %v2834_v19 = vmul.f32 %v12249_v16, %v12249_v16  ;;  %8865 = vmatpush3.msra.mxu0 %v2678_v1 }
 0x3d6   : > { %v12253_v20 = vsub.f32 %v2857_v4, %v2863_v15  ;;  %v8405_v15 = vld [vmem:[%s13193_s23] ss:$0 sm:$0xff]  ;;  %s13201_s23 = sld [smem:[#allocation138_spill]] }
 0x3d7   : > { %2835 = vadd.xlane.f32.xlu1 %v2834_v19  ;;  %v12257_v22 = vsub.f32 %v2856_v5, %v2862_v18  ;;  %v8406_v19 = vld [vmem:[#allocation13] ss:$0 sm:$0xff] }
 0x3d8   : > { %v2867_v21 = vmul.f32 %v12253_v20, %v12253_v20 }
 0x3d9   : > { %v2866_v23 = vmul.f32 %v12257_v22, %v12257_v22 }
 0x3db   : > { %2870 = vadd.xlane.f32.xlu1 %v2867_v21  ;;  %2868 = vadd.xlane.f32.xlu0 %v2866_v23 }
 0x460   : > { %v2836_v3 = vpop.xlane.xlu1 %2835 }
 0x461   : > { %v2837_v4 = vmul.f32 0.0078125, %v2836_v3 }
 0x463   : > { %v2838_v5 = vadd.f32 1e-05, %v2837_v4 }
 0x464   : > { %v2871_v6 = vpop.xlane.xlu1 %2870  ;;  %v2869_v7 = vpop.xlane.xlu0 %2868 }
 0x465   : > { %9796 = vrsqrt.f32 %v2838_v5  ;;  %v2873_v8 = vmul.f32 0.0078125, %v2871_v6  ;;  %v2872_v9 = vmul.f32 0.0078125, %v2869_v7 }
 0x467   : > { %v2875_v10 = vadd.f32 1e-05, %v2873_v8  ;;  %v2874_v11 = vadd.f32 1e-05, %v2872_v9 }
 0x469   : > { %9798 = vrsqrt.f32 %v2875_v10 }
 0x46a   : > { %9800 = vrsqrt.f32 %v2874_v11 }
 0x472   : > { %v9797_v12 = vpop.eup %9796 }
 0x473   : > { %v2840_v14 = vmul.f32 %v9797_v12, %v12249_v16  ;;  %v2978_v16 = vlaneseq }
 0x475   : > { %v2847_v17 = vmul.f32 %v8404_v13, %v2840_v14  ;;  %v12273_v32 = vshrl.u32 %v2978_v16, 7 }
 0x476   : > { %v9799_v18 = vpop.eup %9798 }
 0x477   : > { %v9801_v21 = vpop.eup %9800  ;;  %v2854_v23 = vadd.f32 %v8405_v15, %v2847_v17  ;;  %v2879_v24 = vmul.f32 %v9799_v18, %v12253_v20  ;;  %v2980_v20 = vsub.s32 0, %v12273_v32 }
 0x478   : > { %v2878_v26 = vmul.f32 %v9801_v21, %v12257_v22  ;;  %v2984_v22 = vsub.s32 1, %v12273_v32 }
 0x479   : > { %v2855_v27 = vmax.f32 %v2854_v23, 0.0  ;;  %v2887_v28 = vmul.f32 %v8406_v19, %v2879_v24  ;;  %v2981_v34 = vrot.slane %v2555_v33, %v2980_v20 }
 0x47a   : > { %v2886_v29 = vmul.f32 %v8406_v19, %v2878_v26  ;;  %v2985_v35 = vrot.slane %v2555_v33, %v2984_v22 }
 0x47b   : > { %3053 = vmatmul.mubr.f32.vlgmr.msra.gmra.mxu1 %v2855_v27  ;;  %v12267_v30 = vadd.f32 %v8407_v25, %v2887_v28 }
 0x47c   : > { %v12269_v31 = vadd.f32 %v8407_v25, %v2886_v29 }
 0x47e   : > { %8866 = vmatprep.mubr.f32.mxu0 %v12269_v31 }
 0x47f   : > { %8867 = vmatmul.mubr.f32.vlgmr.msra.gmra.mxu0 %v12267_v30 }
 0x53b   : > { %v3054_v36 = vpop.f32.mrf.mxu1 }
 0x53c   : > { %v3055_v37 = vadd.f32 %v3054_v36, %v2981_v34 }
 0x53d   : > { %v3056_v38 = vpop.f32.mrf.mxu1 }
 0x53e   : > { %v12281_v39 = vadd.f32 %v3056_v38, %v2985_v35  ;;  %3450 = vrot.lane.b32.xlu1 %v3055_v37, %s11438_s22  ;;  %3254 = vrot.lane.b32.xlu0 %v3055_v37, %s11439_s5 }
 0x53f   : > { %v8868_v40 = vpop.f32.mrf.mxu0  ;;  %8869 = vmatprep.subr.msk.mxu0 %vm3059_vm0, %v3055_v37 }
 0x540   : > { %8870 = vmatpush3.xpose.msk.msra.mxu0 %vm3059_vm0, %v3055_v37  ;;  %8874 = vmatprep.subr.mxu1 %v12281_v39  ;;  %v2974_v44 = vadd.f32 %v8868_v40, %v8408_v41 }
 0x541   : > { %v2968_v42 = vpop.f32.mrf.mxu0  ;;  %8875 = vmatpush3.msra.mxu1 %v12281_v39 }
 0x542   : > { %v2969_v43 = vadd.f32 %v8408_v41, %v2968_v42  ;;  %3840 = vrot.lane.b32.xlu1 %v3055_v37, %s11440_s8  ;;  %3645 = vrot.lane.b32.xlu0 %v3055_v37, %s11441_s0 }
 0x544   : > { %8871 = vmatprep.mubr.msk.f32.mxu0 %vm3059_vm0, %v2969_v43 }
 0x545   : > { %8872 = vmatmul.mubr.msk.f32.vlgmr.msra.gmra.mxu0 %vm3059_vm0, %v2974_v44 }
 0x546   : > { %3252 = vrot.lane.b32.xlu1 %v2974_v44, %s11439_s5  ;;  %3643 = vrot.lane.b32.xlu0 %v2974_v44, %s11441_s0 }
 0x54a   : > { %3448 = vrot.lane.b32.xlu1 %v2974_v44, %s11438_s22  ;;  %3446 = vrot.lane.b32.xlu0 %v2969_v43, %s11438_s22 }
 0x54e   : > { %3250 = vrot.lane.b32.xlu1 %v2969_v43, %s11439_s5  ;;  %4035 = vrot.lane.b32.xlu0 %v3055_v37, %s11442_s15 }
 0x552   : > { %3838 = vrot.lane.b32.xlu1 %v2974_v44, %s11440_s8  ;;  %3836 = vrot.lane.b32.xlu0 %v2969_v43, %s11440_s8 }
 0x556   : > { %3641 = vrot.lane.b32.xlu1 %v2969_v43, %s11441_s0  ;;  %4033 = vrot.lane.b32.xlu0 %v2974_v44, %s11442_s15 }
 0x55a   : > { %4230 = vrot.lane.b32.xlu1 %v3055_v37, %s11443_s2  ;;  %4226 = vrot.lane.b32.xlu0 %v2969_v43, %s11443_s2 }
 0x55e   : > { %4031 = vrot.lane.b32.xlu1 %v2969_v43, %s11442_s15  ;;  %4425 = vrot.lane.b32.xlu0 %v3055_v37, %s11444_s18 }
 0x562   : > { %4228 = vrot.lane.b32.xlu1 %v2974_v44, %s11443_s2  ;;  %4423 = vrot.lane.b32.xlu0 %v2974_v44, %s11444_s18 }
 0x566   : > { %4421 = vrot.lane.b32.xlu1 %v2969_v43, %s11444_s18 }
 0x56a   : > { %3362 = vrot.lane.b32.xlu1 %v12281_v39, %s11439_s5 }
 0x5b0   : > { %v3451_v45 = vpop.permute.xlu1 %3450  ;;  %v3255_v46 = vpop.permute.xlu0 %3254 }
 0x5b1   : > { %8879 = vmatprep.subr.msk.mxu0 %vm3059_vm0, %v3255_v46 }
 0x5b2   : > { %8880 = vmatpush3.xpose.msk.msra.mxu0 %vm3059_vm0, %v3255_v46 }
 0x5b3   : > { %8889 = vmatprep.subr.msk.mxu0 %vm3059_vm0, %v3451_v45 }
 0x5b4   : > { %v3841_v47 = vpop.permute.xlu1 %3840  ;;  %v3646_v48 = vpop.permute.xlu0 %3645 }
 0x5b8   : > { %v3253_v49 = vpop.permute.xlu1 %3252  ;;  %v3644_v50 = vpop.permute.xlu0 %3643 }
 0x5bc   : > { %v3449_v51 = vpop.permute.xlu1 %3448  ;;  %v3447_v52 = vpop.permute.xlu0 %3446 }
 0x5c0   : > { %v3251_v53 = vpop.permute.xlu1 %3250  ;;  %v4036_v54 = vpop.permute.xlu0 %4035 }
 0x5c1   : > { %8881 = vmatprep.mubr.msk.f32.mxu0 %vm3059_vm0, %v3251_v53 }
 0x5c2   : > { %8882 = vmatmul.mubr.msk.f32.vlgmr.msra.gmra.mxu0 %vm3059_vm0, %v3253_v49 }
 0x5c3   : > { %8890 = vmatpush3.xpose.msk.msra.mxu0 %vm3059_vm0, %v3451_v45  ;;  %8891 = vmatprep.mubr.msk.f32.mxu0 %vm3059_vm0, %v3447_v52 }
 0x5c4   : > { %8899 = vmatprep.subr.msk.mxu0 %vm3059_vm0, %v3646_v48  ;;  %v3839_v55 = vpop.permute.xlu1 %3838  ;;  %v3837_v56 = vpop.permute.xlu0 %3836 }
 0x5c6   : > { %8892 = vmatmul.mubr.msk.f32.vlgmr.msra.gmra.mxu0 %vm3059_vm0, %v3449_v51 }
 0x5c7   : > { %8900 = vmatpush3.xpose.msk.msra.mxu0 %vm3059_vm0, %v3646_v48 }
 0x5c8   : > { %8909 = vmatprep.subr.msk.mxu0 %vm3059_vm0, %v3841_v47  ;;  %v3642_v57 = vpop.permute.xlu1 %3641  ;;  %v4034_v58 = vpop.permute.xlu0 %4033 }
 0x5c9   : > { %8901 = vmatprep.mubr.msk.f32.mxu0 %vm3059_vm0, %v3642_v57 }
 0x5ca   : > { %8902 = vmatmul.mubr.msk.f32.vlgmr.msra.gmra.mxu0 %vm3059_vm0, %v3644_v50 }
 0x5cb   : > { %8910 = vmatpush3.xpose.msk.msra.mxu0 %vm3059_vm0, %v3841_v47  ;;  %8911 = vmatprep.mubr.msk.f32.mxu0 %vm3059_vm0, %v3837_v56 }
 0x5cc   : > { %8919 = vmatprep.subr.msk.mxu0 %vm3059_vm0, %v4036_v54  ;;  %v4231_v59 = vpop.permute.xlu1 %4230  ;;  %v4227_v60 = vpop.permute.xlu0 %4226 }
 0x5ce   : > { %8912 = vmatmul.mubr.msk.f32.vlgmr.msra.gmra.mxu0 %vm3059_vm0, %v3839_v55 }
 0x5cf   : > { %8920 = vmatpush3.xpose.msk.msra.mxu0 %vm3059_vm0, %v4036_v54 }
 0x5d0   : > { %8929 = vmatprep.subr.msk.mxu0 %vm3059_vm0, %v4231_v59  ;;  %v4032_v61 = vpop.permute.xlu1 %4031  ;;  %v4426_v62 = vpop.permute.xlu0 %4425 }
 0x5d1   : > { %8921 = vmatprep.mubr.msk.f32.mxu0 %vm3059_vm0, %v4032_v61 }
 0x5d2   : > { %8922 = vmatmul.mubr.msk.f32.vlgmr.msra.gmra.mxu0 %vm3059_vm0, %v4034_v58 }
 0x5d3   : > { %8930 = vmatpush3.xpose.msk.msra.mxu0 %vm3059_vm0, %v4231_v59  ;;  %8931 = vmatprep.mubr.msk.f32.mxu0 %vm3059_vm0, %v4227_v60 }
 0x5d4   : > { %8939 = vmatprep.subr.msk.mxu0 %vm3059_vm0, %v4426_v62  ;;  %v4229_v63 = vpop.permute.xlu1 %4228  ;;  %v4424_v1 = vpop.permute.xlu0 %4423 }
 0x5d6   : > { %8932 = vmatmul.mubr.msk.f32.vlgmr.msra.gmra.mxu0 %vm3059_vm0, %v4229_v63 }
 0x5d7   : > { %8940 = vmatpush3.xpose.msk.msra.mxu0 %vm3059_vm0, %v4426_v62 }
 0x5d8   : > { %v4422_v0 = vpop.permute.xlu1 %4421 }
 0x5d9   : > { %8941 = vmatprep.mubr.msk.f32.mxu0 %vm3059_vm0, %v4422_v0 }
 0x5da   : > { %8942 = vmatmul.mubr.msk.f32.vlgmr.msra.gmra.mxu0 %vm3059_vm0, %v4424_v1 }
 0x5dc   : > { %v12340_v3 = vpop.permute.xlu1 %3362 }
 0x5dd   : > { %8884 = vmatprep.subr.mxu1 %v12340_v3 }
 0x605   : > { %v8873_v4 = vpop.f32.mrf.mxu0 }
 0x606   : > { %v12343_v5 = vmul.f32 0.25, %v8873_v4 }
 0x607   : > { %v3135_v6 = vpop.f32.mrf.mxu0 }
 0x608   : > { %v12345_v7 = vmul.f32 0.25, %v3135_v6  ;;  %v3150_v8 = vsel %vm3146_vm1, %v12343_v5, -inf }
 0x609   : > { %3151 = vmax.xlane.f32.xlu0 %v3150_v8 }
 0x60a   : > { %v3147_v9 = vsel %vm3146_vm1, %v12345_v7, -inf }
 0x60b   : > { %3148 = vmax.xlane.f32.xlu1 %v3147_v9 }
 0x682   : > { %v8883_v10 = vpop.f32.mrf.mxu0 }
 0x683   : > { %v12351_v11 = vmul.f32 0.25, %v8883_v10 }
 0x684   : > { %v3328_v12 = vpop.f32.mrf.mxu0 }
 0x685   : > { %v12353_v13 = vmul.f32 0.25, %v3328_v12  ;;  %v3342_v14 = vsel %vm3146_vm1, %v12351_v11, -inf }
 0x686   : > { %3343 = vmax.xlane.f32.xlu0 %v3342_v14  ;;  %v8893_v15 = vpop.f32.mrf.mxu0 }
 0x687   : > { %v12357_v18 = vmul.f32 0.25, %v8893_v15  ;;  %v3339_v21 = vsel %vm3146_vm1, %v12353_v13, -inf }
 0x688   : > { %v3524_v17 = vpop.f32.mrf.mxu0 }
 0x689   : > { %v12359_v19 = vmul.f32 0.25, %v3524_v17  ;;  %v3538_v28 = vsel %vm3146_vm1, %v12357_v18, -inf }
 0x68a   : > { %v8903_v23 = vpop.f32.mrf.mxu0  ;;  %3340 = vmax.xlane.f32.xlu0 %v3339_v21 }
 0x68b   : > { %v3535_v24 = vsel %vm3146_vm1, %v12359_v19, -inf  ;;  %v12365_v26 = vmul.f32 0.25, %v8903_v23 }
 0x68c   : > { %v3719_v25 = vpop.f32.mrf.mxu0  ;;  %3536 = vmax.xlane.f32.xlu1 %v3535_v24 }
 0x68d   : > { %v12367_v27 = vmul.f32 0.25, %v3719_v25  ;;  %v3733_v36 = vsel %vm3146_vm1, %v12365_v26, -inf }
 0x68e   : > { %v8913_v29 = vpop.f32.mrf.mxu0  ;;  %3539 = vmax.xlane.f32.xlu0 %v3538_v28 }
 0x68f   : > { %v3730_v16 = vsel %vm3146_vm1, %v12367_v27, -inf  ;;  %v12373_v34 = vmul.f32 0.25, %v8913_v29 }
 0x690   : > { %v3914_v33 = vpop.f32.mrf.mxu0  ;;  %3731 = vmax.xlane.f32.xlu1 %v3730_v16 }
 0x691   : > { %v12375_v35 = vmul.f32 0.25, %v3914_v33  ;;  %v3928_v43 = vsel %vm3146_vm1, %v12373_v34, -inf }
 0x692   : > { %v8923_v37 = vpop.f32.mrf.mxu0  ;;  %3734 = vmax.xlane.f32.xlu0 %v3733_v36  ;;  %v3152_v55 = vpop.xlane.xlu0 %3151 }
 0x693   : > { %v3925_v38 = vsel %vm3146_vm1, %v12375_v35, -inf  ;;  %v12381_v41 = vmul.f32 0.25, %v8923_v37  ;;  %v3154_v56 = vsub.f32 %v12343_v5, %v3152_v55 }
 0x694   : > { %v4109_v40 = vpop.f32.mrf.mxu0  ;;  %3926 = vmax.xlane.f32.xlu1 %v3925_v38  ;;  %v3149_v63 = vpop.xlane.xlu1 %3148 }
 0x695   : > { %v12383_v42 = vmul.f32 0.25, %v4109_v40  ;;  %v4123_v49 = vsel %vm3146_vm1, %v12381_v41, -inf  ;;  %v3157_v57 = vmul.f32 1.442695, %v3154_v56  ;;  %v3153_v0 = vsub.f32 %v12345_v7, %v3149_v63 }
 0x696   : > { %v8933_v44 = vpop.f32.mrf.mxu0  ;;  %3929 = vmax.xlane.f32.xlu0 %v3928_v43 }
 0x697   : > { %v4120_v45 = vsel %vm3146_vm1, %v12383_v42, -inf  ;;  %v12389_v47 = vmul.f32 0.25, %v8933_v44  ;;  %9802 = vpow2.f32 %v3157_v57  ;;  %v3155_v1 = vmul.f32 1.442695, %v3153_v0 }
 0x698   : > { %v4304_v46 = vpop.f32.mrf.mxu0  ;;  %4121 = vmax.xlane.f32.xlu1 %v4120_v45 }
 0x699   : > { %v12391_v48 = vmul.f32 0.25, %v4304_v46  ;;  %v4318_v53 = vsel %vm3146_vm1, %v12389_v47, -inf  ;;  %9804 = vpow2.f32 %v3155_v1 }
 0x69a   : > { %v8943_v50 = vpop.f32.mrf.mxu0  ;;  %4124 = vmax.xlane.f32.xlu0 %v4123_v49 }
 0x69b   : > { %v4315_v51 = vsel %vm3146_vm1, %v12391_v48, -inf  ;;  %v12397_v52 = vmul.f32 0.25, %v8943_v50 }
 0x69c   : > { %4316 = vmax.xlane.f32.xlu1 %v4315_v51  ;;  %v4499_v58 = vpop.f32.mrf.mxu0 }
 0x69d   : > { %v4513_v54 = vsel %vm3146_vm1, %v12397_v52, -inf  ;;  %v12410_v59 = vmul.f32 0.25, %v4499_v58 }
 0x69e   : > { %4319 = vmax.xlane.f32.xlu0 %v4318_v53 }
 0x69f   : > { %v4510_v61 = vsel %vm3146_vm1, %v12410_v59, -inf }
 0x6a2   : > { %4514 = vmax.xlane.f32.xlu0 %v4513_v54 }
 0x6a4   : > { %v12412_v60 = vpop.eup %9802 }
 0x6a5   : > { %v3162_v62 = vsel %vm3146_vm1, %v12412_v60, 0.0 }
 0x6a6   : > { %v12421_v4 = vpop.eup %9804 }
 0x6a7   : > { %v3159_v5 = vsel %vm3146_vm1, %v12421_v4, 0.0 }
 0x6ad   : > { %3752 = vrot.lane.b32.xlu1 %v12281_v39, %s11441_s0 }
 0x6b1   : > { %3947 = vrot.lane.b32.xlu1 %v12281_v39, %s11440_s8 }
 0x6b8   : > { %3557 = vrot.lane.b32.xlu0 %v12281_v39, %s11438_s22 }
 0x6d5   : > { %4511 = vmax.xlane.f32.xlu1 %v4510_v61 }
 0x6d7   : > { %3163 = vadd.xlane.f32.xlu0 %v3162_v62 }
 0x6e6   : > { %4142 = vrot.lane.b32.xlu1 %v12281_v39, %s11442_s15 }
 0x70a   : > { %3160 = vadd.xlane.f32.xlu1 %v3159_v5 }
 0x70f   : > { %v3344_v6 = vpop.xlane.xlu0 %3343 }
 0x710   : > { %v3346_v8 = vsub.f32 %v12351_v11, %v3344_v6 }
 0x712   : > { %v3349_v9 = vmul.f32 1.442695, %v3346_v8 }
 0x713   : > { %v3341_v10 = vpop.xlane.xlu0 %3340 }
 0x714   : > { %9806 = vpow2.f32 %v3349_v9  ;;  %v3345_v12 = vsub.f32 %v12353_v13, %v3341_v10 }
 0x715   : > { %v3537_v14 = vpop.xlane.xlu1 %3536 }
 0x716   : > { %v3347_v15 = vmul.f32 1.442695, %v3345_v12  ;;  %v3541_v7 = vsub.f32 %v12359_v19, %v3537_v14 }
 0x717   : > { %v3540_v17 = vpop.xlane.xlu0 %3539 }
 0x718   : > { %9808 = vpow2.f32 %v3347_v15  ;;  %v3543_v21 = vmul.f32 1.442695, %v3541_v7  ;;  %v3542_v23 = vsub.f32 %v12357_v18, %v3540_v17 }
 0x719   : > { %v3732_v24 = vpop.xlane.xlu1 %3731 }
 0x71a   : > { %9810 = vpow2.f32 %v3543_v21  ;;  %v3545_v25 = vmul.f32 1.442695, %v3542_v23  ;;  %v3736_v28 = vsub.f32 %v12367_v27, %v3732_v24 }
 0x71b   : > { %v3735_v11 = vpop.xlane.xlu0 %3734 }
 0x71c   : > { %9812 = vpow2.f32 %v3545_v25  ;;  %v3738_v29 = vmul.f32 1.442695, %v3736_v28  ;;  %v3737_v16 = vsub.f32 %v12365_v26, %v3735_v11 }
 0x71d   : > { %v3927_v13 = vpop.xlane.xlu1 %3926 }
 0x71e   : > { %9814 = vpow2.f32 %v3738_v29  ;;  %v3740_v33 = vmul.f32 1.442695, %v3737_v16  ;;  %v3931_v19 = vsub.f32 %v12375_v35, %v3927_v13 }
 0x71f   : > { %v3930_v36 = vpop.xlane.xlu0 %3929 }
 0x720   : > { %9816 = vpow2.f32 %v3740_v33  ;;  %v3933_v37 = vmul.f32 1.442695, %v3931_v19  ;;  %v3932_v18 = vsub.f32 %v12373_v34, %v3930_v36 }
 0x721   : > { %v12433_v38 = vpop.eup %9806  ;;  %v4122_v40 = vpop.xlane.xlu1 %4121 }
 0x722   : > { %9818 = vpow2.f32 %v3933_v37  ;;  %v3935_v27 = vmul.f32 1.442695, %v3932_v18  ;;  %v4126_v43 = vsub.f32 %v12383_v42, %v4122_v40  ;;  %v3354_v26 = vsel %vm3146_vm1, %v12433_v38, 0.0 }
 0x723   : > { %3355 = vadd.xlane.f32.xlu0 %v3354_v26  ;;  %v4125_v44 = vpop.xlane.xlu0 %4124 }
 0x724   : > { %9820 = vpow2.f32 %v3935_v27  ;;  %v4128_v45 = vmul.f32 1.442695, %v4126_v43  ;;  %v4127_v35 = vsub.f32 %v12381_v41, %v4125_v44 }
 0x725   : > { %v12439_v46 = vpop.eup %9808  ;;  %v4317_v49 = vpop.xlane.xlu1 %4316 }
 0x726   : > { %9822 = vpow2.f32 %v4128_v45  ;;  %v4130_v34 = vmul.f32 1.442695, %v4127_v35  ;;  %v4321_v50 = vsub.f32 %v12391_v48, %v4317_v49  ;;  %v3351_v51 = vsel %vm3146_vm1, %v12439_v46, 0.0 }
 0x727   : > { %v12444_v42 = vpop.eup %9810  ;;  %v4320_v53 = vpop.xlane.xlu0 %4319  ;;  %3352 = vadd.xlane.f32.xlu1 %v3351_v51 }
 0x728   : > { %9824 = vpow2.f32 %v4130_v34  ;;  %v4323_v54 = vmul.f32 1.442695, %v4321_v50  ;;  %v4322_v55 = vsub.f32 %v12389_v47, %v4320_v53  ;;  %v3547_v48 = vsel %vm3146_vm1, %v12444_v42, 0.0 }
 0x729   : > { %v12447_v56 = vpop.eup %9812  ;;  %v12490_v25 = vpop.permute.xlu1 %3752 }
 0x72a   : > { %9826 = vpow2.f32 %v4323_v54  ;;  %v4325_v41 = vmul.f32 1.442695, %v4322_v55  ;;  %v3550_v57 = vsel %vm3146_vm1, %v12447_v56, 0.0 }
 0x72b   : > { %v12453_v58 = vpop.eup %9814  ;;  %3551 = vadd.xlane.f32.xlu0 %v3550_v57  ;;  %v4515_v61 = vpop.xlane.xlu0 %4514  ;;  %3548 = vadd.xlane.f32.xlu1 %v3547_v48 }
 0x72c   : > { %9828 = vpow2.f32 %v4325_v41  ;;  %v4517_v62 = vsub.f32 %v12397_v52, %v4515_v61  ;;  %v3742_v1 = vsel %vm3146_vm1, %v12453_v58, 0.0 }
 0x72d   : > { %v12456_v63 = vpop.eup %9816  ;;  %v12494_v28 = vpop.permute.xlu1 %3947 }
 0x72e   : > { %v4520_v47 = vmul.f32 1.442695, %v4517_v62  ;;  %v3745_v0 = vsel %vm3146_vm1, %v12456_v63, 0.0 }
 0x72f   : > { %v12462_v5 = vpop.eup %9818  ;;  %3746 = vadd.xlane.f32.xlu0 %v3745_v0  ;;  %3743 = vadd.xlane.f32.xlu1 %v3742_v1  ;;  %v3558_v19 = vpop.permute.xlu0 %3557 }
 0x730   : > { %9830 = vpow2.f32 %v4520_v47  ;;  %v3937_v52 = vsel %vm3146_vm1, %v12462_v5, 0.0 }
 0x731   : > { %v12464_v6 = vpop.eup %9820 }
 0x732   : > { %v3940_v8 = vsel %vm3146_vm1, %v12464_v6, 0.0 }
 0x733   : > { %v12470_v9 = vpop.eup %9822  ;;  %3941 = vadd.xlane.f32.xlu0 %v3940_v8  ;;  %3938 = vadd.xlane.f32.xlu1 %v3937_v52 }
 0x734   : > { %v4132_v14 = vsel %vm3146_vm1, %v12470_v9, 0.0 }
 0x735   : > { %v12472_v10 = vpop.eup %9824 }
 0x736   : > { %v4135_v12 = vsel %vm3146_vm1, %v12472_v10, 0.0 }
 0x737   : > { %v12478_v15 = vpop.eup %9826  ;;  %4136 = vadd.xlane.f32.xlu0 %v4135_v12  ;;  %4133 = vadd.xlane.f32.xlu1 %v4132_v14 }
 0x738   : > { %v4327_v21 = vsel %vm3146_vm1, %v12478_v15, 0.0 }
 0x739   : > { %v12480_v7 = vpop.eup %9828 }
 0x73a   : > { %v4330_v17 = vsel %vm3146_vm1, %v12480_v7, 0.0 }
 0x73b   : > { %4331 = vadd.xlane.f32.xlu0 %v4330_v17  ;;  %4328 = vadd.xlane.f32.xlu1 %v4327_v21 }
 0x73d   : > { %v12486_v23 = vpop.eup %9830 }
 0x73e   : > { %v4525_v24 = vsel %vm3146_vm1, %v12486_v23, 0.0 }
 0x73f   : > { %4526 = vadd.xlane.f32.xlu0 %v4525_v24 }
 0x755   : > { %4337 = vrot.lane.b32.xlu0 %v12281_v39, %s11443_s2 }
 0x75e   : > { %v4512_v11 = vpop.xlane.xlu1 %4511 }
 0x75f   : > { %v4516_v29 = vsub.f32 %v12410_v59, %v4512_v11 }
 0x760   : > { %v3164_v37 = vpop.xlane.xlu0 %3163 }
 0x761   : > { %v4518_v16 = vmul.f32 1.442695, %v4516_v29 }
 0x762   : > { %v12503_v36 = vpop.permute.xlu1 %4142 }
 0x763   : > { %9832 = vpow2.f32 %v4518_v16 }
 0x764   : > { %9834 = vrcp.f32 %v3164_v37 }
 0x770   : > { %v12497_v13 = vpop.eup %9832 }
 0x771   : > { %v4522_v33 = vsel %vm3146_vm1, %v12497_v13, 0.0  ;;  %v9835_v40 = vpop.eup %9834 }
 0x772   : > { %4523 = vadd.xlane.f32.xlu1 %v4522_v33  ;;  %v3168_v43 = vmul.f32 %v9835_v40, %v12412_v60 }
 0x783   : > { %4532 = vrot.lane.b32.xlu1 %v12281_v39, %s11444_s18 }
 0x793   : > { %v3161_v18 = vpop.xlane.xlu1 %3160 }
 0x794   : > { %9836 = vrcp.f32 %v3161_v18 }
 0x7a1   : > { %v9837_v59 = vpop.eup %9836 }
 0x7a2   : > { %v3166_v27 = vmul.f32 %v9837_v59, %v12421_v4 }
 0x7a4   : > { %8876 = vmatprep.mubr.msk.f32.mxu1 %vm3146_vm1, %v3166_v27  ;;  %v2677_v27 = vld [vmem:[#allocation22 + $0x78] sm:$0xff] }
 0x7a5   : > { %8877 = vmatmul.mubr.msk.f32.vlgmr.msra.gmra.mxu1 %vm3146_vm1, %v3168_v43  ;;  %v2676_v43 = vld [vmem:[#allocation22 + $0x70] sm:$0xff]  ;;  %8949 = vmatprep.subr.mxu0 %v2677_v27 }
 0x7a6   : > { %8885 = vmatpush3.msra.mxu1 %v12340_v3  ;;  %8950 = vmatpush3.msra.mxu0 %v2677_v27 }
 0x7a7   : > { %8894 = vmatprep.subr.mxu1 %v3558_v19  ;;  %8951 = vmatprep.subr.mxu0 %v2676_v43 }
 0x7a8   : > { %8952 = vmatpush3.msra.mxu0 %v2676_v43 }
 0x7ac   : > { %v3356_v39 = vpop.xlane.xlu0 %3355 }
 0x7ad   : > { %9838 = vrcp.f32 %v3356_v39 }
 0x7b0   : > { %v3353_v26 = vpop.xlane.xlu1 %3352 }
 0x7b1   : > { %9840 = vrcp.f32 %v3353_v26  ;;  %v2675_v26 = vld [vmem:[#allocation22 + $0x68] sm:$0xff] }
 0x7b2   : > { %8953 = vmatprep.subr.mxu0 %v2675_v26 }
 0x7b3   : > { %8954 = vmatpush3.msra.mxu0 %v2675_v26 }
 0x7b4   : > { %v3552_v44 = vpop.xlane.xlu0 %3551  ;;  %v3549_v45 = vpop.xlane.xlu1 %3548 }
 0x7b5   : > { %9842 = vrcp.f32 %v3552_v44 }
 0x7b6   : > { %9844 = vrcp.f32 %v3549_v45 }
 0x7b8   : > { %v3747_v35 = vpop.xlane.xlu0 %3746  ;;  %v3744_v49 = vpop.xlane.xlu1 %3743 }
 0x7b9   : > { %9846 = vrcp.f32 %v3747_v35  ;;  %v2674_v35 = vld [vmem:[#allocation22 + $0x60] sm:$0xff] }
 0x7ba   : > { %9848 = vrcp.f32 %v3744_v49  ;;  %v9839_v34 = vpop.eup %9838  ;;  %8955 = vmatprep.subr.mxu0 %v2674_v35 }
 0x7bb   : > { %v3360_v54 = vmul.f32 %v9839_v34, %v12433_v38  ;;  %8956 = vmatpush3.msra.mxu0 %v2674_v35 }
 0x7bc   : > { %v3942_v60 = vpop.xlane.xlu0 %3941  ;;  %v3939_v4 = vpop.xlane.xlu1 %3938 }
 0x7bd   : > { %9850 = vrcp.f32 %v3942_v60  ;;  %v2673_v60 = vld [vmem:[#allocation22 + $0x58] sm:$0xff] }
 0x7be   : > { %v9841_v50 = vpop.eup %9840  ;;  %9852 = vrcp.f32 %v3939_v4  ;;  %8957 = vmatprep.subr.mxu0 %v2673_v60 }
 0x7bf   : > { %v3358_v3 = vmul.f32 %v9841_v50, %v12439_v46  ;;  %v2672_v50 = vld [vmem:[#allocation22 + $0x50] sm:$0xff]  ;;  %8958 = vmatpush3.msra.mxu0 %v2673_v60 }
 0x7c0   : > { %v4137_v51 = vpop.xlane.xlu0 %4136  ;;  %v4134_v53 = vpop.xlane.xlu1 %4133  ;;  %8959 = vmatprep.subr.mxu0 %v2672_v50 }
 0x7c1   : > { %9854 = vrcp.f32 %v4137_v51  ;;  %8886 = vmatprep.mubr.msk.f32.mxu1 %vm3146_vm1, %v3358_v3  ;;  %v2671_v51 = vld [vmem:[#allocation22 + $0x48] sm:$0xff]  ;;  %8960 = vmatpush3.msra.mxu0 %v2672_v50  ;;  %v2590_v50 = vld [vmem:[%s13195_s9 + $0xf8] sm:$0xff] }
 0x7c2   : > { %v9843_v55 = vpop.eup %9842  ;;  %9856 = vrcp.f32 %v4134_v53  ;;  %8887 = vmatmul.mubr.msk.f32.vlgmr.msra.gmra.mxu1 %vm3146_vm1, %v3360_v54  ;;  %v2670_v54 = vld [vmem:[#allocation22 + $0x40] sm:$0xff]  ;;  %8961 = vmatprep.subr.mxu0 %v2671_v51 }
 0x7c3   : > { %v9845_v41 = vpop.eup %9844  ;;  %8895 = vmatpush3.msra.mxu1 %v3558_v19  ;;  %v3556_v57 = vmul.f32 %v9843_v55, %v12447_v56  ;;  %8962 = vmatpush3.msra.mxu0 %v2671_v51  ;;  %v2669_v55 = vld [vmem:[#allocation22 + $0x38] sm:$0xff]  ;;  %v2588_v51 = vld [vmem:[%s13195_s9 + $0xe8] sm:$0xff] }
 0x7c4   : > { %8904 = vmatprep.subr.mxu1 %v12490_v25  ;;  %v4332_v48 = vpop.xlane.xlu0 %4331  ;;  %v4329_v61 = vpop.xlane.xlu1 %4328  ;;  %v3554_v46 = vmul.f32 %v9845_v41, %v12444_v42  ;;  %8963 = vmatprep.subr.mxu0 %v2670_v54  ;;  %v2668_v41 = vld [vmem:[#allocation22 + $0x30] sm:$0xff] }
 0x7c5   : > { %9858 = vrcp.f32 %v4332_v48  ;;  %8964 = vmatpush3.msra.mxu0 %v2670_v54  ;;  %v2666_v48 = vld [vmem:[#allocation22 + $0x20] sm:$0xff]  ;;  %v2586_v54 = vld [vmem:[%s13195_s9 + $0xd8] sm:$0xff] }
 0x7c6   : > { %v9847_v62 = vpop.eup %9846  ;;  %9860 = vrcp.f32 %v4329_v61  ;;  %8896 = vmatprep.mubr.msk.f32.mxu1 %vm3146_vm1, %v3554_v46  ;;  %8965 = vmatprep.subr.mxu0 %v2669_v55  ;;  %v2665_v61 = vld [vmem:[#allocation22 + $0x18] sm:$0xff]  ;;  %v2664_v46 = vld [vmem:[#allocation22 + $0x10] sm:$0xff] }
 0x7c7   : > { %v9849_v38 = vpop.eup %9848  ;;  %8897 = vmatmul.mubr.msk.f32.vlgmr.msra.gmra.mxu1 %vm3146_vm1, %v3556_v57  ;;  %v3751_v47 = vmul.f32 %v9847_v62, %v12456_v63  ;;  %8966 = vmatpush3.msra.mxu0 %v2669_v55  ;;  %v2667_v57 = vld [vmem:[#allocation22 + $0x28] sm:$0xff] }
 0x7c8   : > { %8905 = vmatpush3.msra.mxu1 %v12490_v25  ;;  %v3749_v56 = vmul.f32 %v9849_v38, %v12453_v58  ;;  %v4527_v1 = vpop.xlane.xlu0 %4526  ;;  %8967 = vmatprep.subr.mxu0 %v2668_v41  ;;  %v2663_v62 = vld [vmem:[#allocation22 + $0x8] sm:$0xff]  ;;  %v2662_v38 = vld [vmem:[#allocation22] sm:$0xff] }
 0x7c9   : > { %8914 = vmatprep.subr.mxu1 %v12494_v28  ;;  %9862 = vrcp.f32 %v4527_v1  ;;  %8968 = vmatpush3.msra.mxu0 %v2668_v41  ;;  %v2585_v55 = vld [vmem:[%s13195_s9 + $0xd0] sm:$0xff]  ;;  %v2584_v41 = vld [vmem:[%s13195_s9 + $0xc8] sm:$0xff] }
 0x7ca   : > { %v9851_v0 = vpop.eup %9850  ;;  %8906 = vmatprep.mubr.msk.f32.mxu1 %vm3146_vm1, %v3749_v56  ;;  %8969 = vmatprep.subr.mxu0 %v2667_v57 }
 0x7cb   : > { %v9853_v42 = vpop.eup %9852  ;;  %8907 = vmatmul.mubr.msk.f32.vlgmr.msra.gmra.mxu1 %vm3146_vm1, %v3751_v47  ;;  %v3946_v8 = vmul.f32 %v9851_v0, %v12464_v6  ;;  %8970 = vmatpush3.msra.mxu0 %v2667_v57  ;;  %v2583_v57 = vld [vmem:[%s13195_s9 + $0xc0] sm:$0xff] }
 0x7cc   : > { %8915 = vmatpush3.msra.mxu1 %v12494_v28  ;;  %v3944_v52 = vmul.f32 %v9853_v42, %v12462_v5  ;;  %v4338_v14 = vpop.permute.xlu0 %4337  ;;  %8971 = vmatprep.subr.mxu0 %v2666_v48 }
 0x7cd   : > { %8924 = vmatprep.subr.mxu1 %v12503_v36  ;;  %8972 = vmatpush3.msra.mxu0 %v2666_v48 }
 0x7ce   : > { %v9855_v63 = vpop.eup %9854  ;;  %8916 = vmatprep.mubr.msk.f32.mxu1 %vm3146_vm1, %v3944_v52  ;;  %8973 = vmatprep.subr.mxu0 %v2665_v61 }
 0x7cf   : > { %v9857_v58 = vpop.eup %9856  ;;  %8917 = vmatmul.mubr.msk.f32.vlgmr.msra.gmra.mxu1 %vm3146_vm1, %v3946_v8  ;;  %v4141_v12 = vmul.f32 %v9855_v63, %v12472_v10  ;;  %8974 = vmatpush3.msra.mxu0 %v2665_v61 }
 0x7d0   : > { %8925 = vmatpush3.msra.mxu1 %v12503_v36  ;;  %v4139_v17 = vmul.f32 %v9857_v58, %v12470_v9  ;;  %8975 = vmatprep.subr.mxu0 %v2664_v46 }
 0x7d1   : > { %8934 = vmatprep.subr.mxu1 %v4338_v14  ;;  %8976 = vmatpush3.msra.mxu0 %v2664_v46 }
 0x7d2   : > { %v9859_v6 = vpop.eup %9858  ;;  %8926 = vmatprep.mubr.msk.f32.mxu1 %vm3146_vm1, %v4139_v17  ;;  %8977 = vmatprep.subr.mxu0 %v2663_v62 }
 0x7d3   : > { %v9861_v5 = vpop.eup %9860  ;;  %8927 = vmatmul.mubr.msk.f32.vlgmr.msra.gmra.mxu1 %vm3146_vm1, %v4141_v12  ;;  %v4336_v21 = vmul.f32 %v9859_v6, %v12480_v7  ;;  %8978 = vmatpush3.msra.mxu0 %v2663_v62 }
 0x7d4   : > { %8935 = vmatpush3.msra.mxu1 %v4338_v14  ;;  %v4334_v24 = vmul.f32 %v9861_v5, %v12478_v15  ;;  %8979 = vmatprep.subr.mxu0 %v2662_v38 }
 0x7d5   : > { %8980 = vmatpush3.msra.mxu0 %v2662_v38 }
 0x7d6   : > { %8936 = vmatprep.mubr.msk.f32.mxu1 %vm3146_vm1, %v4334_v24  ;;  %v9863_v25 = vpop.eup %9862 }
 0x7d7   : > { %8937 = vmatmul.mubr.msk.f32.vlgmr.msra.gmra.mxu1 %vm3146_vm1, %v4336_v21  ;;  %v4531_v29 = vmul.f32 %v9863_v25, %v12486_v23 }
 0x7fb   : > { %v4524_v10 = vpop.xlane.xlu1 %4523 }
 0x7fc   : > { %9864 = vrcp.f32 %v4524_v10 }
 0x7ff   : > { %v4533_v9 = vpop.permute.xlu1 %4532 }
 0x800   : > { %8944 = vmatprep.subr.mxu1 %v4533_v9 }
 0x801   : > { %8945 = vmatpush3.msra.mxu1 %v4533_v9 }
 0x802   : > { %4824 = vmatprep.subr.mxu1 %v2590_v50  ;;  %v2613_v50 = vld [vmem:[%s13196_s4 + $0xa8] sm:$0xff] }
 0x809   : > { %v9865_v28 = vpop.eup %9864 }
 0x80a   : > { %v4529_v11 = vmul.f32 %v9865_v28, %v12497_v13 }
 0x80c   : > { %8946 = vmatprep.mubr.msk.f32.mxu1 %vm3146_vm1, %v4529_v11 }
 0x80d   : > { %8947 = vmatmul.mubr.msk.f32.vlgmr.msra.gmra.mxu1 %vm3146_vm1, %v4531_v29 }
 0x80e   : > { %4888 = vmatprep.mubr.f32.mxu1 %v11437_v2 }
 0x865   : > { %v12545_v15 = vpop.f32.mrf.mxu1 }
 0x867   : > { %v12547_v7 = vpop.f32.mrf.mxu1 }
 0x882   : > { %v8888_v16 = vpop.f32.mrf.mxu1 }
 0x884   : > { %v3437_v33 = vpop.f32.mrf.mxu1 }
 0x885   : > { %v9761_v19 = vpack.i.bf16 %v8888_v16, %v3437_v33 }
 0x887   : > { %v8898_v36 = vpop.f32.mrf.mxu1  ;;  %9762 = vrot.lane.b32.xlu0 %v9761_v19, %s11444_s18 }
 0x889   : > { %v3632_v37 = vpop.f32.mrf.mxu1 }
 0x88a   : > { %v9766_v13 = vpack.i.bf16 %v8898_v36, %v3632_v37 }
 0x88b   : > { %v8908_v18 = vpop.f32.mrf.mxu1 }
 0x88c   : > { %9767 = vrot.lane.b32.xlu1 %v9766_v13, %s11443_s2 }
 0x88d   : > { %v3827_v23 = vpop.f32.mrf.mxu1 }
 0x88e   : > { %v9771_v40 = vpack.i.bf16 %v8908_v18, %v3827_v23 }
 0x88f   : > { %v8918_v59 = vpop.f32.mrf.mxu1 }
 0x890   : > { %9772 = vrot.lane.b32.xlu0 %v9771_v40, %s11442_s15 }
 0x891   : > { %v4022_v39 = vpop.f32.mrf.mxu1 }
 0x892   : > { %v9776_v44 = vpack.i.bf16 %v8918_v59, %v4022_v39 }
 0x893   : > { %v8928_v45 = vpop.f32.mrf.mxu1 }
 0x894   : > { %9777 = vrot.lane.b32.xlu1 %v9776_v44, %s11440_s8  ;;  %v8449_v44 = vld [vmem:[%s13194_s28] ss:$0 sm:$0xff] }
 0x895   : > { %v4217_v49 = vpop.f32.mrf.mxu1 }
 0x896   : > { %v9781_v4 = vpack.i.bf16 %v8928_v45, %v4217_v49 }
 0x897   : > { %v8938_v34 = vpop.f32.mrf.mxu1 }
 0x898   : > { %9782 = vrot.lane.b32.xlu0 %v9781_v4, %s11441_s0 }
 0x899   : > { %v4412_v3 = vpop.f32.mrf.mxu1 }
 0x89a   : > { %v9786_v53 = vpack.i.bf16 %v8938_v34, %v4412_v3  ;;  %v2589_v3 = vld [vmem:[%s13195_s9 + $0xf0] sm:$0xff] }
 0x89b   : > { %4825 = vmatpush1.msra.mxu1 %v2589_v3  ;;  %v2597_v3 = vld [vmem:[%s13196_s4 + $0x28] sm:$0xff] }
 0x89c   : > { %9787 = vrot.lane.b32.xlu1 %v9786_v53, %s11438_s22  ;;  %v2587_v53 = vld [vmem:[%s13195_s9 + $0xe0] sm:$0xff]  ;;  %4826 = vmatprep.subr.mxu1 %v2588_v51 }
 0x89d   : > { %4827 = vmatpush1.msra.mxu1 %v2587_v53  ;;  %v2612_v51 = vld [vmem:[%s13196_s4 + $0xa0] sm:$0xff] }
 0x89e   : > { %4828 = vmatprep.subr.mxu1 %v2586_v54  ;;  %v2596_v53 = vld [vmem:[%s13196_s4 + $0x20] sm:$0xff] }
 0x89f   : > { %4829 = vmatpush1.msra.mxu1 %v2585_v55 }
 0x8a0   : > { %4830 = vmatprep.subr.mxu1 %v2584_v41 }
 0x8a1   : > { %4831 = vmatpush1.msra.mxu1 %v2583_v57 }
 0x8cd   : > { %v8948_v47 = vpop.f32.mrf.mxu1 }
 0x8cf   : > { %v4607_v56 = vpop.f32.mrf.mxu1 }
 0x8d0   : > { %v9791_v0 = vpack.i.bf16 %v8948_v47, %v4607_v56  ;;  %v2582_v56 = vld [vmem:[%s13195_s9 + $0xb8] sm:$0xff] }
 0x8d1   : > { %4832 = vmatprep.subr.mxu1 %v2582_v56 }
 0x8d2   : > { %9792 = vrot.lane.b32.xlu0 %v9791_v0, %s11439_s5  ;;  %v2581_v0 = vld [vmem:[%s13195_s9 + $0xb0] sm:$0xff] }
 0x8d3   : > { %4833 = vmatpush1.msra.mxu1 %v2581_v0 }
 0x8f9   : > { %v9763_v1 = vpop.permute.xlu0 %9762 }
 0x8fa   : > { %v9765_v63 = vunpack.i.h.bf16 %v9763_v1  ;;  %v9764_v58 = vunpack.i.l.bf16 %v9763_v1  ;;  %v2580_v1 = vld [vmem:[%s13195_s9 + $0xa8] sm:$0xff] }
 0x8fb   : > { %4834 = vmatprep.subr.mxu1 %v2580_v1 }
 0x8fc   : > { %v4673_v9 = vsel %vm3059_vm0, %v12545_v15, %v9765_v63  ;;  %v4672_v25 = vsel %vm3059_vm0, %v12547_v7, %v9764_v58  ;;  %v2576_v63 = vld [vmem:[%s13195_s9 + $0x88] sm:$0xff]  ;;  %v2575_v58 = vld [vmem:[%s13195_s9 + $0x80] sm:$0xff] }
 0x8fe   : > { %v9768_v42 = vpop.permute.xlu1 %9767 }
 0x8ff   : > { %v9770_v12 = vunpack.i.h.bf16 %v9768_v42  ;;  %v9769_v14 = vunpack.i.l.bf16 %v9768_v42  ;;  %v2579_v42 = vld [vmem:[%s13195_s9 + $0xa0] sm:$0xff] }
 0x900   : > { %4835 = vmatpush1.msra.mxu1 %v2579_v42 }
 0x901   : > { %v4676_v29 = vsel %vm4674_vm2, %v4673_v9, %v9770_v12  ;;  %v4675_v16 = vsel %vm4674_vm2, %v4672_v25, %v9769_v14  ;;  %v2574_v12 = vld [vmem:[%s13195_s9 + $0x78] sm:$0xff]  ;;  %v2573_v14 = vld [vmem:[%s13195_s9 + $0x70] sm:$0xff] }
 0x902   : > { %v9773_v8 = vpop.permute.xlu0 %9772  ;;  %v2566_v9 = vld [vmem:[%s13195_s9 + $0x38] sm:$0xff]  ;;  %v2565_v25 = vld [vmem:[%s13195_s9 + $0x30] sm:$0xff] }
 0x903   : > { %v9775_v6 = vunpack.i.h.bf16 %v9773_v8  ;;  %v9774_v5 = vunpack.i.l.bf16 %v9773_v8  ;;  %v2578_v8 = vld [vmem:[%s13195_s9 + $0x98] sm:$0xff] }
 0x904   : > { %4836 = vmatprep.subr.mxu1 %v2578_v8 }
 0x905   : > { %v4678_v36 = vsel %vm4677_vm3, %v4675_v16, %v9774_v5  ;;  %v4679_v37 = vsel %vm4677_vm3, %v4676_v29, %v9775_v6  ;;  %v2571_v6 = vld [vmem:[%s13195_s9 + $0x60] sm:$0xff]  ;;  %v2570_v5 = vld [vmem:[%s13195_s9 + $0x58] sm:$0xff]  ;;  %v2561_v16 = vld [vmem:[%s13195_s9 + $0x10] sm:$0xff] }
 0x906   : > { %v9778_v52 = vpop.permute.xlu1 %9777  ;;  %v2562_v29 = vld [vmem:[%s13195_s9 + $0x18] sm:$0xff] }
 0x907   : > { %v9780_v24 = vunpack.i.h.bf16 %v9778_v52  ;;  %v9779_v10 = vunpack.i.l.bf16 %v9778_v52  ;;  %v2577_v52 = vld [vmem:[%s13195_s9 + $0x90] sm:$0xff] }
 0x908   : > { %4837 = vmatpush1.msra.mxu1 %v2577_v52 }
 0x909   : > { %v4681_v13 = vsel %vm4680_vm4, %v4678_v36, %v9779_v10  ;;  %v4682_v15 = vsel %vm4680_vm4, %v4679_v37, %v9780_v24  ;;  %4838 = vmatprep.subr.mxu1 %v2576_v63  ;;  %v2568_v24 = vld [vmem:[%s13195_s9 + $0x48] sm:$0xff]  ;;  %v2567_v10 = vld [vmem:[%s13195_s9 + $0x40] sm:$0xff]  ;;  %v2623_v36 = vld [vmem:[%s13196_s4 + $0xf8] sm:$0xff] }
 0x90a   : > { %v9783_v17 = vpop.permute.xlu0 %9782  ;;  %4839 = vmatpush1.msra.mxu1 %v2575_v58  ;;  %v2607_v37 = vld [vmem:[%s13196_s4 + $0x78] sm:$0xff]  ;;  %8628 = vmatprep.subr.mxu0 %v2623_v36  ;;  %v2610_v58 = vld [vmem:[%s13196_s4 + $0x90] sm:$0xff] }
 0x90b   : > { %v9785_v28 = vunpack.i.h.bf16 %v9783_v17  ;;  %v9784_v11 = vunpack.i.l.bf16 %v9783_v17  ;;  %v2572_v17 = vld [vmem:[%s13195_s9 + $0x68] sm:$0xff]  ;;  %4840 = vmatprep.subr.mxu1 %v2574_v12  ;;  %v2611_v63 = vld [vmem:[%s13196_s4 + $0x98] sm:$0xff]  ;;  %v2594_v12 = vld [vmem:[%s13196_s4 + $0x10] sm:$0xff] }
 0x90c   : > { %4841 = vmatpush1.msra.mxu1 %v2573_v14  ;;  %v2609_v14 = vld [vmem:[%s13196_s4 + $0x88] sm:$0xff] }
 0x90d   : > { %v4684_v40 = vsel %vm4683_vm5, %v4681_v13, %v9784_v11  ;;  %v4685_v59 = vsel %vm4683_vm5, %v4682_v15, %v9785_v28  ;;  %4842 = vmatprep.subr.mxu1 %v2572_v17  ;;  %v2564_v28 = vld [vmem:[%s13195_s9 + $0x28] sm:$0xff]  ;;  %v2563_v11 = vld [vmem:[%s13195_s9 + $0x20] sm:$0xff]  ;;  %v2622_v13 = vld [vmem:[%s13196_s4 + $0xf0] sm:$0xff] }
 0x90e   : > { %v9788_v21 = vpop.permute.xlu1 %9787  ;;  %4843 = vmatpush1.msra.mxu1 %v2571_v6  ;;  %v2606_v15 = vld [vmem:[%s13196_s4 + $0x70] sm:$0xff]  ;;  %v2608_v17 = vld [vmem:[%s13196_s4 + $0x80] sm:$0xff] }
 0x90f   : > { %v9790_v33 = vunpack.i.h.bf16 %v9788_v21  ;;  %v9789_v19 = vunpack.i.l.bf16 %v9788_v21  ;;  %v2569_v21 = vld [vmem:[%s13195_s9 + $0x50] sm:$0xff]  ;;  %4844 = vmatprep.subr.mxu1 %v2570_v5  ;;  %v2592_v6 = vld [vmem:[%s13196_s4] sm:$0xff] }
 0x910   : > { %4845 = vmatpush1.msra.mxu1 %v2569_v21 }
 0x911   : > { %v4687_v27 = vsel %vm4686_vm6, %v4684_v40, %v9789_v19  ;;  %v4688_v43 = vsel %vm4686_vm6, %v4685_v59, %v9790_v33  ;;  %4846 = vmatprep.subr.mxu1 %v2568_v24  ;;  %v2560_v33 = vld [vmem:[%s13195_s9 + $0x8] sm:$0xff]  ;;  %v2559_v19 = vld [vmem:[%s13195_s9] sm:$0xff]  ;;  %v2619_v59 = vld [vmem:[%s13196_s4 + $0xd8] sm:$0xff] }
 0x912   : > { %4847 = vmatpush1.msra.mxu1 %v2567_v10  ;;  %v2604_v40 = vld [vmem:[%s13196_s4 + $0x60] sm:$0xff] }
 0x913   : > { %4848 = vmatprep.subr.mxu1 %v2566_v9 }
 0x914   : > { %4849 = vmatpush1.msra.mxu1 %v2565_v25 }
 0x915   : > { %4850 = vmatprep.subr.mxu1 %v2564_v28 }
 0x916   : > { %4851 = vmatpush1.msra.mxu1 %v2563_v11 }
 0x917   : > { %4852 = vmatprep.subr.mxu1 %v2562_v29 }
 0x918   : > { %4853 = vmatpush1.msra.mxu1 %v2561_v16 }
 0x919   : > { %4854 = vmatprep.subr.mxu1 %v2560_v33 }
 0x91a   : > { %4855 = vmatpush1.msra.mxu1 %v2559_v19 }
 0x944   : > { %v9793_v18 = vpop.permute.xlu0 %9792 }
 0x945   : > { %v9795_v7 = vunpack.i.h.bf16 %v9793_v18  ;;  %v9794_v23 = vunpack.i.l.bf16 %v9793_v18  ;;  %v2621_v18 = vld [vmem:[%s13196_s4 + $0xe8] sm:$0xff] }
 0x947   : > { %v4690_v39 = vsel %vm4689_vm7, %v4687_v27, %v9794_v23  ;;  %v4691_v26 = vsel %vm4689_vm7, %v4688_v43, %v9795_v7  ;;  %v2605_v7 = vld [vmem:[%s13196_s4 + $0x68] sm:$0xff]  ;;  %v2620_v23 = vld [vmem:[%s13196_s4 + $0xe0] sm:$0xff]  ;;  %v2603_v27 = vld [vmem:[%s13196_s4 + $0x58] sm:$0xff] }
 0x948   : > { %8981 = vmatprep.mubr.f32.mxu0 %v4690_v39  ;;  %v2618_v43 = vld [vmem:[%s13196_s4 + $0xd0] sm:$0xff] }
 0x949   : > { %8982 = vmatmul.mubr.f32.vlgmr.msra.gmra.mxu0 %v4691_v26  ;;  %v2602_v39 = vld [vmem:[%s13196_s4 + $0x50] sm:$0xff]  ;;  %v2617_v26 = vld [vmem:[%s13196_s4 + $0xc8] sm:$0xff] }
 0x94a   : > { %8629 = vmatpush3.msra.mxu0 %v2607_v37 }
 0x94b   : > { %8630 = vmatprep.subr.mxu0 %v2622_v13 }
 0x94c   : > { %8631 = vmatpush3.msra.mxu0 %v2606_v15 }
 0x94d   : > { %8632 = vmatprep.subr.mxu0 %v2621_v18 }
 0x94e   : > { %8633 = vmatpush3.msra.mxu0 %v2605_v7 }
 0x94f   : > { %8634 = vmatprep.subr.mxu0 %v2620_v23 }
 0x950   : > { %8635 = vmatpush3.msra.mxu0 %v2604_v40 }
 0x951   : > { %8636 = vmatprep.subr.mxu0 %v2619_v59 }
 0x952   : > { %8637 = vmatpush3.msra.mxu0 %v2603_v27 }
 0x953   : > { %8638 = vmatprep.subr.mxu0 %v2618_v43  ;;  %v2808_v43 = vld [vmem:[%s13197_s7 + $0x78] sm:$0xff] }
 0x954   : > { %8639 = vmatpush3.msra.mxu0 %v2602_v39  ;;  %v2807_v39 = vld [vmem:[%s13197_s7 + $0x70] sm:$0xff]  ;;  %8984 = vmatprep.subr.mxu1 %v2808_v43 }
 0x955   : > { %8640 = vmatprep.subr.mxu0 %v2617_v26 }
 0xa09   : > { %v8983_v45 = vpop.f32.mrf.mxu0 }
 0xa0a   : > { %v4770_v35 = vadd.f32 %v8983_v45, %v8449_v44  ;;  %v2616_v45 = vld [vmem:[%s13196_s4 + $0xc0] sm:$0xff] }
 0xa0b   : > { %v4764_v49 = vpop.f32.mrf.mxu0 }
 0xa0c   : > { %v4765_v60 = vadd.f32 %v8449_v44, %v4764_v49  ;;  %v4774_v4 = vadd.f32 %v4770_v35, %v12267_v30  ;;  %v2601_v44 = vld [vmem:[%s13196_s4 + $0x48] sm:$0xff]  ;;  %v2600_v35 = vld [vmem:[%s13196_s4 + $0x40] sm:$0xff]  ;;  %v2615_v49 = vld [vmem:[%s13196_s4 + $0xb8] sm:$0xff] }
 0xa0d   : > { %8641 = vmatpush3.msra.mxu0 %v2601_v44 }
 0xa0e   : > { %4777 = vadd.xlane.f32.xlu0 %v4774_v4  ;;  %v4773_v34 = vadd.f32 %v4765_v60, %v12269_v31  ;;  %8642 = vmatprep.subr.mxu0 %v2616_v45  ;;  %v2599_v60 = vld [vmem:[%s13196_s4 + $0x38] sm:$0xff] }
 0xa0f   : > { %8643 = vmatpush3.msra.mxu0 %v2600_v35 }
 0xa10   : > { %4775 = vadd.xlane.f32.xlu1 %v4773_v34  ;;  %8644 = vmatprep.subr.mxu0 %v2615_v49 }
 0xa11   : > { %8645 = vmatpush3.msra.mxu0 %v2599_v60 }
 0xa97   : > { %v4778_v30 = vpop.xlane.xlu0 %4777 }
 0xa98   : > { %v4780_v48 = vmul.f32 0.0078125, %v4778_v30 }
 0xa99   : > { %v4776_v31 = vpop.xlane.xlu1 %4775 }
 0xa9a   : > { %v4779_v61 = vmul.f32 0.0078125, %v4776_v31  ;;  %v12583_v38 = vsub.f32 %v4774_v4, %v4780_v48  ;;  %v2614_v4 = vld [vmem:[%s13196_s4 + $0xb0] sm:$0xff] }
 0xa9b   : > { %8646 = vmatprep.subr.mxu0 %v2614_v4 }
 0xa9c   : > { %v12579_v46 = vsub.f32 %v4773_v34, %v4779_v61  ;;  %v4784_v47 = vmul.f32 %v12583_v38, %v12583_v38  ;;  %v2598_v34 = vld [vmem:[%s13196_s4 + $0x30] sm:$0xff]  ;;  %v8450_v61 = vld [vmem:[#allocation16] ss:$0 sm:$0xff] }
 0xa9d   : > { %8647 = vmatpush3.msra.mxu0 %v2598_v34 }
 0xa9e   : > { %v4783_v62 = vmul.f32 %v12579_v46, %v12579_v46  ;;  %8648 = vmatprep.subr.mxu0 %v2613_v50  ;;  %v2806_v50 = vld [vmem:[%s13197_s7 + $0x68] sm:$0xff] }
 0xa9f   : > { %8649 = vmatpush3.msra.mxu0 %v2597_v3  ;;  %v2805_v3 = vld [vmem:[%s13197_s7 + $0x60] sm:$0xff] }
 0xaa0   : > { %4785 = vadd.xlane.f32.xlu0 %v4783_v62  ;;  %8650 = vmatprep.subr.mxu0 %v2612_v51  ;;  %v2804_v51 = vld [vmem:[%s13197_s7 + $0x58] sm:$0xff] }
 0xaa1   : > { %8651 = vmatpush3.msra.mxu0 %v2596_v53  ;;  %v2803_v53 = vld [vmem:[%s13197_s7 + $0x50] sm:$0xff] }
 0xaa2   : > { %8652 = vmatprep.subr.mxu0 %v2611_v63 }
 0xaa4   : > { %4787 = vadd.xlane.f32.xlu0 %v4784_v47  ;;  %v8451_v47 = vld [vmem:[#allocation14] ss:$0 sm:$0xff] }
 0xb29   : > { %v4786_v54 = vpop.xlane.xlu0 %4785 }
 0xb2a   : > { %v4789_v55 = vmul.f32 0.0078125, %v4786_v54  ;;  %v2802_v54 = vld [vmem:[%s13197_s7 + $0x48] sm:$0xff] }
 0xb2c   : > { %v4791_v41 = vadd.f32 1e-05, %v4789_v55  ;;  %v2801_v55 = vld [vmem:[%s13197_s7 + $0x40] sm:$0xff] }
 0xb2d   : > { %v4788_v57 = vpop.xlane.xlu0 %4787 }
 0xb2e   : > { %9866 = vrsqrt.f32 %v4791_v41  ;;  %v4790_v30 = vmul.f32 0.0078125, %v4788_v57  ;;  %v2800_v41 = vld [vmem:[%s13197_s7 + $0x38] sm:$0xff]  ;;  %v2799_v57 = vld [vmem:[%s13197_s7 + $0x30] sm:$0xff] }
 0xb30   : > { %v4792_v31 = vadd.f32 1e-05, %v4790_v30  ;;  %v2798_v30 = vld [vmem:[%s13197_s7 + $0x28] sm:$0xff] }
 0xb32   : > { %9868 = vrsqrt.f32 %v4792_v31  ;;  %v2797_v31 = vld [vmem:[%s13197_s7 + $0x20] sm:$0xff] }
 0xb3b   : > { %v9867_v48 = vpop.eup %9866 }
 0xb3c   : > { %v4795_v62 = vmul.f32 %v9867_v48, %v12579_v46  ;;  %v2595_v46 = vld [vmem:[%s13196_s4 + $0x18] sm:$0xff] }
 0xb3d   : > { %8653 = vmatpush3.msra.mxu0 %v2595_v46  ;;  %v2796_v48 = vld [vmem:[%s13197_s7 + $0x18] sm:$0xff]  ;;  %v8453_v46 = vld [vmem:[#allocation19] ss:$0 sm:$0xff] }
 0xb3e   : > { %v4803_v56 = vmul.f32 %v8450_v61, %v4795_v62  ;;  %8654 = vmatprep.subr.mxu0 %v2610_v58  ;;  %v2794_v62 = vld [vmem:[%s13197_s7 + $0x8] sm:$0xff] }
 0xb3f   : > { %v9869_v0 = vpop.eup %9868  ;;  %8655 = vmatpush3.msra.mxu0 %v2594_v12  ;;  %v8454_v12 = vld [vmem:[#allocation17] ss:$0 sm:$0xff] }
 0xb40   : > { %v4811_v1 = vadd.f32 %v8451_v47, %v4803_v56  ;;  %v4796_v42 = vmul.f32 %v9869_v0, %v12583_v38  ;;  %8656 = vmatprep.subr.mxu0 %v2609_v14  ;;  %v2593_v38 = vld [vmem:[%s13196_s4 + $0x8] sm:$0xff] }
 0xb41   : > { %8657 = vmatpush3.msra.mxu0 %v2593_v38 }
 0xb42   : > { %4889 = vmatmul.mubr.f32.vlgmr.msra.gmra.mxu1 %v4811_v1  ;;  %v4804_v8 = vmul.f32 %v8450_v61, %v4796_v42  ;;  %8658 = vmatprep.subr.mxu0 %v2608_v17  ;;  %v2795_v61 = vld [vmem:[%s13197_s7 + $0x10] sm:$0xff] }
 0xb43   : > { %4894 = vmatprep.mubr.f32.mxu1 %v11437_v2  ;;  %8659 = vmatpush3.msra.mxu0 %v2592_v6  ;;  %v2558_v2 = vld [vmem:[#allocation8] sm:$0x3] }
 0xb44   : > { %v4812_v52 = vadd.f32 %v8451_v47, %v4804_v8  ;;  %v4817_v5 = vrot.slane %v2558_v2, %v2980_v20  ;;  %v4821_v21 = vrot.slane %v2558_v2, %v2984_v22  ;;  %v8452_v20 = vld [vmem:[#allocation10] ss:$0 sm:$0xff]  ;;  %8985 = vmatpush3.msra.mxu1 %v2808_v43  ;;  %v2793_v47 = vld [vmem:[%s13197_s7] sm:$0xff] }
 0xb45   : > { %8986 = vmatprep.subr.mxu1 %v2807_v39 }
 0xb46   : > { %4895 = vmatmul.mubr.f32.gmra.mxu1 %v4812_v52 }
 0xb47   : > { %8987 = vmatpush3.msra.mxu1 %v2807_v39 }
 0xb48   : > { %8988 = vmatprep.subr.mxu1 %v2806_v50 }
 0xb49   : > { %8989 = vmatpush3.msra.mxu1 %v2806_v50  ;;  %v2752_v50 = vld [vmem:[#allocation46 + $0x38] sm:$0xff] }
 0xb4a   : > { %8990 = vmatprep.subr.mxu1 %v2805_v3  ;;  %9019 = vmatprep.subr.mxu0 %v2752_v50 }
 0xb4b   : > { %8991 = vmatpush3.msra.mxu1 %v2805_v3  ;;  %v2735_v3 = vld [vmem:[#allocation43 + $0x30] sm:$0xff] }
 0xb4c   : > { %8992 = vmatprep.subr.mxu1 %v2804_v51 }
 0xb4d   : > { %8993 = vmatpush3.msra.mxu1 %v2804_v51  ;;  %v2751_v51 = vld [vmem:[#allocation46 + $0x30] sm:$0xff] }
 0xb4e   : > { %8994 = vmatprep.subr.mxu1 %v2803_v53 }
 0xb4f   : > { %8995 = vmatpush3.msra.mxu1 %v2803_v53  ;;  %v2734_v53 = vld [vmem:[#allocation43 + $0x28] sm:$0xff] }
 0xb50   : > { %8996 = vmatprep.subr.mxu1 %v2802_v54 }
 0xb51   : > { %8997 = vmatpush3.msra.mxu1 %v2802_v54  ;;  %v2750_v54 = vld [vmem:[#allocation46 + $0x28] sm:$0xff] }
 0xb52   : > { %8998 = vmatprep.subr.mxu1 %v2801_v55 }
 0xb53   : > { %8999 = vmatpush3.msra.mxu1 %v2801_v55  ;;  %v2733_v55 = vld [vmem:[#allocation43 + $0x20] sm:$0xff] }
 0xb54   : > { %9000 = vmatprep.subr.mxu1 %v2800_v41 }
 0xb55   : > { %9001 = vmatpush3.msra.mxu1 %v2800_v41  ;;  %v2749_v41 = vld [vmem:[#allocation46 + $0x20] sm:$0xff] }
 0xb56   : > { %9002 = vmatprep.subr.mxu1 %v2799_v57 }
 0xb57   : > { %9003 = vmatpush3.msra.mxu1 %v2799_v57  ;;  %v2732_v57 = vld [vmem:[#allocation43 + $0x18] sm:$0xff] }
 0xb58   : > { %9004 = vmatprep.subr.mxu1 %v2798_v30 }
 0xb59   : > { %9005 = vmatpush3.msra.mxu1 %v2798_v30  ;;  %v2748_v30 = vld [vmem:[#allocation46 + $0x18] sm:$0xff] }
 0xb5a   : > { %9006 = vmatprep.subr.mxu1 %v2797_v31 }
 0xb5b   : > { %9007 = vmatpush3.msra.mxu1 %v2797_v31  ;;  %v2731_v31 = vld [vmem:[#allocation43 + $0x10] sm:$0xff] }
 0xb5c   : > { %9008 = vmatprep.subr.mxu1 %v2796_v48 }
 0xb5d   : > { %9009 = vmatpush3.msra.mxu1 %v2796_v48  ;;  %v2747_v48 = vld [vmem:[#allocation46 + $0x10] sm:$0xff] }
 0xb5e   : > { %9010 = vmatprep.subr.mxu1 %v2795_v61 }
 0xb5f   : > { %9011 = vmatpush3.msra.mxu1 %v2795_v61  ;;  %v2730_v61 = vld [vmem:[#allocation43 + $0x8] sm:$0xff] }
 0xb60   : > { %9012 = vmatprep.subr.mxu1 %v2794_v62 }
 0xb61   : > { %9013 = vmatpush3.msra.mxu1 %v2794_v62  ;;  %v2746_v62 = vld [vmem:[#allocation46 + $0x8] sm:$0xff] }
 0xb62   : > { %9014 = vmatprep.subr.mxu1 %v2793_v47 }
 0xb63   : > { %9015 = vmatpush3.msra.mxu1 %v2793_v47  ;;  %v2729_v47 = vld [vmem:[#allocation43] sm:$0xff] }
 0xc02   : > { %v4890_v24 = vpop.f32.mrf.mxu1 }
 0xc03   : > { %v4891_v10 = vadd.f32 %v4890_v24, %v4817_v5  ;;  %v2825_v24 = vld [vmem:[#allocation77 + $0x8] sm:$0xff] }
 0xc04   : > { %v4892_v9 = vpop.f32.mrf.mxu1 }
 0xc05   : > { %v4893_v25 = vadd.f32 %v4892_v9, %v4821_v21  ;;  %v4901_v29 = vmax.f32 %v4891_v10, 0.0  ;;  %v2824_v9 = vld [vmem:[#allocation77] sm:$0xff] }
 0xc06   : > { %v4896_v28 = vpop.f32.mrf.mxu1 }
 0xc07   : > { %v4902_v11 = vmax.f32 %v4893_v25, 0.0  ;;  %v4897_v16 = vadd.f32 %v4896_v28, %v4817_v5  ;;  %v5153_v28 = vadd.f32 %v2825_v24, %v2825_v24  ;;  %v8457_v24 = vld [vmem:[#allocation68] ss:$0 sm:$0xff] }
 0xc08   : > { %v4898_v33 = vpop.f32.mrf.mxu1 }
 0xc09   : > { %v4899_v19 = vadd.f32 %v4898_v33, %v4821_v21  ;;  %4975 = vmatprep.mubr.f32.mxu0 %v4902_v11  ;;  %v4903_v37 = vmax.f32 %v4897_v16, 0.0  ;;  %v8455_v21 = vld [vmem:[#allocation74] ss:$0 sm:$0xff]  ;;  %v5152_v33 = vadd.f32 %v2824_v9, %v2824_v9 }
 0xc0a   : > { %4976 = vmatmul.mubr.f32.vlgmr.msra.gmra.mxu0 %v4901_v29 }
 0xc0b   : > { %v4904_v36 = vmax.f32 %v4899_v19, 0.0  ;;  %9020 = vmatpush3.msra.mxu0 %v2752_v50 }
 0xc0c   : > { %9021 = vmatprep.subr.mxu0 %v2751_v51 }
 0xc0d   : > { %4980 = vmatprep.mubr.f32.mxu0 %v4904_v36  ;;  %v5157_v36 = vsel %vm4680_vm4, %v5153_v28, 0.0  ;;  %9022 = vmatpush3.msra.mxu0 %v2751_v51 }
 0xc0e   : > { %4981 = vmatmul.mubr.f32.gmra.mxu0 %v4903_v37  ;;  %v5154_v37 = vsel %vm4680_vm4, %v5152_v33, 0.0  ;;  %9023 = vmatprep.subr.mxu0 %v2750_v54 }
 0xc0f   : > { %9024 = vmatpush3.msra.mxu0 %v2750_v54 }
 0xc10   : > { %9025 = vmatprep.subr.mxu0 %v2749_v41 }
 0xc11   : > { %9026 = vmatpush3.msra.mxu0 %v2749_v41 }
 0xc12   : > { %9027 = vmatprep.subr.mxu0 %v2748_v30 }
 0xc13   : > { %9028 = vmatpush3.msra.mxu0 %v2748_v30 }
 0xc14   : > { %9029 = vmatprep.subr.mxu0 %v2747_v48 }
 0xc15   : > { %9030 = vmatpush3.msra.mxu0 %v2747_v48 }
 0xc16   : > { %9031 = vmatprep.subr.mxu0 %v2746_v62 }
 0xc17   : > { %9032 = vmatpush3.msra.mxu0 %v2746_v62 }
 0xcca   : > { %v8660_v32 = vpop.f32.mrf.mxu0 }
 0xccc   : > { %v8661_v22 = vpop.f32.mrf.mxu0 }
 0xccd   : > { %v8662_v13 = vadd.f32 %v8661_v22, %v8660_v32 }
 0xcce   : > { %v8663_v15 = vpop.f32.mrf.mxu0 }
 0xccf   : > { %v4978_v18 = vadd.f32 %v8662_v13, %v8452_v20 }
 0xcd0   : > { %v8664_v7 = vpop.f32.mrf.mxu0 }
 0xcd1   : > { %v8665_v23 = vadd.f32 %v8664_v7, %v8663_v15  ;;  %v4986_v40 = vadd.f32 %v4978_v18, %v4811_v1 }
 0xcd3   : > { %v4983_v59 = vadd.f32 %v8665_v23, %v8452_v20  ;;  %4988 = vadd.xlane.f32.xlu1 %v4986_v40 }
 0xcd5   : > { %v4987_v27 = vadd.f32 %v4983_v59, %v4812_v52 }
 0xcd7   : > { %4990 = vadd.xlane.f32.xlu0 %v4987_v27 }
 0xd5c   : > { %v4989_v26 = vpop.xlane.xlu1 %4988 }
 0xd5d   : > { %v4992_v44 = vmul.f32 0.0078125, %v4989_v26 }
 0xd5f   : > { %v4994_v45 = vsub.f32 %v4986_v40, %v4992_v44 }
 0xd60   : > { %v4991_v35 = vpop.xlane.xlu0 %4990 }
 0xd61   : > { %v4993_v49 = vmul.f32 0.0078125, %v4991_v35  ;;  %v4996_v60 = vmul.f32 %v4994_v45, %v4994_v45 }
 0xd63   : > { %v4995_v4 = vsub.f32 %v4987_v27, %v4993_v49  ;;  %4998 = vadd.xlane.f32.xlu1 %v4996_v60 }
 0xd65   : > { %v4997_v34 = vmul.f32 %v4995_v4, %v4995_v4 }
 0xd67   : > { %5000 = vadd.xlane.f32.xlu0 %v4997_v34  ;;  %v2736_v34 = vld [vmem:[#allocation43 + $0x38] sm:$0xff] }
 0xd68   : > { %9038 = vmatprep.subr.mxu1 %v2736_v34 }
 0xdec   : > { %v4999_v56 = vpop.xlane.xlu1 %4998 }
 0xded   : > { %v5002_v0 = vmul.f32 0.0078125, %v4999_v56  ;;  %v2745_v56 = vld [vmem:[#allocation46] sm:$0xff] }
 0xdee   : > { %9033 = vmatprep.subr.mxu0 %v2745_v56 }
 0xdef   : > { %v5004_v1 = vadd.f32 1e-05, %v5002_v0  ;;  %9034 = vmatpush3.msra.mxu0 %v2745_v56 }
 0xdf0   : > { %v5001_v42 = vpop.xlane.xlu0 %5000 }
 0xdf1   : > { %9870 = vrsqrt.f32 %v5004_v1  ;;  %v5003_v8 = vmul.f32 0.0078125, %v5001_v42 }
 0xdf3   : > { %v5005_v52 = vadd.f32 1e-05, %v5003_v8 }
 0xdf5   : > { %9872 = vrsqrt.f32 %v5005_v52 }
 0xdfe   : > { %v9871_v63 = vpop.eup %9870 }
 0xdff   : > { %v5008_v58 = vmul.f32 %v9871_v63, %v4994_v45 }
 0xe01   : > { %v5016_v14 = vmul.f32 %v8453_v46, %v5008_v58 }
 0xe02   : > { %v9873_v38 = vpop.eup %9872 }
 0xe03   : > { %v5009_v17 = vmul.f32 %v9873_v38, %v4995_v4  ;;  %v5024_v6 = vadd.f32 %v8454_v12, %v5016_v14 }
 0xe05   : > { %v5017_v2 = vmul.f32 %v8453_v46, %v5009_v17  ;;  %9016 = vmatprep.mubr.f32.mxu1 %v5024_v6 }
 0xe07   : > { %v5025_v5 = vadd.f32 %v8454_v12, %v5017_v2  ;;  %v8456_v2 = vld [vmem:[#allocation70] ss:$0 sm:$0xff] }
 0xe09   : > { %9017 = vmatmul.mubr.f32.vlgmr.msra.gmra.mxu1 %v5025_v5 }
 0xe0a   : > { %9039 = vmatpush3.msra.mxu1 %v2736_v34 }
 0xe0b   : > { %9040 = vmatprep.subr.mxu1 %v2735_v3 }
 0xe0c   : > { %9041 = vmatpush3.msra.mxu1 %v2735_v3 }
 0xe0d   : > { %9042 = vmatprep.subr.mxu1 %v2734_v53 }
 0xe0e   : > { %9043 = vmatpush3.msra.mxu1 %v2734_v53 }
 0xe0f   : > { %9044 = vmatprep.subr.mxu1 %v2733_v55 }
 0xe10   : > { %9045 = vmatpush3.msra.mxu1 %v2733_v55 }
 0xe11   : > { %9046 = vmatprep.subr.mxu1 %v2732_v57 }
 0xe12   : > { %9047 = vmatpush3.msra.mxu1 %v2732_v57 }
 0xe13   : > { %9048 = vmatprep.subr.mxu1 %v2731_v31 }
 0xe14   : > { %9049 = vmatpush3.msra.mxu1 %v2731_v31 }
 0xe15   : > { %9050 = vmatprep.subr.mxu1 %v2730_v61 }
 0xe16   : > { %9051 = vmatpush3.msra.mxu1 %v2730_v61 }
 0xe17   : > { %9052 = vmatprep.subr.mxu1 %v2729_v47 }
 0xe18   : > { %9053 = vmatpush3.msra.mxu1 %v2729_v47 }
 0xec9   : > { %v9018_v10 = vpop.f32.mrf.mxu1 }
 0xeca   : > { %v5104_v25 = vadd.f32 %v9018_v10, %v8455_v21 }
 0xecb   : > { %v5098_v11 = vpop.f32.mrf.mxu1 }
 0xecc   : > { %v5099_v29 = vadd.f32 %v8455_v21, %v5098_v11  ;;  %v5110_v16 = vsel %vm4680_vm4, %v5104_v25, 0.0  ;;  %v8458_v11 = vld [vmem:[#allocation35] ss:$0 sm:$0xff] }
 0xecd   : > { %5111 = vadd.xlane.f32.xlu0 %v5110_v16 }
 0xece   : > { %v5107_v19 = vsel %vm4680_vm4, %v5099_v29, 0.0 }
 0xecf   : > { %5108 = vadd.xlane.f32.xlu1 %v5107_v19 }
 0xed1   : > { %5158 = vadd.xlane.f32.xlu0 %v5157_v36 }
 0xed3   : > { %5155 = vadd.xlane.f32.xlu1 %v5154_v37 }
 0xf56   : > { %v5112_v32 = vpop.xlane.xlu0 %5111 }
 0xf57   : > { %v5115_v20 = vmul.f32 0.015625, %v5112_v32 }
 0xf58   : > { %v5109_v22 = vpop.xlane.xlu1 %5108 }
 0xf59   : > { %v12670_v13 = vsub.f32 %v5104_v25, %v5115_v20  ;;  %v5114_v15 = vmul.f32 0.015625, %v5109_v22  ;;  %v8459_v20 = vld [vmem:[#allocation34] ss:$0 sm:$0xff] }
 0xf5a   : > { %v5159_v18 = vpop.xlane.xlu0 %5158 }
 0xf5b   : > { %v12672_v7 = vsub.f32 %v5099_v29, %v5114_v15  ;;  %v5161_v23 = vmul.f32 0.015625, %v5159_v18  ;;  %v5119_v40 = vmul.f32 %v12670_v13, %v12670_v13 }
 0xf5c   : > { %v5156_v59 = vpop.xlane.xlu1 %5155 }
 0xf5d   : > { %v12676_v27 = vsub.f32 %v5153_v28, %v5161_v23  ;;  %v5160_v43 = vmul.f32 0.015625, %v5156_v59  ;;  %v5123_v39 = vsel %vm4680_vm4, %v5119_v40, 0.0  ;;  %v5118_v26 = vmul.f32 %v12672_v7, %v12672_v7 }
 0xf5e   : > { %5124 = vadd.xlane.f32.xlu0 %v5123_v39  ;;  %v8460_v39 = vld [vmem:[#allocation28] ss:$0 sm:$0xff] }
 0xf5f   : > { %v12681_v44 = vsub.f32 %v5152_v33, %v5160_v43  ;;  %v5120_v45 = vsel %vm4680_vm4, %v5118_v26, 0.0  ;;  %v5165_v35 = vmul.f32 %v12676_v27, %v12676_v27 }
 0xf60   : > { %5121 = vadd.xlane.f32.xlu1 %v5120_v45 }
 0xf61   : > { %v5169_v49 = vsel %vm4680_vm4, %v5165_v35, 0.0  ;;  %v5164_v60 = vmul.f32 %v12681_v44, %v12681_v44 }
 0xf62   : > { %5170 = vadd.xlane.f32.xlu0 %v5169_v49 }
 0xf63   : > { %v5166_v4 = vsel %vm4680_vm4, %v5164_v60, 0.0 }
 0xf64   : > { %5167 = vadd.xlane.f32.xlu1 %v5166_v4 }
 0xfe7   : > { %v5125_v0 = vpop.xlane.xlu0 %5124 }
 0xfe8   : > { %v5127_v1 = vmul.f32 0.015625, %v5125_v0 }
 0xfe9   : > { %v5122_v42 = vpop.xlane.xlu1 %5121 }
 0xfea   : > { %v5129_v8 = vadd.f32 1e-05, %v5127_v1  ;;  %v5126_v52 = vmul.f32 0.015625, %v5122_v42 }
 0xfeb   : > { %v5171_v63 = vpop.xlane.xlu0 %5170 }
 0xfec   : > { %9874 = vrsqrt.f32 %v5129_v8  ;;  %v5128_v46 = vadd.f32 1e-05, %v5126_v52  ;;  %v5173_v58 = vmul.f32 0.015625, %v5171_v63 }
 0xfed   : > { %v5168_v12 = vpop.xlane.xlu1 %5167 }
 0xfee   : > { %9876 = vrsqrt.f32 %v5128_v46  ;;  %v5175_v14 = vadd.f32 1e-05, %v5173_v58  ;;  %v5172_v38 = vmul.f32 0.015625, %v5168_v12 }
 0xff0   : > { %9878 = vrsqrt.f32 %v5175_v14  ;;  %v5174_v17 = vadd.f32 1e-05, %v5172_v38 }
 0xff2   : > { %9880 = vrsqrt.f32 %v5174_v17 }
 0xff9   : > { %v9875_v6 = vpop.eup %9874 }
 0xffa   : > { %v5133_v5 = vmul.f32 %v9875_v6, %v12670_v13 }
 0xffb   : > { %v9877_v21 = vpop.eup %9876 }
 0xffc   : > { %v5132_v10 = vmul.f32 %v9877_v21, %v12672_v7  ;;  %v5141_v9 = vmul.f32 %v8456_v2, %v5133_v5  ;;  %v8463_v7 = vld [vmem:[#allocation25] ss:$0 sm:$0xff] }
 0xffd   : > { %v9879_v25 = vpop.eup %9878 }
 0xffe   : > { %v5140_v28 = vmul.f32 %v8456_v2, %v5132_v10  ;;  %v5179_v29 = vmul.f32 %v9879_v25, %v12676_v27  ;;  %v12693_v33 = vadd.f32 %v8457_v24, %v5141_v9 }
 0xfff   : > { %v9881_v16 = vpop.eup %9880 }
0x1000   : > { %v12695_v19 = vadd.f32 %v8457_v24, %v5140_v28  ;;  %v5178_v36 = vmul.f32 %v9881_v16, %v12681_v44  ;;  %v5187_v37 = vmul.f32 %v8458_v11, %v5179_v29  ;;  %v5151_v13 = vmax.f32 %v12693_v33, 0.0 }
0x1002   : > { %v5150_v32 = vmax.f32 %v12695_v19, 0.0  ;;  %v5186_v22 = vmul.f32 %v8458_v11, %v5178_v36  ;;  %v12708_v18 = vadd.f32 %v8459_v20, %v5187_v37 }
0x1004   : > { %9054 = vmatprep.mubr.msk.f32.mxu1 %vm4680_vm4, %v5150_v32  ;;  %v12703_v15 = vadd.f32 %v8459_v20, %v5186_v22 }
0x1005   : > { %9055 = vmatmul.mubr.msk.f32.vlgmr.msra.gmra.mxu1 %vm4680_vm4, %v5151_v13 }
0x1006   : > { %9035 = vmatprep.mubr.msk.f32.mxu0 %vm4680_vm4, %v12703_v15 }
0x1007   : > { %9036 = vmatmul.mubr.msk.f32.vlgmr.msra.gmra.mxu0 %vm4680_vm4, %v12708_v18 }
0x10c5   : > { %v9056_v23 = vpop.f32.mrf.mxu1 }
0x10c6   : > { %v12714_v40 = vadd.f32 %v9056_v23, %v8463_v7 }
0x10c7   : > { %v9037_v59 = vpop.f32.mrf.mxu0  ;;  %v5361_v27 = vpop.f32.mrf.mxu1 }
0x10c8   : > { %v12716_v43 = vadd.f32 %v8463_v7, %v5361_v27  ;;  %9057 = vmatprep.subr.msk.mxu1 %vm3059_vm0, %v12714_v40  ;;  %v12730_v45 = vadd.f32 %v9037_v59, %v8460_v39 }
0x10c9   : > { %v5274_v26 = vpop.f32.mrf.mxu0  ;;  %9058 = vmatpush3.xpose.msk.msra.mxu1 %vm3059_vm0, %v12714_v40 }
0x10ca   : > { %v12722_v44 = vadd.f32 %v8460_v39, %v5274_v26  ;;  %9059 = vmatprep.subr.msk.mxu1 %vm3059_vm0, %v12716_v43 }
0x10cc   : > { %9061 = vmatprep.mubr.msk.f32.mxu1 %vm3059_vm0, %v12722_v44 }
0x10cd   : > { %9060 = vmatpush3.xpose.msk.msra.mxu1 %vm3059_vm0, %v12716_v43 }
0x10d0   : > { %9062 = vmatmul.mubr.msk.f32.vlgmr.msra.gmra.mxu1 %vm3059_vm0, %v12730_v45 }
0x1190   : > { %v9063_v35 = vpop.f32.mrf.mxu1 }
0x1191   : > { %v5458_v49 = vmul.f32 0.25, %v9063_v35 }
0x1192   : > { %v5448_v60 = vpop.f32.mrf.mxu1 }
0x1193   : > { %v5457_v4 = vmul.f32 0.25, %v5448_v60  ;;  %v5462_v34 = vsel %vm3059_vm0, %v5458_v49, -inf }
0x1194   : > { %5463 = vmax.xlane.f32.xlu0 %v5462_v34 }
0x1195   : > { %v5459_v50 = vsel %vm3059_vm0, %v5457_v4, -inf }
0x1196   : > { %5460 = vmax.xlane.f32.xlu1 %v5459_v50 }
0x11a7   : > { %5483 = vrot.lane.b32.xlu1 %v12714_v40, %s11440_s8 }
0x11ab   : > { %5574 = vrot.lane.b32.xlu1 %v12714_v40, %s11439_s5 }
0x11af   : > { %5572 = vrot.lane.b32.xlu1 %v12716_v43, %s11439_s5 }
0x121d   : > { %v5464_v3 = vpop.xlane.xlu0 %5463 }
0x121e   : > { %v5466_v51 = vsub.f32 %v5458_v49, %v5464_v3 }
0x121f   : > { %v5461_v53 = vpop.xlane.xlu1 %5460 }
0x1220   : > { %v5469_v54 = vmul.f32 1.442695, %v5466_v51  ;;  %v5465_v55 = vsub.f32 %v5457_v4, %v5461_v53 }
0x1222   : > { %9882 = vpow2.f32 %v5469_v54  ;;  %v5467_v41 = vmul.f32 1.442695, %v5465_v55 }
0x1223   : > { %v5484_v57 = vpop.permute.xlu1 %5483 }
0x1224   : > { %9884 = vpow2.f32 %v5467_v41  ;;  %9064 = vmatprep.subr.mxu1 %v5484_v57 }
0x1225   : > { %9065 = vmatpush3.msra.mxu1 %v5484_v57 }
0x1227   : > { %v5575_v62 = vpop.permute.xlu1 %5574 }
0x122b   : > { %v5573_v47 = vpop.permute.xlu1 %5572 }
0x122f   : > { %v9883_v30 = vpop.eup %9882 }
0x1230   : > { %v5474_v31 = vsel %vm3059_vm0, %v9883_v30, 0.0 }
0x1231   : > { %v9885_v48 = vpop.eup %9884  ;;  %5475 = vadd.xlane.f32.xlu0 %v5474_v31 }
0x1232   : > { %v5471_v61 = vsel %vm3059_vm0, %v9885_v48, 0.0 }
0x1233   : > { %5472 = vadd.xlane.f32.xlu1 %v5471_v61 }
0x1244   : > { %5568 = vrot.lane.b32.xlu1 %v12722_v44, %s11439_s5 }
0x1247   : > { %5481 = vrot.lane.b32.xlu0 %v12716_v43, %s11440_s8  ;;  %s13204_s8 = sld [smem:[#allocation157_spill]] }
0x124b   : > { %5570 = vrot.lane.b32.xlu0 %v12730_v45, %s11439_s5 }
0x12ba   : > { %v5476_v56 = vpop.xlane.xlu0 %5475 }
0x12bb   : > { %9886 = vrcp.f32 %v5476_v56 }
0x12bc   : > { %v5473_v0 = vpop.xlane.xlu1 %5472 }
0x12bd   : > { %9888 = vrcp.f32 %v5473_v0 }
0x12be   : > { %v5482_v1 = vpop.permute.xlu0 %5481 }
0x12bf   : > { %9066 = vmatprep.subr.mxu1 %v5482_v1 }
0x12c0   : > { %9067 = vmatpush3.msra.mxu1 %v5482_v1  ;;  %v5569_v46 = vpop.permute.xlu1 %5568 }
0x12c1   : > { %9071 = vmatprep.subr.msk.mxu1 %vm3059_vm0, %v5575_v62 }
0x12c2   : > { %v5571_v58 = vpop.permute.xlu0 %5570 }
0x12c8   : > { %v9887_v42 = vpop.eup %9886 }
0x12c9   : > { %v5480_v63 = vmul.f32 %v9887_v42, %v9883_v30 }
0x12ca   : > { %v9889_v8 = vpop.eup %9888 }
0x12cb   : > { %v5478_v52 = vmul.f32 %v9889_v8, %v9885_v48 }
0x12cd   : > { %9068 = vmatprep.mubr.msk.f32.mxu1 %vm3059_vm0, %v5478_v52 }
0x12ce   : > { %9069 = vmatmul.mubr.msk.f32.vlgmr.msra.gmra.mxu1 %vm3059_vm0, %v5480_v63 }
0x12cf   : > { %9072 = vmatpush3.xpose.msk.msra.mxu1 %vm3059_vm0, %v5575_v62  ;;  %9075 = vmatprep.mubr.msk.f32.mxu1 %vm3059_vm0, %v5569_v46 }
0x12d0   : > { %9073 = vmatprep.subr.msk.mxu1 %vm3059_vm0, %v5573_v47 }
0x12d3   : > { %9074 = vmatpush3.xpose.msk.msra.mxu1 %vm3059_vm0, %v5573_v47 }
0x12d6   : > { %9076 = vmatmul.mubr.msk.f32.vlgmr.msra.gmra.mxu1 %vm3059_vm0, %v5571_v58 }
0x138e   : > { %v12758_v12 = vpop.f32.mrf.mxu1 }
0x1390   : > { %v12760_v14 = vpop.f32.mrf.mxu1 }
0x1396   : > { %v9077_v38 = vpop.f32.mrf.mxu1 }
0x1397   : > { %v5660_v17 = vmul.f32 0.25, %v9077_v38 }
0x1398   : > { %v5650_v6 = vpop.f32.mrf.mxu1 }
0x1399   : > { %v5659_v2 = vmul.f32 0.25, %v5650_v6  ;;  %v5664_v5 = vsel %vm3059_vm0, %v5660_v17, -inf }
0x139a   : > { %5665 = vmax.xlane.f32.xlu0 %v5664_v5 }
0x139b   : > { %v5661_v21 = vsel %vm3059_vm0, %v5659_v2, -inf }
0x139c   : > { %5662 = vmax.xlane.f32.xlu1 %v5661_v21 }
0x13ad   : > { %5685 = vrot.lane.b32.xlu1 %v12714_v40, %s11442_s15 }
0x13b1   : > { %5776 = vrot.lane.b32.xlu1 %v12714_v40, %s11438_s22 }
0x13b5   : > { %5774 = vrot.lane.b32.xlu1 %v12716_v43, %s11438_s22 }
0x13b9   : > { %5770 = vrot.lane.b32.xlu1 %v12722_v44, %s11438_s22 }
0x1423   : > { %v5666_v24 = vpop.xlane.xlu0 %5665 }
0x1424   : > { %v5668_v10 = vsub.f32 %v5660_v17, %v5666_v24 }
0x1425   : > { %v5663_v9 = vpop.xlane.xlu1 %5662 }
0x1426   : > { %v5671_v25 = vmul.f32 1.442695, %v5668_v10  ;;  %v5667_v28 = vsub.f32 %v5659_v2, %v5663_v9 }
0x1428   : > { %9890 = vpow2.f32 %v5671_v25  ;;  %v5669_v11 = vmul.f32 1.442695, %v5667_v28 }
0x1429   : > { %v5686_v29 = vpop.permute.xlu1 %5685 }
0x142a   : > { %9892 = vpow2.f32 %v5669_v11  ;;  %9078 = vmatprep.subr.mxu0 %v5686_v29 }
0x142b   : > { %9079 = vmatpush3.msra.mxu0 %v5686_v29 }
0x142d   : > { %v5777_v59 = vpop.permute.xlu1 %5776 }
0x1431   : > { %v5775_v27 = vpop.permute.xlu1 %5774 }
0x1435   : > { %v9891_v16 = vpop.eup %9890  ;;  %v5771_v60 = vpop.permute.xlu1 %5770 }
0x1436   : > { %v5676_v36 = vsel %vm3059_vm0, %v9891_v16, 0.0 }
0x1437   : > { %v9893_v37 = vpop.eup %9892  ;;  %5677 = vadd.xlane.f32.xlu0 %v5676_v36 }
0x1438   : > { %v5673_v20 = vsel %vm3059_vm0, %v9893_v37, 0.0 }
0x143b   : > { %5674 = vadd.xlane.f32.xlu0 %v5673_v20 }
0x1451   : > { %5683 = vrot.lane.b32.xlu0 %v12716_v43, %s11442_s15 }
0x1455   : > { %5772 = vrot.lane.b32.xlu0 %v12730_v45, %s11438_s22 }
0x14c0   : > { %v5678_v22 = vpop.xlane.xlu0 %5677 }
0x14c1   : > { %9894 = vrcp.f32 %v5678_v22 }
0x14c4   : > { %v5675_v7 = vpop.xlane.xlu0 %5674 }
0x14c5   : > { %9896 = vrcp.f32 %v5675_v7 }
0x14c8   : > { %v5684_v23 = vpop.permute.xlu0 %5683 }
0x14c9   : > { %9080 = vmatprep.subr.mxu0 %v5684_v23 }
0x14ca   : > { %9081 = vmatpush3.msra.mxu0 %v5684_v23 }
0x14cb   : > { %9085 = vmatprep.subr.msk.mxu0 %vm3059_vm0, %v5777_v59 }
0x14cc   : > { %v5773_v4 = vpop.permute.xlu0 %5772 }
0x14ce   : > { %v9895_v39 = vpop.eup %9894 }
0x14cf   : > { %v5682_v49 = vmul.f32 %v9895_v39, %v9891_v16 }
0x14d2   : > { %v9897_v26 = vpop.eup %9896 }
0x14d3   : > { %v5680_v35 = vmul.f32 %v9897_v26, %v9893_v37 }
0x14d5   : > { %9082 = vmatprep.mubr.msk.f32.mxu0 %vm3059_vm0, %v5680_v35 }
0x14d6   : > { %9083 = vmatmul.mubr.msk.f32.vlgmr.msra.gmra.mxu0 %vm3059_vm0, %v5682_v49 }
0x14d7   : > { %9086 = vmatpush3.xpose.msk.msra.mxu0 %vm3059_vm0, %v5777_v59  ;;  %9089 = vmatprep.mubr.msk.f32.mxu0 %vm3059_vm0, %v5771_v60 }
0x14d8   : > { %9087 = vmatprep.subr.msk.mxu0 %vm3059_vm0, %v5775_v27 }
0x14db   : > { %9088 = vmatpush3.xpose.msk.msra.mxu0 %vm3059_vm0, %v5775_v27 }
0x14de   : > { %9090 = vmatmul.mubr.msk.f32.vlgmr.msra.gmra.mxu0 %vm3059_vm0, %v5773_v4 }
0x1596   : > { %v12786_v34 = vpop.f32.mrf.mxu0 }
0x1598   : > { %v12788_v50 = vpop.f32.mrf.mxu0 }
0x159e   : > { %v9091_v3 = vpop.f32.mrf.mxu0 }
0x159f   : > { %v5862_v51 = vmul.f32 0.25, %v9091_v3  ;;  %v2743_v3 = vld [vmem:[#allocation44 + $0x30] sm:$0xff] }
0x15a0   : > { %v5852_v53 = vpop.f32.mrf.mxu0 }
0x15a1   : > { %v5861_v54 = vmul.f32 0.25, %v5852_v53  ;;  %v5866_v55 = vsel %vm3059_vm0, %v5862_v51, -inf  ;;  %v2740_v53 = vld [vmem:[#allocation44 + $0x18] sm:$0xff] }
0x15a2   : > { %5867 = vmax.xlane.f32.xlu0 %v5866_v55  ;;  %v2738_v55 = vld [vmem:[#allocation44 + $0x8] sm:$0xff] }
0x15a3   : > { %v5863_v41 = vsel %vm3059_vm0, %v5861_v54, -inf }
0x15a4   : > { %5864 = vmax.xlane.f32.xlu1 %v5863_v41  ;;  %v2737_v41 = vld [vmem:[#allocation44] sm:$0xff] }
0x15b5   : > { %5887 = vrot.lane.b32.xlu1 %v12714_v40, %s11443_s2 }
0x15b9   : > { %5978 = vrot.lane.b32.xlu1 %v12714_v40, %s11441_s0 }
0x15bd   : > { %5976 = vrot.lane.b32.xlu1 %v12716_v43, %s11441_s0 }
0x15c1   : > { %5972 = vrot.lane.b32.xlu1 %v12722_v44, %s11441_s0 }
0x162b   : > { %v5868_v57 = vpop.xlane.xlu0 %5867 }
0x162c   : > { %v5870_v30 = vsub.f32 %v5862_v51, %v5868_v57  ;;  %v2741_v51 = vld [vmem:[#allocation44 + $0x20] sm:$0xff] }
0x162d   : > { %v5865_v31 = vpop.xlane.xlu1 %5864 }
0x162e   : > { %v5873_v48 = vmul.f32 1.442695, %v5870_v30  ;;  %v5869_v61 = vsub.f32 %v5861_v54, %v5865_v31  ;;  %v2739_v54 = vld [vmem:[#allocation44 + $0x10] sm:$0xff] }
0x1630   : > { %9898 = vpow2.f32 %v5873_v48  ;;  %v5871_v62 = vmul.f32 1.442695, %v5869_v61 }
0x1631   : > { %v5888_v47 = vpop.permute.xlu1 %5887 }
0x1632   : > { %9900 = vpow2.f32 %v5871_v62  ;;  %9092 = vmatprep.subr.mxu1 %v5888_v47 }
0x1633   : > { %9093 = vmatpush3.msra.mxu1 %v5888_v47 }
0x1635   : > { %v5979_v63 = vpop.permute.xlu1 %5978 }
0x1639   : > { %v5977_v46 = vpop.permute.xlu1 %5976 }
0x163d   : > { %v9899_v56 = vpop.eup %9898  ;;  %v5973_v2 = vpop.permute.xlu1 %5972 }
0x163e   : > { %v5878_v0 = vsel %vm3059_vm0, %v9899_v56, 0.0 }
0x163f   : > { %v9901_v1 = vpop.eup %9900  ;;  %5879 = vadd.xlane.f32.xlu0 %v5878_v0 }
0x1640   : > { %v5875_v42 = vsel %vm3059_vm0, %v9901_v1, 0.0 }
0x1643   : > { %5876 = vadd.xlane.f32.xlu0 %v5875_v42 }
0x1659   : > { %5885 = vrot.lane.b32.xlu0 %v12716_v43, %s11443_s2 }
0x165d   : > { %5974 = vrot.lane.b32.xlu0 %v12730_v45, %s11441_s0 }
0x16c8   : > { %v5880_v44 = vpop.xlane.xlu0 %5879 }
0x16c9   : > { %9902 = vrcp.f32 %v5880_v44 }
0x16cc   : > { %v5877_v8 = vpop.xlane.xlu0 %5876 }
0x16cd   : > { %9904 = vrcp.f32 %v5877_v8 }
0x16d0   : > { %v5886_v52 = vpop.permute.xlu0 %5885 }
0x16d1   : > { %9094 = vmatprep.subr.mxu1 %v5886_v52 }
0x16d2   : > { %9095 = vmatpush3.msra.mxu1 %v5886_v52 }
0x16d3   : > { %9099 = vmatprep.subr.msk.mxu1 %vm3059_vm0, %v5979_v63 }
0x16d4   : > { %v5975_v45 = vpop.permute.xlu0 %5974 }
0x16d6   : > { %v9903_v58 = vpop.eup %9902 }
0x16d7   : > { %v5884_v6 = vmul.f32 %v9903_v58, %v9899_v56 }
0x16da   : > { %v9905_v38 = vpop.eup %9904 }
0x16db   : > { %v5882_v17 = vmul.f32 %v9905_v38, %v9901_v1 }
0x16dd   : > { %9096 = vmatprep.mubr.msk.f32.mxu1 %vm3059_vm0, %v5882_v17 }
0x16de   : > { %9097 = vmatmul.mubr.msk.f32.vlgmr.msra.gmra.mxu1 %vm3059_vm0, %v5884_v6 }
0x16df   : > { %9100 = vmatpush3.xpose.msk.msra.mxu1 %vm3059_vm0, %v5979_v63  ;;  %9103 = vmatprep.mubr.msk.f32.mxu1 %vm3059_vm0, %v5973_v2  ;;  %v8490_v63 = vld [vmem:[#allocation26] ss:$0 sm:$0xff] }
0x16e0   : > { %9101 = vmatprep.subr.msk.mxu1 %vm3059_vm0, %v5977_v46 }
0x16e3   : > { %9102 = vmatpush3.xpose.msk.msra.mxu1 %vm3059_vm0, %v5977_v46 }
0x16e6   : > { %9104 = vmatmul.mubr.msk.f32.vlgmr.msra.gmra.mxu1 %vm3059_vm0, %v5975_v45 }
0x179e   : > { %v9098_v5 = vpop.f32.mrf.mxu1 }
0x17a0   : > { %v5963_v21 = vpop.f32.mrf.mxu1 }
0x17a6   : > { %v9105_v24 = vpop.f32.mrf.mxu1 }
0x17a7   : > { %v6064_v10 = vmul.f32 0.25, %v9105_v24 }
0x17a8   : > { %v6054_v9 = vpop.f32.mrf.mxu1 }
0x17a9   : > { %v6063_v25 = vmul.f32 0.25, %v6054_v9  ;;  %v6068_v28 = vsel %vm3059_vm0, %v6064_v10, -inf }
0x17aa   : > { %6069 = vmax.xlane.f32.xlu0 %v6068_v28 }
0x17ab   : > { %v6065_v11 = vsel %vm3059_vm0, %v6063_v25, -inf }
0x17ac   : > { %6066 = vmax.xlane.f32.xlu1 %v6065_v11  ;;  %v2705_v11 = vld [vmem:[#allocation31 + $0x38] sm:$0xff] }
0x17ad   : > { %9132 = vmatprep.subr.mxu1 %v2705_v11 }
0x17ae   : > { %9133 = vmatpush3.msra.mxu1 %v2705_v11 }
0x17bd   : > { %6089 = vrot.lane.b32.xlu1 %v12714_v40, %s11444_s18 }
0x17c1   : > { %6176 = vrot.lane.b32.xlu1 %v12788_v50, %s11444_s18  ;;  %v2744_v50 = vld [vmem:[#allocation44 + $0x38] sm:$0xff] }
0x17c5   : > { %6178 = vrot.lane.b32.xlu1 %v12786_v34, %s11444_s18 }
0x17c9   : > { %6184 = vrot.lane.b32.xlu1 %v5963_v21, %s11443_s2 }
0x1833   : > { %v6070_v29 = vpop.xlane.xlu0 %6069 }
0x1834   : > { %v6072_v16 = vsub.f32 %v6064_v10, %v6070_v29  ;;  %v2704_v29 = vld [vmem:[#allocation31 + $0x30] sm:$0xff] }
0x1835   : > { %v6067_v36 = vpop.xlane.xlu1 %6066  ;;  %9134 = vmatprep.subr.mxu1 %v2704_v29 }
0x1836   : > { %v6075_v37 = vmul.f32 1.442695, %v6072_v16  ;;  %v6071_v20 = vsub.f32 %v6063_v25, %v6067_v36  ;;  %v2703_v16 = vld [vmem:[#allocation31 + $0x28] sm:$0xff]  ;;  %9135 = vmatpush3.msra.mxu1 %v2704_v29  ;;  %v2702_v36 = vld [vmem:[#allocation31 + $0x20] sm:$0xff] }
0x1837   : > { %9136 = vmatprep.subr.mxu1 %v2703_v16 }
0x1838   : > { %9906 = vpow2.f32 %v6075_v37  ;;  %v6073_v22 = vmul.f32 1.442695, %v6071_v20  ;;  %9137 = vmatpush3.msra.mxu1 %v2703_v16  ;;  %v2701_v37 = vld [vmem:[#allocation31 + $0x18] sm:$0xff]  ;;  %v2700_v20 = vld [vmem:[#allocation31 + $0x10] sm:$0xff] }
0x1839   : > { %v6090_v7 = vpop.permute.xlu1 %6089  ;;  %9138 = vmatprep.subr.mxu1 %v2702_v36 }
0x183a   : > { %9908 = vpow2.f32 %v6073_v22  ;;  %9106 = vmatprep.subr.mxu0 %v6090_v7  ;;  %9139 = vmatpush3.msra.mxu1 %v2702_v36  ;;  %v2699_v22 = vld [vmem:[#allocation31 + $0x8] sm:$0xff] }
0x183b   : > { %9107 = vmatpush3.msra.mxu0 %v6090_v7  ;;  %9140 = vmatprep.subr.mxu1 %v2701_v37  ;;  %v2698_v7 = vld [vmem:[#allocation31] sm:$0xff] }
0x183c   : > { %9141 = vmatpush3.msra.mxu1 %v2701_v37 }
0x183d   : > { %v6177_v31 = vpop.permute.xlu1 %6176  ;;  %9142 = vmatprep.subr.mxu1 %v2700_v20 }
0x183e   : > { %v6198_v47 = vsel %vm3059_vm0, %v12760_v14, %v6177_v31  ;;  %9143 = vmatpush3.msra.mxu1 %v2700_v20  ;;  %v8494_v31 = vld [vmem:[#allocation37] ss:$0 sm:$0xff] }
0x183f   : > { %9144 = vmatprep.subr.mxu1 %v2699_v22 }
0x1840   : > { %9145 = vmatpush3.msra.mxu1 %v2699_v22  ;;  %v2817_v22 = vld [vmem:[%s13199_s26 + $0x38] sm:$0xff] }
0x1841   : > { %v6179_v48 = vpop.permute.xlu1 %6178  ;;  %9146 = vmatprep.subr.mxu1 %v2698_v7 }
0x1842   : > { %v6199_v0 = vsel %vm3059_vm0, %v12758_v12, %v6179_v48  ;;  %9147 = vmatpush3.msra.mxu1 %v2698_v7  ;;  %v2816_v7 = vld [vmem:[%s13199_s26 + $0x30] sm:$0xff] }
0x1843   : > { %9186 = vmatprep.subr.mxu1 %v2817_v22 }
0x1845   : > { %v9907_v40 = vpop.eup %9906  ;;  %v6185_v62 = vpop.permute.xlu1 %6184 }
0x1846   : > { %v6080_v23 = vsel %vm3059_vm0, %v9907_v40, 0.0  ;;  %v6200_v1 = vsel %vm4674_vm2, %v6198_v47, %v6185_v62 }
0x1847   : > { %v9909_v59 = vpop.eup %9908  ;;  %6081 = vadd.xlane.f32.xlu0 %v6080_v23  ;;  %v2721_v23 = vld [vmem:[%s13198_s11 + $0x70] sm:$0xff] }
0x1848   : > { %v6077_v27 = vsel %vm3059_vm0, %v9909_v59, 0.0 }
0x184b   : > { %6078 = vadd.xlane.f32.xlu0 %v6077_v27  ;;  %v2719_v27 = vld [vmem:[%s13198_s11 + $0x60] sm:$0xff] }
0x1861   : > { %6087 = vrot.lane.b32.xlu0 %v12716_v43, %s11444_s18  ;;  %v2742_v43 = vld [vmem:[#allocation44 + $0x28] sm:$0xff] }
0x1865   : > { %6186 = vrot.lane.b32.xlu0 %v9098_v5, %s11443_s2 }
0x18d0   : > { %v6082_v39 = vpop.xlane.xlu0 %6081 }
0x18d1   : > { %9910 = vrcp.f32 %v6082_v39  ;;  %v2718_v39 = vld [vmem:[%s13198_s11 + $0x58] sm:$0xff] }
0x18d4   : > { %v6079_v26 = vpop.xlane.xlu0 %6078 }
0x18d5   : > { %9912 = vrcp.f32 %v6079_v26  ;;  %v2717_v26 = vld [vmem:[%s13198_s11 + $0x50] sm:$0xff] }
0x18d8   : > { %v6088_v35 = vpop.permute.xlu0 %6087 }
0x18d9   : > { %9108 = vmatprep.subr.mxu0 %v6088_v35 }
0x18da   : > { %9109 = vmatpush3.msra.mxu0 %v6088_v35  ;;  %v2716_v35 = vld [vmem:[%s13198_s11 + $0x48] sm:$0xff] }
0x18db   : > { %9113 = vmatprep.subr.mxu0 %v2744_v50 }
0x18dc   : > { %v6187_v61 = vpop.permute.xlu0 %6186 }
0x18dd   : > { %v6201_v44 = vsel %vm4674_vm2, %v6199_v0, %v6187_v61 }
0x18de   : > { %v9911_v49 = vpop.eup %9910 }
0x18df   : > { %v6086_v34 = vmul.f32 %v9911_v49, %v9907_v40  ;;  %v2722_v40 = vld [vmem:[%s13198_s11 + $0x78] sm:$0xff]  ;;  %v2715_v49 = vld [vmem:[%s13198_s11 + $0x40] sm:$0xff] }
0x18e2   : > { %v9913_v60 = vpop.eup %9912 }
0x18e3   : > { %v6084_v4 = vmul.f32 %v9913_v60, %v9909_v59  ;;  %v2720_v59 = vld [vmem:[%s13198_s11 + $0x68] sm:$0xff]  ;;  %v2714_v60 = vld [vmem:[%s13198_s11 + $0x38] sm:$0xff] }
0x18e5   : > { %9110 = vmatprep.mubr.msk.f32.mxu0 %vm3059_vm0, %v6084_v4  ;;  %v2713_v4 = vld [vmem:[%s13198_s11 + $0x30] sm:$0xff] }
0x18e6   : > { %9111 = vmatmul.mubr.msk.f32.vlgmr.msra.gmra.mxu0 %vm3059_vm0, %v6086_v34  ;;  %v2712_v34 = vld [vmem:[%s13198_s11 + $0x28] sm:$0xff] }
0x18e7   : > { %9114 = vmatpush3.msra.mxu0 %v2744_v50  ;;  %v2711_v50 = vld [vmem:[%s13198_s11 + $0x20] sm:$0xff] }
0x18e8   : > { %9115 = vmatprep.subr.mxu0 %v2743_v3 }
0x18e9   : > { %9116 = vmatpush3.msra.mxu0 %v2743_v3 }
0x18ea   : > { %9117 = vmatprep.subr.mxu0 %v2742_v43 }
0x18eb   : > { %9118 = vmatpush3.msra.mxu0 %v2742_v43 }
0x18ec   : > { %9119 = vmatprep.subr.mxu0 %v2741_v51 }
0x18ed   : > { %9120 = vmatpush3.msra.mxu0 %v2741_v51 }
0x18ee   : > { %9121 = vmatprep.subr.mxu0 %v2740_v53 }
0x18ef   : > { %9122 = vmatpush3.msra.mxu0 %v2740_v53 }
0x18f0   : > { %9123 = vmatprep.subr.mxu0 %v2739_v54 }
0x18f1   : > { %9124 = vmatpush3.msra.mxu0 %v2739_v54 }
0x18f2   : > { %9125 = vmatprep.subr.mxu0 %v2738_v55 }
0x18f3   : > { %9126 = vmatpush3.msra.mxu0 %v2738_v55 }
0x18f4   : > { %9127 = vmatprep.subr.mxu0 %v2737_v41 }
0x18f5   : > { %9128 = vmatpush3.msra.mxu0 %v2737_v41 }
0x18f6   : > { %9151 = vmatprep.subr.mxu0 %v2722_v40 }
0x19a6   : > { %v9112_v57 = vpop.f32.mrf.mxu0 }
0x19a7   : > { %6194 = vrot.lane.b32.xlu0 %v9112_v57, %s11442_s15  ;;  %v8493_v57 = vld [vmem:[#allocation38] ss:$0 sm:$0xff] }
0x19a8   : > { %v6165_v30 = vpop.f32.mrf.mxu0 }
0x19a9   : > { %6192 = vrot.lane.b32.xlu1 %v6165_v30, %s11442_s15 }
0x1a19   : > { %v6195_v56 = vpop.permute.xlu0 %6194 }
0x1a1a   : > { %v6203_v52 = vsel %vm4677_vm3, %v6201_v44, %v6195_v56  ;;  %v2708_v44 = vld [vmem:[%s13198_s11 + $0x8] sm:$0xff] }
0x1a1b   : > { %v6193_v42 = vpop.permute.xlu1 %6192 }
0x1a1c   : > { %v6202_v8 = vsel %vm4677_vm3, %v6200_v1, %v6193_v42  ;;  %v2710_v1 = vld [vmem:[%s13198_s11 + $0x18] sm:$0xff]  ;;  %v2709_v42 = vld [vmem:[%s13198_s11 + $0x10] sm:$0xff] }
0x1a1d   : > { %9129 = vmatprep.mubr.msk.f32.mxu0 %vm4680_vm4, %v6202_v8  ;;  %v2707_v8 = vld [vmem:[%s13198_s11] sm:$0xff] }
0x1a1e   : > { %9130 = vmatmul.mubr.msk.f32.vlgmr.msra.gmra.mxu0 %vm4680_vm4, %v6203_v52  ;;  %v8495_v52 = vld [vmem:[#allocation29] ss:$0 sm:$0xff] }
0x1a1f   : > { %9152 = vmatpush3.msra.mxu0 %v2722_v40  ;;  %v2815_v40 = vld [vmem:[%s13199_s26 + $0x28] sm:$0xff] }
0x1a20   : > { %9153 = vmatprep.subr.mxu0 %v2721_v23 }
0x1a21   : > { %9154 = vmatpush3.msra.mxu0 %v2721_v23  ;;  %v2814_v23 = vld [vmem:[%s13199_s26 + $0x20] sm:$0xff] }
0x1a22   : > { %9155 = vmatprep.subr.mxu0 %v2720_v59 }
0x1a23   : > { %9156 = vmatpush3.msra.mxu0 %v2720_v59  ;;  %v2813_v59 = vld [vmem:[%s13199_s26 + $0x18] sm:$0xff] }
0x1a24   : > { %9157 = vmatprep.subr.mxu0 %v2719_v27 }
0x1a25   : > { %9158 = vmatpush3.msra.mxu0 %v2719_v27  ;;  %v2812_v27 = vld [vmem:[%s13199_s26 + $0x10] sm:$0xff] }
0x1a26   : > { %9159 = vmatprep.subr.mxu0 %v2718_v39 }
0x1a27   : > { %9160 = vmatpush3.msra.mxu0 %v2718_v39  ;;  %v2811_v39 = vld [vmem:[%s13199_s26 + $0x8] sm:$0xff] }
0x1a28   : > { %9161 = vmatprep.subr.mxu0 %v2717_v26 }
0x1a29   : > { %9162 = vmatpush3.msra.mxu0 %v2717_v26  ;;  %v2810_v26 = vld [vmem:[%s13199_s26] sm:$0xff] }
0x1a2a   : > { %9163 = vmatprep.subr.mxu0 %v2716_v35 }
0x1a2b   : > { %9164 = vmatpush3.msra.mxu0 %v2716_v35  ;;  %v2827_v35 = vld [vmem:[#allocation79 + $0x8] sm:$0xff] }
0x1a2c   : > { %9165 = vmatprep.subr.mxu0 %v2715_v49 }
0x1a2d   : > { %9166 = vmatpush3.msra.mxu0 %v2715_v49  ;;  %v2826_v49 = vld [vmem:[#allocation79] sm:$0xff] }
0x1a2e   : > { %9167 = vmatprep.subr.mxu0 %v2714_v60 }
0x1a2f   : > { %9168 = vmatpush3.msra.mxu0 %v2714_v60  ;;  %v6684_v60 = vadd.f32 %v2827_v35, %v2827_v35 }
0x1a30   : > { %9169 = vmatprep.subr.mxu0 %v2713_v4 }
0x1a31   : > { %9170 = vmatpush3.msra.mxu0 %v2713_v4  ;;  %v6683_v4 = vadd.f32 %v2826_v49, %v2826_v49  ;;  %v2779_v49 = vld [vmem:[#allocation64 + $0x18] sm:$0xff] }
0x1a32   : > { %9171 = vmatprep.subr.mxu0 %v2712_v34 }
0x1a33   : > { %9172 = vmatpush3.msra.mxu0 %v2712_v34  ;;  %v6688_v34 = vsel %vm4674_vm2, %v6684_v60, 0.0 }
0x1a34   : > { %9173 = vmatprep.subr.mxu0 %v2711_v50 }
0x1a35   : > { %9174 = vmatpush3.msra.mxu0 %v2711_v50  ;;  %v6685_v50 = vsel %vm4674_vm2, %v6683_v4, 0.0 }
0x1a36   : > { %9175 = vmatprep.subr.mxu0 %v2710_v1 }
0x1a37   : > { %9176 = vmatpush3.msra.mxu0 %v2710_v1 }
0x1a38   : > { %9177 = vmatprep.subr.mxu0 %v2709_v42 }
0x1a39   : > { %9178 = vmatpush3.msra.mxu0 %v2709_v42 }
0x1a3a   : > { %9179 = vmatprep.subr.mxu0 %v2708_v44 }
0x1a3b   : > { %9180 = vmatpush3.msra.mxu0 %v2708_v44 }
0x1a3c   : > { %9181 = vmatprep.subr.mxu0 %v2707_v8 }
0x1a3d   : > { %9182 = vmatpush3.msra.mxu0 %v2707_v8 }
0x1ade   : > { %v9131_v46 = vpop.f32.mrf.mxu0 }
0x1adf   : > { %v6288_v14 = vadd.f32 %v9131_v46, %v8490_v63 }
0x1ae0   : > { %v6282_v58 = vpop.f32.mrf.mxu0 }
0x1ae1   : > { %v6292_v38 = vadd.f32 %v6288_v14, %v12708_v18  ;;  %v6283_v12 = vadd.f32 %v8490_v63, %v6282_v58 }
0x1ae3   : > { %v6291_v17 = vadd.f32 %v6283_v12, %v12703_v15  ;;  %v6296_v6 = vsel %vm4680_vm4, %v6292_v38, 0.0 }
0x1ae4   : > { %6297 = vadd.xlane.f32.xlu0 %v6296_v6 }
0x1ae5   : > { %v6293_v2 = vsel %vm4680_vm4, %v6291_v17, 0.0 }
0x1ae6   : > { %6294 = vadd.xlane.f32.xlu1 %v6293_v2 }
0x1b6d   : > { %v6298_v45 = vpop.xlane.xlu0 %6297 }
0x1b6e   : > { %v6300_v5 = vmul.f32 0.015625, %v6298_v45 }
0x1b6f   : > { %v6295_v21 = vpop.xlane.xlu1 %6294 }
0x1b70   : > { %v6299_v24 = vmul.f32 0.015625, %v6295_v21  ;;  %v12846_v10 = vsub.f32 %v6292_v38, %v6300_v5 }
0x1b72   : > { %v12848_v9 = vsub.f32 %v6291_v17, %v6299_v24  ;;  %v6304_v15 = vmul.f32 %v12846_v10, %v12846_v10  ;;  %v8498_v17 = vld [vmem:[#allocation32] ss:$0 sm:$0xff] }
0x1b74   : > { %v6303_v18 = vmul.f32 %v12848_v9, %v12848_v9  ;;  %v6308_v28 = vsel %vm4680_vm4, %v6304_v15, 0.0 }
0x1b76   : > { %v6305_v25 = vsel %vm4680_vm4, %v6303_v18, 0.0 }
0x1b77   : > { %6306 = vadd.xlane.f32.xlu0 %v6305_v25 }
0x1b7b   : > { %6309 = vadd.xlane.f32.xlu0 %v6308_v28 }
0x1c00   : > { %v6307_v3 = vpop.xlane.xlu0 %6306 }
0x1c01   : > { %v6311_v43 = vmul.f32 0.015625, %v6307_v3 }
0x1c03   : > { %v6313_v51 = vadd.f32 1e-05, %v6311_v43 }
0x1c04   : > { %v6310_v53 = vpop.xlane.xlu0 %6309 }
0x1c05   : > { %9914 = vrsqrt.f32 %v6313_v51  ;;  %v6312_v54 = vmul.f32 0.015625, %v6310_v53 }
0x1c07   : > { %v6314_v55 = vadd.f32 1e-05, %v6312_v54 }
0x1c09   : > { %9916 = vrsqrt.f32 %v6314_v55 }
0x1c12   : > { %v9915_v41 = vpop.eup %9914 }
0x1c13   : > { %v6317_v30 = vmul.f32 %v9915_v41, %v12848_v9 }
0x1c15   : > { %v6325_v48 = vmul.f32 %v8493_v57, %v6317_v30 }
0x1c16   : > { %v9917_v61 = vpop.eup %9916 }
0x1c17   : > { %v6318_v62 = vmul.f32 %v9917_v61, %v12846_v10  ;;  %v6333_v47 = vadd.f32 %v8494_v31, %v6325_v48  ;;  %v8500_v48 = vld [vmem:[#allocation40] ss:$0 sm:$0xff] }
0x1c19   : > { %v6326_v56 = vmul.f32 %v8493_v57, %v6318_v62  ;;  %9148 = vmatprep.mubr.msk.f32.mxu1 %vm4680_vm4, %v6333_v47  ;;  %v8499_v57 = vld [vmem:[#allocation41] ss:$0 sm:$0xff] }
0x1c1b   : > { %v6334_v0 = vadd.f32 %v8494_v31, %v6326_v56 }
0x1c1d   : > { %9149 = vmatmul.mubr.msk.f32.vlgmr.msra.gmra.mxu1 %vm4680_vm4, %v6334_v0 }
0x1c1e   : > { %9187 = vmatpush3.msra.mxu1 %v2817_v22 }
0x1c1f   : > { %9188 = vmatprep.subr.mxu1 %v2816_v7 }
0x1c20   : > { %9189 = vmatpush3.msra.mxu1 %v2816_v7 }
0x1c21   : > { %9190 = vmatprep.subr.mxu1 %v2815_v40 }
0x1c22   : > { %9191 = vmatpush3.msra.mxu1 %v2815_v40 }
0x1c23   : > { %9192 = vmatprep.subr.mxu1 %v2814_v23 }
0x1c24   : > { %9193 = vmatpush3.msra.mxu1 %v2814_v23 }
0x1c25   : > { %9194 = vmatprep.subr.mxu1 %v2813_v59 }
0x1c26   : > { %9195 = vmatpush3.msra.mxu1 %v2813_v59 }
0x1c27   : > { %9196 = vmatprep.subr.mxu1 %v2812_v27 }
0x1c28   : > { %9197 = vmatpush3.msra.mxu1 %v2812_v27 }
0x1c29   : > { %9198 = vmatprep.subr.mxu1 %v2811_v39 }
0x1c2a   : > { %9199 = vmatpush3.msra.mxu1 %v2811_v39  ;;  %v8506_v39 = vld [vmem:[#allocation56] ss:$0 sm:$0xff] }
0x1c2b   : > { %9200 = vmatprep.subr.mxu1 %v2810_v26 }
0x1c2c   : > { %9201 = vmatpush3.msra.mxu1 %v2810_v26 }
0x1cdd   : > { %v9150_v63 = vpop.f32.mrf.mxu1 }
0x1cde   : > { %v6419_v46 = vadd.f32 %v9150_v63, %v8495_v52 }
0x1cdf   : > { %v6413_v14 = vpop.f32.mrf.mxu1 }
0x1ce0   : > { %v6414_v58 = vadd.f32 %v8495_v52, %v6413_v14  ;;  %v6423_v12 = vmax.f32 %v6419_v46, 0.0  ;;  %v8501_v14 = vld [vmem:[%s13200_s16] ss:$0 sm:$0xff] }
0x1ce2   : > { %v6422_v38 = vmax.f32 %v6414_v58, 0.0 }
0x1ce4   : > { %9183 = vmatprep.mubr.f32.mxu0 %v6422_v38 }
0x1ce5   : > { %9184 = vmatmul.mubr.f32.vlgmr.msra.gmra.mxu0 %v6423_v12 }
0x1da5   : > { %v9185_v6 = vpop.f32.mrf.mxu0 }
0x1da6   : > { %v6502_v2 = vadd.f32 %v9185_v6, %v8498_v17 }
0x1da7   : > { %v6496_v45 = vpop.f32.mrf.mxu0 }
0x1da8   : > { %v6506_v5 = vadd.f32 %v6502_v2, %v6334_v0  ;;  %v6497_v21 = vadd.f32 %v8498_v17, %v6496_v45 }
0x1daa   : > { %v6505_v24 = vadd.f32 %v6497_v21, %v6333_v47  ;;  %v6510_v10 = vsel %vm4680_vm4, %v6506_v5, 0.0  ;;  %v2786_v21 = vld [vmem:[#allocation67 + $0x10] sm:$0xff] }
0x1dab   : > { %6511 = vadd.xlane.f32.xlu0 %v6510_v10  ;;  %v2784_v10 = vld [vmem:[#allocation67] sm:$0xff] }
0x1dac   : > { %v6507_v9 = vsel %vm4680_vm4, %v6505_v24, 0.0 }
0x1dad   : > { %6508 = vadd.xlane.f32.xlu1 %v6507_v9 }
0x1e34   : > { %v6512_v18 = vpop.xlane.xlu0 %6511 }
0x1e35   : > { %v6514_v25 = vmul.f32 0.015625, %v6512_v18 }
0x1e36   : > { %v6509_v15 = vpop.xlane.xlu1 %6508 }
0x1e37   : > { %v6516_v28 = vsub.f32 %v6506_v5, %v6514_v25  ;;  %v6513_v11 = vmul.f32 0.015625, %v6509_v15  ;;  %v2787_v5 = vld [vmem:[#allocation67 + $0x18] sm:$0xff] }
0x1e38   : > { %9205 = vmatprep.subr.mxu1 %v2787_v5 }
0x1e39   : > { %v6515_v29 = vsub.f32 %v6505_v24, %v6513_v11  ;;  %v6518_v16 = vmul.f32 %v6516_v28, %v6516_v28  ;;  %v2785_v24 = vld [vmem:[#allocation67 + $0x8] sm:$0xff] }
0x1e3b   : > { %v6522_v36 = vsel %vm4680_vm4, %v6518_v16, 0.0  ;;  %v6517_v37 = vmul.f32 %v6515_v29, %v6515_v29 }
0x1e3c   : > { %6523 = vadd.xlane.f32.xlu0 %v6522_v36 }
0x1e3d   : > { %v6519_v20 = vsel %vm4680_vm4, %v6517_v37, 0.0 }
0x1e3e   : > { %6520 = vadd.xlane.f32.xlu1 %v6519_v20 }
0x1e40   : > { %6689 = vadd.xlane.f32.xlu0 %v6688_v34  ;;  %v8507_v34 = vld [vmem:[%s13201_s23] ss:$0 sm:$0xff] }
0x1e42   : > { %6686 = vadd.xlane.f32.xlu1 %v6685_v50 }
0x1ec5   : > { %v6524_v3 = vpop.xlane.xlu0 %6523 }
0x1ec6   : > { %v6526_v43 = vmul.f32 0.015625, %v6524_v3 }
0x1ec7   : > { %v6521_v51 = vpop.xlane.xlu1 %6520 }
0x1ec8   : > { %v6528_v53 = vadd.f32 1e-05, %v6526_v43  ;;  %v6525_v54 = vmul.f32 0.015625, %v6521_v51  ;;  %v2778_v51 = vld [vmem:[#allocation64 + $0x10] sm:$0xff] }
0x1ec9   : > { %v6690_v44 = vpop.xlane.xlu0 %6689 }
0x1eca   : > { %9918 = vrsqrt.f32 %v6528_v53  ;;  %v6527_v55 = vadd.f32 1e-05, %v6525_v54  ;;  %v6692_v52 = vmul.f32 0.03125, %v6690_v44  ;;  %v2777_v53 = vld [vmem:[#allocation64 + $0x8] sm:$0xff]  ;;  %v2776_v54 = vld [vmem:[#allocation64] sm:$0xff] }
0x1ecb   : > { %v6687_v8 = vpop.xlane.xlu1 %6686 }
0x1ecc   : > { %9920 = vrsqrt.f32 %v6527_v55  ;;  %v6691_v63 = vmul.f32 0.03125, %v6687_v8  ;;  %v6694_v46 = vsub.f32 %v6684_v60, %v6692_v52 }
0x1ece   : > { %v6693_v58 = vsub.f32 %v6683_v4, %v6691_v63  ;;  %v6696_v17 = vmul.f32 %v6694_v46, %v6694_v46 }
0x1ed0   : > { %v6695_v33 = vmul.f32 %v6693_v58, %v6693_v58  ;;  %v6700_v2 = vsel %vm4674_vm2, %v6696_v17, 0.0 }
0x1ed2   : > { %v6697_v45 = vsel %vm4674_vm2, %v6695_v33, 0.0 }
0x1ed7   : > { %v9919_v41 = vpop.eup %9918 }
0x1ed8   : > { %v6532_v30 = vmul.f32 %v9919_v41, %v6516_v28 }
0x1ed9   : > { %v9921_v31 = vpop.eup %9920 }
0x1eda   : > { %v6531_v61 = vmul.f32 %v9921_v31, %v6515_v29  ;;  %v6540_v62 = vmul.f32 %v8499_v57, %v6532_v30 }
0x1edc   : > { %v6539_v47 = vmul.f32 %v8499_v57, %v6531_v61  ;;  %v6548_v56 = vadd.f32 %v8500_v48, %v6540_v62  ;;  %v8504_v62 = vld [vmem:[#allocation73] ss:$0 sm:$0xff] }
0x1ede   : > { %v6547_v0 = vadd.f32 %v8500_v48, %v6539_v47  ;;  %v6550_v42 = vadd.f32 %v6548_v56, %v5151_v13 }
0x1ee0   : > { %v6549_v1 = vadd.f32 %v6547_v0, %v5150_v32  ;;  %v8505_v0 = vld [vmem:[#allocation71] ss:$0 sm:$0xff] }
0x1ee2   : > { %9202 = vmatprep.mubr.msk.f32.mxu1 %vm4680_vm4, %v6549_v1 }
0x1ee3   : > { %9203 = vmatmul.mubr.msk.f32.vlgmr.msra.gmra.mxu1 %vm4680_vm4, %v6550_v42 }
0x1ee4   : > { %9206 = vmatpush3.msra.mxu1 %v2787_v5 }
0x1ee5   : > { %9207 = vmatprep.subr.mxu1 %v2786_v21 }
0x1ee6   : > { %9208 = vmatpush3.msra.mxu1 %v2786_v21 }
0x1ee7   : > { %9209 = vmatprep.subr.mxu1 %v2785_v24 }
0x1ee8   : > { %9210 = vmatpush3.msra.mxu1 %v2785_v24 }
0x1ee9   : > { %9211 = vmatprep.subr.mxu1 %v2784_v10 }
0x1eea   : > { %9212 = vmatpush3.msra.mxu1 %v2784_v10 }
0x1eeb   : > { %9216 = vmatprep.subr.mxu1 %v2779_v49 }
0x1fa3   : > { %v9204_v38 = vpop.f32.mrf.mxu1 }
0x1fa4   : > { %v6635_v12 = vadd.f32 %v9204_v38, %v8501_v14 }
0x1fa5   : > { %v6629_v6 = vpop.f32.mrf.mxu1 }
0x1fa6   : > { %v6630_v19 = vadd.f32 %v8501_v14, %v6629_v6  ;;  %v6641_v32 = vsel %vm4674_vm2, %v6635_v12, 0.0  ;;  %v8508_v14 = vld [vmem:[#allocation50] ss:$0 sm:$0xff]  ;;  %v8511_v6 = vld [vmem:[#allocation47] ss:$0 sm:$0xff] }
0x1fa7   : > { %6642 = vadd.xlane.f32.xlu0 %v6641_v32 }
0x1fa8   : > { %v6638_v13 = vsel %vm4674_vm2, %v6630_v19, 0.0 }
0x1fa9   : > { %6639 = vadd.xlane.f32.xlu1 %v6638_v13 }
0x1fab   : > { %6701 = vadd.xlane.f32.xlu0 %v6700_v2 }
0x1fad   : > { %6698 = vadd.xlane.f32.xlu1 %v6697_v45 }
0x2030   : > { %v6643_v9 = vpop.xlane.xlu0 %6642 }
0x2031   : > { %v6646_v18 = vmul.f32 0.03125, %v6643_v9 }
0x2032   : > { %v6640_v25 = vpop.xlane.xlu1 %6639 }
0x2033   : > { %v6648_v15 = vsub.f32 %v6635_v12, %v6646_v18  ;;  %v6645_v28 = vmul.f32 0.03125, %v6640_v25 }
0x2034   : > { %v6702_v11 = vpop.xlane.xlu0 %6701 }
0x2035   : > { %v6647_v29 = vsub.f32 %v6630_v19, %v6645_v28  ;;  %v6704_v16 = vmul.f32 0.03125, %v6702_v11  ;;  %v6650_v36 = vmul.f32 %v6648_v15, %v6648_v15 }
0x2036   : > { %v6699_v37 = vpop.xlane.xlu1 %6698 }
0x2037   : > { %v6706_v20 = vadd.f32 1e-05, %v6704_v16  ;;  %v6703_v22 = vmul.f32 0.03125, %v6699_v37  ;;  %v6654_v7 = vsel %vm4674_vm2, %v6650_v36, 0.0  ;;  %v6649_v40 = vmul.f32 %v6647_v29, %v6647_v29 }
0x2038   : > { %6655 = vadd.xlane.f32.xlu0 %v6654_v7 }
0x2039   : > { %9922 = vrsqrt.f32 %v6706_v20  ;;  %v6705_v23 = vadd.f32 1e-05, %v6703_v22  ;;  %v6651_v59 = vsel %vm4674_vm2, %v6649_v40, 0.0 }
0x203a   : > { %6652 = vadd.xlane.f32.xlu1 %v6651_v59 }
0x203b   : > { %9924 = vrsqrt.f32 %v6705_v23 }
0x2046   : > { %v9923_v27 = vpop.eup %9922 }
0x2047   : > { %v6710_v26 = vmul.f32 %v9923_v27, %v6694_v46 }
0x2048   : > { %v9925_v35 = vpop.eup %9924 }
0x2049   : > { %v6709_v60 = vmul.f32 %v9925_v35, %v6693_v58  ;;  %v6718_v4 = vmul.f32 %v8506_v39, %v6710_v26 }
0x204b   : > { %v6717_v50 = vmul.f32 %v8506_v39, %v6709_v60  ;;  %v12906_v43 = vadd.f32 %v8507_v34, %v6718_v4 }
0x204d   : > { %v12904_v3 = vadd.f32 %v8507_v34, %v6717_v50 }
0x204f   : > { %9213 = vmatprep.mubr.msk.f32.mxu1 %vm4674_vm2, %v12904_v3 }
0x2050   : > { %9214 = vmatmul.mubr.msk.f32.vlgmr.msra.gmra.mxu1 %vm4674_vm2, %v12906_v43 }
0x2051   : > { %9217 = vmatpush3.msra.mxu1 %v2779_v49 }
0x2052   : > { %9218 = vmatprep.subr.mxu1 %v2778_v51 }
0x2053   : > { %9219 = vmatpush3.msra.mxu1 %v2778_v51 }
0x2054   : > { %9220 = vmatprep.subr.mxu1 %v2777_v53 }
0x2055   : > { %9221 = vmatpush3.msra.mxu1 %v2777_v53 }
0x2056   : > { %9222 = vmatprep.subr.mxu1 %v2776_v54 }
0x2057   : > { %9223 = vmatpush3.msra.mxu1 %v2776_v54 }
0x20c1   : > { %v6656_v55 = vpop.xlane.xlu0 %6655 }
0x20c2   : > { %v6658_v41 = vmul.f32 0.03125, %v6656_v55 }
0x20c3   : > { %v6653_v57 = vpop.xlane.xlu1 %6652 }
0x20c4   : > { %v6660_v30 = vadd.f32 1e-05, %v6658_v41  ;;  %v6657_v31 = vmul.f32 0.03125, %v6653_v57 }
0x20c6   : > { %9926 = vrsqrt.f32 %v6660_v30  ;;  %v6659_v48 = vadd.f32 1e-05, %v6657_v31 }
0x20c8   : > { %9928 = vrsqrt.f32 %v6659_v48 }
0x20d3   : > { %v9927_v61 = vpop.eup %9926 }
0x20d4   : > { %v6664_v47 = vmul.f32 %v9927_v61, %v6648_v15 }
0x20d5   : > { %v9929_v56 = vpop.eup %9928 }
0x20d6   : > { %v6663_v1 = vmul.f32 %v9929_v56, %v6647_v29  ;;  %v6672_v42 = vmul.f32 %v8504_v62, %v6664_v47 }
0x20d8   : > { %v6671_v44 = vmul.f32 %v8504_v62, %v6663_v1  ;;  %v12912_v8 = vadd.f32 %v8505_v0, %v6672_v42 }
0x20da   : > { %v12914_v52 = vadd.f32 %v8505_v0, %v6671_v44  ;;  %v6682_v46 = vmax.f32 %v12912_v8, 0.0 }
0x20dc   : > { %v6681_v63 = vmax.f32 %v12914_v52, 0.0 }
0x20de   : > { %9224 = vmatprep.mubr.msk.f32.mxu1 %vm4674_vm2, %v6681_v63 }
0x20df   : > { %9225 = vmatmul.mubr.msk.f32.vlgmr.msra.gmra.mxu1 %vm4674_vm2, %v6682_v46 }
0x2110   : > { %v9215_v58 = vpop.f32.mrf.mxu1 }
0x2111   : > { %v6811_v38 = vadd.f32 %v9215_v58, %v8508_v14 }
0x2112   : > { %v6805_v12 = vpop.f32.mrf.mxu1 }
0x2113   : > { %v6806_v17 = vadd.f32 %v8508_v14, %v6805_v12 }
0x2115   : > { %9231 = vmatprep.mubr.msk.f32.mxu0 %vm3059_vm0, %v6806_v17 }
0x219f   : > { %v9226_v19 = vpop.f32.mrf.mxu1 }
0x21a0   : > { %v12925_v32 = vadd.f32 %v9226_v19, %v8511_v6  ;;  %v2783_v19 = vld [vmem:[#allocation65 + $0x18] sm:$0xff] }
0x21a1   : > { %v6892_v33 = vpop.f32.mrf.mxu1 }
0x21a2   : > { %v12927_v13 = vadd.f32 %v8511_v6, %v6892_v33  ;;  %9227 = vmatprep.subr.msk.mxu0 %vm3059_vm0, %v12925_v32  ;;  %v2781_v33 = vld [vmem:[#allocation65 + $0x8] sm:$0xff] }
0x21a3   : > { %9228 = vmatpush3.xpose.msk.msra.mxu0 %vm3059_vm0, %v12925_v32 }
0x21a4   : > { %9229 = vmatprep.subr.msk.mxu0 %vm3059_vm0, %v12927_v13 }
0x21a7   : > { %9230 = vmatpush3.xpose.msk.msra.mxu0 %vm3059_vm0, %v12927_v13 }
0x21aa   : > { %9232 = vmatmul.mubr.msk.f32.vlgmr.msra.gmra.mxu0 %vm3059_vm0, %v6811_v38 }
0x226a   : > { %v9233_v2 = vpop.f32.mrf.mxu0 }
0x226b   : > { %v6989_v45 = vmul.f32 0.25, %v9233_v2 }
0x226c   : > { %v6979_v5 = vpop.f32.mrf.mxu0 }
0x226d   : > { %v6988_v21 = vmul.f32 0.25, %v6979_v5  ;;  %v6993_v24 = vsel %vm3059_vm0, %v6989_v45, -inf }
0x226e   : > { %6994 = vmax.xlane.f32.xlu0 %v6993_v24 }
0x226f   : > { %v6990_v10 = vsel %vm3059_vm0, %v6988_v21, -inf }
0x2270   : > { %6991 = vmax.xlane.f32.xlu1 %v6990_v10 }
0x2281   : > { %7014 = vrot.lane.b32.xlu1 %v12925_v32, %s11438_s22 }
0x2285   : > { %7105 = vrot.lane.b32.xlu1 %v12925_v32, %s11439_s5 }
0x2289   : > { %7103 = vrot.lane.b32.xlu1 %v12927_v13, %s11439_s5 }
0x22f7   : > { %v6995_v9 = vpop.xlane.xlu0 %6994 }
0x22f8   : > { %v6997_v18 = vsub.f32 %v6989_v45, %v6995_v9  ;;  %v8526_v9 = vld [vmem:[#allocation49] ss:$0 sm:$0xff] }
0x22f9   : > { %v6992_v25 = vpop.xlane.xlu1 %6991 }
0x22fa   : > { %v7000_v15 = vmul.f32 1.442695, %v6997_v18  ;;  %v6996_v28 = vsub.f32 %v6988_v21, %v6992_v25 }
0x22fc   : > { %9930 = vpow2.f32 %v7000_v15  ;;  %v6998_v11 = vmul.f32 1.442695, %v6996_v28 }
0x22fd   : > { %v7015_v29 = vpop.permute.xlu1 %7014 }
0x22fe   : > { %9932 = vpow2.f32 %v6998_v11  ;;  %9234 = vmatprep.subr.mxu1 %v7015_v29 }
0x22ff   : > { %9235 = vmatpush3.msra.mxu1 %v7015_v29 }
0x2301   : > { %v7106_v22 = vpop.permute.xlu1 %7105 }
0x2305   : > { %v7104_v7 = vpop.permute.xlu1 %7103 }
0x2309   : > { %v9931_v16 = vpop.eup %9930 }
0x230a   : > { %v7005_v36 = vsel %vm3059_vm0, %v9931_v16, 0.0 }
0x230b   : > { %v9933_v37 = vpop.eup %9932  ;;  %7006 = vadd.xlane.f32.xlu0 %v7005_v36 }
0x230c   : > { %v7002_v20 = vsel %vm3059_vm0, %v9933_v37, 0.0 }
0x230d   : > { %7003 = vadd.xlane.f32.xlu1 %v7002_v20 }
0x231e   : > { %7099 = vrot.lane.b32.xlu1 %v6806_v17, %s11439_s5 }
0x2321   : > { %7012 = vrot.lane.b32.xlu0 %v12927_v13, %s11438_s22  ;;  %s13202_s22 = sld [smem:[#allocation137_spill]] }
0x2325   : > { %7101 = vrot.lane.b32.xlu0 %v6811_v38, %s11439_s5  ;;  %s13203_s5 = sld [smem:[#allocation155_spill]] }
0x2394   : > { %v7007_v40 = vpop.xlane.xlu0 %7006 }
0x2395   : > { %9934 = vrcp.f32 %v7007_v40 }
0x2396   : > { %v7004_v23 = vpop.xlane.xlu1 %7003 }
0x2397   : > { %9936 = vrcp.f32 %v7004_v23 }
0x2398   : > { %v7013_v59 = vpop.permute.xlu0 %7012 }
0x2399   : > { %9236 = vmatprep.subr.mxu1 %v7013_v59 }
0x239a   : > { %9237 = vmatpush3.msra.mxu1 %v7013_v59  ;;  %v7100_v49 = vpop.permute.xlu1 %7099 }
0x239b   : > { %9241 = vmatprep.subr.msk.mxu1 %vm3059_vm0, %v7106_v22 }
0x239c   : > { %v7102_v60 = vpop.permute.xlu0 %7101 }
0x23a2   : > { %v9935_v27 = vpop.eup %9934 }
0x23a3   : > { %v7011_v35 = vmul.f32 %v9935_v27, %v9931_v16 }
0x23a4   : > { %v9937_v39 = vpop.eup %9936 }
0x23a5   : > { %v7009_v26 = vmul.f32 %v9937_v39, %v9933_v37 }
0x23a7   : > { %9238 = vmatprep.mubr.msk.f32.mxu1 %vm3059_vm0, %v7009_v26  ;;  %v2759_v26 = vld [vmem:[#allocation53 + $0x10] sm:$0xff] }
0x23a8   : > { %9239 = vmatmul.mubr.msk.f32.vlgmr.msra.gmra.mxu1 %vm3059_vm0, %v7011_v35  ;;  %v2758_v35 = vld [vmem:[#allocation53 + $0x8] sm:$0xff] }
0x23a9   : > { %9242 = vmatpush3.xpose.msk.msra.mxu1 %vm3059_vm0, %v7106_v22  ;;  %9245 = vmatprep.mubr.msk.f32.mxu1 %vm3059_vm0, %v7100_v49  ;;  %v2757_v49 = vld [vmem:[#allocation53] sm:$0xff] }
0x23aa   : > { %9243 = vmatprep.subr.msk.mxu1 %vm3059_vm0, %v7104_v7 }
0x23ad   : > { %9244 = vmatpush3.xpose.msk.msra.mxu1 %vm3059_vm0, %v7104_v7 }
0x23b0   : > { %9246 = vmatmul.mubr.msk.f32.vlgmr.msra.gmra.mxu1 %vm3059_vm0, %v7102_v60  ;;  %v2769_v60 = vld [vmem:[%s13202_s22 + $0x38] sm:$0xff] }
0x2468   : > { %v12960_v4 = vpop.f32.mrf.mxu1 }
0x246a   : > { %v7090_v34 = vpop.f32.mrf.mxu1 }
0x2470   : > { %v9247_v50 = vpop.f32.mrf.mxu1 }
0x2471   : > { %v7191_v51 = vmul.f32 0.25, %v9247_v50  ;;  %v2766_v50 = vld [vmem:[%s13202_s22 + $0x20] sm:$0xff] }
0x2472   : > { %v7181_v53 = vpop.f32.mrf.mxu1 }
0x2473   : > { %v7190_v54 = vmul.f32 0.25, %v7181_v53  ;;  %v7195_v55 = vsel %vm3059_vm0, %v7191_v51, -inf }
0x2474   : > { %7196 = vmax.xlane.f32.xlu0 %v7195_v55 }
0x2475   : > { %v7192_v41 = vsel %vm3059_vm0, %v7190_v54, -inf }
0x2476   : > { %7193 = vmax.xlane.f32.xlu1 %v7192_v41 }
0x2487   : > { %7216 = vrot.lane.b32.xlu1 %v12925_v32, %s11441_s0  ;;  %v2782_v32 = vld [vmem:[#allocation65 + $0x10] sm:$0xff] }
0x24fd   : > { %v7197_v57 = vpop.xlane.xlu0 %7196 }
0x24fe   : > { %v7199_v30 = vsub.f32 %v7191_v51, %v7197_v57 }
0x24ff   : > { %v7194_v31 = vpop.xlane.xlu1 %7193 }
0x2500   : > { %v7202_v48 = vmul.f32 1.442695, %v7199_v30  ;;  %v7198_v61 = vsub.f32 %v7190_v54, %v7194_v31  ;;  %v8529_v31 = vld [vmem:[#allocation59] ss:$0 sm:$0xff] }
0x2502   : > { %9938 = vpow2.f32 %v7202_v48  ;;  %v7200_v62 = vmul.f32 1.442695, %v7198_v61  ;;  %v8530_v61 = vld [vmem:[#allocation58] ss:$0 sm:$0xff] }
0x2503   : > { %v7217_v47 = vpop.permute.xlu1 %7216 }
0x2504   : > { %9940 = vpow2.f32 %v7200_v62  ;;  %9248 = vmatprep.subr.mxu0 %v7217_v47 }
0x2505   : > { %9249 = vmatpush3.msra.mxu0 %v7217_v47 }
0x250f   : > { %v9939_v56 = vpop.eup %9938 }
0x2510   : > { %v7207_v0 = vsel %vm3059_vm0, %v9939_v56, 0.0 }
0x2511   : > { %v9941_v1 = vpop.eup %9940  ;;  %7208 = vadd.xlane.f32.xlu0 %v7207_v0 }
0x2512   : > { %v7204_v42 = vsel %vm3059_vm0, %v9941_v1, 0.0 }
0x2515   : > { %7205 = vadd.xlane.f32.xlu0 %v7204_v42 }
0x252b   : > { %7214 = vrot.lane.b32.xlu0 %v12927_v13, %s11441_s0  ;;  %v2780_v13 = vld [vmem:[#allocation65] sm:$0xff]  ;;  %s8543_s0 = sshll.u32 %s13211_s10, 4 }
0x252c   : > { %s2554_s15 = scalar_lea.vmem %s13204_s8, %s8543_s0 }
0x259a   : > { %v7209_v44 = vpop.xlane.xlu0 %7208 }
0x259b   : > { %9942 = vrcp.f32 %v7209_v44  ;;  %v2765_v44 = vld [vmem:[%s13202_s22 + $0x18] sm:$0xff] }
0x259e   : > { %v7206_v14 = vpop.xlane.xlu0 %7205 }
0x259f   : > { %9944 = vrcp.f32 %v7206_v14  ;;  %v2764_v14 = vld [vmem:[%s13202_s22 + $0x10] sm:$0xff] }
0x25a2   : > { %v7215_v58 = vpop.permute.xlu0 %7214 }
0x25a3   : > { %9250 = vmatprep.subr.mxu0 %v7215_v58 }
0x25a4   : > { %9251 = vmatpush3.msra.mxu0 %v7215_v58  ;;  %v2763_v58 = vld [vmem:[%s13202_s22 + $0x8] sm:$0xff] }
0x25a5   : > { %9255 = vmatprep.subr.mxu0 %v2783_v19 }
0x25a8   : > { %v9943_v38 = vpop.eup %9942 }
0x25a9   : > { %v7213_v6 = vmul.f32 %v9943_v38, %v9939_v56  ;;  %v2762_v38 = vld [vmem:[%s13202_s22] sm:$0xff] }
0x25ac   : > { %v9945_v12 = vpop.eup %9944 }
0x25ad   : > { %v7211_v17 = vmul.f32 %v9945_v12, %v9941_v1  ;;  %v8531_v12 = vld [vmem:[#allocation52] ss:$0 sm:$0xff] }
0x25af   : > { %9252 = vmatprep.mubr.msk.f32.mxu0 %vm3059_vm0, %v7211_v17 }
0x25b0   : > { %9253 = vmatmul.mubr.msk.f32.vlgmr.msra.gmra.mxu0 %vm3059_vm0, %v7213_v6 }
0x25b1   : > { %9256 = vmatpush3.msra.mxu0 %v2783_v19 }
0x25b2   : > { %9257 = vmatprep.subr.mxu0 %v2782_v32 }
0x25b3   : > { %9258 = vmatpush3.msra.mxu0 %v2782_v32 }
0x25b4   : > { %9259 = vmatprep.subr.mxu0 %v2781_v33 }
0x25b5   : > { %9260 = vmatpush3.msra.mxu0 %v2781_v33 }
0x25b6   : > { %9261 = vmatprep.subr.mxu0 %v2780_v13 }
0x25b7   : > { %9262 = vmatpush3.msra.mxu0 %v2780_v13 }
0x25b8   : > { %9277 = vmatprep.subr.mxu0 %v2769_v60 }
0x2670   : > { %v9254_v2 = vpop.f32.mrf.mxu0 }
0x2672   : > { %v7292_v45 = vpop.f32.mrf.mxu0 }
0x2673   : > { %7303 = vrot.lane.b32.xlu1 %v7292_v45, %s11444_s18 }
0x2677   : > { %7305 = vrot.lane.b32.xlu1 %v9254_v2, %s11444_s18  ;;  %v8534_v2 = vld [vmem:[#allocation55] ss:$0 sm:$0xff] }
0x26e5   : > { %v7304_v5 = vpop.permute.xlu1 %7303 }
0x26e6   : > { %v7309_v21 = vsel %vm3059_vm0, %v7090_v34, %v7304_v5  ;;  %v2767_v34 = vld [vmem:[%s13202_s22 + $0x28] sm:$0xff] }
0x26e7   : > { %9263 = vmatprep.mubr.msk.f32.mxu0 %vm4674_vm2, %v7309_v21 }
0x26e9   : > { %v7306_v24 = vpop.permute.xlu1 %7305 }
0x26ea   : > { %v7310_v10 = vsel %vm3059_vm0, %v12960_v4, %v7306_v24  ;;  %v2768_v4 = vld [vmem:[%s13202_s22 + $0x30] sm:$0xff] }
0x26eb   : > { %9264 = vmatmul.mubr.msk.f32.vlgmr.msra.gmra.mxu0 %vm4674_vm2, %v7310_v10 }
0x26ec   : > { %9278 = vmatpush3.msra.mxu0 %v2769_v60  ;;  %v8538_v60 = vld [vmem:[#allocation61] ss:$0 sm:$0xff] }
0x26ed   : > { %9279 = vmatprep.subr.mxu0 %v2768_v4 }
0x26ee   : > { %9280 = vmatpush3.msra.mxu0 %v2768_v4 }
0x26ef   : > { %9281 = vmatprep.subr.mxu0 %v2767_v34 }
0x26f0   : > { %9282 = vmatpush3.msra.mxu0 %v2767_v34 }
0x26f1   : > { %9283 = vmatprep.subr.mxu0 %v2766_v50 }
0x26f2   : > { %9284 = vmatpush3.msra.mxu0 %v2766_v50 }
0x26f3   : > { %9285 = vmatprep.subr.mxu0 %v2765_v44 }
0x26f4   : > { %9286 = vmatpush3.msra.mxu0 %v2765_v44 }
0x26f5   : > { %9287 = vmatprep.subr.mxu0 %v2764_v14 }
0x26f6   : > { %9288 = vmatpush3.msra.mxu0 %v2764_v14 }
0x26f7   : > { %9289 = vmatprep.subr.mxu0 %v2763_v58 }
0x26f8   : > { %9290 = vmatpush3.msra.mxu0 %v2763_v58 }
0x26f9   : > { %9291 = vmatprep.subr.mxu0 %v2762_v38 }
0x26fa   : > { %9292 = vmatpush3.msra.mxu0 %v2762_v38 }
0x27ab   : > { %v9265_v18 = vpop.f32.mrf.mxu0 }
0x27ac   : > { %v7395_v25 = vadd.f32 %v9265_v18, %v8526_v9 }
0x27ad   : > { %v7389_v15 = vpop.f32.mrf.mxu0 }
0x27ae   : > { %v7399_v28 = vadd.f32 %v7395_v25, %v12906_v43  ;;  %v7390_v11 = vadd.f32 %v8526_v9, %v7389_v15  ;;  %v2760_v43 = vld [vmem:[#allocation53 + $0x18] sm:$0xff] }
0x27af   : > { %9266 = vmatprep.subr.mxu1 %v2760_v43 }
0x27b0   : > { %v7398_v29 = vadd.f32 %v7390_v11, %v12904_v3  ;;  %v7403_v16 = vsel %vm4674_vm2, %v7399_v28, 0.0  ;;  %9267 = vmatpush3.msra.mxu1 %v2760_v43 }
0x27b1   : > { %7404 = vadd.xlane.f32.xlu0 %v7403_v16  ;;  %9268 = vmatprep.subr.mxu1 %v2759_v26 }
0x27b2   : > { %v7400_v36 = vsel %vm4674_vm2, %v7398_v29, 0.0  ;;  %9269 = vmatpush3.msra.mxu1 %v2759_v26  ;;  %v8537_v26 = vld [vmem:[#allocation62] ss:$0 sm:$0xff] }
0x27b3   : > { %7401 = vadd.xlane.f32.xlu1 %v7400_v36  ;;  %9270 = vmatprep.subr.mxu1 %v2758_v35 }
0x27b4   : > { %9271 = vmatpush3.msra.mxu1 %v2758_v35 }
0x27b5   : > { %9272 = vmatprep.subr.mxu1 %v2757_v49 }
0x27b6   : > { %9273 = vmatpush3.msra.mxu1 %v2757_v49 }
0x283a   : > { %v7405_v37 = vpop.xlane.xlu0 %7404 }
0x283b   : > { %v7407_v20 = vmul.f32 0.03125, %v7405_v37 }
0x283c   : > { %v7402_v22 = vpop.xlane.xlu1 %7401 }
0x283d   : > { %v7406_v7 = vmul.f32 0.03125, %v7402_v22  ;;  %v7409_v40 = vsub.f32 %v7399_v28, %v7407_v20 }
0x283f   : > { %v7408_v23 = vsub.f32 %v7398_v29, %v7406_v7  ;;  %v7411_v39 = vmul.f32 %v7409_v40, %v7409_v40 }
0x2841   : > { %v7410_v59 = vmul.f32 %v7408_v23, %v7408_v23  ;;  %v7415_v3 = vsel %vm4674_vm2, %v7411_v39, 0.0 }
0x2843   : > { %v7412_v27 = vsel %vm4674_vm2, %v7410_v59, 0.0 }
0x2844   : > { %7413 = vadd.xlane.f32.xlu0 %v7412_v27 }
0x2848   : > { %7416 = vadd.xlane.f32.xlu0 %v7415_v3 }
0x28cd   : > { %v7414_v51 = vpop.xlane.xlu0 %7413 }
0x28ce   : > { %v7418_v53 = vmul.f32 0.03125, %v7414_v51 }
0x28d0   : > { %v7420_v54 = vadd.f32 1e-05, %v7418_v53  ;;  %v8539_v53 = vld [vmem:[%s13203_s5] ss:$0 sm:$0xff] }
0x28d1   : > { %v7417_v55 = vpop.xlane.xlu0 %7416 }
0x28d2   : > { %9946 = vrsqrt.f32 %v7420_v54  ;;  %v7419_v41 = vmul.f32 0.03125, %v7417_v55 }
0x28d4   : > { %v7421_v57 = vadd.f32 1e-05, %v7419_v41 }
0x28d6   : > { %9948 = vrsqrt.f32 %v7421_v57 }
0x28df   : > { %v9947_v30 = vpop.eup %9946 }
0x28e0   : > { %v7424_v48 = vmul.f32 %v9947_v30, %v7408_v23 }
0x28e2   : > { %v7432_v62 = vmul.f32 %v8529_v31, %v7424_v48 }
0x28e3   : > { %v9949_v47 = vpop.eup %9948 }
0x28e4   : > { %v7425_v56 = vmul.f32 %v9949_v47, %v7409_v40  ;;  %v7440_v0 = vadd.f32 %v8530_v61, %v7432_v62 }
0x28e6   : > { %v7433_v1 = vmul.f32 %v8529_v31, %v7425_v56  ;;  %9274 = vmatprep.mubr.msk.f32.mxu1 %vm4674_vm2, %v7440_v0 }
0x28e8   : > { %v7441_v42 = vadd.f32 %v8530_v61, %v7433_v1  ;;  %v8540_v61 = vld [vmem:[#allocation2] ss:$0 sm:$0xff] }
0x28ea   : > { %9275 = vmatmul.mubr.msk.f32.vlgmr.msra.gmra.mxu1 %vm4674_vm2, %v7441_v42 }
0x29aa   : > { %v9276_v17 = vpop.f32.mrf.mxu1 }
0x29ab   : > { %v7526_v6 = vadd.f32 %v9276_v17, %v8531_v12 }
0x29ac   : > { %v7520_v19 = vpop.f32.mrf.mxu1 }
0x29ad   : > { %v7521_v32 = vadd.f32 %v8531_v12, %v7520_v19  ;;  %v7530_v13 = vmax.f32 %v7526_v6, 0.0 }
0x29af   : > { %v7529_v33 = vmax.f32 %v7521_v32, 0.0 }
0x29b1   : > { %9293 = vmatprep.mubr.msk.f32.mxu0 %vm4680_vm4, %v7529_v33 }
0x29b2   : > { %9294 = vmatmul.mubr.msk.f32.vlgmr.msra.gmra.mxu0 %vm4680_vm4, %v7530_v13 }
0x2a72   : > { %v9295_v45 = vpop.f32.mrf.mxu0 }
0x2a73   : > { %v7615_v5 = vadd.f32 %v9295_v45, %v8534_v2 }
0x2a74   : > { %v7609_v21 = vpop.f32.mrf.mxu0 }
0x2a75   : > { %v7619_v24 = vadd.f32 %v7615_v5, %v7441_v42  ;;  %v7610_v10 = vadd.f32 %v8534_v2, %v7609_v21 }
0x2a77   : > { %v7618_v9 = vadd.f32 %v7610_v10, %v7440_v0  ;;  %v7623_v18 = vsel %vm4674_vm2, %v7619_v24, 0.0 }
0x2a78   : > { %7624 = vadd.xlane.f32.xlu0 %v7623_v18 }
0x2a79   : > { %v7620_v25 = vsel %vm4674_vm2, %v7618_v9, 0.0 }
0x2a7a   : > { %7621 = vadd.xlane.f32.xlu1 %v7620_v25 }
0x2b01   : > { %v7625_v15 = vpop.xlane.xlu0 %7624 }
0x2b02   : > { %v7627_v28 = vmul.f32 0.03125, %v7625_v15 }
0x2b03   : > { %v7622_v11 = vpop.xlane.xlu1 %7621 }
0x2b04   : > { %v7629_v29 = vsub.f32 %v7619_v24, %v7627_v28  ;;  %v7626_v16 = vmul.f32 0.03125, %v7622_v11 }
0x2b06   : > { %v7628_v36 = vsub.f32 %v7618_v9, %v7626_v16  ;;  %v7631_v37 = vmul.f32 %v7629_v29, %v7629_v29 }
0x2b08   : > { %v7635_v20 = vsel %vm4674_vm2, %v7631_v37, 0.0  ;;  %v7630_v22 = vmul.f32 %v7628_v36, %v7628_v36 }
0x2b09   : > { %7636 = vadd.xlane.f32.xlu0 %v7635_v20 }
0x2b0a   : > { %v7632_v7 = vsel %vm4674_vm2, %v7630_v22, 0.0 }
0x2b0b   : > { %7633 = vadd.xlane.f32.xlu1 %v7632_v7 }
0x2b92   : > { %v7637_v40 = vpop.xlane.xlu0 %7636 }
0x2b93   : > { %v7639_v23 = vmul.f32 0.03125, %v7637_v40 }
0x2b94   : > { %v7634_v59 = vpop.xlane.xlu1 %7633 }
0x2b95   : > { %v7641_v27 = vadd.f32 1e-05, %v7639_v23  ;;  %v7638_v39 = vmul.f32 0.03125, %v7634_v59 }
0x2b97   : > { %9950 = vrsqrt.f32 %v7641_v27  ;;  %v7640_v3 = vadd.f32 1e-05, %v7638_v39 }
0x2b99   : > { %9952 = vrsqrt.f32 %v7640_v3 }
0x2ba4   : > { %v9951_v43 = vpop.eup %9950 }
0x2ba5   : > { %v7645_v35 = vmul.f32 %v9951_v43, %v7629_v29 }
0x2ba6   : > { %v9953_v49 = vpop.eup %9952 }
0x2ba7   : > { %v7653_v4 = vmul.f32 %v8537_v26, %v7645_v35  ;;  %v7644_v34 = vmul.f32 %v9953_v49, %v7628_v36 }
0x2ba9   : > { %v7661_v50 = vadd.f32 %v8538_v60, %v7653_v4  ;;  %v7652_v51 = vmul.f32 %v8537_v26, %v7644_v34 }
0x2bab   : > { %v7663_v54 = vadd.f32 %v7661_v50, %v6682_v46  ;;  %v7660_v55 = vadd.f32 %v8538_v60, %v7652_v51 }
0x2bad   : > { %v7671_v41 = vmul.f32 %v8539_v53, %v7663_v54  ;;  %v7662_v57 = vadd.f32 %v7660_v55, %v6681_v63 }
0x2baf   : > { %v7675_v30 = vsel %vm4674_vm2, %v7671_v41, 0.0  ;;  %v7670_v31 = vmul.f32 %v8539_v53, %v7662_v57 }
0x2bb0   : > { %7676 = vadd.xlane.f32.xlu0 %v7675_v30 }
0x2bb1   : > { %v7672_v48 = vsel %vm4674_vm2, %v7670_v31, 0.0 }
0x2bb2   : > { %7673 = vadd.xlane.f32.xlu1 %v7672_v48 }
0x2c39   : > { %v7677_v8 = vpop.xlane.xlu0 %7676 }
0x2c3a   : > { %v7685_v46 = vadd.f32 %v8540_v61, %v7677_v8 }
0x2c3b   : > { %v7674_v62 = vpop.xlane.xlu1 %7673 }
0x2c3c   : > { %7688 = vst.msk [vmem:[%s2554_s15 + $0x8] sm:$0xff] %vm7686_vm8, %v7685_v46  ;;  %v7684_v47 = vadd.f32 %v8540_v61, %v7674_v62 }
0x2c3e   : > { %7687 = vst.msk [vmem:[%s2554_s15] sm:$0xff] %vm7686_vm8, %v7684_v47 }
0x2c3f PF: > { %s13205_s2 = sld [smem:[#allocation158_spill]]  ;;  %s13207_s0 = smov %s11308_s29 }
0x2c40   : > { %s13206_s18 = sld [smem:[#allocation159_spill]]  ;;  %s13208_s29 = smov %s11312_s1 }
0x2c45   : > { %p166_p12 = scmp.ge.s32.totalorder %s13205_s2, 4  }
0x2c46   : > { %s13209_s1 = smov %s13206_s18 }
0x2c47   :  { %168 = sbr.rel (!%p166_p12) target bundleno = 151 (0x97), region = 580 }
0x2c4c   :  { %7710 = vsyncpa [#allocation4], 1 }
0x2c4d   :  { %7712 = vsyncpa [#allocation4 + $0x1], 1 }
0x2c4e   :  { %7713 = vsyncpa [#allocation6], 1 }
0x2c4f   :  { %7714 = vsyncpa [#allocation9], 1 }
0x2c50   :  { %7715 = vsyncpa [#allocation12], 1 }
0x2c51   :  { %7716 = vsyncpa [#allocation15], 1 }
0x2c52   :  { %7717 = vsyncpa [#allocation18], 1 }
0x2c53   :  { %7718 = vsyncpa [#allocation21], 1 }
0x2c54   :  { %7719 = vsyncpa [#allocation24], 1 }
0x2c55   :  { %7720 = vsyncpa [#allocation27], 1 }
0x2c56   :  { %7721 = vsyncpa [#allocation30], 1 }
0x2c57   :  { %7722 = vsyncpa [#allocation33], 1 }
0x2c58   :  { %7723 = vsyncpa [#allocation36], 1 }
0x2c59   :  { %7724 = vsyncpa [#allocation39], 1 }
0x2c5a   :  { %7725 = vsyncpa [#allocation42], 1 }
0x2c5b   :  { %7726 = vsyncpa [#allocation45], 1 }
0x2c5c   :  { %7727 = vsyncpa [#allocation48], 1 }
0x2c5d   :  { %7728 = vsyncpa [#allocation51], 1 }
0x2c5e   :  { %7729 = vsyncpa [#allocation54], 1 }
0x2c5f   :  { %7730 = vsyncpa [#allocation57], 1 }
0x2c60   :  { %7731 = vsyncpa [#allocation60], 1 }
0x2c61   :  { %7732 = vsyncpa [#allocation63], 1 }
0x2c62   :  { %7733 = vsyncpa [#allocation66], 1 }
0x2c63   :  { %7734 = vsyncpa [#allocation69], 1 }
0x2c64   :  { %7735 = vsyncpa [#allocation72], 1 }
0x2c65   :  { %7736 = vsyncpa [#allocation75], 1 }
0x2c66   :  { %7737 = vsyncpa [#allocation78], 1 }

</bundles_post_ra>
